<compile_context>
chip_gen: v7x
topology: tpu7x:2x2x1
jax: 0.10.0
libtpu: 0.0.40
codegen_flags: <defaults>
</compile_context>

<pallas_src>
import numpy as np
import jax
import jax.numpy as jnp
from jax.experimental import pallas as pl
from jax.experimental.pallas import tpu as pltpu

# -------------------- static configuration --------------------
INPUT_CHANNEL = 1
OUTPUT_CHANNEL = 32
HIDDEN_SIZE = 32
IMGH = 32
IMGW = 32
NUM_CLASSES = 10
BATCH = 2
SEQ_LEN = 7                     # 32x32 input -> 7 time steps after the VGG stack
OC = [OUTPUT_CHANNEL // 8, OUTPUT_CHANNEL // 4, OUTPUT_CHANNEL // 2, OUTPUT_CHANNEL]

F32 = jnp.float32
VMEM = pl.BlockSpec(memory_space=pltpu.MemorySpace.VMEM)


# -------------------- host-side constant prep --------------------
def _banded(w, w_in, pad, out_cols):
    """Fold the width axis of a conv into the weight matrix (unpadded width).

    w: (k, k, cin, cout).  Returns A of shape (k, w_in*cin, len(out_cols)*cout)
    such that, with feature rows laid out lane-dense as lane = w*cin + ci, the
    conv output at height offset di and output column out_cols[oi] is
    (rows_shifted_by_di @ A[di]).  Out-of-range input columns are clipped,
    which implements the width zero-padding without padded lanes.
    """
    k, cin, cout = w.shape[0], w.shape[2], w.shape[3]
    out_cols = list(out_cols)
    A = np.zeros((k, w_in * cin, len(out_cols) * cout), np.float32)
    for di in range(k):
        for oi, wc in enumerate(out_cols):
            for dj in range(k):
                wi = wc - pad + dj
                if 0 <= wi < w_in:
                    A[di, wi * cin:(wi + 1) * cin,
                      oi * cout:(oi + 1) * cout] = w[di, dj]
    return A


def _build_sel_pack():
    """Host-precomputed 0/1 selection matrices (height pool / placement / row
    gather), packed along sublanes into one 128-lane operand."""
    B = BATCH
    mats = []

    def add(name, shape, entries):
        S = np.zeros(shape, np.float32)
        for r, c in entries:
            S[r, c] = 1.0
        mats.append((name, S))

    # stage input rows into conv1's height-padded map
    add("S_in", (B * 34, B * 32),
        [(b * 34 + 1 + h, b * 32 + h) for b in range(B) for h in range(32)])
    # conv1 MaxPool(2,2) height half + placement into conv2 map
    add("SE1", (B * 18, B * 34 - 2),
        [(b * 18 + 1 + i, b * 34 + 2 * i) for b in range(B) for i in range(16)])
    add("SO1", (B * 18, B * 34 - 2),
        [(b * 18 + 1 + i, b * 34 + 2 * i + 1) for b in range(B) for i in range(16)])
    # conv2 MaxPool(2,2) height half + placement
    add("SE2", (B * 10, B * 18 - 2),
        [(b * 10 + 1 + i, b * 18 + 2 * i) for b in range(B) for i in range(8)])
    add("SO2", (B * 10, B * 18 - 2),
        [(b * 10 + 1 + i, b * 18 + 2 * i + 1) for b in range(B) for i in range(8)])
    # conv3 -> conv4 placement (no pooling)
    add("SP3", (B * 10, B * 10 - 2),
        [(b * 10 + 1 + i, b * 10 + i) for b in range(B) for i in range(8)])
    # conv4 MaxPool((2,1)) + placement
    add("SE4", (B * 6, B * 10 - 2),
        [(b * 6 + 1 + i, b * 10 + 2 * i) for b in range(B) for i in range(4)])
    add("SO4", (B * 6, B * 10 - 2),
        [(b * 6 + 1 + i, b * 10 + 2 * i + 1) for b in range(B) for i in range(4)])
    # conv5 -> conv6 placement (no pooling)
    add("SP5", (B * 6, B * 6 - 2),
        [(b * 6 + 1 + i, b * 6 + i) for b in range(B) for i in range(4)])
    # conv6 MaxPool((2,1)) + placement (conv7 input has no pad rows)
    add("SE6", (B * 2, B * 6 - 2),
        [(b * 2 + i, b * 6 + 2 * i) for b in range(B) for i in range(2)])
    add("SO6", (B * 2, B * 6 - 2),
        [(b * 2 + i, b * 6 + 2 * i + 1) for b in range(B) for i in range(2)])
    # gather the per-batch valid rows of the conv7 output
    add("SV", (B, 2 * B - 1), [(b, 2 * b) for b in range(B)])

    total = sum(m.shape[0] for _, m in mats)
    pack = np.zeros((total, 128), np.float32)
    offsets = {}
    off = 0
    for name, m in mats:
        offsets[name] = (off, m.shape[0], m.shape[1])
        pack[off:off + m.shape[0], :m.shape[1]] = m
        off += m.shape[0]
    return pack, offsets


_SEL_PACK, _SEL = _build_sel_pack()


# -------------------- the fused Pallas kernel --------------------
def _model_kernel(x_ref, a1, a2, a3, a4, a5, a6, a7, misc_ref, sel_ref,
                  lstm_ref, lin_ref, out_ref,
                  p1, p2, p3, p4, p5, p6, p7, hf_ref, hb_ref):
    B, T, H, C = BATCH, SEQ_LEN, HIDDEN_SIZE, NUM_CLASSES

    def sel(name):
        off, r, c = _SEL[name]
        return sel_ref[off:off + r, 0:c]

    def conv(p_ref, a_ref, rows):
        # sum over the k vertical offsets of (shifted rows) @ banded weights
        acc = jnp.dot(p_ref[0:rows, :], a_ref[0], preferred_element_type=F32)
        for di in range(1, a_ref.shape[0]):
            acc = acc + jnp.dot(p_ref[di:di + rows, :], a_ref[di],
                                preferred_element_type=F32)
        return acc

    def wpool(y):
        # MaxPool along width: even outputs in lanes [:half], odd in [half:]
        half = y.shape[1] // 2
        return jnp.maximum(y[:, 0:half], y[:, half:2 * half])

    def hpool(se, so, y):
        # MaxPool along height + placement into the next padded map
        return jnp.maximum(jnp.dot(se, y, preferred_element_type=F32),
                           jnp.dot(so, y, preferred_element_type=F32))

    # ---------------- VGG feature extractor (batch stacked on sublanes) -----
    p1[...] = jnp.dot(sel("S_in"), x_ref[...], preferred_element_type=F32)
    # conv1 3x3 1->4 +ReLU, MaxPool(2,2)
    y = jnp.maximum(conv(p1, a1, B * 34 - 2) + misc_ref[0:1, 0:128], 0.0)
    p2[...] = hpool(sel("SE1"), sel("SO1"), wpool(y))
    # conv2 3x3 4->8 +ReLU, MaxPool(2,2)
    y = jnp.maximum(conv(p2, a2, B * 18 - 2) + misc_ref[1:2, 0:128], 0.0)
    p3[...] = hpool(sel("SE2"), sel("SO2"), wpool(y))
    # conv3 3x3 8->16 +ReLU
    y = jnp.maximum(conv(p3, a3, B * 10 - 2) + misc_ref[2:3, 0:128], 0.0)
    p4[...] = jnp.dot(sel("SP3"), y, preferred_element_type=F32)
    # conv4 3x3 16->16 +ReLU, MaxPool((2,1))
    y = jnp.maximum(conv(p4, a4, B * 10 - 2) + misc_ref[3:4, 0:128], 0.0)
    p5[...] = hpool(sel("SE4"), sel("SO4"), y)
    # conv5 3x3 16->32 (no bias) + folded BatchNorm + ReLU
    y = jnp.maximum(conv(p5, a5, B * 6 - 2) * misc_ref[4:5, :] + misc_ref[5:6, :], 0.0)
    p6[...] = jnp.dot(sel("SP5"), y, preferred_element_type=F32)
    # conv6 3x3 32->32 (no bias) + folded BatchNorm + ReLU, MaxPool((2,1))
    y = jnp.maximum(conv(p6, a6, B * 6 - 2) * misc_ref[6:7, :] + misc_ref[7:8, :], 0.0)
    p7[...] = hpool(sel("SE6"), sel("SO6"), y)
    # conv7 2x2 valid 32->32 + ReLU; AdaptiveAvgPool((None,1))+squeeze of the
    # reference is the identity here (height has collapsed to 1).
    y = jnp.maximum(conv(p7, a7, B * 2 - 1) + misc_ref[8:9, 0:224], 0.0)
    vis = jnp.dot(sel("SV"), y, preferred_element_type=F32)   # (B, T*32) lane-dense

    # ---------------- two BidirectionalLSTM blocks + CTC linear -------------
    def run_dir(gin, whh, hout_ref, reverse):
        # fused gates: one (B,H)@(H,4H) matmul per step; gate order (i,f,g,o)
        h = jnp.zeros((B, H), F32)
        c = jnp.zeros((B, H), F32)
        order = range(T - 1, -1, -1) if reverse else range(T)
        for t in order:                                  # fully unrolled, T=7
            pre = gin[t] + jnp.dot(h, whh, preferred_element_type=F32)
            i_g = jax.nn.sigmoid(pre[:, 0:H])
            f_g = jax.nn.sigmoid(pre[:, H:2 * H])
            g_g = jnp.tanh(pre[:, 2 * H:3 * H])
            o_g = jax.nn.sigmoid(pre[:, 3 * H:4 * H])
            c = f_g * c + i_g * g_g
            h = o_g * jnp.tanh(c)
            hout_ref[t * B:(t + 1) * B, :] = h

    # BiLSTM 1: hoisted per-step input projections (fwd|bwd fused to 256 lanes)
    wih1 = lstm_ref[0:32, :]
    b1 = lstm_ref[32:33, :]
    g1 = [jnp.dot(vis[:, t * 32:(t + 1) * 32], wih1,
                  preferred_element_type=F32) + b1 for t in range(T)]
    run_dir([g[:, 0:128] for g in g1], lstm_ref[33:65, 0:128], hf_ref, False)
    run_dir([g[:, 128:256] for g in g1], lstm_ref[33:65, 128:256], hb_ref, True)
    s1 = (jnp.dot(hf_ref[...], lin_ref[0:32, 0:H], preferred_element_type=F32)
          + jnp.dot(hb_ref[...], lin_ref[32:64, 0:H], preferred_element_type=F32)
          + lin_ref[64:65, 0:H])                                   # (T*B, H)

    # BiLSTM 2: one hoisted input projection over the whole sequence
    g2 = jnp.dot(s1, lstm_ref[65:97, :], preferred_element_type=F32) + lstm_ref[97:98, :]
    run_dir([g2[t * B:(t + 1) * B, 0:128] for t in range(T)],
            lstm_ref[98:130, 0:128], hf_ref, False)
    run_dir([g2[t * B:(t + 1) * B, 128:256] for t in range(T)],
            lstm_ref[98:130, 128:256], hb_ref, True)
    s2 = (jnp.dot(hf_ref[...], lin_ref[65:97, 0:H], preferred_element_type=F32)
          + jnp.dot(hb_ref[...], lin_ref[97:129, 0:H], preferred_element_type=F32)
          + lin_ref[129:130, 0:H])

    # CTC prediction linear
    out_ref[...] = (jnp.dot(s2, lin_ref[130:162, 0:C], preferred_element_type=F32)
                    + lin_ref[162:163, 0:C])


# -------------------- parameters --------------------
def init_params(key, num_classes=NUM_CLASSES):
    assert num_classes == NUM_CLASSES
    keys = iter(jax.random.split(key, 64))

    def nrm(shape, scale):
        return np.asarray(jax.random.normal(next(keys), shape, F32)) * np.float32(scale)

    def conv_w(cin, cout, k):
        return nrm((k, k, cin, cout), (1.0 / (cin * k * k)) ** 0.5)

    # ---- VGG banded conv weights (width-pool folded into conv1/conv2) ----
    w, b = conv_w(INPUT_CHANNEL, OC[0], 3), nrm((OC[0],), 0.05)
    a1 = np.concatenate([_banded(w, 32, 1, range(0, 32, 2)),
                         _banded(w, 32, 1, range(1, 32, 2))], axis=2)
    sh1 = np.tile(b, 32)
    w, b = conv_w(OC[0], OC[1], 3), nrm((OC[1],), 0.05)
    a2 = np.concatenate([_banded(w, 16, 1, range(0, 16, 2)),
                         _banded(w, 16, 1, range(1, 16, 2))], axis=2)
    sh2 = np.tile(b, 16)
    w, b = conv_w(OC[1], OC[2], 3), nrm((OC[2],), 0.05)
    a3, sh3 = _banded(w, 8, 1, range(8)), np.tile(b, 8)
    w, b = conv_w(OC[2], OC[2], 3), nrm((OC[2],), 0.05)
    a4, sh4 = _banded(w, 8, 1, range(8)), np.tile(b, 8)
    # conv5/conv6: no conv bias; BatchNorm folded with fresh eval running stats
    # (mean=0, var=1).  TODO(synk): when importing a trained checkpoint fold the
    # real stats (scale = gamma/sqrt(var+eps), shift = beta - mean*scale).
    w = conv_w(OC[2], OC[3], 3)
    g, be = 1.0 + nrm((OC[3],), 0.05), nrm((OC[3],), 0.05)
    a5 = _banded(w, 8, 1, range(8))
    sc5, sh5 = np.tile(g / np.sqrt(1.0 + 1e-5), 8), np.tile(be, 8)
    w = conv_w(OC[3], OC[3], 3)
    g, be = 1.0 + nrm((OC[3],), 0.05), nrm((OC[3],), 0.05)
    a6 = _banded(w, 8, 1, range(8))
    sc6, sh6 = np.tile(g / np.sqrt(1.0 + 1e-5), 8), np.tile(be, 8)
    w, b = conv_w(OC[3], OC[3], 2), nrm((OC[3],), 0.05)
    a7, sh7 = _banded(w, 8, 0, range(7)), np.tile(b, 7)

    # bias / BN rows packed into one operand
    misc = np.zeros((9, 256), np.float32)
    for r, v in enumerate([sh1, sh2, sh3, sh4, sc5, sh5, sc6, sh6, sh7]):
        misc[r, :v.shape[0]] = v

    # ---- LSTM: fused gate weights (in,4H), gate order (i,f,g,o); fwd|bwd side
    #      by side along lanes.  Single bias per gate (== PyTorch b_ih + b_hh
    #      pre-summed when importing real checkpoints).
    H = HIDDEN_SIZE
    s = (1.0 / H) ** 0.5
    lstm = np.zeros((130, 256), np.float32)
    for row0 in (0, 65):                      # BiLSTM layer 1, layer 2
        for half in (0, 1):                   # forward, backward direction
            lo = 128 * half
            lstm[row0:row0 + 32, lo:lo + 128] = nrm((32, 4 * H), s)        # w_ih
            lstm[row0 + 32, lo:lo + 128] = nrm((4 * H,), s)                # bias
            lstm[row0 + 33:row0 + 65, lo:lo + 128] = nrm((H, 4 * H), s)    # w_hh

    # ---- output linears: BiLSTM heads (2H->H) and CTC prediction (H->classes)
    lin = np.zeros((163, 128), np.float32)
    lin[0:64, 0:H] = nrm((2 * H, H), (1.0 / (2 * H)) ** 0.5)
    lin[64, 0:H] = nrm((H,), 0.05)
    lin[65:129, 0:H] = nrm((2 * H, H), (1.0 / (2 * H)) ** 0.5)
    lin[129, 0:H] = nrm((H,), 0.05)
    lin[130:162, 0:num_classes] = nrm((H, num_classes), (1.0 / H) ** 0.5)
    lin[162, 0:num_classes] = 0.0

    ops = [a1, a2, a3, a4, a5, a6, a7, misc, _SEL_PACK, lstm, lin]
    return {'ops': [jnp.asarray(o) for o in ops]}


# -------------------- forward pass --------------------
def model_forward(params, input_nchw, text=None, is_train=True):
    """Matches Model.forward: Trans='None' (TPS skipped), VGG features,
    AdaptiveAvgPool((None,1)) + squeeze (identity, H collapses to 1),
    two BidirectionalLSTM blocks, CTC Linear.  `text` is unused for CTC."""
    # TODO(synk): TPS_SpatialTransformerNetwork not implemented (config Trans='None').
    b = input_nchw.shape[0]
    assert b == BATCH and input_nchw.shape[1] == INPUT_CHANNEL
    x2d = input_nchw.astype(F32).reshape(b * IMGH, IMGW)   # NCHW, C==1 -> (B*H, W)

    logits = pl.pallas_call(
        _model_kernel,
        out_shape=jax.ShapeDtypeStruct((SEQ_LEN * BATCH, NUM_CLASSES), F32),
        in_specs=[VMEM] * 12,
        out_specs=VMEM,
        scratch_shapes=[
            pltpu.VMEM((BATCH * 34, 32), F32),    # conv1 input (height-padded)
            pltpu.VMEM((BATCH * 18, 64), F32),    # conv2 input
            pltpu.VMEM((BATCH * 10, 64), F32),    # conv3 input
            pltpu.VMEM((BATCH * 10, 128), F32),   # conv4 input
            pltpu.VMEM((BATCH * 6, 128), F32),    # conv5 input
            pltpu.VMEM((BATCH * 6, 256), F32),    # conv6 input
            pltpu.VMEM((BATCH * 2, 256), F32),    # conv7 input (no pad rows)
            pltpu.VMEM((SEQ_LEN * BATCH, HIDDEN_SIZE), F32),   # fwd hidden seq
            pltpu.VMEM((SEQ_LEN * BATCH, HIDDEN_SIZE), F32),   # bwd hidden seq
        ],
    )(x2d, *params['ops'])

    # rows are t*B + b  ->  (B, T, num_classes)
    return jnp.transpose(logits.reshape(SEQ_LEN, b, NUM_CLASSES), (1, 0, 2))


# -------------------- main --------------------
if __name__ == "__main__":
    key = jax.random.PRNGKey(0)
    pkey, xkey = jax.random.split(key)
    params = init_params(pkey, NUM_CLASSES)
    x = jax.random.normal(xkey, (BATCH, INPUT_CHANNEL, IMGH, IMGW), F32)

    fwd = jax.jit(model_forward)
    out = fwd(params, x)
    jax.block_until_ready(out)

    assert out.shape == (BATCH, SEQ_LEN, NUM_CLASSES), out.shape
    assert bool(jnp.all(jnp.isfinite(out)))
    print("KERNEL_OK")
</pallas_src>

<mosaic_0001>
module attributes {stable_mosaic.version = 11 : i64} {
  func.func @_model_kernel(%arg0: memref<64x32xf32, #tpu.memory_space<vmem>>, %arg1: memref<3x32x128xf32, #tpu.memory_space<vmem>>, %arg2: memref<3x64x128xf32, #tpu.memory_space<vmem>>, %arg3: memref<3x64x128xf32, #tpu.memory_space<vmem>>, %arg4: memref<3x128x128xf32, #tpu.memory_space<vmem>>, %arg5: memref<3x128x256xf32, #tpu.memory_space<vmem>>, %arg6: memref<3x256x256xf32, #tpu.memory_space<vmem>>, %arg7: memref<2x256x224xf32, #tpu.memory_space<vmem>>, %arg8: memref<9x256xf32, #tpu.memory_space<vmem>>, %arg9: memref<246x128xf32, #tpu.memory_space<vmem>>, %arg10: memref<130x256xf32, #tpu.memory_space<vmem>>, %arg11: memref<163x128xf32, #tpu.memory_space<vmem>>, %arg12: memref<14x10xf32, #tpu.memory_space<vmem>>, %arg13: memref<68x32xf32, #tpu.memory_space<vmem>>, %arg14: memref<36x64xf32, #tpu.memory_space<vmem>>, %arg15: memref<20x64xf32, #tpu.memory_space<vmem>>, %arg16: memref<20x128xf32, #tpu.memory_space<vmem>>, %arg17: memref<12x128xf32, #tpu.memory_space<vmem>>, %arg18: memref<12x256xf32, #tpu.memory_space<vmem>>, %arg19: memref<4x256xf32, #tpu.memory_space<vmem>>, %arg20: memref<14x32xf32, #tpu.memory_space<vmem>>, %arg21: memref<14x32xf32, #tpu.memory_space<vmem>>) attributes {dimension_semantics = [], scalar_prefetch = 0 : i64, scratch_operands = 9 : i64, tpu.core_type = #tpu.core_type<tc>} {
    %c0 = arith.constant 0 : index
    %c0_0 = arith.constant 0 : index
    %0 = vector.load %arg9[%c0, %c0_0] : memref<246x128xf32, #tpu.memory_space<vmem>>, vector<68x64xf32>
    %c0_1 = arith.constant 0 : index
    %c0_2 = arith.constant 0 : index
    %1 = vector.load %arg0[%c0_1, %c0_2] : memref<64x32xf32, #tpu.memory_space<vmem>>, vector<64x32xf32>
    %cst = arith.constant dense<0.000000e+00> : vector<68x32xf32>
    %2 = tpu.matmul %0, %1, %cst {dimension_numbers = #tpu.dot_dimension_numbers<[1], [0], [0], [1], [0, 0, 1, 1], [], []>} : vector<68x64xf32>, vector<64x32xf32>, vector<68x32xf32> -> vector<68x32xf32>
    %c0_3 = arith.constant 0 : index
    %c0_4 = arith.constant 0 : index
    %3 = vector.load %arg13[%c0_3, %c0_4] : memref<68x32xf32, #tpu.memory_space<vmem>>, vector<68x32xf32>
    tpu.vector_store %arg13[%c0_3, %c0_4], %2 {strides = array<i32>} : memref<68x32xf32, #tpu.memory_space<vmem>>, vector<68x32xf32>,
    %c0_5 = arith.constant 0 : index
    %c0_6 = arith.constant 0 : index
    %4 = vector.load %arg13[%c0_5, %c0_6] : memref<68x32xf32, #tpu.memory_space<vmem>>, vector<66x32xf32>
    %c0_7 = arith.constant 0 : index
    %c0_8 = arith.constant 0 : index
    %c0_9 = arith.constant 0 : index
    %5 = vector.load %arg1[%c0_7, %c0_8, %c0_9] : memref<3x32x128xf32, #tpu.memory_space<vmem>>, vector<1x32x128xf32>
    %6 = vector.shape_cast %5 : vector<1x32x128xf32> to vector<32x128xf32>
    %cst_10 = arith.constant dense<0.000000e+00> : vector<66x128xf32>
    %7 = tpu.matmul %4, %6, %cst_10 {dimension_numbers = #tpu.dot_dimension_numbers<[1], [0], [0], [1], [0, 0, 1, 1], [], []>} : vector<66x32xf32>, vector<32x128xf32>, vector<66x128xf32> -> vector<66x128xf32>
    %c1 = arith.constant 1 : index
    %c0_11 = arith.constant 0 : index
    %8 = vector.load %arg13[%c1, %c0_11] : memref<68x32xf32, #tpu.memory_space<vmem>>, vector<66x32xf32>
    %c1_12 = arith.constant 1 : index
    %c0_13 = arith.constant 0 : index
    %c0_14 = arith.constant 0 : index
    %9 = vector.load %arg1[%c1_12, %c0_13, %c0_14] : memref<3x32x128xf32, #tpu.memory_space<vmem>>, vector<1x32x128xf32>
    %10 = vector.shape_cast %9 : vector<1x32x128xf32> to vector<32x128xf32>
    %cst_15 = arith.constant dense<0.000000e+00> : vector<66x128xf32>
    %11 = tpu.matmul %8, %10, %cst_15 {dimension_numbers = #tpu.dot_dimension_numbers<[1], [0], [0], [1], [0, 0, 1, 1], [], []>} : vector<66x32xf32>, vector<32x128xf32>, vector<66x128xf32> -> vector<66x128xf32>
    %12 = arith.addf %7, %11 : vector<66x128xf32>
    %c2 = arith.constant 2 : index
    %c0_16 = arith.constant 0 : index
    %13 = vector.load %arg13[%c2, %c0_16] : memref<68x32xf32, #tpu.memory_space<vmem>>, vector<66x32xf32>
    %c2_17 = arith.constant 2 : index
    %c0_18 = arith.constant 0 : index
    %c0_19 = arith.constant 0 : index
    %14 = vector.load %arg1[%c2_17, %c0_18, %c0_19] : memref<3x32x128xf32, #tpu.memory_space<vmem>>, vector<1x32x128xf32>
    %15 = vector.shape_cast %14 : vector<1x32x128xf32> to vector<32x128xf32>
    %cst_20 = arith.constant dense<0.000000e+00> : vector<66x128xf32>
    %16 = tpu.matmul %13, %15, %cst_20 {dimension_numbers = #tpu.dot_dimension_numbers<[1], [0], [0], [1], [0, 0, 1, 1], [], []>} : vector<66x32xf32>, vector<32x128xf32>, vector<66x128xf32> -> vector<66x128xf32>
    %17 = arith.addf %12, %16 : vector<66x128xf32>
    %c0_21 = arith.constant 0 : index
    %c0_22 = arith.constant 0 : index
    %18 = vector.load %arg8[%c0_21, %c0_22] : memref<9x256xf32, #tpu.memory_space<vmem>>, vector<1x128xf32>
    %19 = vector.broadcast %18 : vector<1x128xf32> to vector<66x128xf32>
    %20 = arith.addf %17, %19 : vector<66x128xf32>
    %cst_23 = arith.constant 0.000000e+00 : f32
    %21 = vector.broadcast %cst_23 : f32 to vector<66x128xf32>
    %22 = arith.maximumf %20, %21 : vector<66x128xf32>
    %c68 = arith.constant 68 : index
    %c0_24 = arith.constant 0 : index
    %23 = vector.load %arg9[%c68, %c0_24] : memref<246x128xf32, #tpu.memory_space<vmem>>, vector<36x66xf32>
    %c104 = arith.constant 104 : index
    %c0_25 = arith.constant 0 : index
    %24 = vector.load %arg9[%c104, %c0_25] : memref<246x128xf32, #tpu.memory_space<vmem>>, vector<36x66xf32>
    %25 = vector.extract_strided_slice %22 {offsets = [0, 0], sizes = [66, 64], strides = [1, 1]} : vector<66x128xf32> to vector<66x64xf32>
    %26 = vector.extract_strided_slice %22 {offsets = [0, 64], sizes = [66, 64], strides = [1, 1]} : vector<66x128xf32> to vector<66x64xf32>
    %27 = arith.maximumf %25, %26 : vector<66x64xf32>
    %cst_26 = arith.constant dense<0.000000e+00> : vector<36x64xf32>
    %28 = tpu.matmul %23, %27, %cst_26 {dimension_numbers = #tpu.dot_dimension_numbers<[1], [0], [0], [1], [0, 0, 1, 1], [], []>} : vector<36x66xf32>, vector<66x64xf32>, vector<36x64xf32> -> vector<36x64xf32>
    %cst_27 = arith.constant dense<0.000000e+00> : vector<36x64xf32>
    %29 = tpu.matmul %24, %27, %cst_27 {dimension_numbers = #tpu.dot_dimension_numbers<[1], [0], [0], [1], [0, 0, 1, 1], [], []>} : vector<36x66xf32>, vector<66x64xf32>, vector<36x64xf32> -> vector<36x64xf32>
    %30 = arith.maximumf %28, %29 : vector<36x64xf32>
    %c0_28 = arith.constant 0 : index
    %c0_29 = arith.constant 0 : index
    %31 = vector.load %arg14[%c0_28, %c0_29] : memref<36x64xf32, #tpu.memory_space<vmem>>, vector<36x64xf32>
    tpu.vector_store %arg14[%c0_28, %c0_29], %30 {strides = array<i32>} : memref<36x64xf32, #tpu.memory_space<vmem>>, vector<36x64xf32>,
    %c0_30 = arith.constant 0 : index
    %c0_31 = arith.constant 0 : index
    %32 = vector.load %arg14[%c0_30, %c0_31] : memref<36x64xf32, #tpu.memory_space<vmem>>, vector<34x64xf32>
    %c0_32 = arith.constant 0 : index
    %c0_33 = arith.constant 0 : index
    %c0_34 = arith.constant 0 : index
    %33 = vector.load %arg2[%c0_32, %c0_33, %c0_34] : memref<3x64x128xf32, #tpu.memory_space<vmem>>, vector<1x64x128xf32>
    %34 = vector.shape_cast %33 : vector<1x64x128xf32> to vector<64x128xf32>
    %cst_35 = arith.constant dense<0.000000e+00> : vector<34x128xf32>
    %35 = tpu.matmul %32, %34, %cst_35 {dimension_numbers = #tpu.dot_dimension_numbers<[1], [0], [0], [1], [0, 0, 1, 1], [], []>} : vector<34x64xf32>, vector<64x128xf32>, vector<34x128xf32> -> vector<34x128xf32>
    %c1_36 = arith.constant 1 : index
    %c0_37 = arith.constant 0 : index
    %36 = vector.load %arg14[%c1_36, %c0_37] : memref<36x64xf32, #tpu.memory_space<vmem>>, vector<34x64xf32>
    %c1_38 = arith.constant 1 : index
    %c0_39 = arith.constant 0 : index
    %c0_40 = arith.constant 0 : index
    %37 = vector.load %arg2[%c1_38, %c0_39, %c0_40] : memref<3x64x128xf32, #tpu.memory_space<vmem>>, vector<1x64x128xf32>
    %38 = vector.shape_cast %37 : vector<1x64x128xf32> to vector<64x128xf32>
    %cst_41 = arith.constant dense<0.000000e+00> : vector<34x128xf32>
    %39 = tpu.matmul %36, %38, %cst_41 {dimension_numbers = #tpu.dot_dimension_numbers<[1], [0], [0], [1], [0, 0, 1, 1], [], []>} : vector<34x64xf32>, vector<64x128xf32>, vector<34x128xf32> -> vector<34x128xf32>
    %40 = arith.addf %35, %39 : vector<34x128xf32>
    %c2_42 = arith.constant 2 : index
    %c0_43 = arith.constant 0 : index
    %41 = vector.load %arg14[%c2_42, %c0_43] : memref<36x64xf32, #tpu.memory_space<vmem>>, vector<34x64xf32>
    %c2_44 = arith.constant 2 : index
    %c0_45 = arith.constant 0 : index
    %c0_46 = arith.constant 0 : index
    %42 = vector.load %arg2[%c2_44, %c0_45, %c0_46] : memref<3x64x128xf32, #tpu.memory_space<vmem>>, vector<1x64x128xf32>
    %43 = vector.shape_cast %42 : vector<1x64x128xf32> to vector<64x128xf32>
    %cst_47 = arith.constant dense<0.000000e+00> : vector<34x128xf32>
    %44 = tpu.matmul %41, %43, %cst_47 {dimension_numbers = #tpu.dot_dimension_numbers<[1], [0], [0], [1], [0, 0, 1, 1], [], []>} : vector<34x64xf32>, vector<64x128xf32>, vector<34x128xf32> -> vector<34x128xf32>
    %45 = arith.addf %40, %44 : vector<34x128xf32>
    %c1_48 = arith.constant 1 : index
    %c0_49 = arith.constant 0 : index
    %46 = vector.load %arg8[%c1_48, %c0_49] : memref<9x256xf32, #tpu.memory_space<vmem>>, vector<1x128xf32>
    %47 = vector.broadcast %46 : vector<1x128xf32> to vector<34x128xf32>
    %48 = arith.addf %45, %47 : vector<34x128xf32>
    %cst_50 = arith.constant 0.000000e+00 : f32
    %49 = vector.broadcast %cst_50 : f32 to vector<34x128xf32>
    %50 = arith.maximumf %48, %49 : vector<34x128xf32>
    %c140 = arith.constant 140 : index
    %c0_51 = arith.constant 0 : index
    %51 = vector.load %arg9[%c140, %c0_51] : memref<246x128xf32, #tpu.memory_space<vmem>>, vector<20x34xf32>
    %c160 = arith.constant 160 : index
    %c0_52 = arith.constant 0 : index
    %52 = vector.load %arg9[%c160, %c0_52] : memref<246x128xf32, #tpu.memory_space<vmem>>, vector<20x34xf32>
    %53 = vector.extract_strided_slice %50 {offsets = [0, 0], sizes = [34, 64], strides = [1, 1]} : vector<34x128xf32> to vector<34x64xf32>
    %54 = vector.extract_strided_slice %50 {offsets = [0, 64], sizes = [34, 64], strides = [1, 1]} : vector<34x128xf32> to vector<34x64xf32>
    %55 = arith.maximumf %53, %54 : vector<34x64xf32>
    %cst_53 = arith.constant dense<0.000000e+00> : vector<20x64xf32>
    %56 = tpu.matmul %51, %55, %cst_53 {dimension_numbers = #tpu.dot_dimension_numbers<[1], [0], [0], [1], [0, 0, 1, 1], [], []>} : vector<20x34xf32>, vector<34x64xf32>, vector<20x64xf32> -> vector<20x64xf32>
    %cst_54 = arith.constant dense<0.000000e+00> : vector<20x64xf32>
    %57 = tpu.matmul %52, %55, %cst_54 {dimension_numbers = #tpu.dot_dimension_numbers<[1], [0], [0], [1], [0, 0, 1, 1], [], []>} : vector<20x34xf32>, vector<34x64xf32>, vector<20x64xf32> -> vector<20x64xf32>
    %58 = arith.maximumf %56, %57 : vector<20x64xf32>
    %c0_55 = arith.constant 0 : index
    %c0_56 = arith.constant 0 : index
    %59 = vector.load %arg15[%c0_55, %c0_56] : memref<20x64xf32, #tpu.memory_space<vmem>>, vector<20x64xf32>
    tpu.vector_store %arg15[%c0_55, %c0_56], %58 {strides = array<i32>} : memref<20x64xf32, #tpu.memory_space<vmem>>, vector<20x64xf32>,
    %c0_57 = arith.constant 0 : index
    %c0_58 = arith.constant 0 : index
    %60 = vector.load %arg15[%c0_57, %c0_58] : memref<20x64xf32, #tpu.memory_space<vmem>>, vector<18x64xf32>
    %c0_59 = arith.constant 0 : index
    %c0_60 = arith.constant 0 : index
    %c0_61 = arith.constant 0 : index
    %61 = vector.load %arg3[%c0_59, %c0_60, %c0_61] : memref<3x64x128xf32, #tpu.memory_space<vmem>>, vector<1x64x128xf32>
    %62 = vector.shape_cast %61 : vector<1x64x128xf32> to vector<64x128xf32>
    %cst_62 = arith.constant dense<0.000000e+00> : vector<18x128xf32>
    %63 = tpu.matmul %60, %62, %cst_62 {dimension_numbers = #tpu.dot_dimension_numbers<[1], [0], [0], [1], [0, 0, 1, 1], [], []>} : vector<18x64xf32>, vector<64x128xf32>, vector<18x128xf32> -> vector<18x128xf32>
    %c1_63 = arith.constant 1 : index
    %c0_64 = arith.constant 0 : index
    %64 = vector.load %arg15[%c1_63, %c0_64] : memref<20x64xf32, #tpu.memory_space<vmem>>, vector<18x64xf32>
    %c1_65 = arith.constant 1 : index
    %c0_66 = arith.constant 0 : index
    %c0_67 = arith.constant 0 : index
    %65 = vector.load %arg3[%c1_65, %c0_66, %c0_67] : memref<3x64x128xf32, #tpu.memory_space<vmem>>, vector<1x64x128xf32>
    %66 = vector.shape_cast %65 : vector<1x64x128xf32> to vector<64x128xf32>
    %cst_68 = arith.constant dense<0.000000e+00> : vector<18x128xf32>
    %67 = tpu.matmul %64, %66, %cst_68 {dimension_numbers = #tpu.dot_dimension_numbers<[1], [0], [0], [1], [0, 0, 1, 1], [], []>} : vector<18x64xf32>, vector<64x128xf32>, vector<18x128xf32> -> vector<18x128xf32>
    %68 = arith.addf %63, %67 : vector<18x128xf32>
    %c2_69 = arith.constant 2 : index
    %c0_70 = arith.constant 0 : index
    %69 = vector.load %arg15[%c2_69, %c0_70] : memref<20x64xf32, #tpu.memory_space<vmem>>, vector<18x64xf32>
    %c2_71 = arith.constant 2 : index
    %c0_72 = arith.constant 0 : index
    %c0_73 = arith.constant 0 : index
    %70 = vector.load %arg3[%c2_71, %c0_72, %c0_73] : memref<3x64x128xf32, #tpu.memory_space<vmem>>, vector<1x64x128xf32>
    %71 = vector.shape_cast %70 : vector<1x64x128xf32> to vector<64x128xf32>
    %cst_74 = arith.constant dense<0.000000e+00> : vector<18x128xf32>
    %72 = tpu.matmul %69, %71, %cst_74 {dimension_numbers = #tpu.dot_dimension_numbers<[1], [0], [0], [1], [0, 0, 1, 1], [], []>} : vector<18x64xf32>, vector<64x128xf32>, vector<18x128xf32> -> vector<18x128xf32>
    %73 = arith.addf %68, %72 : vector<18x128xf32>
    %c2_75 = arith.constant 2 : index
    %c0_76 = arith.constant 0 : index
    %74 = vector.load %arg8[%c2_75, %c0_76] : memref<9x256xf32, #tpu.memory_space<vmem>>, vector<1x128xf32>
    %75 = vector.broadcast %74 : vector<1x128xf32> to vector<18x128xf32>
    %76 = arith.addf %73, %75 : vector<18x128xf32>
    %cst_77 = arith.constant 0.000000e+00 : f32
    %77 = vector.broadcast %cst_77 : f32 to vector<18x128xf32>
    %78 = arith.maximumf %76, %77 : vector<18x128xf32>
    %c180 = arith.constant 180 : index
    %c0_78 = arith.constant 0 : index
    %79 = vector.load %arg9[%c180, %c0_78] : memref<246x128xf32, #tpu.memory_space<vmem>>, vector<20x18xf32>
    %cst_79 = arith.constant dense<0.000000e+00> : vector<20x128xf32>
    %80 = tpu.matmul %79, %78, %cst_79 {dimension_numbers = #tpu.dot_dimension_numbers<[1], [0], [0], [1], [0, 0, 1, 1], [], []>} : vector<20x18xf32>, vector<18x128xf32>, vector<20x128xf32> -> vector<20x128xf32>
    %c0_80 = arith.constant 0 : index
    %c0_81 = arith.constant 0 : index
    %81 = vector.load %arg16[%c0_80, %c0_81] : memref<20x128xf32, #tpu.memory_space<vmem>>, vector<20x128xf32>
    tpu.vector_store %arg16[%c0_80, %c0_81], %80 {strides = array<i32>} : memref<20x128xf32, #tpu.memory_space<vmem>>, vector<20x128xf32>,
    %c0_82 = arith.constant 0 : index
    %c0_83 = arith.constant 0 : index
    %82 = vector.load %arg16[%c0_82, %c0_83] : memref<20x128xf32, #tpu.memory_space<vmem>>, vector<18x128xf32>
    %c0_84 = arith.constant 0 : index
    %c0_85 = arith.constant 0 : index
    %c0_86 = arith.constant 0 : index
    %83 = vector.load %arg4[%c0_84, %c0_85, %c0_86] : memref<3x128x128xf32, #tpu.memory_space<vmem>>, vector<1x128x128xf32>
    %84 = vector.shape_cast %83 : vector<1x128x128xf32> to vector<128x128xf32>
    %cst_87 = arith.constant dense<0.000000e+00> : vector<18x128xf32>
    %85 = tpu.matmul %82, %84, %cst_87 {dimension_numbers = #tpu.dot_dimension_numbers<[1], [0], [0], [1], [0, 0, 1, 1], [], []>} : vector<18x128xf32>, vector<128x128xf32>, vector<18x128xf32> -> vector<18x128xf32>
    %c1_88 = arith.constant 1 : index
    %c0_89 = arith.constant 0 : index
    %86 = vector.load %arg16[%c1_88, %c0_89] : memref<20x128xf32, #tpu.memory_space<vmem>>, vector<18x128xf32>
    %c1_90 = arith.constant 1 : index
    %c0_91 = arith.constant 0 : index
    %c0_92 = arith.constant 0 : index
    %87 = vector.load %arg4[%c1_90, %c0_91, %c0_92] : memref<3x128x128xf32, #tpu.memory_space<vmem>>, vector<1x128x128xf32>
    %88 = vector.shape_cast %87 : vector<1x128x128xf32> to vector<128x128xf32>
    %cst_93 = arith.constant dense<0.000000e+00> : vector<18x128xf32>
    %89 = tpu.matmul %86, %88, %cst_93 {dimension_numbers = #tpu.dot_dimension_numbers<[1], [0], [0], [1], [0, 0, 1, 1], [], []>} : vector<18x128xf32>, vector<128x128xf32>, vector<18x128xf32> -> vector<18x128xf32>
    %90 = arith.addf %85, %89 : vector<18x128xf32>
    %c2_94 = arith.constant 2 : index
    %c0_95 = arith.constant 0 : index
    %91 = vector.load %arg16[%c2_94, %c0_95] : memref<20x128xf32, #tpu.memory_space<vmem>>, vector<18x128xf32>
    %c2_96 = arith.constant 2 : index
    %c0_97 = arith.constant 0 : index
    %c0_98 = arith.constant 0 : index
    %92 = vector.load %arg4[%c2_96, %c0_97, %c0_98] : memref<3x128x128xf32, #tpu.memory_space<vmem>>, vector<1x128x128xf32>
    %93 = vector.shape_cast %92 : vector<1x128x128xf32> to vector<128x128xf32>
    %cst_99 = arith.constant dense<0.000000e+00> : vector<18x128xf32>
    %94 = tpu.matmul %91, %93, %cst_99 {dimension_numbers = #tpu.dot_dimension_numbers<[1], [0], [0], [1], [0, 0, 1, 1], [], []>} : vector<18x128xf32>, vector<128x128xf32>, vector<18x128xf32> -> vector<18x128xf32>
    %95 = arith.addf %90, %94 : vector<18x128xf32>
    %c3 = arith.constant 3 : index
    %c0_100 = arith.constant 0 : index
    %96 = vector.load %arg8[%c3, %c0_100] : memref<9x256xf32, #tpu.memory_space<vmem>>, vector<1x128xf32>
    %97 = vector.broadcast %96 : vector<1x128xf32> to vector<18x128xf32>
    %98 = arith.addf %95, %97 : vector<18x128xf32>
    %cst_101 = arith.constant 0.000000e+00 : f32
    %99 = vector.broadcast %cst_101 : f32 to vector<18x128xf32>
    %100 = arith.maximumf %98, %99 : vector<18x128xf32>
    %c200 = arith.constant 200 : index
    %c0_102 = arith.constant 0 : index
    %101 = vector.load %arg9[%c200, %c0_102] : memref<246x128xf32, #tpu.memory_space<vmem>>, vector<12x18xf32>
    %c212 = arith.constant 212 : index
    %c0_103 = arith.constant 0 : index
    %102 = vector.load %arg9[%c212, %c0_103] : memref<246x128xf32, #tpu.memory_space<vmem>>, vector<12x18xf32>
    %cst_104 = arith.constant dense<0.000000e+00> : vector<12x128xf32>
    %103 = tpu.matmul %101, %100, %cst_104 {dimension_numbers = #tpu.dot_dimension_numbers<[1], [0], [0], [1], [0, 0, 1, 1], [], []>} : vector<12x18xf32>, vector<18x128xf32>, vector<12x128xf32> -> vector<12x128xf32>
    %cst_105 = arith.constant dense<0.000000e+00> : vector<12x128xf32>
    %104 = tpu.matmul %102, %100, %cst_105 {dimension_numbers = #tpu.dot_dimension_numbers<[1], [0], [0], [1], [0, 0, 1, 1], [], []>} : vector<12x18xf32>, vector<18x128xf32>, vector<12x128xf32> -> vector<12x128xf32>
    %105 = arith.maximumf %103, %104 : vector<12x128xf32>
    %c0_106 = arith.constant 0 : index
    %c0_107 = arith.constant 0 : index
    %106 = vector.load %arg17[%c0_106, %c0_107] : memref<12x128xf32, #tpu.memory_space<vmem>>, vector<12x128xf32>
    tpu.vector_store %arg17[%c0_106, %c0_107], %105 {strides = array<i32>} : memref<12x128xf32, #tpu.memory_space<vmem>>, vector<12x128xf32>,
    %c0_108 = arith.constant 0 : index
    %c0_109 = arith.constant 0 : index
    %107 = vector.load %arg17[%c0_108, %c0_109] : memref<12x128xf32, #tpu.memory_space<vmem>>, vector<10x128xf32>
    %c0_110 = arith.constant 0 : index
    %c0_111 = arith.constant 0 : index
    %c0_112 = arith.constant 0 : index
    %108 = vector.load %arg5[%c0_110, %c0_111, %c0_112] : memref<3x128x256xf32, #tpu.memory_space<vmem>>, vector<1x128x256xf32>
    %109 = vector.shape_cast %108 : vector<1x128x256xf32> to vector<128x256xf32>
    %cst_113 = arith.constant dense<0.000000e+00> : vector<10x256xf32>
    %110 = tpu.matmul %107, %109, %cst_113 {dimension_numbers = #tpu.dot_dimension_numbers<[1], [0], [0], [1], [0, 0, 1, 1], [], []>} : vector<10x128xf32>, vector<128x256xf32>, vector<10x256xf32> -> vector<10x256xf32>
    %c1_114 = arith.constant 1 : index
    %c0_115 = arith.constant 0 : index
    %111 = vector.load %arg17[%c1_114, %c0_115] : memref<12x128xf32, #tpu.memory_space<vmem>>, vector<10x128xf32>
    %c1_116 = arith.constant 1 : index
    %c0_117 = arith.constant 0 : index
    %c0_118 = arith.constant 0 : index
    %112 = vector.load %arg5[%c1_116, %c0_117, %c0_118] : memref<3x128x256xf32, #tpu.memory_space<vmem>>, vector<1x128x256xf32>
    %113 = vector.shape_cast %112 : vector<1x128x256xf32> to vector<128x256xf32>
    %cst_119 = arith.constant dense<0.000000e+00> : vector<10x256xf32>
    %114 = tpu.matmul %111, %113, %cst_119 {dimension_numbers = #tpu.dot_dimension_numbers<[1], [0], [0], [1], [0, 0, 1, 1], [], []>} : vector<10x128xf32>, vector<128x256xf32>, vector<10x256xf32> -> vector<10x256xf32>
    %115 = arith.addf %110, %114 : vector<10x256xf32>
    %c2_120 = arith.constant 2 : index
    %c0_121 = arith.constant 0 : index
    %116 = vector.load %arg17[%c2_120, %c0_121] : memref<12x128xf32, #tpu.memory_space<vmem>>, vector<10x128xf32>
    %c2_122 = arith.constant 2 : index
    %c0_123 = arith.constant 0 : index
    %c0_124 = arith.constant 0 : index
    %117 = vector.load %arg5[%c2_122, %c0_123, %c0_124] : memref<3x128x256xf32, #tpu.memory_space<vmem>>, vector<1x128x256xf32>
    %118 = vector.shape_cast %117 : vector<1x128x256xf32> to vector<128x256xf32>
    %cst_125 = arith.constant dense<0.000000e+00> : vector<10x256xf32>
    %119 = tpu.matmul %116, %118, %cst_125 {dimension_numbers = #tpu.dot_dimension_numbers<[1], [0], [0], [1], [0, 0, 1, 1], [], []>} : vector<10x128xf32>, vector<128x256xf32>, vector<10x256xf32> -> vector<10x256xf32>
    %120 = arith.addf %115, %119 : vector<10x256xf32>
    %c4 = arith.constant 4 : index
    %c0_126 = arith.constant 0 : index
    %121 = vector.load %arg8[%c4, %c0_126] : memref<9x256xf32, #tpu.memory_space<vmem>>, vector<1x256xf32>
    %122 = vector.broadcast %121 : vector<1x256xf32> to vector<10x256xf32>
    %123 = arith.mulf %120, %122 : vector<10x256xf32>
    %c5 = arith.constant 5 : index
    %c0_127 = arith.constant 0 : index
    %124 = vector.load %arg8[%c5, %c0_127] : memref<9x256xf32, #tpu.memory_space<vmem>>, vector<1x256xf32>
    %125 = vector.broadcast %124 : vector<1x256xf32> to vector<10x256xf32>
    %126 = arith.addf %123, %125 : vector<10x256xf32>
    %cst_128 = arith.constant 0.000000e+00 : f32
    %127 = vector.broadcast %cst_128 : f32 to vector<10x256xf32>
    %128 = arith.maximumf %126, %127 : vector<10x256xf32>
    %c224 = arith.constant 224 : index
    %c0_129 = arith.constant 0 : index
    %129 = vector.load %arg9[%c224, %c0_129] : memref<246x128xf32, #tpu.memory_space<vmem>>, vector<12x10xf32>
    %cst_130 = arith.constant dense<0.000000e+00> : vector<12x256xf32>
    %130 = tpu.matmul %129, %128, %cst_130 {dimension_numbers = #tpu.dot_dimension_numbers<[1], [0], [0], [1], [0, 0, 1, 1], [], []>} : vector<12x10xf32>, vector<10x256xf32>, vector<12x256xf32> -> vector<12x256xf32>
    %c0_131 = arith.constant 0 : index
    %c0_132 = arith.constant 0 : index
    %131 = vector.load %arg18[%c0_131, %c0_132] : memref<12x256xf32, #tpu.memory_space<vmem>>, vector<12x256xf32>
    tpu.vector_store %arg18[%c0_131, %c0_132], %130 {strides = array<i32>} : memref<12x256xf32, #tpu.memory_space<vmem>>, vector<12x256xf32>,
    %c0_133 = arith.constant 0 : index
    %c0_134 = arith.constant 0 : index
    %132 = vector.load %arg18[%c0_133, %c0_134] : memref<12x256xf32, #tpu.memory_space<vmem>>, vector<10x256xf32>
    %c0_135 = arith.constant 0 : index
    %c0_136 = arith.constant 0 : index
    %c0_137 = arith.constant 0 : index
    %133 = vector.load %arg6[%c0_135, %c0_136, %c0_137] : memref<3x256x256xf32, #tpu.memory_space<vmem>>, vector<1x256x256xf32>
    %134 = vector.shape_cast %133 : vector<1x256x256xf32> to vector<256x256xf32>
    %cst_138 = arith.constant dense<0.000000e+00> : vector<10x256xf32>
    %135 = tpu.matmul %132, %134, %cst_138 {dimension_numbers = #tpu.dot_dimension_numbers<[1], [0], [0], [1], [0, 0, 1, 1], [], []>} : vector<10x256xf32>, vector<256x256xf32>, vector<10x256xf32> -> vector<10x256xf32>
    %c1_139 = arith.constant 1 : index
    %c0_140 = arith.constant 0 : index
    %136 = vector.load %arg18[%c1_139, %c0_140] : memref<12x256xf32, #tpu.memory_space<vmem>>, vector<10x256xf32>
    %c1_141 = arith.constant 1 : index
    %c0_142 = arith.constant 0 : index
    %c0_143 = arith.constant 0 : index
    %137 = vector.load %arg6[%c1_141, %c0_142, %c0_143] : memref<3x256x256xf32, #tpu.memory_space<vmem>>, vector<1x256x256xf32>
    %138 = vector.shape_cast %137 : vector<1x256x256xf32> to vector<256x256xf32>
    %cst_144 = arith.constant dense<0.000000e+00> : vector<10x256xf32>
    %139 = tpu.matmul %136, %138, %cst_144 {dimension_numbers = #tpu.dot_dimension_numbers<[1], [0], [0], [1], [0, 0, 1, 1], [], []>} : vector<10x256xf32>, vector<256x256xf32>, vector<10x256xf32> -> vector<10x256xf32>
    %140 = arith.addf %135, %139 : vector<10x256xf32>
    %c2_145 = arith.constant 2 : index
    %c0_146 = arith.constant 0 : index
    %141 = vector.load %arg18[%c2_145, %c0_146] : memref<12x256xf32, #tpu.memory_space<vmem>>, vector<10x256xf32>
    %c2_147 = arith.constant 2 : index
    %c0_148 = arith.constant 0 : index
    %c0_149 = arith.constant 0 : index
    %142 = vector.load %arg6[%c2_147, %c0_148, %c0_149] : memref<3x256x256xf32, #tpu.memory_space<vmem>>, vector<1x256x256xf32>
    %143 = vector.shape_cast %142 : vector<1x256x256xf32> to vector<256x256xf32>
    %cst_150 = arith.constant dense<0.000000e+00> : vector<10x256xf32>
    %144 = tpu.matmul %141, %143, %cst_150 {dimension_numbers = #tpu.dot_dimension_numbers<[1], [0], [0], [1], [0, 0, 1, 1], [], []>} : vector<10x256xf32>, vector<256x256xf32>, vector<10x256xf32> -> vector<10x256xf32>
    %145 = arith.addf %140, %144 : vector<10x256xf32>
    %c6 = arith.constant 6 : index
    %c0_151 = arith.constant 0 : index
    %146 = vector.load %arg8[%c6, %c0_151] : memref<9x256xf32, #tpu.memory_space<vmem>>, vector<1x256xf32>
    %147 = vector.broadcast %146 : vector<1x256xf32> to vector<10x256xf32>
    %148 = arith.mulf %145, %147 : vector<10x256xf32>
    %c7 = arith.constant 7 : index
    %c0_152 = arith.constant 0 : index
    %149 = vector.load %arg8[%c7, %c0_152] : memref<9x256xf32, #tpu.memory_space<vmem>>, vector<1x256xf32>
    %150 = vector.broadcast %149 : vector<1x256xf32> to vector<10x256xf32>
    %151 = arith.addf %148, %150 : vector<10x256xf32>
    %cst_153 = arith.constant 0.000000e+00 : f32
    %152 = vector.broadcast %cst_153 : f32 to vector<10x256xf32>
    %153 = arith.maximumf %151, %152 : vector<10x256xf32>
    %c236 = arith.constant 236 : index
    %c0_154 = arith.constant 0 : index
    %154 = vector.load %arg9[%c236, %c0_154] : memref<246x128xf32, #tpu.memory_space<vmem>>, vector<4x10xf32>
    %c240 = arith.constant 240 : index
    %c0_155 = arith.constant 0 : index
    %155 = vector.load %arg9[%c240, %c0_155] : memref<246x128xf32, #tpu.memory_space<vmem>>, vector<4x10xf32>
    %cst_156 = arith.constant dense<0.000000e+00> : vector<4x256xf32>
    %156 = tpu.matmul %154, %153, %cst_156 {dimension_numbers = #tpu.dot_dimension_numbers<[1], [0], [0], [1], [0, 0, 1, 1], [], []>} : vector<4x10xf32>, vector<10x256xf32>, vector<4x256xf32> -> vector<4x256xf32>
    %cst_157 = arith.constant dense<0.000000e+00> : vector<4x256xf32>
    %157 = tpu.matmul %155, %153, %cst_157 {dimension_numbers = #tpu.dot_dimension_numbers<[1], [0], [0], [1], [0, 0, 1, 1], [], []>} : vector<4x10xf32>, vector<10x256xf32>, vector<4x256xf32> -> vector<4x256xf32>
    %158 = arith.maximumf %156, %157 : vector<4x256xf32>
    %c0_158 = arith.constant 0 : index
    %c0_159 = arith.constant 0 : index
    %159 = vector.load %arg19[%c0_158, %c0_159] : memref<4x256xf32, #tpu.memory_space<vmem>>, vector<4x256xf32>
    tpu.vector_store %arg19[%c0_158, %c0_159], %158 {strides = array<i32>} : memref<4x256xf32, #tpu.memory_space<vmem>>, vector<4x256xf32>,
    %c0_160 = arith.constant 0 : index
    %c0_161 = arith.constant 0 : index
    %160 = vector.load %arg19[%c0_160, %c0_161] : memref<4x256xf32, #tpu.memory_space<vmem>>, vector<3x256xf32>
    %c0_162 = arith.constant 0 : index
    %c0_163 = arith.constant 0 : index
    %c0_164 = arith.constant 0 : index
    %161 = vector.load %arg7[%c0_162, %c0_163, %c0_164] : memref<2x256x224xf32, #tpu.memory_space<vmem>>, vector<1x256x224xf32>
    %162 = vector.shape_cast %161 : vector<1x256x224xf32> to vector<256x224xf32>
    %cst_165 = arith.constant dense<0.000000e+00> : vector<3x224xf32>
    %163 = tpu.matmul %160, %162, %cst_165 {dimension_numbers = #tpu.dot_dimension_numbers<[1], [0], [0], [1], [0, 0, 1, 1], [], []>} : vector<3x256xf32>, vector<256x224xf32>, vector<3x224xf32> -> vector<3x224xf32>
    %c1_166 = arith.constant 1 : index
    %c0_167 = arith.constant 0 : index
    %164 = vector.load %arg19[%c1_166, %c0_167] : memref<4x256xf32, #tpu.memory_space<vmem>>, vector<3x256xf32>
    %c1_168 = arith.constant 1 : index
    %c0_169 = arith.constant 0 : index
    %c0_170 = arith.constant 0 : index
    %165 = vector.load %arg7[%c1_168, %c0_169, %c0_170] : memref<2x256x224xf32, #tpu.memory_space<vmem>>, vector<1x256x224xf32>
    %166 = vector.shape_cast %165 : vector<1x256x224xf32> to vector<256x224xf32>
    %cst_171 = arith.constant dense<0.000000e+00> : vector<3x224xf32>
    %167 = tpu.matmul %164, %166, %cst_171 {dimension_numbers = #tpu.dot_dimension_numbers<[1], [0], [0], [1], [0, 0, 1, 1], [], []>} : vector<3x256xf32>, vector<256x224xf32>, vector<3x224xf32> -> vector<3x224xf32>
    %168 = arith.addf %163, %167 : vector<3x224xf32>
    %c8 = arith.constant 8 : index
    %c0_172 = arith.constant 0 : index
    %169 = vector.load %arg8[%c8, %c0_172] : memref<9x256xf32, #tpu.memory_space<vmem>>, vector<1x224xf32>
    %170 = vector.broadcast %169 : vector<1x224xf32> to vector<3x224xf32>
    %171 = arith.addf %168, %170 : vector<3x224xf32>
    %cst_173 = arith.constant 0.000000e+00 : f32
    %172 = vector.broadcast %cst_173 : f32 to vector<3x224xf32>
    %173 = arith.maximumf %171, %172 : vector<3x224xf32>
    %c244 = arith.constant 244 : index
    %c0_174 = arith.constant 0 : index
    %174 = vector.load %arg9[%c244, %c0_174] : memref<246x128xf32, #tpu.memory_space<vmem>>, vector<2x3xf32>
    %cst_175 = arith.constant dense<0.000000e+00> : vector<2x224xf32>
    %175 = tpu.matmul %174, %173, %cst_175 {dimension_numbers = #tpu.dot_dimension_numbers<[1], [0], [0], [1], [0, 0, 1, 1], [], []>} : vector<2x3xf32>, vector<3x224xf32>, vector<2x224xf32> -> vector<2x224xf32>
    %c0_176 = arith.constant 0 : index
    %c0_177 = arith.constant 0 : index
    %176 = vector.load %arg10[%c0_176, %c0_177] : memref<130x256xf32, #tpu.memory_space<vmem>>, vector<32x256xf32>
    %c32 = arith.constant 32 : index
    %c0_178 = arith.constant 0 : index
    %177 = vector.load %arg10[%c32, %c0_178] : memref<130x256xf32, #tpu.memory_space<vmem>>, vector<1x256xf32>
    %178 = vector.extract_strided_slice %175 {offsets = [0, 0], sizes = [2, 32], strides = [1, 1]} : vector<2x224xf32> to vector<2x32xf32>
    %cst_179 = arith.constant dense<0.000000e+00> : vector<2x256xf32>
    %179 = tpu.matmul %178, %176, %cst_179 {dimension_numbers = #tpu.dot_dimension_numbers<[1], [0], [0], [1], [0, 0, 1, 1], [], []>} : vector<2x32xf32>, vector<32x256xf32>, vector<2x256xf32> -> vector<2x256xf32>
    %180 = vector.broadcast %177 : vector<1x256xf32> to vector<2x256xf32>
    %181 = arith.addf %179, %180 : vector<2x256xf32>
    %182 = vector.extract_strided_slice %175 {offsets = [0, 32], sizes = [2, 32], strides = [1, 1]} : vector<2x224xf32> to vector<2x32xf32>
    %cst_180 = arith.constant dense<0.000000e+00> : vector<2x256xf32>
    %183 = tpu.matmul %182, %176, %cst_180 {dimension_numbers = #tpu.dot_dimension_numbers<[1], [0], [0], [1], [0, 0, 1, 1], [], []>} : vector<2x32xf32>, vector<32x256xf32>, vector<2x256xf32> -> vector<2x256xf32>
    %184 = vector.broadcast %177 : vector<1x256xf32> to vector<2x256xf32>
    %185 = arith.addf %183, %184 : vector<2x256xf32>
    %186 = vector.extract_strided_slice %175 {offsets = [0, 64], sizes = [2, 32], strides = [1, 1]} : vector<2x224xf32> to vector<2x32xf32>
    %cst_181 = arith.constant dense<0.000000e+00> : vector<2x256xf32>
    %187 = tpu.matmul %186, %176, %cst_181 {dimension_numbers = #tpu.dot_dimension_numbers<[1], [0], [0], [1], [0, 0, 1, 1], [], []>} : vector<2x32xf32>, vector<32x256xf32>, vector<2x256xf32> -> vector<2x256xf32>
    %188 = vector.broadcast %177 : vector<1x256xf32> to vector<2x256xf32>
    %189 = arith.addf %187, %188 : vector<2x256xf32>
    %190 = vector.extract_strided_slice %175 {offsets = [0, 96], sizes = [2, 32], strides = [1, 1]} : vector<2x224xf32> to vector<2x32xf32>
    %cst_182 = arith.constant dense<0.000000e+00> : vector<2x256xf32>
    %191 = tpu.matmul %190, %176, %cst_182 {dimension_numbers = #tpu.dot_dimension_numbers<[1], [0], [0], [1], [0, 0, 1, 1], [], []>} : vector<2x32xf32>, vector<32x256xf32>, vector<2x256xf32> -> vector<2x256xf32>
    %192 = vector.broadcast %177 : vector<1x256xf32> to vector<2x256xf32>
    %193 = arith.addf %191, %192 : vector<2x256xf32>
    %194 = vector.extract_strided_slice %175 {offsets = [0, 128], sizes = [2, 32], strides = [1, 1]} : vector<2x224xf32> to vector<2x32xf32>
    %cst_183 = arith.constant dense<0.000000e+00> : vector<2x256xf32>
    %195 = tpu.matmul %194, %176, %cst_183 {dimension_numbers = #tpu.dot_dimension_numbers<[1], [0], [0], [1], [0, 0, 1, 1], [], []>} : vector<2x32xf32>, vector<32x256xf32>, vector<2x256xf32> -> vector<2x256xf32>
    %196 = vector.broadcast %177 : vector<1x256xf32> to vector<2x256xf32>
    %197 = arith.addf %195, %196 : vector<2x256xf32>
    %198 = vector.extract_strided_slice %175 {offsets = [0, 160], sizes = [2, 32], strides = [1, 1]} : vector<2x224xf32> to vector<2x32xf32>
    %cst_184 = arith.constant dense<0.000000e+00> : vector<2x256xf32>
    %199 = tpu.matmul %198, %176, %cst_184 {dimension_numbers = #tpu.dot_dimension_numbers<[1], [0], [0], [1], [0, 0, 1, 1], [], []>} : vector<2x32xf32>, vector<32x256xf32>, vector<2x256xf32> -> vector<2x256xf32>
    %200 = vector.broadcast %177 : vector<1x256xf32> to vector<2x256xf32>
    %201 = arith.addf %199, %200 : vector<2x256xf32>
    %202 = vector.extract_strided_slice %175 {offsets = [0, 192], sizes = [2, 32], strides = [1, 1]} : vector<2x224xf32> to vector<2x32xf32>
    %cst_185 = arith.constant dense<0.000000e+00> : vector<2x256xf32>
    %203 = tpu.matmul %202, %176, %cst_185 {dimension_numbers = #tpu.dot_dimension_numbers<[1], [0], [0], [1], [0, 0, 1, 1], [], []>} : vector<2x32xf32>, vector<32x256xf32>, vector<2x256xf32> -> vector<2x256xf32>
    %204 = vector.broadcast %177 : vector<1x256xf32> to vector<2x256xf32>
    %205 = arith.addf %203, %204 : vector<2x256xf32>
    %206 = vector.extract_strided_slice %181 {offsets = [0, 0], sizes = [2, 128], strides = [1, 1]} : vector<2x256xf32> to vector<2x128xf32>
    %207 = vector.extract_strided_slice %185 {offsets = [0, 0], sizes = [2, 128], strides = [1, 1]} : vector<2x256xf32> to vector<2x128xf32>
    %208 = vector.extract_strided_slice %189 {offsets = [0, 0], sizes = [2, 128], strides = [1, 1]} : vector<2x256xf32> to vector<2x128xf32>
    %209 = vector.extract_strided_slice %193 {offsets = [0, 0], sizes = [2, 128], strides = [1, 1]} : vector<2x256xf32> to vector<2x128xf32>
    %210 = vector.extract_strided_slice %197 {offsets = [0, 0], sizes = [2, 128], strides = [1, 1]} : vector<2x256xf32> to vector<2x128xf32>
    %211 = vector.extract_strided_slice %201 {offsets = [0, 0], sizes = [2, 128], strides = [1, 1]} : vector<2x256xf32> to vector<2x128xf32>
    %212 = vector.extract_strided_slice %205 {offsets = [0, 0], sizes = [2, 128], strides = [1, 1]} : vector<2x256xf32> to vector<2x128xf32>
    %c33 = arith.constant 33 : index
    %c0_186 = arith.constant 0 : index
    %213 = vector.load %arg10[%c33, %c0_186] : memref<130x256xf32, #tpu.memory_space<vmem>>, vector<32x128xf32>
    %cst_187 = arith.constant 0.000000e+00 : f32
    %214 = vector.broadcast %cst_187 : f32 to vector<2x32xf32>
    %cst_188 = arith.constant 0.000000e+00 : f32
    %215 = vector.broadcast %cst_188 : f32 to vector<2x32xf32>
    %cst_189 = arith.constant dense<0.000000e+00> : vector<2x128xf32>
    %216 = tpu.matmul %214, %213, %cst_189 {dimension_numbers = #tpu.dot_dimension_numbers<[1], [0], [0], [1], [0, 0, 1, 1], [], []>} : vector<2x32xf32>, vector<32x128xf32>, vector<2x128xf32> -> vector<2x128xf32>
    %217 = arith.addf %206, %216 : vector<2x128xf32>
    %218 = vector.extract_strided_slice %217 {offsets = [0, 0], sizes = [2, 32], strides = [1, 1]} : vector<2x128xf32> to vector<2x32xf32>
    %219 = arith.negf %218 : vector<2x32xf32>
    %220 = math.exp %219 : vector<2x32xf32>
    %cst_190 = arith.constant 1.000000e+00 : f32
    %221 = vector.broadcast %cst_190 : f32 to vector<2x32xf32>
    %222 = arith.addf %221, %220 : vector<2x32xf32>
    %223 = arith.divf %221, %222 : vector<2x32xf32>
    %224 = vector.extract_strided_slice %217 {offsets = [0, 32], sizes = [2, 32], strides = [1, 1]} : vector<2x128xf32> to vector<2x32xf32>
    %225 = arith.negf %224 : vector<2x32xf32>
    %226 = math.exp %225 : vector<2x32xf32>
    %cst_191 = arith.constant 1.000000e+00 : f32
    %227 = vector.broadcast %cst_191 : f32 to vector<2x32xf32>
    %228 = arith.addf %227, %226 : vector<2x32xf32>
    %229 = arith.divf %227, %228 : vector<2x32xf32>
    %230 = vector.extract_strided_slice %217 {offsets = [0, 64], sizes = [2, 32], strides = [1, 1]} : vector<2x128xf32> to vector<2x32xf32>
    %231 = math.tanh %230 : vector<2x32xf32>
    %232 = vector.extract_strided_slice %217 {offsets = [0, 96], sizes = [2, 32], strides = [1, 1]} : vector<2x128xf32> to vector<2x32xf32>
    %233 = arith.negf %232 : vector<2x32xf32>
    %234 = math.exp %233 : vector<2x32xf32>
    %cst_192 = arith.constant 1.000000e+00 : f32
    %235 = vector.broadcast %cst_192 : f32 to vector<2x32xf32>
    %236 = arith.addf %235, %234 : vector<2x32xf32>
    %237 = arith.divf %235, %236 : vector<2x32xf32>
    %238 = arith.mulf %229, %215 : vector<2x32xf32>
    %239 = arith.mulf %223, %231 : vector<2x32xf32>
    %240 = arith.addf %238, %239 : vector<2x32xf32>
    %241 = math.tanh %240 : vector<2x32xf32>
    %242 = arith.mulf %237, %241 : vector<2x32xf32>
    %c0_193 = arith.constant 0 : index
    %c0_194 = arith.constant 0 : index
    %243 = vector.load %arg20[%c0_193, %c0_194] : memref<14x32xf32, #tpu.memory_space<vmem>>, vector<2x32xf32>
    tpu.vector_store %arg20[%c0_193, %c0_194], %242 {strides = array<i32>} : memref<14x32xf32, #tpu.memory_space<vmem>>, vector<2x32xf32>,
    %cst_195 = arith.constant dense<0.000000e+00> : vector<2x128xf32>
    %244 = tpu.matmul %242, %213, %cst_195 {dimension_numbers = #tpu.dot_dimension_numbers<[1], [0], [0], [1], [0, 0, 1, 1], [], []>} : vector<2x32xf32>, vector<32x128xf32>, vector<2x128xf32> -> vector<2x128xf32>
    %245 = arith.addf %207, %244 : vector<2x128xf32>
    %246 = vector.extract_strided_slice %245 {offsets = [0, 0], sizes = [2, 32], strides = [1, 1]} : vector<2x128xf32> to vector<2x32xf32>
    %247 = arith.negf %246 : vector<2x32xf32>
    %248 = math.exp %247 : vector<2x32xf32>
    %cst_196 = arith.constant 1.000000e+00 : f32
    %249 = vector.broadcast %cst_196 : f32 to vector<2x32xf32>
    %250 = arith.addf %249, %248 : vector<2x32xf32>
    %251 = arith.divf %249, %250 : vector<2x32xf32>
    %252 = vector.extract_strided_slice %245 {offsets = [0, 32], sizes = [2, 32], strides = [1, 1]} : vector<2x128xf32> to vector<2x32xf32>
    %253 = arith.negf %252 : vector<2x32xf32>
    %254 = math.exp %253 : vector<2x32xf32>
    %cst_197 = arith.constant 1.000000e+00 : f32
    %255 = vector.broadcast %cst_197 : f32 to vector<2x32xf32>
    %256 = arith.addf %255, %254 : vector<2x32xf32>
    %257 = arith.divf %255, %256 : vector<2x32xf32>
    %258 = vector.extract_strided_slice %245 {offsets = [0, 64], sizes = [2, 32], strides = [1, 1]} : vector<2x128xf32> to vector<2x32xf32>
    %259 = math.tanh %258 : vector<2x32xf32>
    %260 = vector.extract_strided_slice %245 {offsets = [0, 96], sizes = [2, 32], strides = [1, 1]} : vector<2x128xf32> to vector<2x32xf32>
    %261 = arith.negf %260 : vector<2x32xf32>
    %262 = math.exp %261 : vector<2x32xf32>
    %cst_198 = arith.constant 1.000000e+00 : f32
    %263 = vector.broadcast %cst_198 : f32 to vector<2x32xf32>
    %264 = arith.addf %263, %262 : vector<2x32xf32>
    %265 = arith.divf %263, %264 : vector<2x32xf32>
    %266 = arith.mulf %257, %240 : vector<2x32xf32>
    %267 = arith.mulf %251, %259 : vector<2x32xf32>
    %268 = arith.addf %266, %267 : vector<2x32xf32>
    %269 = math.tanh %268 : vector<2x32xf32>
    %270 = arith.mulf %265, %269 : vector<2x32xf32>
    %c2_199 = arith.constant 2 : index
    %c0_200 = arith.constant 0 : index
    %271 = vector.load %arg20[%c2_199, %c0_200] : memref<14x32xf32, #tpu.memory_space<vmem>>, vector<2x32xf32>
    tpu.vector_store %arg20[%c2_199, %c0_200], %270 {strides = array<i32>} : memref<14x32xf32, #tpu.memory_space<vmem>>, vector<2x32xf32>,
    %cst_201 = arith.constant dense<0.000000e+00> : vector<2x128xf32>
    %272 = tpu.matmul %270, %213, %cst_201 {dimension_numbers = #tpu.dot_dimension_numbers<[1], [0], [0], [1], [0, 0, 1, 1], [], []>} : vector<2x32xf32>, vector<32x128xf32>, vector<2x128xf32> -> vector<2x128xf32>
    %273 = arith.addf %208, %272 : vector<2x128xf32>
    %274 = vector.extract_strided_slice %273 {offsets = [0, 0], sizes = [2, 32], strides = [1, 1]} : vector<2x128xf32> to vector<2x32xf32>
    %275 = arith.negf %274 : vector<2x32xf32>
    %276 = math.exp %275 : vector<2x32xf32>
    %cst_202 = arith.constant 1.000000e+00 : f32
    %277 = vector.broadcast %cst_202 : f32 to vector<2x32xf32>
    %278 = arith.addf %277, %276 : vector<2x32xf32>
    %279 = arith.divf %277, %278 : vector<2x32xf32>
    %280 = vector.extract_strided_slice %273 {offsets = [0, 32], sizes = [2, 32], strides = [1, 1]} : vector<2x128xf32> to vector<2x32xf32>
    %281 = arith.negf %280 : vector<2x32xf32>
    %282 = math.exp %281 : vector<2x32xf32>
    %cst_203 = arith.constant 1.000000e+00 : f32
    %283 = vector.broadcast %cst_203 : f32 to vector<2x32xf32>
    %284 = arith.addf %283, %282 : vector<2x32xf32>
    %285 = arith.divf %283, %284 : vector<2x32xf32>
    %286 = vector.extract_strided_slice %273 {offsets = [0, 64], sizes = [2, 32], strides = [1, 1]} : vector<2x128xf32> to vector<2x32xf32>
    %287 = math.tanh %286 : vector<2x32xf32>
    %288 = vector.extract_strided_slice %273 {offsets = [0, 96], sizes = [2, 32], strides = [1, 1]} : vector<2x128xf32> to vector<2x32xf32>
    %289 = arith.negf %288 : vector<2x32xf32>
    %290 = math.exp %289 : vector<2x32xf32>
    %cst_204 = arith.constant 1.000000e+00 : f32
    %291 = vector.broadcast %cst_204 : f32 to vector<2x32xf32>
    %292 = arith.addf %291, %290 : vector<2x32xf32>
    %293 = arith.divf %291, %292 : vector<2x32xf32>
    %294 = arith.mulf %285, %268 : vector<2x32xf32>
    %295 = arith.mulf %279, %287 : vector<2x32xf32>
    %296 = arith.addf %294, %295 : vector<2x32xf32>
    %297 = math.tanh %296 : vector<2x32xf32>
    %298 = arith.mulf %293, %297 : vector<2x32xf32>
    %c4_205 = arith.constant 4 : index
    %c0_206 = arith.constant 0 : index
    %299 = vector.load %arg20[%c4_205, %c0_206] : memref<14x32xf32, #tpu.memory_space<vmem>>, vector<2x32xf32>
    tpu.vector_store %arg20[%c4_205, %c0_206], %298 {strides = array<i32>} : memref<14x32xf32, #tpu.memory_space<vmem>>, vector<2x32xf32>,
    %cst_207 = arith.constant dense<0.000000e+00> : vector<2x128xf32>
    %300 = tpu.matmul %298, %213, %cst_207 {dimension_numbers = #tpu.dot_dimension_numbers<[1], [0], [0], [1], [0, 0, 1, 1], [], []>} : vector<2x32xf32>, vector<32x128xf32>, vector<2x128xf32> -> vector<2x128xf32>
    %301 = arith.addf %209, %300 : vector<2x128xf32>
    %302 = vector.extract_strided_slice %301 {offsets = [0, 0], sizes = [2, 32], strides = [1, 1]} : vector<2x128xf32> to vector<2x32xf32>
    %303 = arith.negf %302 : vector<2x32xf32>
    %304 = math.exp %303 : vector<2x32xf32>
    %cst_208 = arith.constant 1.000000e+00 : f32
    %305 = vector.broadcast %cst_208 : f32 to vector<2x32xf32>
    %306 = arith.addf %305, %304 : vector<2x32xf32>
    %307 = arith.divf %305, %306 : vector<2x32xf32>
    %308 = vector.extract_strided_slice %301 {offsets = [0, 32], sizes = [2, 32], strides = [1, 1]} : vector<2x128xf32> to vector<2x32xf32>
    %309 = arith.negf %308 : vector<2x32xf32>
    %310 = math.exp %309 : vector<2x32xf32>
    %cst_209 = arith.constant 1.000000e+00 : f32
    %311 = vector.broadcast %cst_209 : f32 to vector<2x32xf32>
    %312 = arith.addf %311, %310 : vector<2x32xf32>
    %313 = arith.divf %311, %312 : vector<2x32xf32>
    %314 = vector.extract_strided_slice %301 {offsets = [0, 64], sizes = [2, 32], strides = [1, 1]} : vector<2x128xf32> to vector<2x32xf32>
    %315 = math.tanh %314 : vector<2x32xf32>
    %316 = vector.extract_strided_slice %301 {offsets = [0, 96], sizes = [2, 32], strides = [1, 1]} : vector<2x128xf32> to vector<2x32xf32>
    %317 = arith.negf %316 : vector<2x32xf32>
    %318 = math.exp %317 : vector<2x32xf32>
    %cst_210 = arith.constant 1.000000e+00 : f32
    %319 = vector.broadcast %cst_210 : f32 to vector<2x32xf32>
    %320 = arith.addf %319, %318 : vector<2x32xf32>
    %321 = arith.divf %319, %320 : vector<2x32xf32>
    %322 = arith.mulf %313, %296 : vector<2x32xf32>
    %323 = arith.mulf %307, %315 : vector<2x32xf32>
    %324 = arith.addf %322, %323 : vector<2x32xf32>
    %325 = math.tanh %324 : vector<2x32xf32>
    %326 = arith.mulf %321, %325 : vector<2x32xf32>
    %c6_211 = arith.constant 6 : index
    %c0_212 = arith.constant 0 : index
    %327 = vector.load %arg20[%c6_211, %c0_212] : memref<14x32xf32, #tpu.memory_space<vmem>>, vector<2x32xf32>
    tpu.vector_store %arg20[%c6_211, %c0_212], %326 {strides = array<i32>} : memref<14x32xf32, #tpu.memory_space<vmem>>, vector<2x32xf32>,
    %cst_213 = arith.constant dense<0.000000e+00> : vector<2x128xf32>
    %328 = tpu.matmul %326, %213, %cst_213 {dimension_numbers = #tpu.dot_dimension_numbers<[1], [0], [0], [1], [0, 0, 1, 1], [], []>} : vector<2x32xf32>, vector<32x128xf32>, vector<2x128xf32> -> vector<2x128xf32>
    %329 = arith.addf %210, %328 : vector<2x128xf32>
    %330 = vector.extract_strided_slice %329 {offsets = [0, 0], sizes = [2, 32], strides = [1, 1]} : vector<2x128xf32> to vector<2x32xf32>
    %331 = arith.negf %330 : vector<2x32xf32>
    %332 = math.exp %331 : vector<2x32xf32>
    %cst_214 = arith.constant 1.000000e+00 : f32
    %333 = vector.broadcast %cst_214 : f32 to vector<2x32xf32>
    %334 = arith.addf %333, %332 : vector<2x32xf32>
    %335 = arith.divf %333, %334 : vector<2x32xf32>
    %336 = vector.extract_strided_slice %329 {offsets = [0, 32], sizes = [2, 32], strides = [1, 1]} : vector<2x128xf32> to vector<2x32xf32>
    %337 = arith.negf %336 : vector<2x32xf32>
    %338 = math.exp %337 : vector<2x32xf32>
    %cst_215 = arith.constant 1.000000e+00 : f32
    %339 = vector.broadcast %cst_215 : f32 to vector<2x32xf32>
    %340 = arith.addf %339, %338 : vector<2x32xf32>
    %341 = arith.divf %339, %340 : vector<2x32xf32>
    %342 = vector.extract_strided_slice %329 {offsets = [0, 64], sizes = [2, 32], strides = [1, 1]} : vector<2x128xf32> to vector<2x32xf32>
    %343 = math.tanh %342 : vector<2x32xf32>
    %344 = vector.extract_strided_slice %329 {offsets = [0, 96], sizes = [2, 32], strides = [1, 1]} : vector<2x128xf32> to vector<2x32xf32>
    %345 = arith.negf %344 : vector<2x32xf32>
    %346 = math.exp %345 : vector<2x32xf32>
    %cst_216 = arith.constant 1.000000e+00 : f32
    %347 = vector.broadcast %cst_216 : f32 to vector<2x32xf32>
    %348 = arith.addf %347, %346 : vector<2x32xf32>
    %349 = arith.divf %347, %348 : vector<2x32xf32>
    %350 = arith.mulf %341, %324 : vector<2x32xf32>
    %351 = arith.mulf %335, %343 : vector<2x32xf32>
    %352 = arith.addf %350, %351 : vector<2x32xf32>
    %353 = math.tanh %352 : vector<2x32xf32>
    %354 = arith.mulf %349, %353 : vector<2x32xf32>
    %c8_217 = arith.constant 8 : index
    %c0_218 = arith.constant 0 : index
    %355 = vector.load %arg20[%c8_217, %c0_218] : memref<14x32xf32, #tpu.memory_space<vmem>>, vector<2x32xf32>
    tpu.vector_store %arg20[%c8_217, %c0_218], %354 {strides = array<i32>} : memref<14x32xf32, #tpu.memory_space<vmem>>, vector<2x32xf32>,
    %cst_219 = arith.constant dense<0.000000e+00> : vector<2x128xf32>
    %356 = tpu.matmul %354, %213, %cst_219 {dimension_numbers = #tpu.dot_dimension_numbers<[1], [0], [0], [1], [0, 0, 1, 1], [], []>} : vector<2x32xf32>, vector<32x128xf32>, vector<2x128xf32> -> vector<2x128xf32>
    %357 = arith.addf %211, %356 : vector<2x128xf32>
    %358 = vector.extract_strided_slice %357 {offsets = [0, 0], sizes = [2, 32], strides = [1, 1]} : vector<2x128xf32> to vector<2x32xf32>
    %359 = arith.negf %358 : vector<2x32xf32>
    %360 = math.exp %359 : vector<2x32xf32>
    %cst_220 = arith.constant 1.000000e+00 : f32
    %361 = vector.broadcast %cst_220 : f32 to vector<2x32xf32>
    %362 = arith.addf %361, %360 : vector<2x32xf32>
    %363 = arith.divf %361, %362 : vector<2x32xf32>
    %364 = vector.extract_strided_slice %357 {offsets = [0, 32], sizes = [2, 32], strides = [1, 1]} : vector<2x128xf32> to vector<2x32xf32>
    %365 = arith.negf %364 : vector<2x32xf32>
    %366 = math.exp %365 : vector<2x32xf32>
    %cst_221 = arith.constant 1.000000e+00 : f32
    %367 = vector.broadcast %cst_221 : f32 to vector<2x32xf32>
    %368 = arith.addf %367, %366 : vector<2x32xf32>
    %369 = arith.divf %367, %368 : vector<2x32xf32>
    %370 = vector.extract_strided_slice %357 {offsets = [0, 64], sizes = [2, 32], strides = [1, 1]} : vector<2x128xf32> to vector<2x32xf32>
    %371 = math.tanh %370 : vector<2x32xf32>
    %372 = vector.extract_strided_slice %357 {offsets = [0, 96], sizes = [2, 32], strides = [1, 1]} : vector<2x128xf32> to vector<2x32xf32>
    %373 = arith.negf %372 : vector<2x32xf32>
    %374 = math.exp %373 : vector<2x32xf32>
    %cst_222 = arith.constant 1.000000e+00 : f32
    %375 = vector.broadcast %cst_222 : f32 to vector<2x32xf32>
    %376 = arith.addf %375, %374 : vector<2x32xf32>
    %377 = arith.divf %375, %376 : vector<2x32xf32>
    %378 = arith.mulf %369, %352 : vector<2x32xf32>
    %379 = arith.mulf %363, %371 : vector<2x32xf32>
    %380 = arith.addf %378, %379 : vector<2x32xf32>
    %381 = math.tanh %380 : vector<2x32xf32>
    %382 = arith.mulf %377, %381 : vector<2x32xf32>
    %c10 = arith.constant 10 : index
    %c0_223 = arith.constant 0 : index
    %383 = vector.load %arg20[%c10, %c0_223] : memref<14x32xf32, #tpu.memory_space<vmem>>, vector<2x32xf32>
    tpu.vector_store %arg20[%c10, %c0_223], %382 {strides = array<i32>} : memref<14x32xf32, #tpu.memory_space<vmem>>, vector<2x32xf32>,
    %cst_224 = arith.constant dense<0.000000e+00> : vector<2x128xf32>
    %384 = tpu.matmul %382, %213, %cst_224 {dimension_numbers = #tpu.dot_dimension_numbers<[1], [0], [0], [1], [0, 0, 1, 1], [], []>} : vector<2x32xf32>, vector<32x128xf32>, vector<2x128xf32> -> vector<2x128xf32>
    %385 = arith.addf %212, %384 : vector<2x128xf32>
    %386 = vector.extract_strided_slice %385 {offsets = [0, 0], sizes = [2, 32], strides = [1, 1]} : vector<2x128xf32> to vector<2x32xf32>
    %387 = arith.negf %386 : vector<2x32xf32>
    %388 = math.exp %387 : vector<2x32xf32>
    %cst_225 = arith.constant 1.000000e+00 : f32
    %389 = vector.broadcast %cst_225 : f32 to vector<2x32xf32>
    %390 = arith.addf %389, %388 : vector<2x32xf32>
    %391 = arith.divf %389, %390 : vector<2x32xf32>
    %392 = vector.extract_strided_slice %385 {offsets = [0, 32], sizes = [2, 32], strides = [1, 1]} : vector<2x128xf32> to vector<2x32xf32>
    %393 = arith.negf %392 : vector<2x32xf32>
    %394 = math.exp %393 : vector<2x32xf32>
    %cst_226 = arith.constant 1.000000e+00 : f32
    %395 = vector.broadcast %cst_226 : f32 to vector<2x32xf32>
    %396 = arith.addf %395, %394 : vector<2x32xf32>
    %397 = arith.divf %395, %396 : vector<2x32xf32>
    %398 = vector.extract_strided_slice %385 {offsets = [0, 64], sizes = [2, 32], strides = [1, 1]} : vector<2x128xf32> to vector<2x32xf32>
    %399 = math.tanh %398 : vector<2x32xf32>
    %400 = vector.extract_strided_slice %385 {offsets = [0, 96], sizes = [2, 32], strides = [1, 1]} : vector<2x128xf32> to vector<2x32xf32>
    %401 = arith.negf %400 : vector<2x32xf32>
    %402 = math.exp %401 : vector<2x32xf32>
    %cst_227 = arith.constant 1.000000e+00 : f32
    %403 = vector.broadcast %cst_227 : f32 to vector<2x32xf32>
    %404 = arith.addf %403, %402 : vector<2x32xf32>
    %405 = arith.divf %403, %404 : vector<2x32xf32>
    %406 = arith.mulf %397, %380 : vector<2x32xf32>
    %407 = arith.mulf %391, %399 : vector<2x32xf32>
    %408 = arith.addf %406, %407 : vector<2x32xf32>
    %409 = math.tanh %408 : vector<2x32xf32>
    %410 = arith.mulf %405, %409 : vector<2x32xf32>
    %c12 = arith.constant 12 : index
    %c0_228 = arith.constant 0 : index
    %411 = vector.load %arg20[%c12, %c0_228] : memref<14x32xf32, #tpu.memory_space<vmem>>, vector<2x32xf32>
    tpu.vector_store %arg20[%c12, %c0_228], %410 {strides = array<i32>} : memref<14x32xf32, #tpu.memory_space<vmem>>, vector<2x32xf32>,
    %412 = vector.extract_strided_slice %181 {offsets = [0, 128], sizes = [2, 128], strides = [1, 1]} : vector<2x256xf32> to vector<2x128xf32>
    %413 = vector.extract_strided_slice %185 {offsets = [0, 128], sizes = [2, 128], strides = [1, 1]} : vector<2x256xf32> to vector<2x128xf32>
    %414 = vector.extract_strided_slice %189 {offsets = [0, 128], sizes = [2, 128], strides = [1, 1]} : vector<2x256xf32> to vector<2x128xf32>
    %415 = vector.extract_strided_slice %193 {offsets = [0, 128], sizes = [2, 128], strides = [1, 1]} : vector<2x256xf32> to vector<2x128xf32>
    %416 = vector.extract_strided_slice %197 {offsets = [0, 128], sizes = [2, 128], strides = [1, 1]} : vector<2x256xf32> to vector<2x128xf32>
    %417 = vector.extract_strided_slice %201 {offsets = [0, 128], sizes = [2, 128], strides = [1, 1]} : vector<2x256xf32> to vector<2x128xf32>
    %418 = vector.extract_strided_slice %205 {offsets = [0, 128], sizes = [2, 128], strides = [1, 1]} : vector<2x256xf32> to vector<2x128xf32>
    %c33_229 = arith.constant 33 : index
    %c128 = arith.constant 128 : index
    %419 = vector.load %arg10[%c33_229, %c128] : memref<130x256xf32, #tpu.memory_space<vmem>>, vector<32x128xf32>
    %cst_230 = arith.constant 0.000000e+00 : f32
    %420 = vector.broadcast %cst_230 : f32 to vector<2x32xf32>
    %cst_231 = arith.constant 0.000000e+00 : f32
    %421 = vector.broadcast %cst_231 : f32 to vector<2x32xf32>
    %cst_232 = arith.constant dense<0.000000e+00> : vector<2x128xf32>
    %422 = tpu.matmul %420, %419, %cst_232 {dimension_numbers = #tpu.dot_dimension_numbers<[1], [0], [0], [1], [0, 0, 1, 1], [], []>} : vector<2x32xf32>, vector<32x128xf32>, vector<2x128xf32> -> vector<2x128xf32>
    %423 = arith.addf %418, %422 : vector<2x128xf32>
    %424 = vector.extract_strided_slice %423 {offsets = [0, 0], sizes = [2, 32], strides = [1, 1]} : vector<2x128xf32> to vector<2x32xf32>
    %425 = arith.negf %424 : vector<2x32xf32>
    %426 = math.exp %425 : vector<2x32xf32>
    %cst_233 = arith.constant 1.000000e+00 : f32
    %427 = vector.broadcast %cst_233 : f32 to vector<2x32xf32>
    %428 = arith.addf %427, %426 : vector<2x32xf32>
    %429 = arith.divf %427, %428 : vector<2x32xf32>
    %430 = vector.extract_strided_slice %423 {offsets = [0, 32], sizes = [2, 32], strides = [1, 1]} : vector<2x128xf32> to vector<2x32xf32>
    %431 = arith.negf %430 : vector<2x32xf32>
    %432 = math.exp %431 : vector<2x32xf32>
    %cst_234 = arith.constant 1.000000e+00 : f32
    %433 = vector.broadcast %cst_234 : f32 to vector<2x32xf32>
    %434 = arith.addf %433, %432 : vector<2x32xf32>
    %435 = arith.divf %433, %434 : vector<2x32xf32>
    %436 = vector.extract_strided_slice %423 {offsets = [0, 64], sizes = [2, 32], strides = [1, 1]} : vector<2x128xf32> to vector<2x32xf32>
    %437 = math.tanh %436 : vector<2x32xf32>
    %438 = vector.extract_strided_slice %423 {offsets = [0, 96], sizes = [2, 32], strides = [1, 1]} : vector<2x128xf32> to vector<2x32xf32>
    %439 = arith.negf %438 : vector<2x32xf32>
    %440 = math.exp %439 : vector<2x32xf32>
    %cst_235 = arith.constant 1.000000e+00 : f32
    %441 = vector.broadcast %cst_235 : f32 to vector<2x32xf32>
    %442 = arith.addf %441, %440 : vector<2x32xf32>
    %443 = arith.divf %441, %442 : vector<2x32xf32>
    %444 = arith.mulf %435, %421 : vector<2x32xf32>
    %445 = arith.mulf %429, %437 : vector<2x32xf32>
    %446 = arith.addf %444, %445 : vector<2x32xf32>
    %447 = math.tanh %446 : vector<2x32xf32>
    %448 = arith.mulf %443, %447 : vector<2x32xf32>
    %c12_236 = arith.constant 12 : index
    %c0_237 = arith.constant 0 : index
    %449 = vector.load %arg21[%c12_236, %c0_237] : memref<14x32xf32, #tpu.memory_space<vmem>>, vector<2x32xf32>
    tpu.vector_store %arg21[%c12_236, %c0_237], %448 {strides = array<i32>} : memref<14x32xf32, #tpu.memory_space<vmem>>, vector<2x32xf32>,
    %cst_238 = arith.constant dense<0.000000e+00> : vector<2x128xf32>
    %450 = tpu.matmul %448, %419, %cst_238 {dimension_numbers = #tpu.dot_dimension_numbers<[1], [0], [0], [1], [0, 0, 1, 1], [], []>} : vector<2x32xf32>, vector<32x128xf32>, vector<2x128xf32> -> vector<2x128xf32>
    %451 = arith.addf %417, %450 : vector<2x128xf32>
    %452 = vector.extract_strided_slice %451 {offsets = [0, 0], sizes = [2, 32], strides = [1, 1]} : vector<2x128xf32> to vector<2x32xf32>
    %453 = arith.negf %452 : vector<2x32xf32>
    %454 = math.exp %453 : vector<2x32xf32>
    %cst_239 = arith.constant 1.000000e+00 : f32
    %455 = vector.broadcast %cst_239 : f32 to vector<2x32xf32>
    %456 = arith.addf %455, %454 : vector<2x32xf32>
    %457 = arith.divf %455, %456 : vector<2x32xf32>
    %458 = vector.extract_strided_slice %451 {offsets = [0, 32], sizes = [2, 32], strides = [1, 1]} : vector<2x128xf32> to vector<2x32xf32>
    %459 = arith.negf %458 : vector<2x32xf32>
    %460 = math.exp %459 : vector<2x32xf32>
    %cst_240 = arith.constant 1.000000e+00 : f32
    %461 = vector.broadcast %cst_240 : f32 to vector<2x32xf32>
    %462 = arith.addf %461, %460 : vector<2x32xf32>
    %463 = arith.divf %461, %462 : vector<2x32xf32>
    %464 = vector.extract_strided_slice %451 {offsets = [0, 64], sizes = [2, 32], strides = [1, 1]} : vector<2x128xf32> to vector<2x32xf32>
    %465 = math.tanh %464 : vector<2x32xf32>
    %466 = vector.extract_strided_slice %451 {offsets = [0, 96], sizes = [2, 32], strides = [1, 1]} : vector<2x128xf32> to vector<2x32xf32>
    %467 = arith.negf %466 : vector<2x32xf32>
    %468 = math.exp %467 : vector<2x32xf32>
    %cst_241 = arith.constant 1.000000e+00 : f32
    %469 = vector.broadcast %cst_241 : f32 to vector<2x32xf32>
    %470 = arith.addf %469, %468 : vector<2x32xf32>
    %471 = arith.divf %469, %470 : vector<2x32xf32>
    %472 = arith.mulf %463, %446 : vector<2x32xf32>
    %473 = arith.mulf %457, %465 : vector<2x32xf32>
    %474 = arith.addf %472, %473 : vector<2x32xf32>
    %475 = math.tanh %474 : vector<2x32xf32>
    %476 = arith.mulf %471, %475 : vector<2x32xf32>
    %c10_242 = arith.constant 10 : index
    %c0_243 = arith.constant 0 : index
    %477 = vector.load %arg21[%c10_242, %c0_243] : memref<14x32xf32, #tpu.memory_space<vmem>>, vector<2x32xf32>
    tpu.vector_store %arg21[%c10_242, %c0_243], %476 {strides = array<i32>} : memref<14x32xf32, #tpu.memory_space<vmem>>, vector<2x32xf32>,
    %cst_244 = arith.constant dense<0.000000e+00> : vector<2x128xf32>
    %478 = tpu.matmul %476, %419, %cst_244 {dimension_numbers = #tpu.dot_dimension_numbers<[1], [0], [0], [1], [0, 0, 1, 1], [], []>} : vector<2x32xf32>, vector<32x128xf32>, vector<2x128xf32> -> vector<2x128xf32>
    %479 = arith.addf %416, %478 : vector<2x128xf32>
    %480 = vector.extract_strided_slice %479 {offsets = [0, 0], sizes = [2, 32], strides = [1, 1]} : vector<2x128xf32> to vector<2x32xf32>
    %481 = arith.negf %480 : vector<2x32xf32>
    %482 = math.exp %481 : vector<2x32xf32>
    %cst_245 = arith.constant 1.000000e+00 : f32
    %483 = vector.broadcast %cst_245 : f32 to vector<2x32xf32>
    %484 = arith.addf %483, %482 : vector<2x32xf32>
    %485 = arith.divf %483, %484 : vector<2x32xf32>
    %486 = vector.extract_strided_slice %479 {offsets = [0, 32], sizes = [2, 32], strides = [1, 1]} : vector<2x128xf32> to vector<2x32xf32>
    %487 = arith.negf %486 : vector<2x32xf32>
    %488 = math.exp %487 : vector<2x32xf32>
    %cst_246 = arith.constant 1.000000e+00 : f32
    %489 = vector.broadcast %cst_246 : f32 to vector<2x32xf32>
    %490 = arith.addf %489, %488 : vector<2x32xf32>
    %491 = arith.divf %489, %490 : vector<2x32xf32>
    %492 = vector.extract_strided_slice %479 {offsets = [0, 64], sizes = [2, 32], strides = [1, 1]} : vector<2x128xf32> to vector<2x32xf32>
    %493 = math.tanh %492 : vector<2x32xf32>
    %494 = vector.extract_strided_slice %479 {offsets = [0, 96], sizes = [2, 32], strides = [1, 1]} : vector<2x128xf32> to vector<2x32xf32>
    %495 = arith.negf %494 : vector<2x32xf32>
    %496 = math.exp %495 : vector<2x32xf32>
    %cst_247 = arith.constant 1.000000e+00 : f32
    %497 = vector.broadcast %cst_247 : f32 to vector<2x32xf32>
    %498 = arith.addf %497, %496 : vector<2x32xf32>
    %499 = arith.divf %497, %498 : vector<2x32xf32>
    %500 = arith.mulf %491, %474 : vector<2x32xf32>
    %501 = arith.mulf %485, %493 : vector<2x32xf32>
    %502 = arith.addf %500, %501 : vector<2x32xf32>
    %503 = math.tanh %502 : vector<2x32xf32>
    %504 = arith.mulf %499, %503 : vector<2x32xf32>
    %c8_248 = arith.constant 8 : index
    %c0_249 = arith.constant 0 : index
    %505 = vector.load %arg21[%c8_248, %c0_249] : memref<14x32xf32, #tpu.memory_space<vmem>>, vector<2x32xf32>
    tpu.vector_store %arg21[%c8_248, %c0_249], %504 {strides = array<i32>} : memref<14x32xf32, #tpu.memory_space<vmem>>, vector<2x32xf32>,
    %cst_250 = arith.constant dense<0.000000e+00> : vector<2x128xf32>
    %506 = tpu.matmul %504, %419, %cst_250 {dimension_numbers = #tpu.dot_dimension_numbers<[1], [0], [0], [1], [0, 0, 1, 1], [], []>} : vector<2x32xf32>, vector<32x128xf32>, vector<2x128xf32> -> vector<2x128xf32>
    %507 = arith.addf %415, %506 : vector<2x128xf32>
    %508 = vector.extract_strided_slice %507 {offsets = [0, 0], sizes = [2, 32], strides = [1, 1]} : vector<2x128xf32> to vector<2x32xf32>
    %509 = arith.negf %508 : vector<2x32xf32>
    %510 = math.exp %509 : vector<2x32xf32>
    %cst_251 = arith.constant 1.000000e+00 : f32
    %511 = vector.broadcast %cst_251 : f32 to vector<2x32xf32>
    %512 = arith.addf %511, %510 : vector<2x32xf32>
    %513 = arith.divf %511, %512 : vector<2x32xf32>
    %514 = vector.extract_strided_slice %507 {offsets = [0, 32], sizes = [2, 32], strides = [1, 1]} : vector<2x128xf32> to vector<2x32xf32>
    %515 = arith.negf %514 : vector<2x32xf32>
    %516 = math.exp %515 : vector<2x32xf32>
    %cst_252 = arith.constant 1.000000e+00 : f32
    %517 = vector.broadcast %cst_252 : f32 to vector<2x32xf32>
    %518 = arith.addf %517, %516 : vector<2x32xf32>
    %519 = arith.divf %517, %518 : vector<2x32xf32>
    %520 = vector.extract_strided_slice %507 {offsets = [0, 64], sizes = [2, 32], strides = [1, 1]} : vector<2x128xf32> to vector<2x32xf32>
    %521 = math.tanh %520 : vector<2x32xf32>
    %522 = vector.extract_strided_slice %507 {offsets = [0, 96], sizes = [2, 32], strides = [1, 1]} : vector<2x128xf32> to vector<2x32xf32>
    %523 = arith.negf %522 : vector<2x32xf32>
    %524 = math.exp %523 : vector<2x32xf32>
    %cst_253 = arith.constant 1.000000e+00 : f32
    %525 = vector.broadcast %cst_253 : f32 to vector<2x32xf32>
    %526 = arith.addf %525, %524 : vector<2x32xf32>
    %527 = arith.divf %525, %526 : vector<2x32xf32>
    %528 = arith.mulf %519, %502 : vector<2x32xf32>
    %529 = arith.mulf %513, %521 : vector<2x32xf32>
    %530 = arith.addf %528, %529 : vector<2x32xf32>
    %531 = math.tanh %530 : vector<2x32xf32>
    %532 = arith.mulf %527, %531 : vector<2x32xf32>
    %c6_254 = arith.constant 6 : index
    %c0_255 = arith.constant 0 : index
    %533 = vector.load %arg21[%c6_254, %c0_255] : memref<14x32xf32, #tpu.memory_space<vmem>>, vector<2x32xf32>
    tpu.vector_store %arg21[%c6_254, %c0_255], %532 {strides = array<i32>} : memref<14x32xf32, #tpu.memory_space<vmem>>, vector<2x32xf32>,
    %cst_256 = arith.constant dense<0.000000e+00> : vector<2x128xf32>
    %534 = tpu.matmul %532, %419, %cst_256 {dimension_numbers = #tpu.dot_dimension_numbers<[1], [0], [0], [1], [0, 0, 1, 1], [], []>} : vector<2x32xf32>, vector<32x128xf32>, vector<2x128xf32> -> vector<2x128xf32>
    %535 = arith.addf %414, %534 : vector<2x128xf32>
    %536 = vector.extract_strided_slice %535 {offsets = [0, 0], sizes = [2, 32], strides = [1, 1]} : vector<2x128xf32> to vector<2x32xf32>
    %537 = arith.negf %536 : vector<2x32xf32>
    %538 = math.exp %537 : vector<2x32xf32>
    %cst_257 = arith.constant 1.000000e+00 : f32
    %539 = vector.broadcast %cst_257 : f32 to vector<2x32xf32>
    %540 = arith.addf %539, %538 : vector<2x32xf32>
    %541 = arith.divf %539, %540 : vector<2x32xf32>
    %542 = vector.extract_strided_slice %535 {offsets = [0, 32], sizes = [2, 32], strides = [1, 1]} : vector<2x128xf32> to vector<2x32xf32>
    %543 = arith.negf %542 : vector<2x32xf32>
    %544 = math.exp %543 : vector<2x32xf32>
    %cst_258 = arith.constant 1.000000e+00 : f32
    %545 = vector.broadcast %cst_258 : f32 to vector<2x32xf32>
    %546 = arith.addf %545, %544 : vector<2x32xf32>
    %547 = arith.divf %545, %546 : vector<2x32xf32>
    %548 = vector.extract_strided_slice %535 {offsets = [0, 64], sizes = [2, 32], strides = [1, 1]} : vector<2x128xf32> to vector<2x32xf32>
    %549 = math.tanh %548 : vector<2x32xf32>
    %550 = vector.extract_strided_slice %535 {offsets = [0, 96], sizes = [2, 32], strides = [1, 1]} : vector<2x128xf32> to vector<2x32xf32>
    %551 = arith.negf %550 : vector<2x32xf32>
    %552 = math.exp %551 : vector<2x32xf32>
    %cst_259 = arith.constant 1.000000e+00 : f32
    %553 = vector.broadcast %cst_259 : f32 to vector<2x32xf32>
    %554 = arith.addf %553, %552 : vector<2x32xf32>
    %555 = arith.divf %553, %554 : vector<2x32xf32>
    %556 = arith.mulf %547, %530 : vector<2x32xf32>
    %557 = arith.mulf %541, %549 : vector<2x32xf32>
    %558 = arith.addf %556, %557 : vector<2x32xf32>
    %559 = math.tanh %558 : vector<2x32xf32>
    %560 = arith.mulf %555, %559 : vector<2x32xf32>
    %c4_260 = arith.constant 4 : index
    %c0_261 = arith.constant 0 : index
    %561 = vector.load %arg21[%c4_260, %c0_261] : memref<14x32xf32, #tpu.memory_space<vmem>>, vector<2x32xf32>
    tpu.vector_store %arg21[%c4_260, %c0_261], %560 {strides = array<i32>} : memref<14x32xf32, #tpu.memory_space<vmem>>, vector<2x32xf32>,
    %cst_262 = arith.constant dense<0.000000e+00> : vector<2x128xf32>
    %562 = tpu.matmul %560, %419, %cst_262 {dimension_numbers = #tpu.dot_dimension_numbers<[1], [0], [0], [1], [0, 0, 1, 1], [], []>} : vector<2x32xf32>, vector<32x128xf32>, vector<2x128xf32> -> vector<2x128xf32>
    %563 = arith.addf %413, %562 : vector<2x128xf32>
    %564 = vector.extract_strided_slice %563 {offsets = [0, 0], sizes = [2, 32], strides = [1, 1]} : vector<2x128xf32> to vector<2x32xf32>
    %565 = arith.negf %564 : vector<2x32xf32>
    %566 = math.exp %565 : vector<2x32xf32>
    %cst_263 = arith.constant 1.000000e+00 : f32
    %567 = vector.broadcast %cst_263 : f32 to vector<2x32xf32>
    %568 = arith.addf %567, %566 : vector<2x32xf32>
    %569 = arith.divf %567, %568 : vector<2x32xf32>
    %570 = vector.extract_strided_slice %563 {offsets = [0, 32], sizes = [2, 32], strides = [1, 1]} : vector<2x128xf32> to vector<2x32xf32>
    %571 = arith.negf %570 : vector<2x32xf32>
    %572 = math.exp %571 : vector<2x32xf32>
    %cst_264 = arith.constant 1.000000e+00 : f32
    %573 = vector.broadcast %cst_264 : f32 to vector<2x32xf32>
    %574 = arith.addf %573, %572 : vector<2x32xf32>
    %575 = arith.divf %573, %574 : vector<2x32xf32>
    %576 = vector.extract_strided_slice %563 {offsets = [0, 64], sizes = [2, 32], strides = [1, 1]} : vector<2x128xf32> to vector<2x32xf32>
    %577 = math.tanh %576 : vector<2x32xf32>
    %578 = vector.extract_strided_slice %563 {offsets = [0, 96], sizes = [2, 32], strides = [1, 1]} : vector<2x128xf32> to vector<2x32xf32>
    %579 = arith.negf %578 : vector<2x32xf32>
    %580 = math.exp %579 : vector<2x32xf32>
    %cst_265 = arith.constant 1.000000e+00 : f32
    %581 = vector.broadcast %cst_265 : f32 to vector<2x32xf32>
    %582 = arith.addf %581, %580 : vector<2x32xf32>
    %583 = arith.divf %581, %582 : vector<2x32xf32>
    %584 = arith.mulf %575, %558 : vector<2x32xf32>
    %585 = arith.mulf %569, %577 : vector<2x32xf32>
    %586 = arith.addf %584, %585 : vector<2x32xf32>
    %587 = math.tanh %586 : vector<2x32xf32>
    %588 = arith.mulf %583, %587 : vector<2x32xf32>
    %c2_266 = arith.constant 2 : index
    %c0_267 = arith.constant 0 : index
    %589 = vector.load %arg21[%c2_266, %c0_267] : memref<14x32xf32, #tpu.memory_space<vmem>>, vector<2x32xf32>
    tpu.vector_store %arg21[%c2_266, %c0_267], %588 {strides = array<i32>} : memref<14x32xf32, #tpu.memory_space<vmem>>, vector<2x32xf32>,
    %cst_268 = arith.constant dense<0.000000e+00> : vector<2x128xf32>
    %590 = tpu.matmul %588, %419, %cst_268 {dimension_numbers = #tpu.dot_dimension_numbers<[1], [0], [0], [1], [0, 0, 1, 1], [], []>} : vector<2x32xf32>, vector<32x128xf32>, vector<2x128xf32> -> vector<2x128xf32>
    %591 = arith.addf %412, %590 : vector<2x128xf32>
    %592 = vector.extract_strided_slice %591 {offsets = [0, 0], sizes = [2, 32], strides = [1, 1]} : vector<2x128xf32> to vector<2x32xf32>
    %593 = arith.negf %592 : vector<2x32xf32>
    %594 = math.exp %593 : vector<2x32xf32>
    %cst_269 = arith.constant 1.000000e+00 : f32
    %595 = vector.broadcast %cst_269 : f32 to vector<2x32xf32>
    %596 = arith.addf %595, %594 : vector<2x32xf32>
    %597 = arith.divf %595, %596 : vector<2x32xf32>
    %598 = vector.extract_strided_slice %591 {offsets = [0, 32], sizes = [2, 32], strides = [1, 1]} : vector<2x128xf32> to vector<2x32xf32>
    %599 = arith.negf %598 : vector<2x32xf32>
    %600 = math.exp %599 : vector<2x32xf32>
    %cst_270 = arith.constant 1.000000e+00 : f32
    %601 = vector.broadcast %cst_270 : f32 to vector<2x32xf32>
    %602 = arith.addf %601, %600 : vector<2x32xf32>
    %603 = arith.divf %601, %602 : vector<2x32xf32>
    %604 = vector.extract_strided_slice %591 {offsets = [0, 64], sizes = [2, 32], strides = [1, 1]} : vector<2x128xf32> to vector<2x32xf32>
    %605 = math.tanh %604 : vector<2x32xf32>
    %606 = vector.extract_strided_slice %591 {offsets = [0, 96], sizes = [2, 32], strides = [1, 1]} : vector<2x128xf32> to vector<2x32xf32>
    %607 = arith.negf %606 : vector<2x32xf32>
    %608 = math.exp %607 : vector<2x32xf32>
    %cst_271 = arith.constant 1.000000e+00 : f32
    %609 = vector.broadcast %cst_271 : f32 to vector<2x32xf32>
    %610 = arith.addf %609, %608 : vector<2x32xf32>
    %611 = arith.divf %609, %610 : vector<2x32xf32>
    %612 = arith.mulf %603, %586 : vector<2x32xf32>
    %613 = arith.mulf %597, %605 : vector<2x32xf32>
    %614 = arith.addf %612, %613 : vector<2x32xf32>
    %615 = math.tanh %614 : vector<2x32xf32>
    %616 = arith.mulf %611, %615 : vector<2x32xf32>
    %c0_272 = arith.constant 0 : index
    %c0_273 = arith.constant 0 : index
    %617 = vector.load %arg21[%c0_272, %c0_273] : memref<14x32xf32, #tpu.memory_space<vmem>>, vector<2x32xf32>
    tpu.vector_store %arg21[%c0_272, %c0_273], %616 {strides = array<i32>} : memref<14x32xf32, #tpu.memory_space<vmem>>, vector<2x32xf32>,
    %c0_274 = arith.constant 0 : index
    %c0_275 = arith.constant 0 : index
    %618 = vector.load %arg20[%c0_274, %c0_275] : memref<14x32xf32, #tpu.memory_space<vmem>>, vector<14x32xf32>
    %c0_276 = arith.constant 0 : index
    %c0_277 = arith.constant 0 : index
    %619 = vector.load %arg11[%c0_276, %c0_277] : memref<163x128xf32, #tpu.memory_space<vmem>>, vector<32x32xf32>
    %cst_278 = arith.constant dense<0.000000e+00> : vector<14x32xf32>
    %620 = tpu.matmul %618, %619, %cst_278 {dimension_numbers = #tpu.dot_dimension_numbers<[1], [0], [0], [1], [0, 0, 1, 1], [], []>} : vector<14x32xf32>, vector<32x32xf32>, vector<14x32xf32> -> vector<14x32xf32>
    %c0_279 = arith.constant 0 : index
    %c0_280 = arith.constant 0 : index
    %621 = vector.load %arg21[%c0_279, %c0_280] : memref<14x32xf32, #tpu.memory_space<vmem>>, vector<14x32xf32>
    %c32_281 = arith.constant 32 : index
    %c0_282 = arith.constant 0 : index
    %622 = vector.load %arg11[%c32_281, %c0_282] : memref<163x128xf32, #tpu.memory_space<vmem>>, vector<32x32xf32>
    %cst_283 = arith.constant dense<0.000000e+00> : vector<14x32xf32>
    %623 = tpu.matmul %621, %622, %cst_283 {dimension_numbers = #tpu.dot_dimension_numbers<[1], [0], [0], [1], [0, 0, 1, 1], [], []>} : vector<14x32xf32>, vector<32x32xf32>, vector<14x32xf32> -> vector<14x32xf32>
    %624 = arith.addf %620, %623 : vector<14x32xf32>
    %c64 = arith.constant 64 : index
    %c0_284 = arith.constant 0 : index
    %625 = vector.load %arg11[%c64, %c0_284] : memref<163x128xf32, #tpu.memory_space<vmem>>, vector<1x32xf32>
    %626 = vector.broadcast %625 : vector<1x32xf32> to vector<14x32xf32>
    %627 = arith.addf %624, %626 : vector<14x32xf32>
    %c65 = arith.constant 65 : index
    %c0_285 = arith.constant 0 : index
    %628 = vector.load %arg10[%c65, %c0_285] : memref<130x256xf32, #tpu.memory_space<vmem>>, vector<32x256xf32>
    %cst_286 = arith.constant dense<0.000000e+00> : vector<14x256xf32>
    %629 = tpu.matmul %627, %628, %cst_286 {dimension_numbers = #tpu.dot_dimension_numbers<[1], [0], [0], [1], [0, 0, 1, 1], [], []>} : vector<14x32xf32>, vector<32x256xf32>, vector<14x256xf32> -> vector<14x256xf32>
    %c97 = arith.constant 97 : index
    %c0_287 = arith.constant 0 : index
    %630 = vector.load %arg10[%c97, %c0_287] : memref<130x256xf32, #tpu.memory_space<vmem>>, vector<1x256xf32>
    %631 = vector.broadcast %630 : vector<1x256xf32> to vector<14x256xf32>
    %632 = arith.addf %629, %631 : vector<14x256xf32>
    %633 = vector.extract_strided_slice %632 {offsets = [0, 0], sizes = [2, 128], strides = [1, 1]} : vector<14x256xf32> to vector<2x128xf32>
    %634 = vector.extract_strided_slice %632 {offsets = [2, 0], sizes = [2, 128], strides = [1, 1]} : vector<14x256xf32> to vector<2x128xf32>
    %635 = vector.extract_strided_slice %632 {offsets = [4, 0], sizes = [2, 128], strides = [1, 1]} : vector<14x256xf32> to vector<2x128xf32>
    %636 = vector.extract_strided_slice %632 {offsets = [6, 0], sizes = [2, 128], strides = [1, 1]} : vector<14x256xf32> to vector<2x128xf32>
    %637 = vector.extract_strided_slice %632 {offsets = [8, 0], sizes = [2, 128], strides = [1, 1]} : vector<14x256xf32> to vector<2x128xf32>
    %638 = vector.extract_strided_slice %632 {offsets = [10, 0], sizes = [2, 128], strides = [1, 1]} : vector<14x256xf32> to vector<2x128xf32>
    %639 = vector.extract_strided_slice %632 {offsets = [12, 0], sizes = [2, 128], strides = [1, 1]} : vector<14x256xf32> to vector<2x128xf32>
    %c98 = arith.constant 98 : index
    %c0_288 = arith.constant 0 : index
    %640 = vector.load %arg10[%c98, %c0_288] : memref<130x256xf32, #tpu.memory_space<vmem>>, vector<32x128xf32>
    %cst_289 = arith.constant 0.000000e+00 : f32
    %641 = vector.broadcast %cst_289 : f32 to vector<2x32xf32>
    %cst_290 = arith.constant 0.000000e+00 : f32
    %642 = vector.broadcast %cst_290 : f32 to vector<2x32xf32>
    %cst_291 = arith.constant dense<0.000000e+00> : vector<2x128xf32>
    %643 = tpu.matmul %641, %640, %cst_291 {dimension_numbers = #tpu.dot_dimension_numbers<[1], [0], [0], [1], [0, 0, 1, 1], [], []>} : vector<2x32xf32>, vector<32x128xf32>, vector<2x128xf32> -> vector<2x128xf32>
    %644 = arith.addf %633, %643 : vector<2x128xf32>
    %645 = vector.extract_strided_slice %644 {offsets = [0, 0], sizes = [2, 32], strides = [1, 1]} : vector<2x128xf32> to vector<2x32xf32>
    %646 = arith.negf %645 : vector<2x32xf32>
    %647 = math.exp %646 : vector<2x32xf32>
    %cst_292 = arith.constant 1.000000e+00 : f32
    %648 = vector.broadcast %cst_292 : f32 to vector<2x32xf32>
    %649 = arith.addf %648, %647 : vector<2x32xf32>
    %650 = arith.divf %648, %649 : vector<2x32xf32>
    %651 = vector.extract_strided_slice %644 {offsets = [0, 32], sizes = [2, 32], strides = [1, 1]} : vector<2x128xf32> to vector<2x32xf32>
    %652 = arith.negf %651 : vector<2x32xf32>
    %653 = math.exp %652 : vector<2x32xf32>
    %cst_293 = arith.constant 1.000000e+00 : f32
    %654 = vector.broadcast %cst_293 : f32 to vector<2x32xf32>
    %655 = arith.addf %654, %653 : vector<2x32xf32>
    %656 = arith.divf %654, %655 : vector<2x32xf32>
    %657 = vector.extract_strided_slice %644 {offsets = [0, 64], sizes = [2, 32], strides = [1, 1]} : vector<2x128xf32> to vector<2x32xf32>
    %658 = math.tanh %657 : vector<2x32xf32>
    %659 = vector.extract_strided_slice %644 {offsets = [0, 96], sizes = [2, 32], strides = [1, 1]} : vector<2x128xf32> to vector<2x32xf32>
    %660 = arith.negf %659 : vector<2x32xf32>
    %661 = math.exp %660 : vector<2x32xf32>
    %cst_294 = arith.constant 1.000000e+00 : f32
    %662 = vector.broadcast %cst_294 : f32 to vector<2x32xf32>
    %663 = arith.addf %662, %661 : vector<2x32xf32>
    %664 = arith.divf %662, %663 : vector<2x32xf32>
    %665 = arith.mulf %656, %642 : vector<2x32xf32>
    %666 = arith.mulf %650, %658 : vector<2x32xf32>
    %667 = arith.addf %665, %666 : vector<2x32xf32>
    %668 = math.tanh %667 : vector<2x32xf32>
    %669 = arith.mulf %664, %668 : vector<2x32xf32>
    %c0_295 = arith.constant 0 : index
    %c0_296 = arith.constant 0 : index
    %670 = vector.load %arg20[%c0_295, %c0_296] : memref<14x32xf32, #tpu.memory_space<vmem>>, vector<2x32xf32>
    tpu.vector_store %arg20[%c0_295, %c0_296], %669 {strides = array<i32>} : memref<14x32xf32, #tpu.memory_space<vmem>>, vector<2x32xf32>,
    %cst_297 = arith.constant dense<0.000000e+00> : vector<2x128xf32>
    %671 = tpu.matmul %669, %640, %cst_297 {dimension_numbers = #tpu.dot_dimension_numbers<[1], [0], [0], [1], [0, 0, 1, 1], [], []>} : vector<2x32xf32>, vector<32x128xf32>, vector<2x128xf32> -> vector<2x128xf32>
    %672 = arith.addf %634, %671 : vector<2x128xf32>
    %673 = vector.extract_strided_slice %672 {offsets = [0, 0], sizes = [2, 32], strides = [1, 1]} : vector<2x128xf32> to vector<2x32xf32>
    %674 = arith.negf %673 : vector<2x32xf32>
    %675 = math.exp %674 : vector<2x32xf32>
    %cst_298 = arith.constant 1.000000e+00 : f32
    %676 = vector.broadcast %cst_298 : f32 to vector<2x32xf32>
    %677 = arith.addf %676, %675 : vector<2x32xf32>
    %678 = arith.divf %676, %677 : vector<2x32xf32>
    %679 = vector.extract_strided_slice %672 {offsets = [0, 32], sizes = [2, 32], strides = [1, 1]} : vector<2x128xf32> to vector<2x32xf32>
    %680 = arith.negf %679 : vector<2x32xf32>
    %681 = math.exp %680 : vector<2x32xf32>
    %cst_299 = arith.constant 1.000000e+00 : f32
    %682 = vector.broadcast %cst_299 : f32 to vector<2x32xf32>
    %683 = arith.addf %682, %681 : vector<2x32xf32>
    %684 = arith.divf %682, %683 : vector<2x32xf32>
    %685 = vector.extract_strided_slice %672 {offsets = [0, 64], sizes = [2, 32], strides = [1, 1]} : vector<2x128xf32> to vector<2x32xf32>
    %686 = math.tanh %685 : vector<2x32xf32>
    %687 = vector.extract_strided_slice %672 {offsets = [0, 96], sizes = [2, 32], strides = [1, 1]} : vector<2x128xf32> to vector<2x32xf32>
    %688 = arith.negf %687 : vector<2x32xf32>
    %689 = math.exp %688 : vector<2x32xf32>
    %cst_300 = arith.constant 1.000000e+00 : f32
    %690 = vector.broadcast %cst_300 : f32 to vector<2x32xf32>
    %691 = arith.addf %690, %689 : vector<2x32xf32>
    %692 = arith.divf %690, %691 : vector<2x32xf32>
    %693 = arith.mulf %684, %667 : vector<2x32xf32>
    %694 = arith.mulf %678, %686 : vector<2x32xf32>
    %695 = arith.addf %693, %694 : vector<2x32xf32>
    %696 = math.tanh %695 : vector<2x32xf32>
    %697 = arith.mulf %692, %696 : vector<2x32xf32>
    %c2_301 = arith.constant 2 : index
    %c0_302 = arith.constant 0 : index
    %698 = vector.load %arg20[%c2_301, %c0_302] : memref<14x32xf32, #tpu.memory_space<vmem>>, vector<2x32xf32>
    tpu.vector_store %arg20[%c2_301, %c0_302], %697 {strides = array<i32>} : memref<14x32xf32, #tpu.memory_space<vmem>>, vector<2x32xf32>,
    %cst_303 = arith.constant dense<0.000000e+00> : vector<2x128xf32>
    %699 = tpu.matmul %697, %640, %cst_303 {dimension_numbers = #tpu.dot_dimension_numbers<[1], [0], [0], [1], [0, 0, 1, 1], [], []>} : vector<2x32xf32>, vector<32x128xf32>, vector<2x128xf32> -> vector<2x128xf32>
    %700 = arith.addf %635, %699 : vector<2x128xf32>
    %701 = vector.extract_strided_slice %700 {offsets = [0, 0], sizes = [2, 32], strides = [1, 1]} : vector<2x128xf32> to vector<2x32xf32>
    %702 = arith.negf %701 : vector<2x32xf32>
    %703 = math.exp %702 : vector<2x32xf32>
    %cst_304 = arith.constant 1.000000e+00 : f32
    %704 = vector.broadcast %cst_304 : f32 to vector<2x32xf32>
    %705 = arith.addf %704, %703 : vector<2x32xf32>
    %706 = arith.divf %704, %705 : vector<2x32xf32>
    %707 = vector.extract_strided_slice %700 {offsets = [0, 32], sizes = [2, 32], strides = [1, 1]} : vector<2x128xf32> to vector<2x32xf32>
    %708 = arith.negf %707 : vector<2x32xf32>
    %709 = math.exp %708 : vector<2x32xf32>
    %cst_305 = arith.constant 1.000000e+00 : f32
    %710 = vector.broadcast %cst_305 : f32 to vector<2x32xf32>
    %711 = arith.addf %710, %709 : vector<2x32xf32>
    %712 = arith.divf %710, %711 : vector<2x32xf32>
    %713 = vector.extract_strided_slice %700 {offsets = [0, 64], sizes = [2, 32], strides = [1, 1]} : vector<2x128xf32> to vector<2x32xf32>
    %714 = math.tanh %713 : vector<2x32xf32>
    %715 = vector.extract_strided_slice %700 {offsets = [0, 96], sizes = [2, 32], strides = [1, 1]} : vector<2x128xf32> to vector<2x32xf32>
    %716 = arith.negf %715 : vector<2x32xf32>
    %717 = math.exp %716 : vector<2x32xf32>
    %cst_306 = arith.constant 1.000000e+00 : f32
    %718 = vector.broadcast %cst_306 : f32 to vector<2x32xf32>
    %719 = arith.addf %718, %717 : vector<2x32xf32>
    %720 = arith.divf %718, %719 : vector<2x32xf32>
    %721 = arith.mulf %712, %695 : vector<2x32xf32>
    %722 = arith.mulf %706, %714 : vector<2x32xf32>
    %723 = arith.addf %721, %722 : vector<2x32xf32>
    %724 = math.tanh %723 : vector<2x32xf32>
    %725 = arith.mulf %720, %724 : vector<2x32xf32>
    %c4_307 = arith.constant 4 : index
    %c0_308 = arith.constant 0 : index
    %726 = vector.load %arg20[%c4_307, %c0_308] : memref<14x32xf32, #tpu.memory_space<vmem>>, vector<2x32xf32>
    tpu.vector_store %arg20[%c4_307, %c0_308], %725 {strides = array<i32>} : memref<14x32xf32, #tpu.memory_space<vmem>>, vector<2x32xf32>,
    %cst_309 = arith.constant dense<0.000000e+00> : vector<2x128xf32>
    %727 = tpu.matmul %725, %640, %cst_309 {dimension_numbers = #tpu.dot_dimension_numbers<[1], [0], [0], [1], [0, 0, 1, 1], [], []>} : vector<2x32xf32>, vector<32x128xf32>, vector<2x128xf32> -> vector<2x128xf32>
    %728 = arith.addf %636, %727 : vector<2x128xf32>
    %729 = vector.extract_strided_slice %728 {offsets = [0, 0], sizes = [2, 32], strides = [1, 1]} : vector<2x128xf32> to vector<2x32xf32>
    %730 = arith.negf %729 : vector<2x32xf32>
    %731 = math.exp %730 : vector<2x32xf32>
    %cst_310 = arith.constant 1.000000e+00 : f32
    %732 = vector.broadcast %cst_310 : f32 to vector<2x32xf32>
    %733 = arith.addf %732, %731 : vector<2x32xf32>
    %734 = arith.divf %732, %733 : vector<2x32xf32>
    %735 = vector.extract_strided_slice %728 {offsets = [0, 32], sizes = [2, 32], strides = [1, 1]} : vector<2x128xf32> to vector<2x32xf32>
    %736 = arith.negf %735 : vector<2x32xf32>
    %737 = math.exp %736 : vector<2x32xf32>
    %cst_311 = arith.constant 1.000000e+00 : f32
    %738 = vector.broadcast %cst_311 : f32 to vector<2x32xf32>
    %739 = arith.addf %738, %737 : vector<2x32xf32>
    %740 = arith.divf %738, %739 : vector<2x32xf32>
    %741 = vector.extract_strided_slice %728 {offsets = [0, 64], sizes = [2, 32], strides = [1, 1]} : vector<2x128xf32> to vector<2x32xf32>
    %742 = math.tanh %741 : vector<2x32xf32>
    %743 = vector.extract_strided_slice %728 {offsets = [0, 96], sizes = [2, 32], strides = [1, 1]} : vector<2x128xf32> to vector<2x32xf32>
    %744 = arith.negf %743 : vector<2x32xf32>
    %745 = math.exp %744 : vector<2x32xf32>
    %cst_312 = arith.constant 1.000000e+00 : f32
    %746 = vector.broadcast %cst_312 : f32 to vector<2x32xf32>
    %747 = arith.addf %746, %745 : vector<2x32xf32>
    %748 = arith.divf %746, %747 : vector<2x32xf32>
    %749 = arith.mulf %740, %723 : vector<2x32xf32>
    %750 = arith.mulf %734, %742 : vector<2x32xf32>
    %751 = arith.addf %749, %750 : vector<2x32xf32>
    %752 = math.tanh %751 : vector<2x32xf32>
    %753 = arith.mulf %748, %752 : vector<2x32xf32>
    %c6_313 = arith.constant 6 : index
    %c0_314 = arith.constant 0 : index
    %754 = vector.load %arg20[%c6_313, %c0_314] : memref<14x32xf32, #tpu.memory_space<vmem>>, vector<2x32xf32>
    tpu.vector_store %arg20[%c6_313, %c0_314], %753 {strides = array<i32>} : memref<14x32xf32, #tpu.memory_space<vmem>>, vector<2x32xf32>,
    %cst_315 = arith.constant dense<0.000000e+00> : vector<2x128xf32>
    %755 = tpu.matmul %753, %640, %cst_315 {dimension_numbers = #tpu.dot_dimension_numbers<[1], [0], [0], [1], [0, 0, 1, 1], [], []>} : vector<2x32xf32>, vector<32x128xf32>, vector<2x128xf32> -> vector<2x128xf32>
    %756 = arith.addf %637, %755 : vector<2x128xf32>
    %757 = vector.extract_strided_slice %756 {offsets = [0, 0], sizes = [2, 32], strides = [1, 1]} : vector<2x128xf32> to vector<2x32xf32>
    %758 = arith.negf %757 : vector<2x32xf32>
    %759 = math.exp %758 : vector<2x32xf32>
    %cst_316 = arith.constant 1.000000e+00 : f32
    %760 = vector.broadcast %cst_316 : f32 to vector<2x32xf32>
    %761 = arith.addf %760, %759 : vector<2x32xf32>
    %762 = arith.divf %760, %761 : vector<2x32xf32>
    %763 = vector.extract_strided_slice %756 {offsets = [0, 32], sizes = [2, 32], strides = [1, 1]} : vector<2x128xf32> to vector<2x32xf32>
    %764 = arith.negf %763 : vector<2x32xf32>
    %765 = math.exp %764 : vector<2x32xf32>
    %cst_317 = arith.constant 1.000000e+00 : f32
    %766 = vector.broadcast %cst_317 : f32 to vector<2x32xf32>
    %767 = arith.addf %766, %765 : vector<2x32xf32>
    %768 = arith.divf %766, %767 : vector<2x32xf32>
    %769 = vector.extract_strided_slice %756 {offsets = [0, 64], sizes = [2, 32], strides = [1, 1]} : vector<2x128xf32> to vector<2x32xf32>
    %770 = math.tanh %769 : vector<2x32xf32>
    %771 = vector.extract_strided_slice %756 {offsets = [0, 96], sizes = [2, 32], strides = [1, 1]} : vector<2x128xf32> to vector<2x32xf32>
    %772 = arith.negf %771 : vector<2x32xf32>
    %773 = math.exp %772 : vector<2x32xf32>
    %cst_318 = arith.constant 1.000000e+00 : f32
    %774 = vector.broadcast %cst_318 : f32 to vector<2x32xf32>
    %775 = arith.addf %774, %773 : vector<2x32xf32>
    %776 = arith.divf %774, %775 : vector<2x32xf32>
    %777 = arith.mulf %768, %751 : vector<2x32xf32>
    %778 = arith.mulf %762, %770 : vector<2x32xf32>
    %779 = arith.addf %777, %778 : vector<2x32xf32>
    %780 = math.tanh %779 : vector<2x32xf32>
    %781 = arith.mulf %776, %780 : vector<2x32xf32>
    %c8_319 = arith.constant 8 : index
    %c0_320 = arith.constant 0 : index
    %782 = vector.load %arg20[%c8_319, %c0_320] : memref<14x32xf32, #tpu.memory_space<vmem>>, vector<2x32xf32>
    tpu.vector_store %arg20[%c8_319, %c0_320], %781 {strides = array<i32>} : memref<14x32xf32, #tpu.memory_space<vmem>>, vector<2x32xf32>,
    %cst_321 = arith.constant dense<0.000000e+00> : vector<2x128xf32>
    %783 = tpu.matmul %781, %640, %cst_321 {dimension_numbers = #tpu.dot_dimension_numbers<[1], [0], [0], [1], [0, 0, 1, 1], [], []>} : vector<2x32xf32>, vector<32x128xf32>, vector<2x128xf32> -> vector<2x128xf32>
    %784 = arith.addf %638, %783 : vector<2x128xf32>
    %785 = vector.extract_strided_slice %784 {offsets = [0, 0], sizes = [2, 32], strides = [1, 1]} : vector<2x128xf32> to vector<2x32xf32>
    %786 = arith.negf %785 : vector<2x32xf32>
    %787 = math.exp %786 : vector<2x32xf32>
    %cst_322 = arith.constant 1.000000e+00 : f32
    %788 = vector.broadcast %cst_322 : f32 to vector<2x32xf32>
    %789 = arith.addf %788, %787 : vector<2x32xf32>
    %790 = arith.divf %788, %789 : vector<2x32xf32>
    %791 = vector.extract_strided_slice %784 {offsets = [0, 32], sizes = [2, 32], strides = [1, 1]} : vector<2x128xf32> to vector<2x32xf32>
    %792 = arith.negf %791 : vector<2x32xf32>
    %793 = math.exp %792 : vector<2x32xf32>
    %cst_323 = arith.constant 1.000000e+00 : f32
    %794 = vector.broadcast %cst_323 : f32 to vector<2x32xf32>
    %795 = arith.addf %794, %793 : vector<2x32xf32>
    %796 = arith.divf %794, %795 : vector<2x32xf32>
    %797 = vector.extract_strided_slice %784 {offsets = [0, 64], sizes = [2, 32], strides = [1, 1]} : vector<2x128xf32> to vector<2x32xf32>
    %798 = math.tanh %797 : vector<2x32xf32>
    %799 = vector.extract_strided_slice %784 {offsets = [0, 96], sizes = [2, 32], strides = [1, 1]} : vector<2x128xf32> to vector<2x32xf32>
    %800 = arith.negf %799 : vector<2x32xf32>
    %801 = math.exp %800 : vector<2x32xf32>
    %cst_324 = arith.constant 1.000000e+00 : f32
    %802 = vector.broadcast %cst_324 : f32 to vector<2x32xf32>
    %803 = arith.addf %802, %801 : vector<2x32xf32>
    %804 = arith.divf %802, %803 : vector<2x32xf32>
    %805 = arith.mulf %796, %779 : vector<2x32xf32>
    %806 = arith.mulf %790, %798 : vector<2x32xf32>
    %807 = arith.addf %805, %806 : vector<2x32xf32>
    %808 = math.tanh %807 : vector<2x32xf32>
    %809 = arith.mulf %804, %808 : vector<2x32xf32>
    %c10_325 = arith.constant 10 : index
    %c0_326 = arith.constant 0 : index
    %810 = vector.load %arg20[%c10_325, %c0_326] : memref<14x32xf32, #tpu.memory_space<vmem>>, vector<2x32xf32>
    tpu.vector_store %arg20[%c10_325, %c0_326], %809 {strides = array<i32>} : memref<14x32xf32, #tpu.memory_space<vmem>>, vector<2x32xf32>,
    %cst_327 = arith.constant dense<0.000000e+00> : vector<2x128xf32>
    %811 = tpu.matmul %809, %640, %cst_327 {dimension_numbers = #tpu.dot_dimension_numbers<[1], [0], [0], [1], [0, 0, 1, 1], [], []>} : vector<2x32xf32>, vector<32x128xf32>, vector<2x128xf32> -> vector<2x128xf32>
    %812 = arith.addf %639, %811 : vector<2x128xf32>
    %813 = vector.extract_strided_slice %812 {offsets = [0, 0], sizes = [2, 32], strides = [1, 1]} : vector<2x128xf32> to vector<2x32xf32>
    %814 = arith.negf %813 : vector<2x32xf32>
    %815 = math.exp %814 : vector<2x32xf32>
    %cst_328 = arith.constant 1.000000e+00 : f32
    %816 = vector.broadcast %cst_328 : f32 to vector<2x32xf32>
    %817 = arith.addf %816, %815 : vector<2x32xf32>
    %818 = arith.divf %816, %817 : vector<2x32xf32>
    %819 = vector.extract_strided_slice %812 {offsets = [0, 32], sizes = [2, 32], strides = [1, 1]} : vector<2x128xf32> to vector<2x32xf32>
    %820 = arith.negf %819 : vector<2x32xf32>
    %821 = math.exp %820 : vector<2x32xf32>
    %cst_329 = arith.constant 1.000000e+00 : f32
    %822 = vector.broadcast %cst_329 : f32 to vector<2x32xf32>
    %823 = arith.addf %822, %821 : vector<2x32xf32>
    %824 = arith.divf %822, %823 : vector<2x32xf32>
    %825 = vector.extract_strided_slice %812 {offsets = [0, 64], sizes = [2, 32], strides = [1, 1]} : vector<2x128xf32> to vector<2x32xf32>
    %826 = math.tanh %825 : vector<2x32xf32>
    %827 = vector.extract_strided_slice %812 {offsets = [0, 96], sizes = [2, 32], strides = [1, 1]} : vector<2x128xf32> to vector<2x32xf32>
    %828 = arith.negf %827 : vector<2x32xf32>
    %829 = math.exp %828 : vector<2x32xf32>
    %cst_330 = arith.constant 1.000000e+00 : f32
    %830 = vector.broadcast %cst_330 : f32 to vector<2x32xf32>
    %831 = arith.addf %830, %829 : vector<2x32xf32>
    %832 = arith.divf %830, %831 : vector<2x32xf32>
    %833 = arith.mulf %824, %807 : vector<2x32xf32>
    %834 = arith.mulf %818, %826 : vector<2x32xf32>
    %835 = arith.addf %833, %834 : vector<2x32xf32>
    %836 = math.tanh %835 : vector<2x32xf32>
    %837 = arith.mulf %832, %836 : vector<2x32xf32>
    %c12_331 = arith.constant 12 : index
    %c0_332 = arith.constant 0 : index
    %838 = vector.load %arg20[%c12_331, %c0_332] : memref<14x32xf32, #tpu.memory_space<vmem>>, vector<2x32xf32>
    tpu.vector_store %arg20[%c12_331, %c0_332], %837 {strides = array<i32>} : memref<14x32xf32, #tpu.memory_space<vmem>>, vector<2x32xf32>,
    %839 = vector.extract_strided_slice %632 {offsets = [0, 128], sizes = [2, 128], strides = [1, 1]} : vector<14x256xf32> to vector<2x128xf32>
    %840 = vector.extract_strided_slice %632 {offsets = [2, 128], sizes = [2, 128], strides = [1, 1]} : vector<14x256xf32> to vector<2x128xf32>
    %841 = vector.extract_strided_slice %632 {offsets = [4, 128], sizes = [2, 128], strides = [1, 1]} : vector<14x256xf32> to vector<2x128xf32>
    %842 = vector.extract_strided_slice %632 {offsets = [6, 128], sizes = [2, 128], strides = [1, 1]} : vector<14x256xf32> to vector<2x128xf32>
    %843 = vector.extract_strided_slice %632 {offsets = [8, 128], sizes = [2, 128], strides = [1, 1]} : vector<14x256xf32> to vector<2x128xf32>
    %844 = vector.extract_strided_slice %632 {offsets = [10, 128], sizes = [2, 128], strides = [1, 1]} : vector<14x256xf32> to vector<2x128xf32>
    %845 = vector.extract_strided_slice %632 {offsets = [12, 128], sizes = [2, 128], strides = [1, 1]} : vector<14x256xf32> to vector<2x128xf32>
    %c98_333 = arith.constant 98 : index
    %c128_334 = arith.constant 128 : index
    %846 = vector.load %arg10[%c98_333, %c128_334] : memref<130x256xf32, #tpu.memory_space<vmem>>, vector<32x128xf32>
    %cst_335 = arith.constant 0.000000e+00 : f32
    %847 = vector.broadcast %cst_335 : f32 to vector<2x32xf32>
    %cst_336 = arith.constant 0.000000e+00 : f32
    %848 = vector.broadcast %cst_336 : f32 to vector<2x32xf32>
    %cst_337 = arith.constant dense<0.000000e+00> : vector<2x128xf32>
    %849 = tpu.matmul %847, %846, %cst_337 {dimension_numbers = #tpu.dot_dimension_numbers<[1], [0], [0], [1], [0, 0, 1, 1], [], []>} : vector<2x32xf32>, vector<32x128xf32>, vector<2x128xf32> -> vector<2x128xf32>
    %850 = arith.addf %845, %849 : vector<2x128xf32>
    %851 = vector.extract_strided_slice %850 {offsets = [0, 0], sizes = [2, 32], strides = [1, 1]} : vector<2x128xf32> to vector<2x32xf32>
    %852 = arith.negf %851 : vector<2x32xf32>
    %853 = math.exp %852 : vector<2x32xf32>
    %cst_338 = arith.constant 1.000000e+00 : f32
    %854 = vector.broadcast %cst_338 : f32 to vector<2x32xf32>
    %855 = arith.addf %854, %853 : vector<2x32xf32>
    %856 = arith.divf %854, %855 : vector<2x32xf32>
    %857 = vector.extract_strided_slice %850 {offsets = [0, 32], sizes = [2, 32], strides = [1, 1]} : vector<2x128xf32> to vector<2x32xf32>
    %858 = arith.negf %857 : vector<2x32xf32>
    %859 = math.exp %858 : vector<2x32xf32>
    %cst_339 = arith.constant 1.000000e+00 : f32
    %860 = vector.broadcast %cst_339 : f32 to vector<2x32xf32>
    %861 = arith.addf %860, %859 : vector<2x32xf32>
    %862 = arith.divf %860, %861 : vector<2x32xf32>
    %863 = vector.extract_strided_slice %850 {offsets = [0, 64], sizes = [2, 32], strides = [1, 1]} : vector<2x128xf32> to vector<2x32xf32>
    %864 = math.tanh %863 : vector<2x32xf32>
    %865 = vector.extract_strided_slice %850 {offsets = [0, 96], sizes = [2, 32], strides = [1, 1]} : vector<2x128xf32> to vector<2x32xf32>
    %866 = arith.negf %865 : vector<2x32xf32>
    %867 = math.exp %866 : vector<2x32xf32>
    %cst_340 = arith.constant 1.000000e+00 : f32
    %868 = vector.broadcast %cst_340 : f32 to vector<2x32xf32>
    %869 = arith.addf %868, %867 : vector<2x32xf32>
    %870 = arith.divf %868, %869 : vector<2x32xf32>
    %871 = arith.mulf %862, %848 : vector<2x32xf32>
    %872 = arith.mulf %856, %864 : vector<2x32xf32>
    %873 = arith.addf %871, %872 : vector<2x32xf32>
    %874 = math.tanh %873 : vector<2x32xf32>
    %875 = arith.mulf %870, %874 : vector<2x32xf32>
    %c12_341 = arith.constant 12 : index
    %c0_342 = arith.constant 0 : index
    %876 = vector.load %arg21[%c12_341, %c0_342] : memref<14x32xf32, #tpu.memory_space<vmem>>, vector<2x32xf32>
    tpu.vector_store %arg21[%c12_341, %c0_342], %875 {strides = array<i32>} : memref<14x32xf32, #tpu.memory_space<vmem>>, vector<2x32xf32>,
    %cst_343 = arith.constant dense<0.000000e+00> : vector<2x128xf32>
    %877 = tpu.matmul %875, %846, %cst_343 {dimension_numbers = #tpu.dot_dimension_numbers<[1], [0], [0], [1], [0, 0, 1, 1], [], []>} : vector<2x32xf32>, vector<32x128xf32>, vector<2x128xf32> -> vector<2x128xf32>
    %878 = arith.addf %844, %877 : vector<2x128xf32>
    %879 = vector.extract_strided_slice %878 {offsets = [0, 0], sizes = [2, 32], strides = [1, 1]} : vector<2x128xf32> to vector<2x32xf32>
    %880 = arith.negf %879 : vector<2x32xf32>
    %881 = math.exp %880 : vector<2x32xf32>
    %cst_344 = arith.constant 1.000000e+00 : f32
    %882 = vector.broadcast %cst_344 : f32 to vector<2x32xf32>
    %883 = arith.addf %882, %881 : vector<2x32xf32>
    %884 = arith.divf %882, %883 : vector<2x32xf32>
    %885 = vector.extract_strided_slice %878 {offsets = [0, 32], sizes = [2, 32], strides = [1, 1]} : vector<2x128xf32> to vector<2x32xf32>
    %886 = arith.negf %885 : vector<2x32xf32>
    %887 = math.exp %886 : vector<2x32xf32>
    %cst_345 = arith.constant 1.000000e+00 : f32
    %888 = vector.broadcast %cst_345 : f32 to vector<2x32xf32>
    %889 = arith.addf %888, %887 : vector<2x32xf32>
    %890 = arith.divf %888, %889 : vector<2x32xf32>
    %891 = vector.extract_strided_slice %878 {offsets = [0, 64], sizes = [2, 32], strides = [1, 1]} : vector<2x128xf32> to vector<2x32xf32>
    %892 = math.tanh %891 : vector<2x32xf32>
    %893 = vector.extract_strided_slice %878 {offsets = [0, 96], sizes = [2, 32], strides = [1, 1]} : vector<2x128xf32> to vector<2x32xf32>
    %894 = arith.negf %893 : vector<2x32xf32>
    %895 = math.exp %894 : vector<2x32xf32>
    %cst_346 = arith.constant 1.000000e+00 : f32
    %896 = vector.broadcast %cst_346 : f32 to vector<2x32xf32>
    %897 = arith.addf %896, %895 : vector<2x32xf32>
    %898 = arith.divf %896, %897 : vector<2x32xf32>
    %899 = arith.mulf %890, %873 : vector<2x32xf32>
    %900 = arith.mulf %884, %892 : vector<2x32xf32>
    %901 = arith.addf %899, %900 : vector<2x32xf32>
    %902 = math.tanh %901 : vector<2x32xf32>
    %903 = arith.mulf %898, %902 : vector<2x32xf32>
    %c10_347 = arith.constant 10 : index
    %c0_348 = arith.constant 0 : index
    %904 = vector.load %arg21[%c10_347, %c0_348] : memref<14x32xf32, #tpu.memory_space<vmem>>, vector<2x32xf32>
    tpu.vector_store %arg21[%c10_347, %c0_348], %903 {strides = array<i32>} : memref<14x32xf32, #tpu.memory_space<vmem>>, vector<2x32xf32>,
    %cst_349 = arith.constant dense<0.000000e+00> : vector<2x128xf32>
    %905 = tpu.matmul %903, %846, %cst_349 {dimension_numbers = #tpu.dot_dimension_numbers<[1], [0], [0], [1], [0, 0, 1, 1], [], []>} : vector<2x32xf32>, vector<32x128xf32>, vector<2x128xf32> -> vector<2x128xf32>
    %906 = arith.addf %843, %905 : vector<2x128xf32>
    %907 = vector.extract_strided_slice %906 {offsets = [0, 0], sizes = [2, 32], strides = [1, 1]} : vector<2x128xf32> to vector<2x32xf32>
    %908 = arith.negf %907 : vector<2x32xf32>
    %909 = math.exp %908 : vector<2x32xf32>
    %cst_350 = arith.constant 1.000000e+00 : f32
    %910 = vector.broadcast %cst_350 : f32 to vector<2x32xf32>
    %911 = arith.addf %910, %909 : vector<2x32xf32>
    %912 = arith.divf %910, %911 : vector<2x32xf32>
    %913 = vector.extract_strided_slice %906 {offsets = [0, 32], sizes = [2, 32], strides = [1, 1]} : vector<2x128xf32> to vector<2x32xf32>
    %914 = arith.negf %913 : vector<2x32xf32>
    %915 = math.exp %914 : vector<2x32xf32>
    %cst_351 = arith.constant 1.000000e+00 : f32
    %916 = vector.broadcast %cst_351 : f32 to vector<2x32xf32>
    %917 = arith.addf %916, %915 : vector<2x32xf32>
    %918 = arith.divf %916, %917 : vector<2x32xf32>
    %919 = vector.extract_strided_slice %906 {offsets = [0, 64], sizes = [2, 32], strides = [1, 1]} : vector<2x128xf32> to vector<2x32xf32>
    %920 = math.tanh %919 : vector<2x32xf32>
    %921 = vector.extract_strided_slice %906 {offsets = [0, 96], sizes = [2, 32], strides = [1, 1]} : vector<2x128xf32> to vector<2x32xf32>
    %922 = arith.negf %921 : vector<2x32xf32>
    %923 = math.exp %922 : vector<2x32xf32>
    %cst_352 = arith.constant 1.000000e+00 : f32
    %924 = vector.broadcast %cst_352 : f32 to vector<2x32xf32>
    %925 = arith.addf %924, %923 : vector<2x32xf32>
    %926 = arith.divf %924, %925 : vector<2x32xf32>
    %927 = arith.mulf %918, %901 : vector<2x32xf32>
    %928 = arith.mulf %912, %920 : vector<2x32xf32>
    %929 = arith.addf %927, %928 : vector<2x32xf32>
    %930 = math.tanh %929 : vector<2x32xf32>
    %931 = arith.mulf %926, %930 : vector<2x32xf32>
    %c8_353 = arith.constant 8 : index
    %c0_354 = arith.constant 0 : index
    %932 = vector.load %arg21[%c8_353, %c0_354] : memref<14x32xf32, #tpu.memory_space<vmem>>, vector<2x32xf32>
    tpu.vector_store %arg21[%c8_353, %c0_354], %931 {strides = array<i32>} : memref<14x32xf32, #tpu.memory_space<vmem>>, vector<2x32xf32>,
    %cst_355 = arith.constant dense<0.000000e+00> : vector<2x128xf32>
    %933 = tpu.matmul %931, %846, %cst_355 {dimension_numbers = #tpu.dot_dimension_numbers<[1], [0], [0], [1], [0, 0, 1, 1], [], []>} : vector<2x32xf32>, vector<32x128xf32>, vector<2x128xf32> -> vector<2x128xf32>
    %934 = arith.addf %842, %933 : vector<2x128xf32>
    %935 = vector.extract_strided_slice %934 {offsets = [0, 0], sizes = [2, 32], strides = [1, 1]} : vector<2x128xf32> to vector<2x32xf32>
    %936 = arith.negf %935 : vector<2x32xf32>
    %937 = math.exp %936 : vector<2x32xf32>
    %cst_356 = arith.constant 1.000000e+00 : f32
    %938 = vector.broadcast %cst_356 : f32 to vector<2x32xf32>
    %939 = arith.addf %938, %937 : vector<2x32xf32>
    %940 = arith.divf %938, %939 : vector<2x32xf32>
    %941 = vector.extract_strided_slice %934 {offsets = [0, 32], sizes = [2, 32], strides = [1, 1]} : vector<2x128xf32> to vector<2x32xf32>
    %942 = arith.negf %941 : vector<2x32xf32>
    %943 = math.exp %942 : vector<2x32xf32>
    %cst_357 = arith.constant 1.000000e+00 : f32
    %944 = vector.broadcast %cst_357 : f32 to vector<2x32xf32>
    %945 = arith.addf %944, %943 : vector<2x32xf32>
    %946 = arith.divf %944, %945 : vector<2x32xf32>
    %947 = vector.extract_strided_slice %934 {offsets = [0, 64], sizes = [2, 32], strides = [1, 1]} : vector<2x128xf32> to vector<2x32xf32>
    %948 = math.tanh %947 : vector<2x32xf32>
    %949 = vector.extract_strided_slice %934 {offsets = [0, 96], sizes = [2, 32], strides = [1, 1]} : vector<2x128xf32> to vector<2x32xf32>
    %950 = arith.negf %949 : vector<2x32xf32>
    %951 = math.exp %950 : vector<2x32xf32>
    %cst_358 = arith.constant 1.000000e+00 : f32
    %952 = vector.broadcast %cst_358 : f32 to vector<2x32xf32>
    %953 = arith.addf %952, %951 : vector<2x32xf32>
    %954 = arith.divf %952, %953 : vector<2x32xf32>
    %955 = arith.mulf %946, %929 : vector<2x32xf32>
    %956 = arith.mulf %940, %948 : vector<2x32xf32>
    %957 = arith.addf %955, %956 : vector<2x32xf32>
    %958 = math.tanh %957 : vector<2x32xf32>
    %959 = arith.mulf %954, %958 : vector<2x32xf32>
    %c6_359 = arith.constant 6 : index
    %c0_360 = arith.constant 0 : index
    %960 = vector.load %arg21[%c6_359, %c0_360] : memref<14x32xf32, #tpu.memory_space<vmem>>, vector<2x32xf32>
    tpu.vector_store %arg21[%c6_359, %c0_360], %959 {strides = array<i32>} : memref<14x32xf32, #tpu.memory_space<vmem>>, vector<2x32xf32>,
    %cst_361 = arith.constant dense<0.000000e+00> : vector<2x128xf32>
    %961 = tpu.matmul %959, %846, %cst_361 {dimension_numbers = #tpu.dot_dimension_numbers<[1], [0], [0], [1], [0, 0, 1, 1], [], []>} : vector<2x32xf32>, vector<32x128xf32>, vector<2x128xf32> -> vector<2x128xf32>
    %962 = arith.addf %841, %961 : vector<2x128xf32>
    %963 = vector.extract_strided_slice %962 {offsets = [0, 0], sizes = [2, 32], strides = [1, 1]} : vector<2x128xf32> to vector<2x32xf32>
    %964 = arith.negf %963 : vector<2x32xf32>
    %965 = math.exp %964 : vector<2x32xf32>
    %cst_362 = arith.constant 1.000000e+00 : f32
    %966 = vector.broadcast %cst_362 : f32 to vector<2x32xf32>
    %967 = arith.addf %966, %965 : vector<2x32xf32>
    %968 = arith.divf %966, %967 : vector<2x32xf32>
    %969 = vector.extract_strided_slice %962 {offsets = [0, 32], sizes = [2, 32], strides = [1, 1]} : vector<2x128xf32> to vector<2x32xf32>
    %970 = arith.negf %969 : vector<2x32xf32>
    %971 = math.exp %970 : vector<2x32xf32>
    %cst_363 = arith.constant 1.000000e+00 : f32
    %972 = vector.broadcast %cst_363 : f32 to vector<2x32xf32>
    %973 = arith.addf %972, %971 : vector<2x32xf32>
    %974 = arith.divf %972, %973 : vector<2x32xf32>
    %975 = vector.extract_strided_slice %962 {offsets = [0, 64], sizes = [2, 32], strides = [1, 1]} : vector<2x128xf32> to vector<2x32xf32>
    %976 = math.tanh %975 : vector<2x32xf32>
    %977 = vector.extract_strided_slice %962 {offsets = [0, 96], sizes = [2, 32], strides = [1, 1]} : vector<2x128xf32> to vector<2x32xf32>
    %978 = arith.negf %977 : vector<2x32xf32>
    %979 = math.exp %978 : vector<2x32xf32>
    %cst_364 = arith.constant 1.000000e+00 : f32
    %980 = vector.broadcast %cst_364 : f32 to vector<2x32xf32>
    %981 = arith.addf %980, %979 : vector<2x32xf32>
    %982 = arith.divf %980, %981 : vector<2x32xf32>
    %983 = arith.mulf %974, %957 : vector<2x32xf32>
    %984 = arith.mulf %968, %976 : vector<2x32xf32>
    %985 = arith.addf %983, %984 : vector<2x32xf32>
    %986 = math.tanh %985 : vector<2x32xf32>
    %987 = arith.mulf %982, %986 : vector<2x32xf32>
    %c4_365 = arith.constant 4 : index
    %c0_366 = arith.constant 0 : index
    %988 = vector.load %arg21[%c4_365, %c0_366] : memref<14x32xf32, #tpu.memory_space<vmem>>, vector<2x32xf32>
    tpu.vector_store %arg21[%c4_365, %c0_366], %987 {strides = array<i32>} : memref<14x32xf32, #tpu.memory_space<vmem>>, vector<2x32xf32>,
    %cst_367 = arith.constant dense<0.000000e+00> : vector<2x128xf32>
    %989 = tpu.matmul %987, %846, %cst_367 {dimension_numbers = #tpu.dot_dimension_numbers<[1], [0], [0], [1], [0, 0, 1, 1], [], []>} : vector<2x32xf32>, vector<32x128xf32>, vector<2x128xf32> -> vector<2x128xf32>
    %990 = arith.addf %840, %989 : vector<2x128xf32>
    %991 = vector.extract_strided_slice %990 {offsets = [0, 0], sizes = [2, 32], strides = [1, 1]} : vector<2x128xf32> to vector<2x32xf32>
    %992 = arith.negf %991 : vector<2x32xf32>
    %993 = math.exp %992 : vector<2x32xf32>
    %cst_368 = arith.constant 1.000000e+00 : f32
    %994 = vector.broadcast %cst_368 : f32 to vector<2x32xf32>
    %995 = arith.addf %994, %993 : vector<2x32xf32>
    %996 = arith.divf %994, %995 : vector<2x32xf32>
    %997 = vector.extract_strided_slice %990 {offsets = [0, 32], sizes = [2, 32], strides = [1, 1]} : vector<2x128xf32> to vector<2x32xf32>
    %998 = arith.negf %997 : vector<2x32xf32>
    %999 = math.exp %998 : vector<2x32xf32>
    %cst_369 = arith.constant 1.000000e+00 : f32
    %1000 = vector.broadcast %cst_369 : f32 to vector<2x32xf32>
    %1001 = arith.addf %1000, %999 : vector<2x32xf32>
    %1002 = arith.divf %1000, %1001 : vector<2x32xf32>
    %1003 = vector.extract_strided_slice %990 {offsets = [0, 64], sizes = [2, 32], strides = [1, 1]} : vector<2x128xf32> to vector<2x32xf32>
    %1004 = math.tanh %1003 : vector<2x32xf32>
    %1005 = vector.extract_strided_slice %990 {offsets = [0, 96], sizes = [2, 32], strides = [1, 1]} : vector<2x128xf32> to vector<2x32xf32>
    %1006 = arith.negf %1005 : vector<2x32xf32>
    %1007 = math.exp %1006 : vector<2x32xf32>
    %cst_370 = arith.constant 1.000000e+00 : f32
    %1008 = vector.broadcast %cst_370 : f32 to vector<2x32xf32>
    %1009 = arith.addf %1008, %1007 : vector<2x32xf32>
    %1010 = arith.divf %1008, %1009 : vector<2x32xf32>
    %1011 = arith.mulf %1002, %985 : vector<2x32xf32>
    %1012 = arith.mulf %996, %1004 : vector<2x32xf32>
    %1013 = arith.addf %1011, %1012 : vector<2x32xf32>
    %1014 = math.tanh %1013 : vector<2x32xf32>
    %1015 = arith.mulf %1010, %1014 : vector<2x32xf32>
    %c2_371 = arith.constant 2 : index
    %c0_372 = arith.constant 0 : index
    %1016 = vector.load %arg21[%c2_371, %c0_372] : memref<14x32xf32, #tpu.memory_space<vmem>>, vector<2x32xf32>
    tpu.vector_store %arg21[%c2_371, %c0_372], %1015 {strides = array<i32>} : memref<14x32xf32, #tpu.memory_space<vmem>>, vector<2x32xf32>,
    %cst_373 = arith.constant dense<0.000000e+00> : vector<2x128xf32>
    %1017 = tpu.matmul %1015, %846, %cst_373 {dimension_numbers = #tpu.dot_dimension_numbers<[1], [0], [0], [1], [0, 0, 1, 1], [], []>} : vector<2x32xf32>, vector<32x128xf32>, vector<2x128xf32> -> vector<2x128xf32>
    %1018 = arith.addf %839, %1017 : vector<2x128xf32>
    %1019 = vector.extract_strided_slice %1018 {offsets = [0, 0], sizes = [2, 32], strides = [1, 1]} : vector<2x128xf32> to vector<2x32xf32>
    %1020 = arith.negf %1019 : vector<2x32xf32>
    %1021 = math.exp %1020 : vector<2x32xf32>
    %cst_374 = arith.constant 1.000000e+00 : f32
    %1022 = vector.broadcast %cst_374 : f32 to vector<2x32xf32>
    %1023 = arith.addf %1022, %1021 : vector<2x32xf32>
    %1024 = arith.divf %1022, %1023 : vector<2x32xf32>
    %1025 = vector.extract_strided_slice %1018 {offsets = [0, 32], sizes = [2, 32], strides = [1, 1]} : vector<2x128xf32> to vector<2x32xf32>
    %1026 = arith.negf %1025 : vector<2x32xf32>
    %1027 = math.exp %1026 : vector<2x32xf32>
    %cst_375 = arith.constant 1.000000e+00 : f32
    %1028 = vector.broadcast %cst_375 : f32 to vector<2x32xf32>
    %1029 = arith.addf %1028, %1027 : vector<2x32xf32>
    %1030 = arith.divf %1028, %1029 : vector<2x32xf32>
    %1031 = vector.extract_strided_slice %1018 {offsets = [0, 64], sizes = [2, 32], strides = [1, 1]} : vector<2x128xf32> to vector<2x32xf32>
    %1032 = math.tanh %1031 : vector<2x32xf32>
    %1033 = vector.extract_strided_slice %1018 {offsets = [0, 96], sizes = [2, 32], strides = [1, 1]} : vector<2x128xf32> to vector<2x32xf32>
    %1034 = arith.negf %1033 : vector<2x32xf32>
    %1035 = math.exp %1034 : vector<2x32xf32>
    %cst_376 = arith.constant 1.000000e+00 : f32
    %1036 = vector.broadcast %cst_376 : f32 to vector<2x32xf32>
    %1037 = arith.addf %1036, %1035 : vector<2x32xf32>
    %1038 = arith.divf %1036, %1037 : vector<2x32xf32>
    %1039 = arith.mulf %1030, %1013 : vector<2x32xf32>
    %1040 = arith.mulf %1024, %1032 : vector<2x32xf32>
    %1041 = arith.addf %1039, %1040 : vector<2x32xf32>
    %1042 = math.tanh %1041 : vector<2x32xf32>
    %1043 = arith.mulf %1038, %1042 : vector<2x32xf32>
    %c0_377 = arith.constant 0 : index
    %c0_378 = arith.constant 0 : index
    %1044 = vector.load %arg21[%c0_377, %c0_378] : memref<14x32xf32, #tpu.memory_space<vmem>>, vector<2x32xf32>
    tpu.vector_store %arg21[%c0_377, %c0_378], %1043 {strides = array<i32>} : memref<14x32xf32, #tpu.memory_space<vmem>>, vector<2x32xf32>,
    %c0_379 = arith.constant 0 : index
    %c0_380 = arith.constant 0 : index
    %1045 = vector.load %arg20[%c0_379, %c0_380] : memref<14x32xf32, #tpu.memory_space<vmem>>, vector<14x32xf32>
    %c65_381 = arith.constant 65 : index
    %c0_382 = arith.constant 0 : index
    %1046 = vector.load %arg11[%c65_381, %c0_382] : memref<163x128xf32, #tpu.memory_space<vmem>>, vector<32x32xf32>
    %cst_383 = arith.constant dense<0.000000e+00> : vector<14x32xf32>
    %1047 = tpu.matmul %1045, %1046, %cst_383 {dimension_numbers = #tpu.dot_dimension_numbers<[1], [0], [0], [1], [0, 0, 1, 1], [], []>} : vector<14x32xf32>, vector<32x32xf32>, vector<14x32xf32> -> vector<14x32xf32>
    %c0_384 = arith.constant 0 : index
    %c0_385 = arith.constant 0 : index
    %1048 = vector.load %arg21[%c0_384, %c0_385] : memref<14x32xf32, #tpu.memory_space<vmem>>, vector<14x32xf32>
    %c97_386 = arith.constant 97 : index
    %c0_387 = arith.constant 0 : index
    %1049 = vector.load %arg11[%c97_386, %c0_387] : memref<163x128xf32, #tpu.memory_space<vmem>>, vector<32x32xf32>
    %cst_388 = arith.constant dense<0.000000e+00> : vector<14x32xf32>
    %1050 = tpu.matmul %1048, %1049, %cst_388 {dimension_numbers = #tpu.dot_dimension_numbers<[1], [0], [0], [1], [0, 0, 1, 1], [], []>} : vector<14x32xf32>, vector<32x32xf32>, vector<14x32xf32> -> vector<14x32xf32>
    %1051 = arith.addf %1047, %1050 : vector<14x32xf32>
    %c129 = arith.constant 129 : index
    %c0_389 = arith.constant 0 : index
    %1052 = vector.load %arg11[%c129, %c0_389] : memref<163x128xf32, #tpu.memory_space<vmem>>, vector<1x32xf32>
    %1053 = vector.broadcast %1052 : vector<1x32xf32> to vector<14x32xf32>
    %1054 = arith.addf %1051, %1053 : vector<14x32xf32>
    %c130 = arith.constant 130 : index
    %c0_390 = arith.constant 0 : index
    %1055 = vector.load %arg11[%c130, %c0_390] : memref<163x128xf32, #tpu.memory_space<vmem>>, vector<32x10xf32>
    %cst_391 = arith.constant dense<0.000000e+00> : vector<14x10xf32>
    %1056 = tpu.matmul %1054, %1055, %cst_391 {dimension_numbers = #tpu.dot_dimension_numbers<[1], [0], [0], [1], [0, 0, 1, 1], [], []>} : vector<14x32xf32>, vector<32x10xf32>, vector<14x10xf32> -> vector<14x10xf32>
    %c162 = arith.constant 162 : index
    %c0_392 = arith.constant 0 : index
    %1057 = vector.load %arg11[%c162, %c0_392] : memref<163x128xf32, #tpu.memory_space<vmem>>, vector<1x10xf32>
    %1058 = vector.broadcast %1057 : vector<1x10xf32> to vector<14x10xf32>
    %1059 = arith.addf %1056, %1058 : vector<14x10xf32>
    %c0_393 = arith.constant 0 : index
    %c0_394 = arith.constant 0 : index
    %1060 = vector.load %arg12[%c0_393, %c0_394] : memref<14x10xf32, #tpu.memory_space<vmem>>, vector<14x10xf32>
    tpu.vector_store %arg12[%c0_393, %c0_394], %1059 {strides = array<i32>} : memref<14x10xf32, #tpu.memory_space<vmem>>, vector<14x10xf32>,
    return
  }
}

</mosaic_0001>

<bundles_post_ra>
// kernel: model_forward.1
= control target key start
LH: loop header
LB: loop body
LE: loop exit
PB: predicated region body
PF: predicated region fallthrough
CT: control target
= control target key end

     0   :  { %17 = vsyncpa [#allocation12], 0  ;;  %s13884_s0 = inlined_call_operand.hbm [shape: f32[64,32], index: 0, kind: input, shape index: {}]   ;;  %s13885_s1 = inlined_call_operand.hbm [shape: f32[3,32,128], index: 1, kind: input, shape index: {}]   ;;  %s13886_s2 = inlined_call_operand.hbm [shape: f32[3,64,128], index: 2, kind: input, shape index: {}]   ;;  %s13887_s3 = inlined_call_operand.hbm [shape: f32[3,64,128], index: 3, kind: input, shape index: {}]   ;;  %s13888_s4 = inlined_call_operand.vmem [shape: f32[3,128,128], index: 4, kind: input, shape index: {}]   ;;  %s13889_s5 = inlined_call_operand.hbm [shape: f32[3,128,256], index: 5, kind: input, shape index: {}]   ;;  %s13890_s6 = inlined_call_operand.vmem [shape: f32[3,256,256], index: 6, kind: input, shape index: {}]   ;;  %s13891_s7 = inlined_call_operand.vmem [shape: f32[2,256,224], index: 7, kind: input, shape index: {}]   ;;  %s13892_s8 = inlined_call_operand.hbm [shape: f32[9,256], index: 8, kind: input, shape index: {}]   ;;  %s13893_s9 = inlined_call_operand.hbm [shape: f32[246,128], index: 9, kind: input, shape index: {}]   ;;  %s13894_s10 = inlined_call_operand.hbm [shape: f32[130,256], index: 10, kind: input, shape index: {}]   ;;  %s13895_s11 = inlined_call_operand.hbm [shape: f32[163,128], index: 11, kind: input, shape index: {}]   ;;  %s13896_s12 = inlined_call_operand.vmem [shape: f32[14,10], index: 12, kind: output, shape index: {}]  }
   0x1   :  { %18 = vsyncpa [#allocation14], 0 }
   0x2   :  { %19 = vsyncpa [#allocation17], 0 }
   0x3   :  { %20 = vsyncpa [#allocation20], 0 }
   0x4   :  { %21 = vsyncpa [#allocation23], 0  ;;  %s11479_s21 = smov [#allocation13]   ;;  %s11480_s23 = smov [#allocation16]  }
   0x5   :  { %s39_s22 = sshll.u32 %s11479_s21, 4  ;;  %s63_s24 = sshll.u32 %s11480_s23, 4  ;;  %s40_s22 = int_to_ptr.vmem [resolvable:$true] %s39_s22  ;;  %s11564_s24 = int_to_ptr.vmem [resolvable:$true] %s63_s24 }
   0x6   :  { %s11271_s27 = scalar_lea.hbm %s13885_s1, 1536 }
   0x7   :  { %p11272_p0 = scmp.ne.s32.totalorder %s13885_s1, %s11271_s27  ;;  %p11275_p1 = scmp.lt.u32.totalorder %s11271_s27, %s13885_s1 }
   0x9   :  { %p11277_p2 = pnand %p11275_p1, %p11272_p0 }
   0xb   :  { %11280 = shalt.err (!%p11277_p2)
}
   0xc   :  { %s11281_s14 = scalar_lea.vmem %s40_s22, 1536  ;;  %p11286_p4 = scmp.lt.s32.totalorder %s40_s22, %s40_s22 }
   0xd   :  { %p11282_p3 = scmp.ne.s32.totalorder %s40_s22, %s11281_s14  ;;  %p11287_p5 = scmp.lt.s32.totalorder %s11281_s14, %s11281_s14 }
   0xf   :  { %p11288_p6 = por %p11287_p5, %p11286_p4 }
  0x11   :  { %p11289_p7 = pnand %p11288_p6, %p11282_p3 }
  0x13   :  { %11292 = shalt.err (!%p11289_p7)
}
  0x14   :  { %s11481_s15 = smov 128   ;;  %s11482_s16 = smov 8  }
  0x15   :  { %45 = dma.hbm_to_vmem [thread:$0]  %s13885_s1, 1536, %s40_s22, [#allocation14], %s11481_s15, %s11481_s15, %s11482_s16  }
  0x16   :  { %s11293_s21 = scalar_lea.hbm %s13887_s3, 3072 }
  0x17   :  { %p11294_p8 = scmp.ne.s32.totalorder %s13887_s3, %s11293_s21  ;;  %p11297_p9 = scmp.lt.u32.totalorder %s11293_s21, %s13887_s3 }
  0x19   :  { %p11299_p10 = pnand %p11297_p9, %p11294_p8 }
  0x1b   :  { %11302 = shalt.err (!%p11299_p10)
}
  0x1c   :  { %s11303_s28 = scalar_lea.vmem %s11564_s24, 3072  ;;  %p11308_p12 = scmp.lt.s32.totalorder %s11564_s24, %s11564_s24 }
  0x1d   :  { %p11304_p11 = scmp.ne.s32.totalorder %s11564_s24, %s11303_s28  ;;  %p11309_p13 = scmp.lt.s32.totalorder %s11303_s28, %s11303_s28 }
  0x1f   :  { %p11310_p0 = por %p11309_p13, %p11308_p12 }
  0x21   :  { %p11311_p1 = pnand %p11310_p0, %p11304_p11 }
  0x23   :  { %11314 = shalt.err (!%p11311_p1)
}
  0x24   :  { %69 = dma.hbm_to_vmem [thread:$0]  %s13887_s3, 3072, %s11564_s24, [#allocation17], %s11481_s15, %s11481_s15, %s11482_s16  }
  0x25   :  { %s11483_s29 = smov [#allocation19]   ;;  %s11484_s13 = smov [#allocation22]  }
  0x26   :  { %s93_s30 = sshll.u32 %s11483_s29, 4  ;;  %s117_s14 = sshll.u32 %s11484_s13, 4  ;;  %s94_s30 = int_to_ptr.vmem [resolvable:$true] %s93_s30  ;;  %s11601_s14 = int_to_ptr.vmem [resolvable:$true] %s117_s14 }
  0x27   :  { %s11315_s19 = scalar_lea.hbm %s13892_s8, 512 }
  0x28   :  { %p11316_p2 = scmp.ne.s32.totalorder %s13892_s8, %s11315_s19  ;;  %p11319_p3 = scmp.lt.u32.totalorder %s11315_s19, %s13892_s8 }
  0x2a   :  { %p11321_p4 = pnand %p11319_p3, %p11316_p2 }
  0x2c   :  { %11324 = shalt.err (!%p11321_p4)
}
  0x2d   :  { %s11325_s3 = scalar_lea.vmem %s94_s30, 512  ;;  %p11330_p6 = scmp.lt.s32.totalorder %s94_s30, %s94_s30 }
  0x2e   :  { %p11326_p5 = scmp.ne.s32.totalorder %s94_s30, %s11325_s3  ;;  %p11331_p7 = scmp.lt.s32.totalorder %s11325_s3, %s11325_s3 }
  0x30   :  { %p11332_p8 = por %p11331_p7, %p11330_p6 }
  0x32   :  { %p11333_p9 = pnand %p11332_p8, %p11326_p5 }
  0x34   :  { %11336 = shalt.err (!%p11333_p9)
}
  0x35   :  { %s11485_s24 = smov 256   ;;  %s11486_s26 = smov 16  }
  0x36   :  { %99 = dma.hbm_to_vmem [thread:$0]  %s13892_s8, 512, %s94_s30, [#allocation20], %s11485_s24, %s11485_s24, %s11486_s26  }
  0x37   :  { %s11337_s29 = scalar_lea.hbm %s13894_s10, 4352 }
  0x38   :  { %p11338_p10 = scmp.ne.s32.totalorder %s13894_s10, %s11337_s29  ;;  %p11341_p11 = scmp.lt.u32.totalorder %s11337_s29, %s13894_s10 }
  0x3a   :  { %p11343_p12 = pnand %p11341_p11, %p11338_p10 }
  0x3c   :  { %11346 = shalt.err (!%p11343_p12)
}
  0x3d   :  { %s11347_s20 = scalar_lea.vmem %s11601_s14, 4352  ;;  %p11352_p0 = scmp.lt.s32.totalorder %s11601_s14, %s11601_s14 }
  0x3e   :  { %p11348_p13 = scmp.ne.s32.totalorder %s11601_s14, %s11347_s20  ;;  %p11353_p1 = scmp.lt.s32.totalorder %s11347_s20, %s11347_s20 }
  0x40   :  { %p11354_p2 = por %p11353_p1, %p11352_p0 }
  0x42   :  { %p11355_p3 = pnand %p11354_p2, %p11348_p13 }
  0x44   :  { %11358 = shalt.err (!%p11355_p3)
}
  0x45   :  { %123 = dma.hbm_to_vmem [thread:$0]  %s13894_s10, 4352, %s11601_s14, [#allocation23], %s11485_s24, %s11485_s24, %s11486_s26  }
  0x46   :  { %s11487_s21 = smov [#allocation11]   ;;  %s11488_s25 = smov [#allocation15]  }
  0x47   :  { %s27_s23 = sshll.u32 %s11487_s21, 4  ;;  %s51_s3 = sshll.u32 %s11488_s25, 4  ;;  %s28_s23 = int_to_ptr.vmem [resolvable:$true] %s27_s23  ;;  %s11638_s3 = int_to_ptr.vmem [resolvable:$true] %s51_s3 }
  0x48   :  { %s11359_s1 = scalar_lea.hbm %s13884_s0, 1024 }
  0x49   :  { %p11360_p4 = scmp.ne.s32.totalorder %s13884_s0, %s11359_s1  ;;  %p11363_p5 = scmp.lt.u32.totalorder %s11359_s1, %s13884_s0 }
  0x4b   :  { %p11365_p6 = pnand %p11363_p5, %p11360_p4 }
  0x4d   :  { %11368 = shalt.err (!%p11365_p6)
}
  0x4e   :  { %s11369_s10 = scalar_lea.vmem %s28_s23, 1024  ;;  %p11374_p8 = scmp.lt.s32.totalorder %s28_s23, %s28_s23 }
  0x4f   :  { %p11370_p7 = scmp.ne.s32.totalorder %s28_s23, %s11369_s10  ;;  %p11375_p9 = scmp.lt.s32.totalorder %s11369_s10, %s11369_s10 }
  0x51   :  { %p11376_p10 = por %p11375_p9, %p11374_p8 }
  0x53   :  { %p11377_p11 = pnand %p11376_p10, %p11370_p7 }
  0x55   :  { %11380 = shalt.err (!%p11377_p11)
}
  0x56   :  { %33 = dma.hbm_to_vmem [thread:$0]  %s13884_s0, 1024, %s28_s23, [#allocation12], %s11481_s15, %s11481_s15, %s11482_s16  }
  0x57   :  { %s11381_s8 = scalar_lea.hbm %s13886_s2, 3072 }
  0x58   :  { %p11382_p12 = scmp.ne.s32.totalorder %s13886_s2, %s11381_s8  ;;  %p11385_p13 = scmp.lt.u32.totalorder %s11381_s8, %s13886_s2 }
  0x5a   :  { %p11387_p0 = pnand %p11385_p13, %p11382_p12 }
  0x5c   :  { %11390 = shalt.err (!%p11387_p0)
}
  0x5d   :  { %s11391_s28 = scalar_lea.vmem %s11638_s3, 3072  ;;  %p11396_p2 = scmp.lt.s32.totalorder %s11638_s3, %s11638_s3 }
  0x5e   :  { %p11392_p1 = scmp.ne.s32.totalorder %s11638_s3, %s11391_s28  ;;  %p11397_p3 = scmp.lt.s32.totalorder %s11391_s28, %s11391_s28 }
  0x60   :  { %p11398_p4 = por %p11397_p3, %p11396_p2 }
  0x62   :  { %p11399_p5 = pnand %p11398_p4, %p11392_p1 }
  0x64   :  { %11402 = shalt.err (!%p11399_p5)
}
  0x65   :  { %57 = dma.hbm_to_vmem [thread:$0]  %s13886_s2, 3072, %s11638_s3, [#allocation14], %s11481_s15, %s11481_s15, %s11482_s16  }
  0x66   :  { %s11489_s1 = smov [#allocation18]   ;;  %s11490_s29 = smov [#allocation21]  }
  0x67   :  { %s77_s22 = sshll.u32 %s11489_s1, 4  ;;  %s105_s13 = sshll.u32 %s11490_s29, 4  ;;  %s78_s22 = int_to_ptr.vmem [resolvable:$true] %s77_s22  ;;  %s11675_s13 = int_to_ptr.vmem [resolvable:$true] %s105_s13 }
  0x68   :  { %s11403_s14 = scalar_lea.hbm %s13889_s5, 12288 }
  0x69   :  { %p11404_p6 = scmp.ne.s32.totalorder %s13889_s5, %s11403_s14  ;;  %p11407_p7 = scmp.lt.u32.totalorder %s11403_s14, %s13889_s5 }
  0x6b   :  { %p11409_p8 = pnand %p11407_p7, %p11404_p6 }
  0x6d   :  { %11412 = shalt.err (!%p11409_p8)
}
  0x6e   :  { %s11413_s2 = scalar_lea.vmem %s78_s22, 12288  ;;  %p11418_p10 = scmp.lt.s32.totalorder %s78_s22, %s78_s22 }
  0x6f   :  { %p11414_p9 = scmp.ne.s32.totalorder %s78_s22, %s11413_s2  ;;  %p11419_p11 = scmp.lt.s32.totalorder %s11413_s2, %s11413_s2 }
  0x71   :  { %p11420_p12 = por %p11419_p11, %p11418_p10 }
  0x73   :  { %p11421_p13 = pnand %p11420_p12, %p11414_p9 }
  0x75   :  { %11424 = shalt.err (!%p11421_p13)
}
  0x76   :  { %83 = dma.hbm_to_vmem [thread:$0]  %s13889_s5, 12288, %s78_s22, [#allocation17], %s11485_s24, %s11485_s24, %s11486_s26  }
  0x77   :  { %s11425_s27 = scalar_lea.hbm %s13893_s9, 3968 }
  0x78   :  { %p11426_p0 = scmp.ne.s32.totalorder %s13893_s9, %s11425_s27  ;;  %p11429_p1 = scmp.lt.u32.totalorder %s11425_s27, %s13893_s9 }
  0x7a   :  { %p11431_p2 = pnand %p11429_p1, %p11426_p0 }
  0x7c   :  { %11434 = shalt.err (!%p11431_p2)
}
  0x7d   :  { %s11435_s29 = scalar_lea.vmem %s11675_s13, 3968  ;;  %p11440_p4 = scmp.lt.s32.totalorder %s11675_s13, %s11675_s13 }
  0x7e   :  { %p11436_p3 = scmp.ne.s32.totalorder %s11675_s13, %s11435_s29  ;;  %p11441_p5 = scmp.lt.s32.totalorder %s11435_s29, %s11435_s29 }
  0x80   :  { %p11442_p6 = por %p11441_p5, %p11440_p4 }
  0x82   :  { %p11443_p7 = pnand %p11442_p6, %p11436_p3 }
  0x84   :  { %11446 = shalt.err (!%p11443_p7)
}
  0x85   :  { %111 = dma.hbm_to_vmem [thread:$0]  %s13893_s9, 3968, %s11675_s13, [#allocation20], %s11481_s15, %s11481_s15, %s11482_s16  }
  0x86   :  { %s11491_s26 = smov [#allocation24]   ;;  %s11447_s14 = scalar_lea.hbm %s13895_s11, 2688 }
  0x87   :  { %s129_s22 = sshll.u32 %s11491_s26, 4  ;;  %p11448_p8 = scmp.ne.s32.totalorder %s13895_s11, %s11447_s14  ;;  %s130_s22 = int_to_ptr.vmem [resolvable:$true] %s129_s22 }
  0x88   :  { %p11451_p9 = scmp.lt.u32.totalorder %s11447_s14, %s13895_s11 }
  0x8a   :  { %p11453_p10 = pnand %p11451_p9, %p11448_p8 }
  0x8c   :  { %11456 = shalt.err (!%p11453_p10)
}
  0x8d   :  { %s11457_s2 = scalar_lea.vmem %s130_s22, 2688  ;;  %p11462_p12 = scmp.lt.s32.totalorder %s130_s22, %s130_s22 }
  0x8e   :  { %p11458_p11 = scmp.ne.s32.totalorder %s130_s22, %s11457_s2  ;;  %p11463_p13 = scmp.lt.s32.totalorder %s11457_s2, %s11457_s2 }
  0x90   :  { %p11464_p0 = por %p11463_p13, %p11462_p12 }
  0x92   :  { %p11465_p1 = pnand %p11464_p0, %p11458_p11 }
  0x94   :  { %11468 = shalt.err (!%p11465_p1)
}
  0x95   :  { %135 = dma.hbm_to_vmem [thread:$0]  %s13895_s11, 2688, %s130_s22, [#allocation23], %s11481_s15, %s11481_s15, %s11482_s16  }
  0x96   :  { %11469 = dma.done.wait [#allocation12], 1024  }
  0x97   :  { %11470 = vsyncadd [#allocation12], 4294966272 }
  0x98   :  { %11471 = dma.done.wait [#allocation14], 4608  }
  0x99   :  { %11472 = vsyncadd [#allocation14], 4294962688 }
  0x9a   :  { %11473 = dma.done.wait [#allocation17], 15360  }
  0x9b   :  { %11474 = vsyncadd [#allocation17], 4294951936 }
  0x9c   :  { %11475 = dma.done.wait [#allocation20], 4480  }
  0x9d   :  { %11476 = vsyncadd [#allocation20], 4294962816 }
  0x9e   :  { %11477 = dma.done.wait [#allocation23], 7040  }
  0x9f   :  { %11478 = vsyncadd [#allocation23], 4294960256  ;;  %v11492_v0 = vmov 0.0|0.0   ;;  %vm11493_vm0 = vmmov 0   ;;  %v11494_v1 = vmov 0.0   ;;  %v172_v2 = vld [vmem:[#allocation11] sm:$0xff] }
  0xa0   :  { %10046 = vmatprep.subr.bf16.mxu0 %v11492_v0  ;;  %9123 = vmatprep.mubr.msk.f32.mxu0 %vm11493_vm0, %v11494_v1  ;;  %v173_v3 = vld [vmem:[#allocation11 + $0x8] sm:$0xff]  ;;  %v174_v4 = vld [vmem:[#allocation11 + $0x10] sm:$0xff]  ;;  %v175_v6 = vld [vmem:[#allocation11 + $0x18] sm:$0xff]  ;;  %vm180_vm1 = vcmask 523264   ;;  %vm318_vm2 = vcmask 261120   ;;  %vm327_vm3 = vcmask 257024  }
  0xa1   :  { %10058 = vmatprep.subr.bf16.mxu1 %v11492_v0  ;;  %9158 = vmatprep.mubr.msk.f32.mxu1 %vm11493_vm0, %v11494_v1  ;;  %v10047_v5 = vpack.c.bf16 %v173_v3, %v172_v2  ;;  %v10050_v7 = vpack.c.bf16 %v175_v6, %v174_v4  ;;  %v176_v8 = vld [vmem:[#allocation11 + $0x20] sm:$0xff]  ;;  %v177_v9 = vld [vmem:[#allocation11 + $0x28] sm:$0xff]  ;;  %v178_v11 = vld [vmem:[#allocation11 + $0x30] sm:$0xff]  ;;  %s11495_s11 = smov 64   ;;  %vm880_vm4 = vcmask 1041408   ;;  %vm864_vm5 = vcmask 539648  }
  0xa2   :  { %v10053_v10 = vpack.c.bf16 %v177_v9, %v176_v8  ;;  %v179_v12 = vld [vmem:[#allocation11 + $0x38] sm:$0xff]  ;;  %v163_v14 = vld [vmem:[#allocation21] sm:$0xff]  ;;  %v164_v15 = vld [vmem:[#allocation21 + $0x8] sm:$0xff]  ;;  %vm1088_vm6 = vcmask 519168   ;;  %vm1493_vm7 = vcmask 277504   ;;  %vm1996_vm8 = vcmask 146432  }
  0xa3   :  { %10048 = vmatpush3.bf16.msra.mxu0 %v10047_v5  ;;  %v10056_v13 = vpack.c.bf16 %v179_v12, %v178_v11  ;;  %v165_v16 = vld [vmem:[#allocation21 + $0x10] sm:$0xff]  ;;  %v166_v17 = vld [vmem:[#allocation21 + $0x18] sm:$0xff]  ;;  %v167_v18 = vld [vmem:[#allocation21 + $0x20] sm:$0xff]  ;;  %vm11496_vm9 = vmmov 1   ;;  %vm2953_vm11 = vcmask 80896   ;;  %vm3188_vm12 = vcmask 1046528  }
  0xa4   :  { %10049 = vmatprep.subr.bf16.mxu0 %v11492_v0  ;;  %v168_v19 = vld [vmem:[#allocation21 + $0x28] sm:$0xff]  ;;  %v169_v20 = vld [vmem:[#allocation21 + $0x30] sm:$0xff]  ;;  %v170_v21 = vld [vmem:[#allocation21 + $0x38] sm:$0xff]  ;;  %vm3426_vm13 = vcmask 1045504   ;;  %vm4023_vm14 = vcmask 1042432   ;;  %vm4019_vm15 = vcmask 23552  }
  0xa5   :  { %v171_v22 = vld [vmem:[#allocation21 + $0x40] sm:$0xf]  ;;  %v353_v24 = vld [vmem:[#allocation13 + $0x28] sm:$0xff]  ;;  %v354_v29 = vld [vmem:[#allocation13 + $0x30] sm:$0xff]  ;;  %s11498_s15 = smov 96  }
  0xa6   :  { %v352_v23 = vld [vmem:[#allocation13 + $0x20] sm:$0xff]  ;;  %v641_v27 = vld [vmem:[#allocation13 + $0x48] sm:$0xff]  ;;  %v355_v30 = vld [vmem:[#allocation13 + $0x38] sm:$0xff] }
  0xa7   :  { %10051 = vmatpush3.bf16.msra.mxu0 %v10050_v7  ;;  %v640_v25 = vld [vmem:[#allocation13 + $0x40] sm:$0xff]  ;;  %v10059_v26 = vpack.c.bf16 %v353_v24, %v352_v23  ;;  %v642_v31 = vld [vmem:[#allocation13 + $0x50] sm:$0xff]  ;;  %v10062_v32 = vpack.c.bf16 %v355_v30, %v354_v29  ;;  %v643_v33 = vld [vmem:[#allocation13 + $0x58] sm:$0xff] }
  0xa8   :  { %10052 = vmatprep.subr.bf16.mxu0 %v11492_v0  ;;  %v10071_v28 = vpack.c.bf16 %v641_v27, %v640_v25  ;;  %v10074_v34 = vpack.c.bf16 %v643_v33, %v642_v31  ;;  %v338_v40 = vld [vmem:[#allocation13] sm:$0xff]  ;;  %v339_v41 = vld [vmem:[#allocation13 + $0x8] sm:$0xff]  ;;  %v340_v44 = vld [vmem:[#allocation13 + $0x10] sm:$0xff] }
  0xa9   :  { %10060 = vmatpush3.bf16.msra.mxu1 %v10059_v26  ;;  %v10065_v43 = vpack.c.bf16 %v339_v41, %v338_v40  ;;  %v341_v48 = vld [vmem:[#allocation13 + $0x18] sm:$0xff]  ;;  %vm12266_vm10 = vmpackc.low %vm880_vm4, %vm11496_vm9 }
  0xaa   :  { %10061 = vmatprep.subr.bf16.mxu1 %v11492_v0  ;;  %v10068_v50 = vpack.c.bf16 %v341_v48, %v340_v44 }
  0xab   :  { %10054 = vmatpush3.bf16.msra.mxu0 %v10053_v10 }
  0xac   :  { %10055 = vmatprep.subr.bf16.mxu0 %v11492_v0 }
  0xad   :  { %10063 = vmatpush3.bf16.msra.mxu1 %v10062_v32 }
  0xae   :  { %10064 = vmatprep.subr.bf16.mxu1 %v11492_v0 }
  0xaf   :  { %10057 = vmatpush3.bf16.msra.mxu0 %v10056_v13 }
  0xb0   :  { %10070 = vmatprep.subr.bf16.mxu0 %v11492_v0 }
  0xb2   :  { %9124 = vmatmul.mubr.msk.f32.vlgmr.msra.gmra.mrb[0].mxu0 %vm180_vm1, %v163_v14 }
  0xb3   :  { %9126 = vmatprep.mubr.msk.f32.mxu0 %vm11493_vm0, %v11494_v1  ;;  %10072 = vmatpush3.bf16.msra.mxu0 %v10071_v28 }
  0xb4   :  { %10073 = vmatprep.subr.bf16.mxu0 %v11492_v0 }
  0xb6   :  { %9127 = vmatmul.mubr.msk.f32.gmra.mrb[2].mxu0 %vm180_vm1, %v164_v15 }
  0xb7   :  { %9129 = vmatprep.mubr.msk.f32.mxu0 %vm11493_vm0, %v11494_v1  ;;  %10075 = vmatpush3.bf16.msra.mxu0 %v10074_v34 }
  0xb8   :  { %10088 = vmatprep.subr.bf16.mxu0 %v11492_v0 }
  0xba   :  { %9130 = vmatmul.mubr.msk.f32.gmra.mrb[4].mxu0 %vm180_vm1, %v165_v16 }
  0xbb   :  { %9132 = vmatprep.mubr.msk.f32.mxu0 %vm11493_vm0, %v11494_v1 }
  0xbe   :  { %9133 = vmatmul.mubr.msk.f32.gmra.mrb[6].mxu0 %vm180_vm1, %v166_v17 }
  0xbf   :  { %9135 = vmatprep.mubr.msk.f32.mxu0 %vm11493_vm0, %v11494_v1 }
  0xc2   :  { %9136 = vmatmul.mubr.msk.f32.gmra.mrb[8].mxu0 %vm180_vm1, %v167_v18 }
  0xc3   :  { %9138 = vmatprep.mubr.msk.f32.mxu0 %vm11493_vm0, %v11494_v1 }
  0xc6   :  { %9139 = vmatmul.mubr.msk.f32.gmra.mrb[10].mxu0 %vm180_vm1, %v168_v19 }
  0xc7   :  { %9141 = vmatprep.mubr.msk.f32.mxu0 %vm11493_vm0, %v11494_v1 }
  0xca   :  { %9142 = vmatmul.mubr.msk.f32.gmra.mrb[12].mxu0 %vm180_vm1, %v169_v20 }
  0xcb   :  { %9144 = vmatprep.mubr.msk.f32.mxu0 %vm11493_vm0, %v11494_v1 }
  0xce   :  { %9145 = vmatmul.mubr.msk.f32.gmra.mrb[14].mxu0 %vm180_vm1, %v170_v21 }
  0xcf   :  { %9147 = vmatprep.mubr.msk.f32.mxu0 %vm11493_vm0, %v11494_v1 }
  0xd2   :  { %9148 = vmatmul.mubr.msk.f32.gmra.mrb[16].mxu0 %vm180_vm1, %v171_v22 }
  0xd3   :  { %9228 = vmatprep.mubr.msk.f32.mxu0 %vm11493_vm0, %v11494_v1 }
 0x185   :  { %v274_v35 = vpop.f32.mrb[0].mxu0 }
 0x186   :  { %319 = vst.msk [vmem:[#allocation2] sm:$0xff] %vm318_vm2, %v274_v35  ;;  %v9125_v36 = vpop.f32.mrb[1].mxu0 }
 0x189   :  { %v279_v37 = vpop.f32.mrb[2].mxu0 }
 0x18a   :  { %320 = vst.msk [vmem:[#allocation2 + $0x8] sm:$0xff] %vm318_vm2, %v279_v37  ;;  %v9128_v38 = vpop.f32.mrb[3].mxu0 }
 0x18d   :  { %v284_v39 = vpop.f32.mrb[4].mxu0  ;;  %v329_v15 = vld [vmem:[#allocation2] sm:$0xff] }
 0x18e   :  { %321 = vst.msk [vmem:[#allocation2 + $0x10] sm:$0xff] %vm318_vm2, %v284_v39  ;;  %v9131_v42 = vpop.f32.mrb[5].mxu0 }
 0x191   :  { %v289_v45 = vpop.f32.mrb[6].mxu0  ;;  %v342_v46 = vld [vmem:[#allocation2 + $0x1] sm:$0xff] }
 0x192   :  { %v630_v47 = vld [vmem:[#allocation2 + $0x2] sm:$0xff]  ;;  %322 = vst.msk [vmem:[#allocation2 + $0x18] sm:$0xff] %vm318_vm2, %v289_v45  ;;  %v9134_v49 = vpop.f32.mrb[7].mxu0  ;;  %9159 = vmatmul.mubr.msk.f32.vlgmr.msra.gmra.mrb[0].mxu1 %vm318_vm2, %v342_v46 }
 0x193   :  { %9229 = vmatmul.mubr.msk.f32.vlgmr.msra.gmra.mrb[18].mxu0 %vm318_vm2, %v630_v47  ;;  %9161 = vmatprep.mubr.msk.f32.mxu1 %vm11493_vm0, %v11494_v1  ;;  %v330_v16 = vld [vmem:[#allocation2 + $0x8] sm:$0xff] }
 0x194   :  { %9231 = vmatprep.mubr.msk.f32.mxu0 %vm11493_vm0, %v11494_v1  ;;  %10066 = vmatpush3.bf16.msra.mxu1 %v10065_v43 }
 0x195   :  { %v294_v51 = vpop.f32.mrb[8].mxu0  ;;  %v343_v52 = vld [vmem:[#allocation2 + $0x9] sm:$0xff]  ;;  %10067 = vmatprep.subr.bf16.mxu1 %v11492_v0 }
 0x196   :  { %v631_v53 = vld [vmem:[#allocation2 + $0xa] sm:$0xff]  ;;  %323 = vst.msk [vmem:[#allocation2 + $0x20] sm:$0xff] %vm318_vm2, %v294_v51  ;;  %v9137_v54 = vpop.f32.mrb[9].mxu0  ;;  %9162 = vmatmul.mubr.msk.f32.gmra.mrb[2].mxu1 %vm318_vm2, %v343_v52 }
 0x197   :  { %9232 = vmatmul.mubr.msk.f32.gmra.mrb[20].mxu0 %vm318_vm2, %v631_v53  ;;  %9164 = vmatprep.mubr.msk.f32.mxu1 %vm11493_vm0, %v11494_v1  ;;  %v331_v17 = vld [vmem:[#allocation2 + $0x10] sm:$0xff] }
 0x198   :  { %9234 = vmatprep.mubr.msk.f32.mxu0 %vm11493_vm0, %v11494_v1  ;;  %10069 = vmatpush3.bf16.msra.mxu1 %v10068_v50 }
 0x199   :  { %v299_v55 = vpop.f32.mrb[10].mxu0  ;;  %v344_v56 = vld [vmem:[#allocation2 + $0x11] sm:$0xff]  ;;  %10076 = vmatprep.subr.bf16.mxu1 %v11492_v0 }
 0x19a   :  { %v632_v57 = vld [vmem:[#allocation2 + $0x12] sm:$0xff]  ;;  %324 = vst.msk [vmem:[#allocation2 + $0x28] sm:$0xff] %vm318_vm2, %v299_v55  ;;  %v9140_v58 = vpop.f32.mrb[11].mxu0  ;;  %9165 = vmatmul.mubr.msk.f32.gmra.mrb[4].mxu1 %vm318_vm2, %v344_v56 }
 0x19b   :  { %9235 = vmatmul.mubr.msk.f32.gmra.mrb[22].mxu0 %vm318_vm2, %v632_v57  ;;  %9167 = vmatprep.mubr.msk.f32.mxu1 %vm11493_vm0, %v11494_v1  ;;  %v332_v18 = vld [vmem:[#allocation2 + $0x18] sm:$0xff] }
 0x19c   :  { %9237 = vmatprep.mubr.msk.f32.mxu0 %vm11493_vm0, %v11494_v1 }
 0x19d   :  { %v304_v59 = vpop.f32.mrb[12].mxu0  ;;  %v345_v60 = vld [vmem:[#allocation2 + $0x19] sm:$0xff] }
 0x19e   :  { %v633_v61 = vld [vmem:[#allocation2 + $0x1a] sm:$0xff]  ;;  %325 = vst.msk [vmem:[#allocation2 + $0x30] sm:$0xff] %vm318_vm2, %v304_v59  ;;  %v9143_v62 = vpop.f32.mrb[13].mxu0  ;;  %9168 = vmatmul.mubr.msk.f32.gmra.mrb[6].mxu1 %vm318_vm2, %v345_v60 }
 0x19f   :  { %9238 = vmatmul.mubr.msk.f32.gmra.mrb[24].mxu0 %vm318_vm2, %v633_v61  ;;  %9170 = vmatprep.mubr.msk.f32.mxu1 %vm11493_vm0, %v11494_v1  ;;  %v333_v19 = vld [vmem:[#allocation2 + $0x20] sm:$0xff] }
 0x1a0   :  { %9240 = vmatprep.mubr.msk.f32.mxu0 %vm11493_vm0, %v11494_v1 }
 0x1a1   :  { %v309_v63 = vpop.f32.mrb[14].mxu0  ;;  %v346_v2 = vld [vmem:[#allocation2 + $0x21] sm:$0xff] }
 0x1a2   :  { %v634_v3 = vld [vmem:[#allocation2 + $0x22] sm:$0xff]  ;;  %326 = vst.msk [vmem:[#allocation2 + $0x38] sm:$0xff] %vm318_vm2, %v309_v63  ;;  %v9146_v4 = vpop.f32.mrb[15].mxu0  ;;  %9171 = vmatmul.mubr.msk.f32.gmra.mrb[8].mxu1 %vm318_vm2, %v346_v2 }
 0x1a3   :  { %9241 = vmatmul.mubr.msk.f32.gmra.mrb[26].mxu0 %vm318_vm2, %v634_v3  ;;  %9173 = vmatprep.mubr.msk.f32.mxu1 %vm11493_vm0, %v11494_v1  ;;  %v334_v20 = vld [vmem:[#allocation2 + $0x28] sm:$0xff]  ;;  %v790_v3 = vld [vmem:[#allocation19] ss:$0 sm:$0xff] }
 0x1a4   :  { %9243 = vmatprep.mubr.msk.f32.mxu0 %vm11493_vm0, %v11494_v1 }
 0x1a5   :  { %v314_v5 = vpop.f32.mrb[16].mxu0  ;;  %v347_v6 = vld [vmem:[#allocation2 + $0x29] sm:$0xff] }
 0x1a6   :  { %v635_v7 = vld [vmem:[#allocation2 + $0x2a] sm:$0xff]  ;;  %328 = vst.msk [vmem:[#allocation2 + $0x40] sm:$0xf] %vm327_vm3, %v314_v5  ;;  %v9149_v8 = vpop.f32.mrb[17].mxu0  ;;  %9174 = vmatmul.mubr.msk.f32.gmra.mrb[10].mxu1 %vm318_vm2, %v347_v6  ;;  %vm6896_vm3 = vcmask 261126  }
 0x1a7   :  { %9244 = vmatmul.mubr.msk.f32.gmra.mrb[28].mxu0 %vm318_vm2, %v635_v7  ;;  %9176 = vmatprep.mubr.msk.f32.mxu1 %vm11493_vm0, %v11494_v1  ;;  %v335_v21 = vld [vmem:[#allocation2 + $0x30] sm:$0xff] }
 0x1a8   :  { %9246 = vmatprep.mubr.msk.f32.mxu0 %vm11493_vm0, %v11494_v1 }
 0x1a9   :  { %v348_v9 = vld [vmem:[#allocation2 + $0x31] sm:$0xff] }
 0x1aa   :  { %v636_v10 = vld [vmem:[#allocation2 + $0x32] sm:$0xff]  ;;  %9177 = vmatmul.mubr.msk.f32.gmra.mrb[12].mxu1 %vm318_vm2, %v348_v9 }
 0x1ab   :  { %9247 = vmatmul.mubr.msk.f32.gmra.mrb[30].mxu0 %vm318_vm2, %v636_v10  ;;  %9179 = vmatprep.mubr.msk.f32.mxu1 %vm11493_vm0, %v11494_v1  ;;  %v336_v22 = vld [vmem:[#allocation2 + $0x38] sm:$0xff] }
 0x1ac   :  { %9249 = vmatprep.mubr.msk.f32.mxu0 %vm11493_vm0, %v11494_v1 }
 0x1ad   :  { %v349_v11 = vld [vmem:[#allocation2 + $0x39] sm:$0xff]  ;;  %v350_v13 = vld [vmem:[#allocation2 + $0x41] sm:$0x3] }
 0x1ae   :  { %v637_v12 = vld [vmem:[#allocation2 + $0x3a] sm:$0xff]  ;;  %9180 = vmatmul.mubr.msk.f32.gmra.mrb[14].mxu1 %vm318_vm2, %v349_v11  ;;  %v638_v14 = vld [vmem:[#allocation2 + $0x42] sm:$0x3] }
 0x1af   :  { %9250 = vmatmul.mubr.msk.f32.gmra.mrb[32].mxu0 %vm318_vm2, %v637_v12  ;;  %9182 = vmatprep.mubr.msk.f32.mxu1 %vm11493_vm0, %v11494_v1  ;;  %v337_v23 = vld [vmem:[#allocation2 + $0x40] sm:$0x3] }
 0x1b0   :  { %9252 = vmatprep.mubr.msk.f32.mxu0 %vm11493_vm0, %v11494_v1 }
 0x1b2   :  { %9183 = vmatmul.mubr.msk.f32.gmra.mrb[16].mxu1 %vm318_vm2, %v350_v13 }
 0x1b3   :  { %9253 = vmatmul.mubr.msk.f32.gmra.mrb[34].mxu0 %vm318_vm2, %v638_v14  ;;  %9193 = vmatprep.mubr.msk.f32.mxu1 %vm11493_vm0, %v11494_v1 }
 0x1b4   :  { %9306 = vmatprep.mubr.msk.f32.mxu0 %vm11493_vm0, %v11494_v1 }
 0x1b6   :  { %9194 = vmatmul.mubr.msk.f32.vlgmr.msra.gmra.mrb[18].mxu1 %vm318_vm2, %v329_v15 }
 0x1b7   :  { %9196 = vmatprep.mubr.msk.f32.mxu1 %vm11493_vm0, %v11494_v1 }
 0x1ba   :  { %9197 = vmatmul.mubr.msk.f32.gmra.mrb[20].mxu1 %vm318_vm2, %v330_v16 }
 0x1bb   :  { %9199 = vmatprep.mubr.msk.f32.mxu1 %vm11493_vm0, %v11494_v1 }
 0x1be   :  { %9200 = vmatmul.mubr.msk.f32.gmra.mrb[22].mxu1 %vm318_vm2, %v331_v17 }
 0x1bf   :  { %9202 = vmatprep.mubr.msk.f32.mxu1 %vm11493_vm0, %v11494_v1 }
 0x1c2   :  { %9203 = vmatmul.mubr.msk.f32.gmra.mrb[24].mxu1 %vm318_vm2, %v332_v18 }
 0x1c3   :  { %9205 = vmatprep.mubr.msk.f32.mxu1 %vm11493_vm0, %v11494_v1 }
 0x1c6   :  { %9206 = vmatmul.mubr.msk.f32.gmra.mrb[26].mxu1 %vm318_vm2, %v333_v19 }
 0x1c7   :  { %9208 = vmatprep.mubr.msk.f32.mxu1 %vm11493_vm0, %v11494_v1 }
 0x1ca   :  { %9209 = vmatmul.mubr.msk.f32.gmra.mrb[28].mxu1 %vm318_vm2, %v334_v20 }
 0x1cb   :  { %9211 = vmatprep.mubr.msk.f32.mxu1 %vm11493_vm0, %v11494_v1 }
 0x1ce   :  { %9212 = vmatmul.mubr.msk.f32.gmra.mrb[30].mxu1 %vm318_vm2, %v335_v21 }
 0x1cf   :  { %9214 = vmatprep.mubr.msk.f32.mxu1 %vm11493_vm0, %v11494_v1 }
 0x1d2   :  { %9215 = vmatmul.mubr.msk.f32.gmra.mrb[32].mxu1 %vm318_vm2, %v336_v22 }
 0x1d3   :  { %9217 = vmatprep.mubr.msk.f32.mxu1 %vm11493_vm0, %v11494_v1 }
 0x1d6   :  { %9218 = vmatmul.mubr.msk.f32.gmra.mrb[34].mxu1 %vm318_vm2, %v337_v23 }
 0x1d7   :  { %9273 = vmatprep.mubr.msk.f32.mxu1 %vm11493_vm0, %v11494_v1 }
 0x265   :  { %v449_v24 = vpop.f32.mrb[0].mxu1 }
 0x266   :  { %v737_v25 = vpop.f32.mrb[18].mxu0  ;;  %v9160_v26 = vpop.f32.mrb[1].mxu1 }
 0x267   :  { %v9230_v27 = vpop.f32.mrb[19].mxu0 }
 0x269   :  { %v454_v28 = vpop.f32.mrb[2].mxu1 }
 0x26a   :  { %v742_v29 = vpop.f32.mrb[20].mxu0  ;;  %v9163_v30 = vpop.f32.mrb[3].mxu1 }
 0x26b   :  { %v9233_v31 = vpop.f32.mrb[21].mxu0 }
 0x26d   :  { %v459_v32 = vpop.f32.mrb[4].mxu1 }
 0x26e   :  { %v747_v33 = vpop.f32.mrb[22].mxu0  ;;  %v9166_v34 = vpop.f32.mrb[5].mxu1 }
 0x26f   :  { %v9236_v35 = vpop.f32.mrb[23].mxu0 }
 0x271   :  { %v464_v36 = vpop.f32.mrb[6].mxu1 }
 0x272   :  { %v752_v37 = vpop.f32.mrb[24].mxu0  ;;  %v9169_v38 = vpop.f32.mrb[7].mxu1 }
 0x273   :  { %v9239_v39 = vpop.f32.mrb[25].mxu0 }
 0x275   :  { %v469_v40 = vpop.f32.mrb[8].mxu1 }
 0x276   :  { %v757_v41 = vpop.f32.mrb[26].mxu0  ;;  %v9172_v42 = vpop.f32.mrb[9].mxu1 }
 0x277   :  { %v9242_v43 = vpop.f32.mrb[27].mxu0 }
 0x279   :  { %v474_v44 = vpop.f32.mrb[10].mxu1 }
 0x27a   :  { %v762_v45 = vpop.f32.mrb[28].mxu0  ;;  %v9175_v46 = vpop.f32.mrb[11].mxu1 }
 0x27b   :  { %v9245_v47 = vpop.f32.mrb[29].mxu0 }
 0x27d   :  { %v479_v48 = vpop.f32.mrb[12].mxu1 }
 0x27e   :  { %v767_v49 = vpop.f32.mrb[30].mxu0  ;;  %v9178_v50 = vpop.f32.mrb[13].mxu1 }
 0x27f   :  { %v9248_v51 = vpop.f32.mrb[31].mxu0 }
 0x281   :  { %v484_v52 = vpop.f32.mrb[14].mxu1 }
 0x282   :  { %v772_v53 = vpop.f32.mrb[32].mxu0  ;;  %v9181_v54 = vpop.f32.mrb[15].mxu1 }
 0x283   :  { %v9251_v55 = vpop.f32.mrb[33].mxu0 }
 0x285   :  { %v489_v56 = vpop.f32.mrb[16].mxu1 }
 0x286   :  { %v777_v57 = vpop.f32.mrb[34].mxu0  ;;  %v9184_v58 = vpop.f32.mrb[17].mxu1 }
 0x287   :  { %v9254_v59 = vpop.f32.mrb[35].mxu0 }
 0x289   :  { %v586_v60 = vpop.f32.mrb[18].mxu1 }
 0x28a   :  { %v587_v61 = vadd.f32 %v586_v60, %v449_v24  ;;  %v9195_v62 = vpop.f32.mrb[19].mxu1 }
 0x28c   :  { %v781_v63 = vadd.f32 %v737_v25, %v587_v61 }
 0x28d   :  { %v591_v2 = vpop.f32.mrb[20].mxu1 }
 0x28e   :  { %v592_v4 = vadd.f32 %v591_v2, %v454_v28  ;;  %v9198_v5 = vpop.f32.mrb[21].mxu1  ;;  %v791_v7 = vadd.f32 %v790_v3, %v781_v63 }
 0x290   :  { %v782_v6 = vadd.f32 %v742_v29, %v592_v4  ;;  %v800_v13 = vmax.f32 %v791_v7, 0.0 }
 0x291   :  { %v596_v8 = vpop.f32.mrb[22].mxu1 }
 0x292   :  { %v597_v9 = vadd.f32 %v596_v8, %v459_v32  ;;  %v9201_v10 = vpop.f32.mrb[23].mxu1  ;;  %v792_v11 = vadd.f32 %v790_v3, %v782_v6 }
 0x294   :  { %v783_v12 = vadd.f32 %v747_v33, %v597_v9  ;;  %v801_v14 = vmax.f32 %v792_v11, 0.0 }
 0x295   :  { %v601_v15 = vpop.f32.mrb[24].mxu1 }
 0x296   :  { %v602_v16 = vadd.f32 %v601_v15, %v464_v36  ;;  %v9204_v17 = vpop.f32.mrb[25].mxu1  ;;  %v11015_v18 = vpack.i.bf16 %v801_v14, %v800_v13  ;;  %v793_v19 = vadd.f32 %v790_v3, %v783_v12 }
 0x298   :  { %v784_v20 = vadd.f32 %v752_v37, %v602_v16  ;;  %11016 = vrot.lane.b32.xlu0 %v11015_v18, %s11495_s11  ;;  %v802_v25 = vmax.f32 %v793_v19, 0.0 }
 0x299   :  { %v606_v21 = vpop.f32.mrb[26].mxu1 }
 0x29a   :  { %v794_v22 = vadd.f32 %v790_v3, %v784_v20  ;;  %v607_v23 = vadd.f32 %v606_v21, %v469_v40  ;;  %v9207_v24 = vpop.f32.mrb[27].mxu1  ;;  %v1095_v20 = vld [vmem:[#allocation15] sm:$0xff]  ;;  %v1096_v21 = vld [vmem:[#allocation15 + $0x8] sm:$0xff] }
 0x29b   :  { %v814_v24 = vld [vmem:[#allocation21 + $0x68] sm:$0xff] }
 0x29c   :  { %v803_v26 = vmax.f32 %v794_v22, 0.0  ;;  %v785_v27 = vadd.f32 %v757_v41, %v607_v23  ;;  %v809_v23 = vld [vmem:[#allocation21 + $0x44] sm:$0xff] }
 0x29d   :  { %v611_v28 = vpop.f32.mrb[28].mxu1 }
 0x29e   :  { %v612_v29 = vadd.f32 %v611_v28, %v474_v44  ;;  %v9210_v30 = vpop.f32.mrb[29].mxu1  ;;  %v11020_v31 = vpack.i.bf16 %v803_v26, %v802_v25  ;;  %v795_v33 = vadd.f32 %v790_v3, %v785_v27  ;;  %v815_v27 = vld [vmem:[#allocation21 + $0x70] sm:$0xff] }
 0x29f   :  { %v811_v28 = vld [vmem:[#allocation21 + $0x54] sm:$0xff]  ;;  %v812_v30 = vld [vmem:[#allocation21 + $0x5c] sm:$0xff] }
 0x2a0   :  { %v786_v32 = vadd.f32 %v762_v45, %v612_v29  ;;  %11021 = vrot.lane.b32.xlu0 %v11020_v31, %s11495_s11  ;;  %v804_v39 = vmax.f32 %v795_v33, 0.0  ;;  %v816_v29 = vld [vmem:[#allocation21 + $0x78] sm:$0xff]  ;;  %v817_v31 = vld [vmem:[#allocation21 + $0x80] sm:$0xff]  ;;  %v818_v33 = vld [vmem:[#allocation21 + $0x88] sm:$0xf] }
 0x2a1   :  { %v616_v34 = vpop.f32.mrb[30].mxu1 }
 0x2a2   :  { %v617_v35 = vadd.f32 %v616_v34, %v479_v48  ;;  %v9213_v36 = vpop.f32.mrb[31].mxu1  ;;  %v796_v37 = vadd.f32 %v790_v3, %v786_v32  ;;  %v813_v32 = vld [vmem:[#allocation21 + $0x64] sm:$0xf] }
 0x2a3   :  { %v1109_v34 = vld [vmem:[#allocation15 + $0x40] sm:$0xff]  ;;  %v1097_v36 = vld [vmem:[#allocation15 + $0x10] sm:$0xff] }
 0x2a4   :  { %v787_v38 = vadd.f32 %v767_v49, %v617_v35  ;;  %v805_v42 = vmax.f32 %v796_v37, 0.0  ;;  %v1110_v35 = vld [vmem:[#allocation15 + $0x48] sm:$0xff] }
 0x2a5   :  { %v621_v40 = vpop.f32.mrb[32].mxu1  ;;  %v10101_v37 = vpack.c.bf16 %v1110_v35, %v1109_v34  ;;  %v1340_v35 = vld [vmem:[#allocation15 + $0xb8] sm:$0xff] }
 0x2a6   :  { %v622_v43 = vadd.f32 %v621_v40, %v484_v52  ;;  %v9216_v46 = vpop.f32.mrb[33].mxu1  ;;  %v11025_v47 = vpack.i.bf16 %v805_v42, %v804_v39  ;;  %v797_v41 = vadd.f32 %v790_v3, %v787_v38  ;;  %v1098_v38 = vld [vmem:[#allocation15 + $0x18] sm:$0xff] }
 0x2a7   :  { %v1112_v40 = vld [vmem:[#allocation15 + $0x58] sm:$0xff] }
 0x2a8   :  { %v788_v50 = vadd.f32 %v772_v53, %v622_v43  ;;  %11026 = vrot.lane.b32.xlu1 %v11025_v47, %s11495_s11  ;;  %v806_v55 = vmax.f32 %v797_v41, 0.0  ;;  %v1099_v43 = vld [vmem:[#allocation15 + $0x20] sm:$0xff]  ;;  %v1100_v47 = vld [vmem:[#allocation15 + $0x28] sm:$0xff] }
 0x2a9   :  { %v626_v44 = vpop.f32.mrb[34].mxu1  ;;  %v10119_v41 = vpack.c.bf16 %v1100_v47, %v1099_v43 }
 0x2aa   :  { %v798_v45 = vadd.f32 %v790_v3, %v788_v50  ;;  %v627_v51 = vadd.f32 %v626_v44, %v489_v56  ;;  %v9219_v54 = vpop.f32.mrb[35].mxu1  ;;  %v1113_v50 = vld [vmem:[#allocation15 + $0x60] sm:$0xff]  ;;  %v1114_v44 = vld [vmem:[#allocation15 + $0x68] sm:$0xff] }
 0x2ab   :  { %v1102_v54 = vld [vmem:[#allocation15 + $0x38] sm:$0xff] }
 0x2ac   :  { %v807_v58 = vmax.f32 %v798_v45, 0.0  ;;  %v789_v48 = vadd.f32 %v777_v57, %v627_v51  ;;  %v1101_v45 = vld [vmem:[#allocation15 + $0x30] sm:$0xff]  ;;  %v10107_v51 = vpack.c.bf16 %v1114_v44, %v1113_v50 }
 0x2ae   :  { %v11030_v59 = vpack.i.bf16 %v807_v58, %v806_v55  ;;  %v799_v60 = vadd.f32 %v790_v3, %v789_v48  ;;  %v1116_v48 = vld [vmem:[#allocation15 + $0x78] sm:$0xff] }
 0x2b0   :  { %11031 = vrot.lane.b32.xlu1 %v11030_v59, %s11495_s11  ;;  %v808_v49 = vmax.f32 %v799_v60, 0.0 }
 0x2b2   :  { %844 = vrot.lane.b32.xlu0 %v808_v49, %s11495_s11 }
 0x30a   :  { %v11017_v52 = vpop.permute.xlu0 %11016 }
 0x30b   :  { %v11019_v61 = vunpack.i.h.bf16 %v11017_v52  ;;  %v11018_v62 = vunpack.i.l.bf16 %v11017_v52 }
 0x30d   :  { %v856_v53 = vmax.f32 %v801_v14, %v11019_v61  ;;  %v855_v63 = vmax.f32 %v800_v13, %v11018_v62 }
 0x30f   :  { %v10077_v2 = vpack.c.bf16 %v856_v53, %v855_v63 }
 0x311   :  { %10078 = vmatpush3.bf16.msra.mxu1 %v10077_v2  ;;  %10090 = vmatpush3.bf16.msra.mxu0 %v10077_v2 }
 0x312   :  { %v11022_v56 = vpop.permute.xlu0 %11021  ;;  %10079 = vmatprep.subr.bf16.mxu1 %v11492_v0  ;;  %10091 = vmatprep.subr.bf16.mxu0 %v11492_v0 }
 0x313   :  { %v11024_v57 = vunpack.i.h.bf16 %v11022_v56  ;;  %v11023_v3 = vunpack.i.l.bf16 %v11022_v56 }
 0x315   :  { %v858_v4 = vmax.f32 %v803_v26, %v11024_v57  ;;  %v857_v5 = vmax.f32 %v802_v25, %v11023_v3  ;;  %v10113_v25 = vpack.c.bf16 %v1096_v21, %v1095_v20  ;;  %v810_v26 = vld [vmem:[#allocation21 + $0x4c] sm:$0xff]  ;;  %v1336_v20 = vld [vmem:[#allocation15 + $0x98] sm:$0xff] }
 0x317   :  { %v10080_v6 = vpack.c.bf16 %v858_v4, %v857_v5 }
 0x319   :  { %10081 = vmatpush3.bf16.msra.mxu1 %v10080_v6  ;;  %10093 = vmatpush3.bf16.msra.mxu0 %v10080_v6 }
 0x31a   :  { %v11027_v7 = vpop.permute.xlu1 %11026  ;;  %10082 = vmatprep.subr.bf16.mxu1 %v11492_v0  ;;  %10094 = vmatprep.subr.bf16.mxu0 %v11492_v0 }
 0x31b   :  { %v11029_v8 = vunpack.i.h.bf16 %v11027_v7  ;;  %v11028_v9 = vunpack.i.l.bf16 %v11027_v7 }
 0x31d   :  { %v860_v10 = vmax.f32 %v805_v42, %v11029_v8  ;;  %v859_v11 = vmax.f32 %v804_v39, %v11028_v9  ;;  %v10116_v39 = vpack.c.bf16 %v1098_v38, %v1097_v36  ;;  %v1111_v42 = vld [vmem:[#allocation15 + $0x50] sm:$0xff]  ;;  %v1333_v9 = vld [vmem:[#allocation15 + $0x80] sm:$0xff] }
 0x31e   :  { %v10104_v46 = vpack.c.bf16 %v1112_v40, %v1111_v42 }
 0x31f   :  { %v10083_v12 = vpack.c.bf16 %v860_v10, %v859_v11  ;;  %v1334_v10 = vld [vmem:[#allocation15 + $0x88] sm:$0xff] }
 0x321   :  { %10084 = vmatpush3.bf16.msra.mxu1 %v10083_v12  ;;  %10096 = vmatpush3.bf16.msra.mxu0 %v10083_v12 }
 0x322   :  { %v11032_v13 = vpop.permute.xlu1 %11031  ;;  %10085 = vmatprep.subr.bf16.mxu1 %v11492_v0  ;;  %10097 = vmatprep.subr.bf16.mxu0 %v11492_v0 }
 0x323   :  { %v11034_v14 = vunpack.i.h.bf16 %v11032_v13  ;;  %v11033_v15 = vunpack.i.l.bf16 %v11032_v13 }
 0x324   :  { %v845_v19 = vpop.permute.xlu0 %844 }
 0x325   :  { %v862_v16 = vmax.f32 %v807_v58, %v11034_v14  ;;  %v861_v17 = vmax.f32 %v806_v55, %v11033_v15  ;;  %v863_v22 = vmax.f32 %v808_v49, %v845_v19  ;;  %v10122_v55 = vpack.c.bf16 %v1102_v54, %v1101_v45  ;;  %v1115_v58 = vld [vmem:[#allocation15 + $0x70] sm:$0xff] }
 0x326   :  { %v10110_v59 = vpack.c.bf16 %v1116_v48, %v1115_v58 }
 0x327   :  { %v10086_v18 = vpack.c.bf16 %v862_v16, %v861_v17  ;;  %v10125_v16 = vpack.c.bf16 %v1334_v10, %v1333_v9  ;;  %v1335_v17 = vld [vmem:[#allocation15 + $0x90] sm:$0xff] }
 0x329   :  { %10087 = vmatpush3.bf16.msra.mxu1 %v10086_v18  ;;  %10099 = vmatpush3.bf16.msra.mxu0 %v10086_v18 }
 0x32a   :  { %9271 = vmatprep.subr.mxu1 %v11494_v1  ;;  %9304 = vmatprep.subr.mxu0 %v11494_v1 }
 0x32d   :  { %9272 = vmatpush3.msk.msra.mxu1 %vm880_vm4, %v863_v22  ;;  %9305 = vmatpush3.msk.msra.mxu0 %vm880_vm4, %v863_v22 }
 0x32e   :  { %9274 = vmatmul.mubr.msk.f32.vlgmr.msra.gmra.mrb[36].mxu1 %vm864_vm5, %v809_v23  ;;  %9307 = vmatmul.mubr.msk.f32.vlgmr.msra.gmra.mrb[36].mxu0 %vm864_vm5, %v814_v24 }
 0x32f   :  { %9276 = vmatprep.mubr.msk.f32.mxu1 %vm11493_vm0, %v11494_v1  ;;  %9309 = vmatprep.mubr.msk.f32.mxu0 %vm11493_vm0, %v11494_v1 }
 0x330   :  { %10112 = vmatprep.subr.bf16.mxu0 %v11492_v0  ;;  %10100 = vmatprep.subr.bf16.mxu1 %v11492_v0 }
 0x331   :  { %10114 = vmatpush3.bf16.msra.mxu0 %v10113_v25  ;;  %10102 = vmatpush3.bf16.msra.mxu1 %v10101_v37 }
 0x332   :  { %9277 = vmatmul.mubr.msk.f32.gmra.mrb[38].mxu1 %vm864_vm5, %v810_v26  ;;  %9310 = vmatmul.mubr.msk.f32.gmra.mrb[38].mxu0 %vm864_vm5, %v815_v27  ;;  %v10128_v26 = vpack.c.bf16 %v1336_v20, %v1335_v17  ;;  %v1337_v27 = vld [vmem:[#allocation15 + $0xa0] sm:$0xff] }
 0x333   :  { %9279 = vmatprep.mubr.msk.f32.mxu1 %vm11493_vm0, %v11494_v1  ;;  %9312 = vmatprep.mubr.msk.f32.mxu0 %vm11493_vm0, %v11494_v1 }
 0x334   :  { %10115 = vmatprep.subr.bf16.mxu0 %v11492_v0  ;;  %10103 = vmatprep.subr.bf16.mxu1 %v11492_v0 }
 0x335   :  { %10117 = vmatpush3.bf16.msra.mxu0 %v10116_v39  ;;  %10105 = vmatpush3.bf16.msra.mxu1 %v10104_v46 }
 0x336   :  { %9280 = vmatmul.mubr.msk.f32.gmra.mrb[40].mxu1 %vm864_vm5, %v811_v28  ;;  %9313 = vmatmul.mubr.msk.f32.gmra.mrb[40].mxu0 %vm864_vm5, %v816_v29 }
 0x337   :  { %9282 = vmatprep.mubr.msk.f32.mxu1 %vm11493_vm0, %v11494_v1  ;;  %9315 = vmatprep.mubr.msk.f32.mxu0 %vm11493_vm0, %v11494_v1 }
 0x338   :  { %10118 = vmatprep.subr.bf16.mxu0 %v11492_v0  ;;  %10106 = vmatprep.subr.bf16.mxu1 %v11492_v0 }
 0x339   :  { %10120 = vmatpush3.bf16.msra.mxu0 %v10119_v41  ;;  %10108 = vmatpush3.bf16.msra.mxu1 %v10107_v51 }
 0x33a   :  { %9283 = vmatmul.mubr.msk.f32.gmra.mrb[42].mxu1 %vm864_vm5, %v812_v30  ;;  %9316 = vmatmul.mubr.msk.f32.gmra.mrb[42].mxu0 %vm864_vm5, %v817_v31  ;;  %v1338_v30 = vld [vmem:[#allocation15 + $0xa8] sm:$0xff] }
 0x33b   :  { %9285 = vmatprep.mubr.msk.f32.mxu1 %vm11493_vm0, %v11494_v1  ;;  %9318 = vmatprep.mubr.msk.f32.mxu0 %vm11493_vm0, %v11494_v1  ;;  %v10131_v31 = vpack.c.bf16 %v1338_v30, %v1337_v27 }
 0x33c   :  { %10121 = vmatprep.subr.bf16.mxu0 %v11492_v0  ;;  %10109 = vmatprep.subr.bf16.mxu1 %v11492_v0 }
 0x33d   :  { %10123 = vmatpush3.bf16.msra.mxu0 %v10122_v55  ;;  %10111 = vmatpush3.bf16.msra.mxu1 %v10110_v59 }
 0x33e   :  { %9286 = vmatmul.mubr.msk.f32.gmra.mrb[44].mxu1 %vm864_vm5, %v813_v32  ;;  %9319 = vmatmul.mubr.msk.f32.gmra.mrb[44].mxu0 %vm864_vm5, %v818_v33  ;;  %v1339_v32 = vld [vmem:[#allocation15 + $0xb0] sm:$0xff]  ;;  %vm8280_vm5 = vcmask 78848  }
 0x33f   :  { %9368 = vmatprep.mubr.msk.f32.mxu0 %vm11493_vm0, %v11494_v1  ;;  %9337 = vmatprep.mubr.msk.f32.mxu1 %vm11493_vm0, %v11494_v1  ;;  %v10134_v36 = vpack.c.bf16 %v1340_v35, %v1339_v32 }
 0x340   :  { %10136 = vmatprep.subr.bf16.mxu0 %v11492_v0  ;;  %10124 = vmatprep.subr.bf16.mxu1 %v11492_v0 }
 0x401   :  { %v950_v60 = vpop.f32.mrb[36].mxu1  ;;  %v1055_v49 = vpop.f32.mrb[36].mxu0 }
 0x402   :  { %v1079_v52 = vmax.f32 %v950_v60, %v1055_v49  ;;  %v9275_v61 = vpop.f32.mrb[37].mxu1  ;;  %v9308_v62 = vpop.f32.mrb[37].mxu0 }
 0x404   :  { %1084 = vst.msk [vmem:[#allocation3] sm:$0xff] %vm180_vm1, %v1079_v52 }
 0x405   :  { %v955_v53 = vpop.f32.mrb[38].mxu1  ;;  %v1060_v63 = vpop.f32.mrb[38].mxu0 }
 0x406   :  { %v1080_v2 = vmax.f32 %v955_v53, %v1060_v63  ;;  %v9278_v56 = vpop.f32.mrb[39].mxu1  ;;  %v9311_v57 = vpop.f32.mrb[39].mxu0 }
 0x408   :  { %1085 = vst.msk [vmem:[#allocation3 + $0x8] sm:$0xff] %vm180_vm1, %v1080_v2 }
 0x409   :  { %v960_v3 = vpop.f32.mrb[40].mxu1  ;;  %v1065_v4 = vpop.f32.mrb[40].mxu0 }
 0x40a   :  { %v1081_v5 = vmax.f32 %v960_v3, %v1065_v4  ;;  %v9281_v6 = vpop.f32.mrb[41].mxu1  ;;  %v9314_v7 = vpop.f32.mrb[41].mxu0 }
 0x40b   :  { %v1090_v8 = vld [vmem:[#allocation3] sm:$0xff] }
 0x40c   :  { %1086 = vst.msk [vmem:[#allocation3 + $0x10] sm:$0xff] %vm180_vm1, %v1081_v5  ;;  %9369 = vmatmul.mubr.msk.f32.vlgmr.msra.gmra.mrb[46].mxu0 %vm180_vm1, %v1090_v8 }
 0x40d   :  { %v965_v11 = vpop.f32.mrb[42].mxu1  ;;  %v1070_v12 = vpop.f32.mrb[42].mxu0  ;;  %9371 = vmatprep.mubr.msk.f32.mxu0 %vm11493_vm0, %v11494_v1 }
 0x40e   :  { %v1082_v13 = vmax.f32 %v965_v11, %v1070_v12  ;;  %v9284_v14 = vpop.f32.mrb[43].mxu1  ;;  %v9317_v15 = vpop.f32.mrb[43].mxu0  ;;  %v1451_v11 = vld [vmem:[#allocation19 + $0x1] ss:$0 sm:$0xff] }
 0x40f   :  { %v1103_v18 = vld [vmem:[#allocation3 + $0x1] sm:$0xff] }
 0x410   :  { %v1091_v19 = vld [vmem:[#allocation3 + $0x8] sm:$0xff]  ;;  %1087 = vst.msk [vmem:[#allocation3 + $0x18] sm:$0xff] %vm180_vm1, %v1082_v13  ;;  %9338 = vmatmul.mubr.msk.f32.vlgmr.msra.gmra.mrb[46].mxu1 %vm180_vm1, %v1103_v18 }
 0x411   :  { %9372 = vmatmul.mubr.msk.f32.gmra.mrb[48].mxu0 %vm180_vm1, %v1091_v19  ;;  %v970_v21 = vpop.f32.mrb[44].mxu1  ;;  %v1075_v22 = vpop.f32.mrb[44].mxu0  ;;  %9340 = vmatprep.mubr.msk.f32.mxu1 %vm11493_vm0, %v11494_v1  ;;  %v1327_v42 = vld [vmem:[#allocation3 + $0x2] sm:$0xff] }
 0x412   :  { %9374 = vmatprep.mubr.msk.f32.mxu0 %vm11493_vm0, %v11494_v1  ;;  %v1083_v23 = vmax.f32 %v970_v21, %v1075_v22  ;;  %v9287_v24 = vpop.f32.mrb[45].mxu1  ;;  %v9320_v25 = vpop.f32.mrb[45].mxu0  ;;  %10126 = vmatpush3.bf16.msra.mxu1 %v10125_v16 }
 0x413   :  { %v1104_v28 = vld [vmem:[#allocation3 + $0x9] sm:$0xff]  ;;  %10127 = vmatprep.subr.bf16.mxu1 %v11492_v0 }
 0x414   :  { %v1092_v29 = vld [vmem:[#allocation3 + $0x10] sm:$0xff]  ;;  %1089 = vst.msk [vmem:[#allocation3 + $0x20] sm:$0xf] %vm1088_vm6, %v1083_v23  ;;  %9341 = vmatmul.mubr.msk.f32.gmra.mrb[48].mxu1 %vm180_vm1, %v1104_v28 }
 0x415   :  { %9375 = vmatmul.mubr.msk.f32.gmra.mrb[50].mxu0 %vm180_vm1, %v1092_v29  ;;  %9343 = vmatprep.mubr.msk.f32.mxu1 %vm11493_vm0, %v11494_v1  ;;  %v1328_v40 = vld [vmem:[#allocation3 + $0xa] sm:$0xff] }
 0x416   :  { %9377 = vmatprep.mubr.msk.f32.mxu0 %vm11493_vm0, %v11494_v1  ;;  %10129 = vmatpush3.bf16.msra.mxu1 %v10128_v26 }
 0x417   :  { %v1105_v33 = vld [vmem:[#allocation3 + $0x11] sm:$0xff]  ;;  %10130 = vmatprep.subr.bf16.mxu1 %v11492_v0 }
 0x418   :  { %v1093_v34 = vld [vmem:[#allocation3 + $0x18] sm:$0xff]  ;;  %9344 = vmatmul.mubr.msk.f32.gmra.mrb[50].mxu1 %vm180_vm1, %v1105_v33 }
 0x419   :  { %9378 = vmatmul.mubr.msk.f32.gmra.mrb[52].mxu0 %vm180_vm1, %v1093_v34  ;;  %9346 = vmatprep.mubr.msk.f32.mxu1 %vm11493_vm0, %v11494_v1  ;;  %v1329_v43 = vld [vmem:[#allocation3 + $0x12] sm:$0xff] }
 0x41a   :  { %9380 = vmatprep.mubr.msk.f32.mxu0 %vm11493_vm0, %v11494_v1  ;;  %10132 = vmatpush3.bf16.msra.mxu1 %v10131_v31 }
 0x41b   :  { %v1106_v37 = vld [vmem:[#allocation3 + $0x19] sm:$0xff]  ;;  %10133 = vmatprep.subr.bf16.mxu1 %v11492_v0  ;;  %v1107_v39 = vld [vmem:[#allocation3 + $0x21] sm:$0x3] }
 0x41c   :  { %v1094_v38 = vld [vmem:[#allocation3 + $0x20] sm:$0x3]  ;;  %9347 = vmatmul.mubr.msk.f32.gmra.mrb[52].mxu1 %vm180_vm1, %v1106_v37  ;;  %v1331_v47 = vld [vmem:[#allocation3 + $0x22] sm:$0x3] }
 0x41d   :  { %9381 = vmatmul.mubr.msk.f32.gmra.mrb[54].mxu0 %vm180_vm1, %v1094_v38  ;;  %9349 = vmatprep.mubr.msk.f32.mxu1 %vm11493_vm0, %v11494_v1  ;;  %v1330_v46 = vld [vmem:[#allocation3 + $0x1a] sm:$0xff] }
 0x41e   :  { %9424 = vmatprep.mubr.msk.f32.mxu0 %vm11493_vm0, %v11494_v1  ;;  %10135 = vmatpush3.bf16.msra.mxu1 %v10134_v36 }
 0x41f   :  { %10148 = vmatprep.subr.bf16.mxu1 %v11492_v0 }
 0x420   :  { %9350 = vmatmul.mubr.msk.f32.gmra.mrb[54].mxu1 %vm180_vm1, %v1107_v39 }
 0x421   :  { %9399 = vmatprep.mubr.msk.f32.mxu1 %vm11493_vm0, %v11494_v1 }
 0x424   :  { %9400 = vmatmul.mubr.msk.f32.vlgmr.msra.gmra.mrb[56].mxu1 %vm180_vm1, %v1327_v42 }
 0x425   :  { %9402 = vmatprep.mubr.msk.f32.mxu1 %vm11493_vm0, %v11494_v1 }
 0x428   :  { %9403 = vmatmul.mubr.msk.f32.gmra.mrb[58].mxu1 %vm180_vm1, %v1328_v40 }
 0x429   :  { %9405 = vmatprep.mubr.msk.f32.mxu1 %vm11493_vm0, %v11494_v1 }
 0x42c   :  { %9406 = vmatmul.mubr.msk.f32.gmra.mrb[60].mxu1 %vm180_vm1, %v1329_v43 }
 0x42d   :  { %9408 = vmatprep.mubr.msk.f32.mxu1 %vm11493_vm0, %v11494_v1 }
 0x430   :  { %9409 = vmatmul.mubr.msk.f32.gmra.mrb[62].mxu1 %vm180_vm1, %v1330_v46 }
 0x431   :  { %9411 = vmatprep.mubr.msk.f32.mxu1 %vm11493_vm0, %v11494_v1 }
 0x434   :  { %9412 = vmatmul.mubr.msk.f32.gmra.mrb[64].mxu1 %vm180_vm1, %v1331_v47 }
 0x435   :  { %9468 = vmatprep.mubr.msk.f32.mxu1 %vm11493_vm0, %v11494_v1 }
 0x4df   :  { %v1303_v41 = vpop.f32.mrb[46].mxu0 }
 0x4e0   :  { %v9370_v50 = vpop.f32.mrb[47].mxu0 }
 0x4e3   :  { %v1198_v44 = vpop.f32.mrb[46].mxu1 }
 0x4e4   :  { %v1308_v45 = vpop.f32.mrb[48].mxu0  ;;  %v1304_v51 = vadd.f32 %v1303_v41, %v1198_v44  ;;  %v9339_v54 = vpop.f32.mrb[47].mxu1 }
 0x4e5   :  { %v9373_v55 = vpop.f32.mrb[49].mxu0  ;;  %v1462_v54 = vld [vmem:[#allocation21 + $0x8c] sm:$0xff] }
 0x4e6   :  { %v1463_v55 = vld [vmem:[#allocation21 + $0x94] sm:$0xff] }
 0x4e7   :  { %v1203_v58 = vpop.f32.mrb[48].mxu1 }
 0x4e8   :  { %v1313_v48 = vpop.f32.mrb[50].mxu0  ;;  %v1309_v59 = vadd.f32 %v1308_v45, %v1203_v58  ;;  %v9342_v60 = vpop.f32.mrb[49].mxu1  ;;  %v1464_v58 = vld [vmem:[#allocation21 + $0x9c] sm:$0xf] }
 0x4e9   :  { %v9376_v49 = vpop.f32.mrb[51].mxu0  ;;  %v1467_v60 = vld [vmem:[#allocation21 + $0xb0] sm:$0xf] }
 0x4ea   :  { %v1684_v49 = vld [vmem:[#allocation16] sm:$0xff] }
 0x4eb   :  { %v1208_v52 = vpop.f32.mrb[50].mxu1 }
 0x4ec   :  { %v1318_v61 = vpop.f32.mrb[52].mxu0  ;;  %v1314_v62 = vadd.f32 %v1313_v48, %v1208_v52  ;;  %v9345_v53 = vpop.f32.mrb[51].mxu1  ;;  %v1465_v48 = vld [vmem:[#allocation21 + $0xa0] sm:$0xff]  ;;  %v1685_v52 = vld [vmem:[#allocation16 + $0x8] sm:$0xff] }
 0x4ed   :  { %v9379_v63 = vpop.f32.mrb[53].mxu0  ;;  %v1697_v53 = vld [vmem:[#allocation16 + $0x48] sm:$0xff] }
 0x4ef   :  { %v1213_v2 = vpop.f32.mrb[52].mxu1 }
 0x4f0   :  { %v1323_v56 = vpop.f32.mrb[54].mxu0  ;;  %v1319_v57 = vadd.f32 %v1318_v61, %v1213_v2  ;;  %v9348_v3 = vpop.f32.mrb[53].mxu1  ;;  %v10161_v61 = vpack.c.bf16 %v1685_v52, %v1684_v49  ;;  %v1686_v2 = vld [vmem:[#allocation16 + $0x10] sm:$0xff]  ;;  %v8377_v52 = vld [vmem:[%s13888_s4 + $0x90] sm:$0xff] }
 0x4f1   :  { %v9382_v4 = vpop.f32.mrb[55].mxu0  ;;  %v1698_v3 = vld [vmem:[#allocation16 + $0x50] sm:$0xff] }
 0x4f2   :  { %v1699_v4 = vld [vmem:[#allocation16 + $0x58] sm:$0xff] }
 0x4f3   :  { %v1218_v5 = vpop.f32.mrb[54].mxu1 }
 0x4f4   :  { %v1324_v6 = vadd.f32 %v1323_v56, %v1218_v5  ;;  %v9351_v7 = vpop.f32.mrb[55].mxu1  ;;  %v1687_v56 = vld [vmem:[#allocation16 + $0x18] sm:$0xff]  ;;  %v10152_v5 = vpack.c.bf16 %v1699_v4, %v1698_v3  ;;  %v8383_v4 = vld [vmem:[%s13888_s4 + $0xc0] sm:$0xff] }
 0x4f5   :  { %v1689_v7 = vld [vmem:[#allocation16 + $0x28] sm:$0xff] }
 0x4f7   :  { %v1422_v8 = vpop.f32.mrb[56].mxu1 }
 0x4f8   :  { %v1446_v9 = vadd.f32 %v1422_v8, %v1304_v51  ;;  %v9401_v10 = vpop.f32.mrb[57].mxu1 }
 0x4f9   :  { %v1701_v10 = vld [vmem:[#allocation16 + $0x68] sm:$0xff] }
 0x4fa   :  { %v1452_v13 = vadd.f32 %v1451_v11, %v1446_v9  ;;  %v1700_v9 = vld [vmem:[#allocation16 + $0x60] sm:$0xff] }
 0x4fb   :  { %v1427_v12 = vpop.f32.mrb[58].mxu1 }
 0x4fc   :  { %v1447_v14 = vadd.f32 %v1427_v12, %v1309_v59  ;;  %v9404_v15 = vpop.f32.mrb[59].mxu1  ;;  %v1457_v18 = vmax.f32 %v1452_v13, 0.0  ;;  %v1466_v59 = vld [vmem:[#allocation21 + $0xa8] sm:$0xff]  ;;  %v1690_v12 = vld [vmem:[#allocation16 + $0x30] sm:$0xff]  ;;  %v1691_v13 = vld [vmem:[#allocation16 + $0x38] sm:$0xff] }
 0x4fd   :  { %v1702_v15 = vld [vmem:[#allocation16 + $0x70] sm:$0xff] }
 0x4fe   :  { %v1453_v16 = vadd.f32 %v1451_v11, %v1447_v14  ;;  %v10170_v14 = vpack.c.bf16 %v1691_v13, %v1690_v12 }
 0x4ff   :  { %v1432_v17 = vpop.f32.mrb[60].mxu1 }
 0x500   :  { %v1458_v19 = vmax.f32 %v1453_v16, 0.0  ;;  %v1448_v20 = vadd.f32 %v1432_v17, %v1314_v62  ;;  %v9407_v21 = vpop.f32.mrb[61].mxu1  ;;  %v1696_v62 = vld [vmem:[#allocation16 + $0x40] sm:$0xff]  ;;  %v1703_v16 = vld [vmem:[#allocation16 + $0x78] sm:$0xff] }
 0x501   :  { %v10149_v63 = vpack.c.bf16 %v1697_v53, %v1696_v62  ;;  %v10158_v17 = vpack.c.bf16 %v1703_v16, %v1702_v15  ;;  %v8379_v53 = vld [vmem:[%s13888_s4 + $0xa0] sm:$0xff] }
 0x502   :  { %v11035_v22 = vpack.i.bf16 %v1458_v19, %v1457_v18  ;;  %v1454_v24 = vadd.f32 %v1451_v11, %v1448_v20 }
 0x503   :  { %v1437_v23 = vpop.f32.mrb[62].mxu1  ;;  %10150 = vmatpush3.bf16.msra.mxu1 %v10149_v63  ;;  %v8380_v63 = vld [vmem:[%s13888_s4 + $0xa8] sm:$0xff] }
 0x504   :  { %v1449_v25 = vadd.f32 %v1437_v23, %v1319_v57  ;;  %v9410_v26 = vpop.f32.mrb[63].mxu1  ;;  %11036 = vrot.lane.b32.xlu1 %v11035_v22, %s11495_s11  ;;  %v1459_v29 = vmax.f32 %v1454_v24, 0.0  ;;  %v10164_v57 = vpack.c.bf16 %v1687_v56, %v1686_v2  ;;  %10151 = vmatprep.subr.bf16.mxu1 %v11492_v0  ;;  %v10194_v2 = vpack.c.bf16 %v8380_v63, %v8379_v53  ;;  %v8381_v56 = vld [vmem:[%s13888_s4 + $0xb0] sm:$0xff]  ;;  %v2107_v53 = vld [vmem:[%s13888_s4 + $0x60] sm:$0xff]  ;;  %v2108_v63 = vld [vmem:[%s13888_s4 + $0x68] sm:$0xff] }
 0x506   :  { %v1455_v27 = vadd.f32 %v1451_v11, %v1449_v25 }
 0x507   :  { %v1442_v28 = vpop.f32.mrb[64].mxu1  ;;  %10153 = vmatpush3.bf16.msra.mxu1 %v10152_v5  ;;  %v8384_v5 = vld [vmem:[%s13888_s4 + $0xc8] sm:$0xff] }
 0x508   :  { %v1460_v30 = vmax.f32 %v1455_v27, 0.0  ;;  %v1450_v31 = vadd.f32 %v1442_v28, %v1324_v6  ;;  %v9413_v32 = vpop.f32.mrb[65].mxu1  ;;  %v1688_v6 = vld [vmem:[#allocation16 + $0x20] sm:$0xff]  ;;  %10154 = vmatprep.subr.bf16.mxu1 %v11492_v0 }
 0x509   :  { %v10167_v8 = vpack.c.bf16 %v1689_v7, %v1688_v6  ;;  %v10200_v6 = vpack.c.bf16 %v8384_v5, %v8383_v4  ;;  %v8385_v4 = vld [vmem:[%s13888_s4 + $0xd0] sm:$0xff]  ;;  %v8386_v5 = vld [vmem:[%s13888_s4 + $0xd8] sm:$0xff] }
 0x50a   :  { %v1456_v33 = vadd.f32 %v1451_v11, %v1450_v31  ;;  %v11040_v34 = vpack.i.bf16 %v1460_v30, %v1459_v29  ;;  %v10155_v11 = vpack.c.bf16 %v1701_v10, %v1700_v9 }
 0x50c   :  { %v1461_v35 = vmax.f32 %v1456_v33, 0.0  ;;  %11041 = vrot.lane.b32.xlu0 %v11040_v34, %s11495_s11  ;;  %10156 = vmatpush3.bf16.msra.mxu1 %v10155_v11  ;;  %v1886_v33 = vld [vmem:[#allocation16 + $0x80] sm:$0xff]  ;;  %v1887_v34 = vld [vmem:[#allocation16 + $0x88] sm:$0xff] }
 0x50d   :  { %10157 = vmatprep.subr.bf16.mxu1 %v11492_v0 }
 0x50e   :  { %1481 = vrot.lane.b32.xlu1 %v1461_v35, %s11495_s11 }
 0x510   :  { %10159 = vmatpush3.bf16.msra.mxu1 %v10158_v17 }
 0x511   :  { %10172 = vmatprep.subr.bf16.mxu1 %v11492_v0 }
 0x576   :  { %v11037_v36 = vpop.permute.xlu1 %11036 }
 0x577   :  { %v11039_v37 = vunpack.i.h.bf16 %v11037_v36  ;;  %v11038_v38 = vunpack.i.l.bf16 %v11037_v36  ;;  %v10173_v36 = vpack.c.bf16 %v1887_v34, %v1886_v33 }
 0x579   :  { %v1489_v39 = vmax.f32 %v1458_v19, %v11039_v37  ;;  %v1488_v42 = vmax.f32 %v1457_v18, %v11038_v38  ;;  %v1888_v37 = vld [vmem:[#allocation16 + $0x90] sm:$0xff]  ;;  %v1889_v38 = vld [vmem:[#allocation16 + $0x98] sm:$0xff] }
 0x57b   :  { %v10137_v40 = vpack.c.bf16 %v1489_v39, %v1488_v42 }
 0x57d   :  { %10138 = vmatpush3.bf16.msra.mxu0 %v10137_v40 }
 0x57e   :  { %v11042_v43 = vpop.permute.xlu0 %11041  ;;  %10139 = vmatprep.subr.bf16.mxu0 %v11492_v0 }
 0x57f   :  { %v11044_v46 = vunpack.i.h.bf16 %v11042_v43  ;;  %v11043_v47 = vunpack.i.l.bf16 %v11042_v43  ;;  %v1890_v43 = vld [vmem:[#allocation16 + $0xa0] sm:$0xff] }
 0x580   :  { %v1482_v45 = vpop.permute.xlu1 %1481 }
 0x581   :  { %v1491_v41 = vmax.f32 %v1460_v30, %v11044_v46  ;;  %v1490_v50 = vmax.f32 %v1459_v29, %v11043_v47  ;;  %v1492_v51 = vmax.f32 %v1461_v35, %v1482_v45  ;;  %v1891_v46 = vld [vmem:[#allocation16 + $0xa8] sm:$0xff]  ;;  %v1893_v45 = vld [vmem:[#allocation16 + $0xb8] sm:$0xff] }
 0x583   :  { %v10140_v44 = vpack.c.bf16 %v1491_v41, %v1490_v50  ;;  %v10179_v50 = vpack.c.bf16 %v1891_v46, %v1890_v43  ;;  %v2097_v46 = vld [vmem:[%s13888_s4 + $0x10] sm:$0xff] }
 0x585   :  { %10141 = vmatpush3.bf16.msra.mxu0 %v10140_v44 }
 0x586   :  { %9422 = vmatprep.subr.mxu0 %v11494_v1 }
 0x589   :  { %9423 = vmatpush3.msk.msra.mxu0 %vm880_vm4, %v1492_v51 }
 0x58a   :  { %9425 = vmatmul.mubr.msk.f32.vlgmr.msra.gmra.mrb[56].mxu0 %vm1493_vm7, %v1462_v54  ;;  %10142 = vmatprep.subr.bf16.mxu0 %v11492_v0 }
 0x58b   :  { %10144 = vmatpush3.bf16.msra.mxu0 %v10137_v40  ;;  %9427 = vmatprep.mubr.msk.f32.mxu0 %vm11493_vm0, %v11494_v1  ;;  %v10176_v40 = vpack.c.bf16 %v1889_v38, %v1888_v37  ;;  %v2095_v38 = vld [vmem:[%s13888_s4] sm:$0xff] }
 0x58c   :  { %10145 = vmatprep.subr.bf16.mxu0 %v11492_v0 }
 0x58e   :  { %9428 = vmatmul.mubr.msk.f32.gmra.mrb[58].mxu0 %vm1493_vm7, %v1463_v55 }
 0x58f   :  { %10147 = vmatpush3.bf16.msra.mxu0 %v10140_v44  ;;  %9430 = vmatprep.mubr.msk.f32.mxu0 %vm11493_vm0, %v11494_v1  ;;  %v1892_v44 = vld [vmem:[#allocation16 + $0xb0] sm:$0xff] }
 0x590   :  { %9441 = vmatprep.subr.mxu0 %v11494_v1  ;;  %v10182_v54 = vpack.c.bf16 %v1893_v45, %v1892_v44  ;;  %v2099_v44 = vld [vmem:[%s13888_s4 + $0x20] sm:$0xff]  ;;  %v2100_v45 = vld [vmem:[%s13888_s4 + $0x28] sm:$0xff] }
 0x592   :  { %9431 = vmatmul.mubr.msk.f32.gmra.mrb[60].mxu0 %vm1493_vm7, %v1464_v58 }
 0x593   :  { %9442 = vmatpush3.msk.msra.mxu0 %vm880_vm4, %v1492_v51  ;;  %9443 = vmatprep.mubr.msk.f32.mxu0 %vm11493_vm0, %v11494_v1 }
 0x594   :  { %10160 = vmatprep.subr.bf16.mxu0 %v11492_v0 }
 0x596   :  { %9444 = vmatmul.mubr.msk.f32.vlgmr.msra.gmra.mrb[62].mxu0 %vm1493_vm7, %v1465_v48 }
 0x597   :  { %9446 = vmatprep.mubr.msk.f32.mxu0 %vm11493_vm0, %v11494_v1  ;;  %10162 = vmatpush3.bf16.msra.mxu0 %v10161_v61  ;;  %v8378_v61 = vld [vmem:[%s13888_s4 + $0x98] sm:$0xff] }
 0x598   :  { %10163 = vmatprep.subr.bf16.mxu0 %v11492_v0  ;;  %v10191_v62 = vpack.c.bf16 %v8378_v61, %v8377_v52  ;;  %v2105_v52 = vld [vmem:[%s13888_s4 + $0x50] sm:$0xff]  ;;  %v2106_v61 = vld [vmem:[%s13888_s4 + $0x58] sm:$0xff] }
 0x59a   :  { %9447 = vmatmul.mubr.msk.f32.gmra.mrb[64].mxu0 %vm1493_vm7, %v1466_v59  ;;  %v8375_v59 = vld [vmem:[%s13888_s4 + $0x80] sm:$0xff] }
 0x59b   :  { %9449 = vmatprep.mubr.msk.f32.mxu0 %vm11493_vm0, %v11494_v1  ;;  %10165 = vmatpush3.bf16.msra.mxu0 %v10164_v57  ;;  %v8382_v57 = vld [vmem:[%s13888_s4 + $0xb8] sm:$0xff] }
 0x59c   :  { %10166 = vmatprep.subr.bf16.mxu0 %v11492_v0  ;;  %v10197_v3 = vpack.c.bf16 %v8382_v57, %v8381_v56  ;;  %v2109_v56 = vld [vmem:[%s13888_s4 + $0x70] sm:$0xff]  ;;  %v2110_v57 = vld [vmem:[%s13888_s4 + $0x78] sm:$0xff] }
 0x59e   :  { %9450 = vmatmul.mubr.msk.f32.gmra.mrb[66].mxu0 %vm1493_vm7, %v1467_v60  ;;  %v8376_v60 = vld [vmem:[%s13888_s4 + $0x88] sm:$0xff] }
 0x59f   :  { %9493 = vmatprep.mubr.msk.f32.mxu0 %vm11493_vm0, %v11494_v1  ;;  %10168 = vmatpush3.bf16.msra.mxu0 %v10167_v8  ;;  %v10188_v49 = vpack.c.bf16 %v8376_v60, %v8375_v59  ;;  %v2103_v59 = vld [vmem:[%s13888_s4 + $0x40] sm:$0xff]  ;;  %v2104_v60 = vld [vmem:[%s13888_s4 + $0x48] sm:$0xff] }
 0x5a0   :  { %10169 = vmatprep.subr.bf16.mxu0 %v11492_v0 }
 0x5a3   :  { %10171 = vmatpush3.bf16.msra.mxu0 %v10170_v14 }
 0x5a4   :  { %10184 = vmatprep.subr.bf16.mxu0 %v11492_v0 }
 0x65d   :  { %v1572_v18 = vpop.f32.mrb[56].mxu0 }
 0x65e   :  { %v9426_v19 = vpop.f32.mrb[57].mxu0 }
 0x661   :  { %v1577_v20 = vpop.f32.mrb[58].mxu0 }
 0x662   :  { %v9429_v21 = vpop.f32.mrb[59].mxu0 }
 0x665   :  { %v1582_v22 = vpop.f32.mrb[60].mxu0 }
 0x666   :  { %v9432_v23 = vpop.f32.mrb[61].mxu0 }
 0x669   :  { %v1661_v24 = vpop.f32.mrb[62].mxu0 }
 0x66a   :  { %v1675_v25 = vmax.f32 %v1572_v18, %v1661_v24  ;;  %v9445_v26 = vpop.f32.mrb[63].mxu0 }
 0x66c   :  { %1678 = vst.msk [vmem:[#allocation4] sm:$0xff] %vm180_vm1, %v1675_v25  ;;  %v1986_v25 = vld [vmem:[#allocation19 + $0x2] ss:$0 sm:$0xff] }
 0x66d   :  { %v1666_v27 = vpop.f32.mrb[64].mxu0 }
 0x66e   :  { %v1676_v28 = vmax.f32 %v1577_v20, %v1666_v27  ;;  %v9448_v29 = vpop.f32.mrb[65].mxu0 }
 0x670   :  { %1679 = vst.msk [vmem:[#allocation4 + $0x8] sm:$0xff] %vm180_vm1, %v1676_v28 }
 0x671   :  { %v1671_v30 = vpop.f32.mrb[66].mxu0 }
 0x672   :  { %v1677_v31 = vmax.f32 %v1582_v22, %v1671_v30  ;;  %v9451_v32 = vpop.f32.mrb[67].mxu0 }
 0x673   :  { %v1681_v35 = vld [vmem:[#allocation4] sm:$0xff] }
 0x674   :  { %1680 = vst.msk [vmem:[#allocation4 + $0x10] sm:$0xf] %vm1088_vm6, %v1677_v31  ;;  %9494 = vmatmul.mubr.msk.f32.vlgmr.msra.gmra.mrb[68].mxu0 %vm180_vm1, %v1681_v35 }
 0x675   :  { %9496 = vmatprep.mubr.msk.f32.mxu0 %vm11493_vm0, %v11494_v1 }
 0x677   :  { %v1692_v39 = vld [vmem:[#allocation4 + $0x1] sm:$0xff] }
 0x678   :  { %v1682_v42 = vld [vmem:[#allocation4 + $0x8] sm:$0xff]  ;;  %9469 = vmatmul.mubr.msk.f32.vlgmr.msra.gmra.mrb[66].mxu1 %vm180_vm1, %v1692_v39  ;;  %v2096_v39 = vld [vmem:[%s13888_s4 + $0x8] sm:$0xff] }
 0x679   :  { %9497 = vmatmul.mubr.msk.f32.gmra.mrb[70].mxu0 %vm180_vm1, %v1682_v42  ;;  %10174 = vmatpush3.bf16.msra.mxu1 %v10173_v36  ;;  %v1882_v55 = vld [vmem:[#allocation4 + $0x2] sm:$0xff]  ;;  %v10212_v43 = vpack.c.bf16 %v2096_v39, %v2095_v38 }
 0x67a   :  { %9471 = vmatprep.mubr.msk.f32.mxu1 %vm11493_vm0, %v11494_v1  ;;  %9499 = vmatprep.mubr.msk.f32.mxu0 %vm11493_vm0, %v11494_v1  ;;  %v8401_v38 = vld [vmem:[%s13888_s4 + $0x150] sm:$0xff]  ;;  %v8402_v39 = vld [vmem:[%s13888_s4 + $0x158] sm:$0xff] }
 0x67b   :  { %10175 = vmatprep.subr.bf16.mxu1 %v11492_v0  ;;  %v1693_v47 = vld [vmem:[#allocation4 + $0x9] sm:$0xff]  ;;  %v1694_v51 = vld [vmem:[#allocation4 + $0x11] sm:$0x3] }
 0x67c   :  { %v1683_v41 = vld [vmem:[#allocation4 + $0x10] sm:$0x3]  ;;  %9472 = vmatmul.mubr.msk.f32.gmra.mrb[68].mxu1 %vm180_vm1, %v1693_v47  ;;  %v1884_v48 = vld [vmem:[#allocation4 + $0x12] sm:$0x3]  ;;  %v2098_v47 = vld [vmem:[%s13888_s4 + $0x18] sm:$0xff] }
 0x67d   :  { %9500 = vmatmul.mubr.msk.f32.gmra.mrb[72].mxu0 %vm180_vm1, %v1683_v41  ;;  %10177 = vmatpush3.bf16.msra.mxu1 %v10176_v40  ;;  %v1883_v58 = vld [vmem:[#allocation4 + $0xa] sm:$0xff]  ;;  %v1993_v40 = vld [vmem:[#allocation21 + $0xb4] sm:$0xff] }
 0x67e   :  { %9474 = vmatprep.mubr.msk.f32.mxu1 %vm11493_vm0, %v11494_v1  ;;  %10178 = vmatprep.subr.bf16.mxu1 %v11492_v0  ;;  %v1994_v41 = vld [vmem:[#allocation21 + $0xbc] sm:$0xff] }
 0x67f   :  { %9533 = vmatprep.mubr.msk.f32.mxu0 %vm11493_vm0, %v11494_v1 }
 0x680   :  { %9475 = vmatmul.mubr.msk.f32.gmra.mrb[70].mxu1 %vm180_vm1, %v1694_v51  ;;  %v1995_v51 = vld [vmem:[#allocation21 + $0xc4] sm:$0xf] }
 0x681   :  { %10180 = vmatpush3.bf16.msra.mxu1 %v10179_v50  ;;  %9518 = vmatprep.mubr.msk.f32.mxu1 %vm11493_vm0, %v11494_v1  ;;  %v10215_v50 = vpack.c.bf16 %v2098_v47, %v2097_v46  ;;  %v8405_v47 = vld [vmem:[%s13888_s4 + $0x170] sm:$0xff] }
 0x682   :  { %10181 = vmatprep.subr.bf16.mxu1 %v11492_v0 }
 0x685   :  { %10183 = vmatpush3.bf16.msra.mxu1 %v10182_v54  ;;  %v10218_v54 = vpack.c.bf16 %v2100_v45, %v2099_v44 }
 0x686   :  { %10187 = vmatprep.subr.bf16.mxu1 %v11492_v0 }
 0x688   :  { %9519 = vmatmul.mubr.msk.f32.vlgmr.msra.gmra.mrb[72].mxu1 %vm180_vm1, %v1882_v55  ;;  %v2101_v55 = vld [vmem:[%s13888_s4 + $0x30] sm:$0xff] }
 0x689   :  { %9521 = vmatprep.mubr.msk.f32.mxu1 %vm11493_vm0, %v11494_v1  ;;  %10189 = vmatpush3.bf16.msra.mxu1 %v10188_v49  ;;  %v10224_v49 = vpack.c.bf16 %v2104_v60, %v2103_v59 }
 0x68a   :  { %10190 = vmatprep.subr.bf16.mxu1 %v11492_v0 }
 0x68c   :  { %9522 = vmatmul.mubr.msk.f32.gmra.mrb[74].mxu1 %vm180_vm1, %v1883_v58  ;;  %v2102_v58 = vld [vmem:[%s13888_s4 + $0x38] sm:$0xff] }
 0x68d   :  { %9524 = vmatprep.mubr.msk.f32.mxu1 %vm11493_vm0, %v11494_v1  ;;  %10192 = vmatpush3.bf16.msra.mxu1 %v10191_v62  ;;  %v10227_v62 = vpack.c.bf16 %v2106_v61, %v2105_v52 }
 0x68e   :  { %10193 = vmatprep.subr.bf16.mxu1 %v11492_v0 }
 0x690   :  { %9525 = vmatmul.mubr.msk.f32.gmra.mrb[76].mxu1 %vm180_vm1, %v1884_v48  ;;  %v10221_v48 = vpack.c.bf16 %v2102_v58, %v2101_v55  ;;  %vm4770_vm1 = vcmask 254976  }
 0x691   :  { %9574 = vmatprep.mubr.msk.f32.mxu1 %vm11493_vm0, %v11494_v1  ;;  %10195 = vmatpush3.bf16.msra.mxu1 %v10194_v2  ;;  %v10230_v2 = vpack.c.bf16 %v2108_v63, %v2107_v53 }
 0x692   :  { %10196 = vmatprep.subr.bf16.mxu1 %v11492_v0 }
 0x695   :  { %10198 = vmatpush3.bf16.msra.mxu1 %v10197_v3  ;;  %v10233_v3 = vpack.c.bf16 %v2110_v57, %v2109_v56 }
 0x696   :  { %10199 = vmatprep.subr.bf16.mxu1 %v11492_v0 }
 0x699   :  { %10201 = vmatpush3.bf16.msra.mxu1 %v10200_v6  ;;  %v10203_v6 = vpack.c.bf16 %v8386_v5, %v8385_v4 }
 0x69a   :  { %10202 = vmatprep.subr.bf16.mxu1 %v11492_v0 }
 0x69d   :  { %10204 = vmatpush3.bf16.msra.mxu1 %v10203_v6 }
 0x69e   :  { %10205 = vmatprep.subr.bf16.mxu1 %v11492_v0 }
 0x747   :  { %v1868_v7 = vpop.f32.mrb[68].mxu0 }
 0x748   :  { %v9495_v8 = vpop.f32.mrb[69].mxu0 }
 0x749   :  { %v8388_v8 = vld [vmem:[%s13888_s4 + $0xe8] sm:$0xff] }
 0x74b   :  { %v1779_v9 = vpop.f32.mrb[66].mxu1 }
 0x74c   :  { %v1873_v10 = vpop.f32.mrb[70].mxu0  ;;  %v1869_v11 = vadd.f32 %v1868_v7, %v1779_v9  ;;  %v9470_v12 = vpop.f32.mrb[67].mxu1  ;;  %v8387_v7 = vld [vmem:[%s13888_s4 + $0xe0] sm:$0xff] }
 0x74d   :  { %v9498_v13 = vpop.f32.mrb[71].mxu0  ;;  %v10206_v9 = vpack.c.bf16 %v8388_v8, %v8387_v7  ;;  %v2394_v7 = vld [vmem:[#allocation19 + $0x3] ss:$0 sm:$0xff] }
 0x74f   :  { %v1784_v14 = vpop.f32.mrb[68].mxu1  ;;  %10207 = vmatpush3.bf16.msra.mxu1 %v10206_v9 }
 0x750   :  { %v1878_v15 = vpop.f32.mrb[72].mxu0  ;;  %v1874_v16 = vadd.f32 %v1873_v10, %v1784_v14  ;;  %v9473_v17 = vpop.f32.mrb[69].mxu1  ;;  %10208 = vmatprep.subr.bf16.mxu1 %v11492_v0  ;;  %v8389_v10 = vld [vmem:[%s13888_s4 + $0xf0] sm:$0xff] }
 0x751   :  { %v9501_v18 = vpop.f32.mrb[73].mxu0  ;;  %v8391_v17 = vld [vmem:[%s13888_s4 + $0x100] sm:$0xff] }
 0x752   :  { %v8392_v18 = vld [vmem:[%s13888_s4 + $0x108] sm:$0xff] }
 0x753   :  { %v1789_v19 = vpop.f32.mrb[70].mxu1 }
 0x754   :  { %v1879_v20 = vadd.f32 %v1878_v15, %v1789_v19  ;;  %v9476_v21 = vpop.f32.mrb[71].mxu1 }
 0x755   :  { %v10236_v21 = vpack.c.bf16 %v8392_v18, %v8391_v17 }
 0x75b   :  { %v1969_v22 = vpop.f32.mrb[72].mxu1 }
 0x75c   :  { %v1983_v23 = vadd.f32 %v1969_v22, %v1869_v11  ;;  %v9520_v24 = vpop.f32.mrb[73].mxu1  ;;  %v8390_v11 = vld [vmem:[%s13888_s4 + $0xf8] sm:$0xff]  ;;  %v8393_v22 = vld [vmem:[%s13888_s4 + $0x110] sm:$0xff] }
 0x75d   :  { %v10209_v12 = vpack.c.bf16 %v8390_v11, %v8389_v10 }
 0x75e   :  { %v1987_v27 = vadd.f32 %v1986_v25, %v1983_v23  ;;  %v8394_v23 = vld [vmem:[%s13888_s4 + $0x118] sm:$0xff] }
 0x75f   :  { %v1974_v26 = vpop.f32.mrb[74].mxu1  ;;  %10210 = vmatpush3.bf16.msra.mxu1 %v10209_v12 }
 0x760   :  { %v1984_v28 = vadd.f32 %v1974_v26, %v1874_v16  ;;  %v9523_v29 = vpop.f32.mrb[75].mxu1  ;;  %v1990_v32 = vmax.f32 %v1987_v27, 0.0  ;;  %10235 = vmatprep.subr.bf16.mxu1 %v11492_v0  ;;  %v8395_v26 = vld [vmem:[%s13888_s4 + $0x120] sm:$0xff]  ;;  %v8396_v27 = vld [vmem:[%s13888_s4 + $0x128] sm:$0xff] }
 0x762   :  { %v1988_v30 = vadd.f32 %v1986_v25, %v1984_v28 }
 0x763   :  { %v1979_v31 = vpop.f32.mrb[76].mxu1 }
 0x764   :  { %v1991_v33 = vmax.f32 %v1988_v30, 0.0  ;;  %v1985_v34 = vadd.f32 %v1979_v31, %v1879_v20  ;;  %v9526_v35 = vpop.f32.mrb[77].mxu1  ;;  %v10242_v30 = vpack.c.bf16 %v8396_v27, %v8395_v26  ;;  %v2613_v26 = vld [vmem:[#allocation18 + $0x110] sm:$0xff]  ;;  %v2616_v27 = vld [vmem:[#allocation18 + $0x128] sm:$0xff] }
 0x765   :  { %v8399_v35 = vld [vmem:[%s13888_s4 + $0x140] sm:$0xff] }
 0x766   :  { %v10185_v36 = vpack.c.bf16 %v1991_v33, %v1990_v32  ;;  %v1989_v37 = vadd.f32 %v1986_v25, %v1985_v34  ;;  %v10239_v25 = vpack.c.bf16 %v8394_v23, %v8393_v22  ;;  %v8397_v32 = vld [vmem:[%s13888_s4 + $0x130] sm:$0xff]  ;;  %v8398_v33 = vld [vmem:[%s13888_s4 + $0x138] sm:$0xff]  ;;  %v2612_v23 = vld [vmem:[#allocation18 + $0x108] sm:$0xff] }
 0x767   :  { %v10245_v34 = vpack.c.bf16 %v8398_v33, %v8397_v32  ;;  %v2403_v22 = vld [vmem:[#allocation21 + $0xd4] sm:$0xff]  ;;  %v2615_v33 = vld [vmem:[#allocation18 + $0x120] sm:$0xff] }
 0x768   :  { %10186 = vmatpush3.bf16.msra.mxu0 %v10185_v36  ;;  %v1992_v42 = vmax.f32 %v1989_v37, 0.0  ;;  %v8400_v36 = vld [vmem:[%s13888_s4 + $0x148] sm:$0xff] }
 0x769   :  { %9531 = vmatprep.subr.mxu0 %v11494_v1  ;;  %v10248_v37 = vpack.c.bf16 %v8400_v36, %v8399_v35  ;;  %v2620_v35 = vld [vmem:[#allocation18 + $0x148] sm:$0xff]  ;;  %v2622_v36 = vld [vmem:[#allocation18 + $0x158] sm:$0xff] }
 0x76c   :  { %9532 = vmatpush3.msk.msra.mxu0 %vm880_vm4, %v1992_v42  ;;  %v10251_v42 = vpack.c.bf16 %v8402_v39, %v8401_v38  ;;  %v10275_v38 = vpack.c.bf16 %v2622_v36, %v2620_v35  ;;  %v2619_v39 = vld [vmem:[#allocation18 + $0x140] sm:$0xff]  ;;  %v2589_v35 = vld [vmem:[#allocation18 + $0x68] sm:$0xff]  ;;  %v2591_v36 = vld [vmem:[#allocation18 + $0x78] sm:$0xff] }
 0x76d   :  { %9534 = vmatmul.mubr.msk.f32.vlgmr.msra.gmra.mrb[74].mxu0 %vm1996_vm8, %v1993_v40  ;;  %10211 = vmatprep.subr.bf16.mxu0 %v11492_v0  ;;  %v8403_v40 = vld [vmem:[%s13888_s4 + $0x160] sm:$0xff] }
 0x76e   :  { %9536 = vmatprep.mubr.msk.f32.mxu0 %vm11493_vm0, %v11494_v1  ;;  %10213 = vmatpush3.bf16.msra.mxu0 %v10212_v43  ;;  %v8404_v43 = vld [vmem:[%s13888_s4 + $0x168] sm:$0xff] }
 0x76f   :  { %10214 = vmatprep.subr.bf16.mxu0 %v11492_v0  ;;  %v10254_v46 = vpack.c.bf16 %v8404_v43, %v8403_v40  ;;  %v2624_v40 = vld [vmem:[#allocation18 + $0x168] sm:$0xff]  ;;  %v2626_v43 = vld [vmem:[#allocation18 + $0x178] sm:$0xff] }
 0x771   :  { %9537 = vmatmul.mubr.msk.f32.gmra.mrb[76].mxu0 %vm1996_vm8, %v1994_v41  ;;  %v8406_v41 = vld [vmem:[%s13888_s4 + $0x178] sm:$0xff] }
 0x772   :  { %9539 = vmatprep.mubr.msk.f32.mxu0 %vm11493_vm0, %v11494_v1  ;;  %10216 = vmatpush3.bf16.msra.mxu0 %v10215_v50  ;;  %v10257_v50 = vpack.c.bf16 %v8406_v41, %v8405_v47  ;;  %v10279_v47 = vpack.c.bf16 %v2626_v43, %v2624_v40  ;;  %v2623_v41 = vld [vmem:[#allocation18 + $0x160] sm:$0xff]  ;;  %v2593_v40 = vld [vmem:[#allocation18 + $0x88] sm:$0xff]  ;;  %v2595_v43 = vld [vmem:[#allocation18 + $0x98] sm:$0xff] }
 0x773   :  { %10217 = vmatprep.subr.bf16.mxu0 %v11492_v0 }
 0x775   :  { %9540 = vmatmul.mubr.msk.f32.gmra.mrb[78].mxu0 %vm1996_vm8, %v1995_v51 }
 0x776   :  { %10219 = vmatpush3.bf16.msra.mxu0 %v10218_v54  ;;  %9615 = vmatprep.mubr.msk.f32.mxu0 %vm11493_vm0, %v11494_v1  ;;  %v2401_v54 = vld [vmem:[#allocation21 + $0xc8] sm:$0xff] }
 0x777   :  { %10220 = vmatprep.subr.bf16.mxu0 %v11492_v0 }
 0x77a   :  { %10222 = vmatpush3.bf16.msra.mxu0 %v10221_v48 }
 0x77b   :  { %10223 = vmatprep.subr.bf16.mxu0 %v11492_v0 }
 0x77e   :  { %10225 = vmatpush3.bf16.msra.mxu0 %v10224_v49 }
 0x77f   :  { %10226 = vmatprep.subr.bf16.mxu0 %v11492_v0 }
 0x782   :  { %10228 = vmatpush3.bf16.msra.mxu0 %v10227_v62 }
 0x783   :  { %10229 = vmatprep.subr.bf16.mxu0 %v11492_v0 }
 0x786   :  { %10231 = vmatpush3.bf16.msra.mxu0 %v10230_v2 }
 0x787   :  { %10232 = vmatprep.subr.bf16.mxu0 %v11492_v0 }
 0x78a   :  { %10234 = vmatpush3.bf16.msra.mxu0 %v10233_v3 }
 0x840   :  { %v2075_v13 = vpop.f32.mrb[74].mxu0 }
 0x841   :  { %2089 = vst [vmem:[#allocation5] sm:$0xff] %v2075_v13  ;;  %v9535_v14 = vpop.f32.mrb[75].mxu0  ;;  %9616 = vmatmul.mubr.f32.vlgmr.msra.gmra.mrb[80].mxu0 %v2075_v13 }
 0x842   :  { %9618 = vmatprep.mubr.msk.f32.mxu0 %vm11493_vm0, %v11494_v1 }
 0x844   :  { %v2080_v15 = vpop.f32.mrb[76].mxu0 }
 0x845   :  { %2090 = vst [vmem:[#allocation5 + $0x8] sm:$0xff] %v2080_v15  ;;  %v9538_v16 = vpop.f32.mrb[77].mxu0  ;;  %9619 = vmatmul.mubr.f32.gmra.mrb[82].mxu0 %v2080_v15 }
 0x846   :  { %9621 = vmatprep.mubr.msk.f32.mxu0 %vm11493_vm0, %v11494_v1 }
 0x848   :  { %v2085_v19 = vpop.f32.mrb[78].mxu0 }
 0x849   :  { %2091 = vst [vmem:[#allocation5 + $0x10] sm:$0xf] %v2085_v19  ;;  %v9541_v20 = vpop.f32.mrb[79].mxu0 }
 0x84c   :  { %v2111_v24 = vld [vmem:[#allocation5 + $0x1] sm:$0xff] }
 0x84d   :  { %9575 = vmatmul.mubr.f32.vlgmr.msra.gmra.mrb[78].mxu1 %v2111_v24  ;;  %v2291_v44 = vld [vmem:[#allocation5 + $0x2] sm:$0xff] }
 0x84e   :  { %10237 = vmatpush3.bf16.msra.mxu1 %v10236_v21  ;;  %9577 = vmatprep.mubr.msk.f32.mxu1 %vm11493_vm0, %v11494_v1  ;;  %v2402_v21 = vld [vmem:[#allocation21 + $0xd0] sm:$0xf]  ;;  %v2614_v24 = vld [vmem:[#allocation18 + $0x118] sm:$0xff] }
 0x84f   :  { %10238 = vmatprep.subr.bf16.mxu1 %v11492_v0 }
 0x850   :  { %v2112_v28 = vld [vmem:[#allocation5 + $0x9] sm:$0xff]  ;;  %v2113_v31 = vld [vmem:[#allocation5 + $0x11] sm:$0x3] }
 0x851   :  { %v2094_v29 = vld [vmem:[#allocation5 + $0x10] sm:$0x3]  ;;  %9578 = vmatmul.mubr.f32.gmra.mrb[80].mxu1 %v2112_v28  ;;  %v2293_v51 = vld [vmem:[#allocation5 + $0x12] sm:$0x3]  ;;  %v2618_v28 = vld [vmem:[#allocation18 + $0x138] sm:$0xff] }
 0x852   :  { %9622 = vmatmul.mubr.f32.gmra.mrb[84].mxu0 %v2094_v29  ;;  %10240 = vmatpush3.bf16.msra.mxu1 %v10239_v25  ;;  %v2292_v45 = vld [vmem:[#allocation5 + $0xa] sm:$0xff]  ;;  %v10267_v29 = vpack.c.bf16 %v2614_v24, %v2612_v23  ;;  %v10271_v32 = vpack.c.bf16 %v2618_v28, %v2616_v27  ;;  %v2585_v28 = vld [vmem:[#allocation18 + $0x48] sm:$0xff] }
 0x853   :  { %9580 = vmatprep.mubr.msk.f32.mxu1 %vm11493_vm0, %v11494_v1  ;;  %10241 = vmatprep.subr.bf16.mxu1 %v11492_v0  ;;  %v2611_v25 = vld [vmem:[#allocation18 + $0x100] sm:$0xff] }
 0x854   :  { %9671 = vmatprep.mubr.msk.f32.mxu0 %vm1996_vm8, %v2401_v54 }
 0x855   :  { %9581 = vmatmul.mubr.f32.gmra.mrb[82].mxu1 %v2113_v31  ;;  %v10269_v31 = vpack.c.bf16 %v2613_v26, %v2611_v25  ;;  %v2580_v25 = vld [vmem:[#allocation18 + $0x20] sm:$0xff]  ;;  %v2582_v26 = vld [vmem:[#allocation18 + $0x30] sm:$0xff] }
 0x856   :  { %10243 = vmatpush3.bf16.msra.mxu1 %v10242_v30  ;;  %9656 = vmatprep.mubr.msk.f32.mxu1 %vm11493_vm0, %v11494_v1  ;;  %v2404_v30 = vld [vmem:[#allocation21 + $0xdc] sm:$0xf] }
 0x857   :  { %10244 = vmatprep.subr.bf16.mxu1 %v11492_v0 }
 0x85a   :  { %10246 = vmatpush3.bf16.msra.mxu1 %v10245_v34  ;;  %v2617_v34 = vld [vmem:[#allocation18 + $0x130] sm:$0xff] }
 0x85b   :  { %10247 = vmatprep.subr.bf16.mxu1 %v11492_v0 }
 0x85e   :  { %10249 = vmatpush3.bf16.msra.mxu1 %v10248_v37  ;;  %v10273_v37 = vpack.c.bf16 %v2617_v34, %v2615_v33  ;;  %v2586_v33 = vld [vmem:[#allocation18 + $0x50] sm:$0xff] }
 0x85f   :  { %10250 = vmatprep.subr.bf16.mxu1 %v11492_v0 }
 0x862   :  { %10252 = vmatpush3.bf16.msra.mxu1 %v10251_v42  ;;  %v2621_v42 = vld [vmem:[#allocation18 + $0x150] sm:$0xff] }
 0x863   :  { %10253 = vmatprep.subr.bf16.mxu1 %v11492_v0 }
 0x866   :  { %10255 = vmatpush3.bf16.msra.mxu1 %v10254_v46  ;;  %v10277_v46 = vpack.c.bf16 %v2621_v42, %v2619_v39  ;;  %v2588_v39 = vld [vmem:[#allocation18 + $0x60] sm:$0xff]  ;;  %v2590_v42 = vld [vmem:[#allocation18 + $0x70] sm:$0xff] }
 0x867   :  { %10256 = vmatprep.subr.bf16.mxu1 %v11492_v0 }
 0x86a   :  { %10258 = vmatpush3.bf16.msra.mxu1 %v10257_v50  ;;  %v2625_v50 = vld [vmem:[#allocation18 + $0x170] sm:$0xff] }
 0x86d   :  { %9657 = vmatmul.mubr.f32.vlgmr.msra.gmra.mrb[84].mxu1 %v2291_v44  ;;  %v10281_v44 = vpack.c.bf16 %v2625_v50, %v2623_v41  ;;  %v2592_v41 = vld [vmem:[#allocation18 + $0x80] sm:$0xff]  ;;  %v2594_v50 = vld [vmem:[#allocation18 + $0x90] sm:$0xff] }
 0x86e   :  { %9659 = vmatprep.mubr.msk.f32.mxu1 %vm11493_vm0, %v11494_v1 }
 0x871   :  { %9660 = vmatmul.mubr.f32.gmra.mrb[86].mxu1 %v2292_v45  ;;  %v2628_v45 = vld [vmem:[#allocation18 + $0x188] sm:$0xff] }
 0x872   :  { %9662 = vmatprep.mubr.msk.f32.mxu1 %vm11493_vm0, %v11494_v1 }
 0x875   :  { %9663 = vmatmul.mubr.f32.gmra.mrb[88].mxu1 %v2293_v51  ;;  %v2630_v51 = vld [vmem:[#allocation18 + $0x198] sm:$0xff] }
 0x876   :  { %3030 = vmatprep.mubr.f32.mxu1 %v11494_v1  ;;  %v10283_v54 = vpack.c.bf16 %v2630_v51, %v2628_v45  ;;  %v2599_v45 = vld [vmem:[#allocation18 + $0xb8] sm:$0xff]  ;;  %v10317_v51 = vpack.c.bf16 %v2594_v50, %v2592_v41  ;;  %v2826_v41 = vld [vmem:[#allocation18 + $0x2d0] sm:$0xff]  ;;  %v2829_v50 = vld [vmem:[#allocation18 + $0x2e8] sm:$0xff] }
 0x914   :  { %v2277_v55 = vpop.f32.mrb[80].mxu0 }
 0x915   :  { %v9617_v58 = vpop.f32.mrb[81].mxu0 }
 0x916   :  { %v2629_v58 = vld [vmem:[#allocation18 + $0x190] sm:$0xff] }
 0x918   :  { %v2282_v48 = vpop.f32.mrb[82].mxu0 }
 0x919   :  { %v9620_v59 = vpop.f32.mrb[83].mxu0 }
 0x91a   :  { %v2632_v59 = vld [vmem:[#allocation18 + $0x1a8] sm:$0xff] }
 0x920   :  { %v2197_v60 = vpop.f32.mrb[78].mxu1 }
 0x921   :  { %v2278_v49 = vadd.f32 %v2277_v55, %v2197_v60  ;;  %v9576_v52 = vpop.f32.mrb[79].mxu1  ;;  %v2627_v55 = vld [vmem:[#allocation18 + $0x180] sm:$0xff]  ;;  %v2634_v60 = vld [vmem:[#allocation18 + $0x1b8] sm:$0xff] }
 0x922   :  { %v2631_v52 = vld [vmem:[#allocation18 + $0x1a0] sm:$0xff] }
 0x924   :  { %v2202_v61 = vpop.f32.mrb[80].mxu1 }
 0x925   :  { %v2287_v62 = vpop.f32.mrb[84].mxu0  ;;  %v2283_v53 = vadd.f32 %v2282_v48, %v2202_v61  ;;  %v9579_v63 = vpop.f32.mrb[81].mxu1  ;;  %v10285_v48 = vpack.c.bf16 %v2629_v58, %v2627_v55  ;;  %v2633_v61 = vld [vmem:[#allocation18 + $0x1b0] sm:$0xff]  ;;  %v2596_v55 = vld [vmem:[#allocation18 + $0xa0] sm:$0xff] }
 0x926   :  { %v9623_v2 = vpop.f32.mrb[85].mxu0  ;;  %v2638_v63 = vld [vmem:[#allocation18 + $0x1d8] sm:$0xff]  ;;  %v2598_v58 = vld [vmem:[#allocation18 + $0xb0] sm:$0xff] }
 0x928   :  { %v2207_v56 = vpop.f32.mrb[82].mxu1 }
 0x929   :  { %v2288_v57 = vadd.f32 %v2287_v62, %v2207_v56  ;;  %v9582_v3 = vpop.f32.mrb[83].mxu1  ;;  %v10289_v62 = vpack.c.bf16 %v2633_v61, %v2631_v52  ;;  %v2635_v56 = vld [vmem:[#allocation18 + $0x1c0] sm:$0xff]  ;;  %v2602_v61 = vld [vmem:[#allocation18 + $0xd0] sm:$0xff] }
 0x92a   :  { %v2600_v52 = vld [vmem:[#allocation18 + $0xc0] sm:$0xff] }
 0x940   :  { %v2377_v4 = vpop.f32.mrb[84].mxu1 }
 0x941   :  { %v2391_v5 = vadd.f32 %v2377_v4, %v2278_v49  ;;  %v9658_v6 = vpop.f32.mrb[85].mxu1  ;;  %v10287_v49 = vpack.c.bf16 %v2634_v60, %v2632_v59  ;;  %v2640_v4 = vld [vmem:[#allocation18 + $0x1e8] sm:$0xff]  ;;  %v2603_v59 = vld [vmem:[#allocation18 + $0xd8] sm:$0xff]  ;;  %v10321_v60 = vpack.c.bf16 %v2598_v58, %v2596_v55  ;;  %v2830_v55 = vld [vmem:[#allocation18 + $0x2f0] sm:$0xff] }
 0x942   :  { %v2639_v6 = vld [vmem:[#allocation18 + $0x1e0] sm:$0xff] }
 0x943   :  { %v2395_v9 = vadd.f32 %v2394_v7, %v2391_v5  ;;  %v2642_v5 = vld [vmem:[#allocation18 + $0x1f8] sm:$0xff] }
 0x944   :  { %v2382_v8 = vpop.f32.mrb[86].mxu1 }
 0x945   :  { %v2392_v10 = vadd.f32 %v2382_v8, %v2283_v53  ;;  %v9661_v11 = vpop.f32.mrb[87].mxu1  ;;  %v2398_v14 = vmax.f32 %v2395_v9, 0.0  ;;  %v2636_v53 = vld [vmem:[#allocation18 + $0x1c8] sm:$0xff]  ;;  %v2641_v8 = vld [vmem:[#allocation18 + $0x1f0] sm:$0xff] }
 0x946   :  { %v10291_v2 = vpack.c.bf16 %v2638_v63, %v2636_v53  ;;  %v2577_v9 = vld [vmem:[#allocation18 + $0x8] sm:$0xff]  ;;  %v10297_v11 = vpack.c.bf16 %v2641_v8, %v2639_v6  ;;  %v2607_v53 = vld [vmem:[#allocation18 + $0xf8] sm:$0xff]  ;;  %v10325_v63 = vpack.c.bf16 %v2602_v61, %v2600_v52  ;;  %v2802_v8 = vld [vmem:[#allocation18 + $0x210] sm:$0xff] }
 0x947   :  { %v2396_v12 = vadd.f32 %v2394_v7, %v2392_v10  ;;  %v2579_v10 = vld [vmem:[#allocation18 + $0x18] sm:$0xff]  ;;  %v2914_v61 = vld [vmem:[#allocation19 + $0x4] ss:$8 sm:$0x3] }
 0x948   :  { %v2387_v13 = vpop.f32.mrb[88].mxu1 }
 0x949   :  { %v2399_v15 = vmax.f32 %v2396_v12, 0.0  ;;  %v2393_v16 = vadd.f32 %v2387_v13, %v2288_v57  ;;  %v9664_v17 = vpop.f32.mrb[89].mxu1  ;;  %v2637_v57 = vld [vmem:[#allocation18 + $0x1d0] sm:$0xff]  ;;  %v10299_v12 = vpack.c.bf16 %v2579_v10, %v2577_v9  ;;  %v2805_v9 = vld [vmem:[#allocation18 + $0x228] sm:$0xff]  ;;  %v2807_v10 = vld [vmem:[#allocation18 + $0x238] sm:$0xff] }
 0x94a   :  { %v10293_v3 = vpack.c.bf16 %v2637_v57, %v2635_v56  ;;  %v2604_v56 = vld [vmem:[#allocation18 + $0xe0] sm:$0xff]  ;;  %v2606_v57 = vld [vmem:[#allocation18 + $0xf0] sm:$0xff] }
 0x94b   :  { %v10259_v18 = vpack.c.bf16 %v2399_v15, %v2398_v14  ;;  %v2397_v19 = vadd.f32 %v2394_v7, %v2393_v16  ;;  %v10295_v7 = vpack.c.bf16 %v2642_v5, %v2640_v4  ;;  %v2803_v4 = vld [vmem:[#allocation18 + $0x218] sm:$0xff]  ;;  %v10329_v5 = vpack.c.bf16 %v2606_v57, %v2604_v56 }
 0x94d   :  { %v2400_v20 = vmax.f32 %v2397_v19, 0.0  ;;  %10260 = vmatprep.subr.bf16.mxu0 %v10259_v18  ;;  %v2576_v19 = vld [vmem:[#allocation18] sm:$0xff] }
 0x94e   :  { %10262 = vmatpush3.bf16.msra.mxu0 %v10259_v18 }
 0x94f   :  { %9669 = vmatprep.subr.msk.mxu0 %vm880_vm4, %v2400_v20 }
 0x952   :  { %9670 = vmatpush3.msk.msra.mxu0 %vm880_vm4, %v2400_v20 }
 0x953   :  { %9672 = vmatmul.mubr.msk.f32.vlgmr.msra.gmra.mrb[86].mxu0 %vm1996_vm8, %v2402_v21  ;;  %10264 = vmatprep.subr.bf16.mxu0 %v10259_v18  ;;  %v2581_v21 = vld [vmem:[#allocation18 + $0x28] sm:$0xff] }
 0x954   :  { %10266 = vmatpush3.bf16.msra.mxu0 %v10259_v18  ;;  %9680 = vmatprep.mubr.msk.f32.mxu0 %vm1996_vm8, %v2403_v22  ;;  %v2583_v22 = vld [vmem:[#allocation18 + $0x38] sm:$0xff] }
 0x955   :  { %9678 = vmatprep.subr.msk.mxu0 %vm880_vm4, %v2400_v20  ;;  %v10303_v24 = vpack.c.bf16 %v2583_v22, %v2581_v21  ;;  %v2810_v21 = vld [vmem:[#allocation18 + $0x250] sm:$0xff] }
 0x958   :  { %9679 = vmatpush3.msk.msra.mxu0 %vm880_vm4, %v2400_v20  ;;  %v2578_v20 = vld [vmem:[#allocation18 + $0x10] sm:$0xff]  ;;  %vm6672_vm4 = vcmask 257026  }
 0x959   :  { %9681 = vmatmul.mubr.msk.f32.vlgmr.msra.gmra.mrb[88].mxu0 %vm1996_vm8, %v2404_v30  ;;  %10268 = vmatprep.subr.bf16.mxu0 %v10267_v29  ;;  %v10301_v23 = vpack.c.bf16 %v2578_v20, %v2576_v19  ;;  %v2587_v29 = vld [vmem:[#allocation18 + $0x58] sm:$0xff]  ;;  %v10305_v30 = vpack.c.bf16 %v2582_v26, %v2580_v25  ;;  %v2808_v20 = vld [vmem:[#allocation18 + $0x240] sm:$0xff] }
 0x95a   :  { %10270 = vmatpush1.bf16.msra.mxu0 %v10269_v31  ;;  %2707 = vmatprep.mubr.f32.mxu0 %v11494_v1  ;;  %v10307_v31 = vpack.c.bf16 %v2587_v29, %v2585_v28  ;;  %v10341_v25 = vpack.c.bf16 %v2810_v21, %v2808_v20  ;;  %v2817_v28 = vld [vmem:[#allocation18 + $0x288] sm:$0xff]  ;;  %v2819_v29 = vld [vmem:[#allocation18 + $0x298] sm:$0xff] }
 0x95b   :  { %10272 = vmatprep.subr.bf16.mxu0 %v10271_v32  ;;  %v2584_v32 = vld [vmem:[#allocation18 + $0x40] sm:$0xff] }
 0x95e   :  { %10274 = vmatpush1.bf16.msra.mxu0 %v10273_v37  ;;  %v10309_v37 = vpack.c.bf16 %v2586_v33, %v2584_v32  ;;  %v2816_v32 = vld [vmem:[#allocation18 + $0x280] sm:$0xff]  ;;  %v2818_v33 = vld [vmem:[#allocation18 + $0x290] sm:$0xff] }
 0x95f   :  { %10276 = vmatprep.subr.bf16.mxu0 %v10275_v38  ;;  %v10311_v38 = vpack.c.bf16 %v2591_v36, %v2589_v35  ;;  %v2823_v35 = vld [vmem:[#allocation18 + $0x2b8] sm:$0xff]  ;;  %v10349_v36 = vpack.c.bf16 %v2818_v33, %v2816_v32  ;;  %v8421_v32 = vld [vmem:[%s13890_s6 + $0x220] sm:$0xff] }
 0x960   :  { %v8423_v33 = vld [vmem:[%s13890_s6 + $0x230] sm:$0xff] }
 0x962   :  { %10278 = vmatpush1.bf16.msra.mxu0 %v10277_v46  ;;  %v10313_v46 = vpack.c.bf16 %v2590_v42, %v2588_v39  ;;  %v2822_v39 = vld [vmem:[#allocation18 + $0x2b0] sm:$0xff]  ;;  %v2825_v42 = vld [vmem:[#allocation18 + $0x2c8] sm:$0xff] }
 0x963   :  { %10280 = vmatprep.subr.bf16.mxu0 %v10279_v47  ;;  %v10315_v47 = vpack.c.bf16 %v2595_v43, %v2593_v40  ;;  %v2827_v40 = vld [vmem:[#allocation18 + $0x2d8] sm:$0xff] }
 0x966   :  { %10282 = vmatpush1.bf16.msra.mxu0 %v10281_v44  ;;  %v2597_v44 = vld [vmem:[#allocation18 + $0xa8] sm:$0xff] }
 0x967   :  { %10284 = vmatprep.subr.bf16.mxu0 %v10283_v54  ;;  %v10319_v54 = vpack.c.bf16 %v2599_v45, %v2597_v44  ;;  %v2831_v44 = vld [vmem:[#allocation18 + $0x2f8] sm:$0xff] }
 0x96a   :  { %10286 = vmatpush1.bf16.msra.mxu0 %v10285_v48  ;;  %v2601_v48 = vld [vmem:[#allocation18 + $0xc8] sm:$0xff] }
 0x96b   :  { %10288 = vmatprep.subr.bf16.mxu0 %v10287_v49  ;;  %v10323_v49 = vpack.c.bf16 %v2603_v59, %v2601_v48 }
 0x96e   :  { %10290 = vmatpush1.bf16.msra.mxu0 %v10289_v62  ;;  %v2605_v62 = vld [vmem:[#allocation18 + $0xe8] sm:$0xff] }
 0x96f   :  { %10292 = vmatprep.subr.bf16.mxu0 %v10291_v2  ;;  %v10327_v2 = vpack.c.bf16 %v2607_v53, %v2605_v62 }
 0x972   :  { %10294 = vmatpush1.bf16.msra.mxu0 %v10293_v3  ;;  %v2801_v3 = vld [vmem:[#allocation18 + $0x208] sm:$0xff] }
 0x973   :  { %10296 = vmatprep.subr.bf16.mxu0 %v10295_v7  ;;  %v10331_v6 = vpack.c.bf16 %v2803_v4, %v2801_v3  ;;  %v2800_v7 = vld [vmem:[#allocation18 + $0x200] sm:$0xff] }
 0x976   :  { %10298 = vmatpush1.bf16.msra.mxu0 %v10297_v11  ;;  %v10333_v11 = vpack.c.bf16 %v2802_v8, %v2800_v7 }
 0x977   :  { %10300 = vmatprep.subr.bf16.mxu0 %v10299_v12  ;;  %v10335_v12 = vpack.c.bf16 %v2807_v10, %v2805_v9 }
 0xa26   :  { %v9673_v13 = vpop.f32.mrb[86].mxu0 }
 0xa27   :  { %v2480_v14 = vpop.f32.mrb[87].mxu0 }
 0xa2c   :  { %v9682_v15 = vpop.f32.mrb[88].mxu0 }
 0xa2d   :  { %v2571_v16 = vmax.f32 %v9673_v13, %v9682_v15  ;;  %v2561_v17 = vpop.f32.mrb[89].mxu0  ;;  %v2804_v13 = vld [vmem:[#allocation18 + $0x220] sm:$0xff]  ;;  %v2809_v15 = vld [vmem:[#allocation18 + $0x248] sm:$0xff] }
 0xa2e   :  { %v12241_v18 = vmax.f32 %v2480_v14, %v2561_v17  ;;  %v2806_v14 = vld [vmem:[#allocation18 + $0x230] sm:$0xff] }
 0xa2f   :  { %2573 = vst [vmem:[#allocation6 + $0x8] sm:$0xf] %v2571_v16  ;;  %v2811_v16 = vld [vmem:[#allocation18 + $0x258] sm:$0xff]  ;;  %v10337_v17 = vpack.c.bf16 %v2806_v14, %v2804_v13 }
 0xa30   :  { %2572 = vst [vmem:[#allocation6] sm:$0xff] %v12241_v18  ;;  %v10339_v19 = vpack.c.bf16 %v2811_v16, %v2809_v15 }
 0xa36   :  { %v2609_v34 = vld [vmem:[#allocation6 + $0x9] sm:$0x3] }
 0xa37   :  { %v2608_v27 = vld [vmem:[#allocation6 + $0x1] sm:$0xff]  ;;  %v2798_v59 = vld [vmem:[#allocation6 + $0xa] sm:$0x3] }
 0xa38   :  { %2708 = vmatmul.mubr.f32.vlgmr.msra.gmra.mrb[90].mxu0 %v2608_v27  ;;  %v2575_v22 = vld [vmem:[#allocation6 + $0x8] sm:$0x3]  ;;  %v2812_v27 = vld [vmem:[#allocation18 + $0x260] sm:$0xff] }
 0xa39   :  { %10302 = vmatpush1.bf16.msra.mxu0 %v10301_v23  ;;  %2713 = vmatprep.mubr.f32.mxu0 %v11494_v1  ;;  %v2813_v23 = vld [vmem:[#allocation18 + $0x268] sm:$0xff] }
 0xa3a   :  { %10304 = vmatprep.subr.bf16.mxu0 %v10303_v24  ;;  %v2815_v24 = vld [vmem:[#allocation18 + $0x278] sm:$0xff]  ;;  %v2797_v48 = vld [vmem:[#allocation6 + $0x2] sm:$0xff] }
 0xa3b   :  { %v10343_v26 = vpack.c.bf16 %v2815_v24, %v2813_v23  ;;  %v8562_v23 = vld [vmem:[%s13891_s7 + $0x258] sm:$0xff] }
 0xa3c   :  { %2714 = vmatmul.mubr.f32.gmra.mrb[92].mxu0 %v2609_v34  ;;  %v2821_v34 = vld [vmem:[#allocation18 + $0x2a8] sm:$0xff] }
 0xa3d   :  { %10306 = vmatpush1.bf16.msra.mxu0 %v10305_v30  ;;  %2784 = vmatprep.mubr.f32.mxu0 %v11494_v1 }
 0xa3e   :  { %10308 = vmatprep.subr.bf16.mxu0 %v10307_v31  ;;  %v10347_v31 = vpack.c.bf16 %v2819_v29, %v2817_v28  ;;  %v8424_v28 = vld [vmem:[%s13890_s6 + $0x238] sm:$0xff] }
 0xa3f   :  { %v2951_v29 = vld [vmem:[#allocation21 + $0xe0] sm:$0xff] }
 0xa41   :  { %10310 = vmatpush1.bf16.msra.mxu0 %v10309_v37  ;;  %v10351_v37 = vpack.c.bf16 %v2823_v35, %v2821_v34  ;;  %v8426_v34 = vld [vmem:[%s13890_s6 + $0x248] sm:$0xff]  ;;  %v8428_v35 = vld [vmem:[%s13890_s6 + $0x258] sm:$0xff] }
 0xa42   :  { %10312 = vmatprep.subr.bf16.mxu0 %v10311_v38  ;;  %v2820_v38 = vld [vmem:[#allocation18 + $0x2a0] sm:$0xff] }
 0xa43   :  { %v10353_v43 = vpack.c.bf16 %v2822_v39, %v2820_v38  ;;  %v10377_v38 = vpack.c.bf16 %v8428_v35, %v8426_v34  ;;  %v8425_v39 = vld [vmem:[%s13890_s6 + $0x240] sm:$0xff]  ;;  %v8463_v35 = vld [vmem:[%s13890_s6 + $0x370] sm:$0xff] }
 0xa44   :  { %v8461_v34 = vld [vmem:[%s13890_s6 + $0x360] sm:$0xff] }
 0xa45   :  { %10314 = vmatpush1.bf16.msra.mxu0 %v10313_v46  ;;  %v10355_v46 = vpack.c.bf16 %v2827_v40, %v2825_v42  ;;  %v8427_v42 = vld [vmem:[%s13890_s6 + $0x250] sm:$0xff]  ;;  %v8430_v40 = vld [vmem:[%s13890_s6 + $0x268] sm:$0xff] }
 0xa46   :  { %10316 = vmatprep.subr.bf16.mxu0 %v10315_v47  ;;  %v2824_v47 = vld [vmem:[#allocation18 + $0x2c0] sm:$0xff] }
 0xa47   :  { %v10357_v45 = vpack.c.bf16 %v2826_v41, %v2824_v47  ;;  %v8429_v41 = vld [vmem:[%s13890_s6 + $0x260] sm:$0xff] }
 0xa49   :  { %10318 = vmatpush1.bf16.msra.mxu0 %v10317_v51  ;;  %v10359_v51 = vpack.c.bf16 %v2831_v44, %v2829_v50  ;;  %v8431_v50 = vld [vmem:[%s13890_s6 + $0x270] sm:$0xff]  ;;  %v8434_v44 = vld [vmem:[%s13890_s6 + $0x288] sm:$0xff] }
 0xa4a   :  { %10320 = vmatprep.subr.bf16.mxu0 %v10319_v54  ;;  %v2828_v54 = vld [vmem:[#allocation18 + $0x2e0] sm:$0xff] }
 0xa4b   :  { %v10361_v58 = vpack.c.bf16 %v2830_v55, %v2828_v54  ;;  %v8433_v55 = vld [vmem:[%s13890_s6 + $0x280] sm:$0xff] }
 0xa4d   :  { %10322 = vmatpush1.bf16.msra.mxu0 %v10321_v60  ;;  %v2916_v60 = vlaneseq }
 0xa4e   :  { %10324 = vmatprep.subr.bf16.mxu0 %v10323_v49 }
 0xa4f   :  { %v2917_v49 = vshrl.u32 %v2916_v60, 7 }
 0xa51   :  { %10326 = vmatpush1.bf16.msra.mxu0 %v10325_v63  ;;  %v12251_v52 = vsub.s32 0, %v2917_v49  ;;  %v12253_v62 = vsub.s32 1, %v2917_v49  ;;  %v2931_v63 = vld [vmem:[#allocation19 + $0x5] ss:$8 sm:$0x3] }
 0xa52   :  { %10328 = vmatprep.subr.bf16.mxu0 %v10327_v2 }
 0xa53   :  { %v2919_v53 = vrot.slane %v2914_v61, %v12251_v52  ;;  %v2923_v2 = vrot.slane %v2914_v61, %v12253_v62  ;;  %v2936_v3 = vrot.slane %v2931_v63, %v12251_v52  ;;  %v8437_v61 = vld [vmem:[%s13890_s6 + $0x2a0] sm:$0xff] }
 0xa55   :  { %10330 = vmatpush1.bf16.msra.mxu0 %v10329_v5 }
 0xa56   :  { %10332 = vmatprep.subr.bf16.mxu0 %v10331_v6  ;;  %v2940_v6 = vrot.slane %v2931_v63, %v12253_v62  ;;  %v8442_v63 = vld [vmem:[%s13890_s6 + $0x2c8] sm:$0xff] }
 0xa58   :  { %2785 = vmatmul.mubr.f32.vlgmr.msra.gmra.mrb[90].mxu0 %v12241_v18  ;;  %v2814_v18 = vld [vmem:[#allocation18 + $0x270] sm:$0xff] }
 0xa59   :  { %10334 = vmatpush1.bf16.msra.mxu0 %v10333_v11  ;;  %2790 = vmatprep.mubr.f32.mxu0 %v11494_v1  ;;  %v10345_v30 = vpack.c.bf16 %v2814_v18, %v2812_v27  ;;  %v8419_v27 = vld [vmem:[%s13890_s6 + $0x210] sm:$0xff]  ;;  %v8422_v18 = vld [vmem:[%s13890_s6 + $0x228] sm:$0xff] }
 0xa5a   :  { %10336 = vmatprep.subr.bf16.mxu0 %v10335_v12 }
 0xa5c   :  { %2791 = vmatmul.mubr.f32.gmra.mrb[92].mxu0 %v2575_v22 }
 0xa5d   :  { %10338 = vmatpush1.bf16.msra.mxu0 %v10337_v17  ;;  %2896 = vmatprep.mubr.f32.mxu0 %v11494_v1  ;;  %v8418_v17 = vld [vmem:[%s13890_s6 + $0x208] sm:$0xff] }
 0xa5e   :  { %10340 = vmatprep.subr.bf16.mxu0 %v10339_v19  ;;  %v8420_v19 = vld [vmem:[%s13890_s6 + $0x218] sm:$0xff] }
 0xa61   :  { %10342 = vmatpush1.bf16.msra.mxu0 %v10341_v25  ;;  %v10369_v25 = vpack.c.bf16 %v8420_v19, %v8418_v17  ;;  %v8454_v17 = vld [vmem:[%s13890_s6 + $0x328] sm:$0xff]  ;;  %v8456_v19 = vld [vmem:[%s13890_s6 + $0x338] sm:$0xff] }
 0xa62   :  { %10344 = vmatprep.subr.bf16.mxu0 %v10343_v26  ;;  %v8417_v26 = vld [vmem:[%s13890_s6 + $0x200] sm:$0xff] }
 0xa65   :  { %10346 = vmatpush1.bf16.msra.mxu0 %v10345_v30  ;;  %v10371_v30 = vpack.c.bf16 %v8419_v27, %v8417_v26  ;;  %v8460_v26 = vld [vmem:[%s13890_s6 + $0x358] sm:$0xff] }
 0xa66   :  { %10348 = vmatprep.subr.bf16.mxu0 %v10347_v31  ;;  %v10373_v31 = vpack.c.bf16 %v8424_v28, %v8422_v18  ;;  %v8457_v28 = vld [vmem:[%s13890_s6 + $0x340] sm:$0xff] }
 0xa69   :  { %10350 = vmatpush1.bf16.msra.mxu0 %v10349_v36  ;;  %v2952_v36 = vld [vmem:[#allocation21 + $0xe8] sm:$0xf] }
 0xa6a   :  { %10352 = vmatprep.subr.bf16.mxu0 %v10351_v37  ;;  %v10375_v37 = vpack.c.bf16 %v8423_v33, %v8421_v32 }
 0xa6d   :  { %10354 = vmatpush1.bf16.msra.mxu0 %v10353_v43  ;;  %v8432_v43 = vld [vmem:[%s13890_s6 + $0x278] sm:$0xff] }
 0xa6e   :  { %10356 = vmatprep.subr.bf16.mxu0 %v10355_v46  ;;  %v10379_v46 = vpack.c.bf16 %v8427_v42, %v8425_v39  ;;  %v10381_v47 = vpack.c.bf16 %v8432_v43, %v8430_v40  ;;  %v8465_v42 = vld [vmem:[%s13890_s6 + $0x380] sm:$0xff]  ;;  %v8467_v40 = vld [vmem:[%s13890_s6 + $0x390] sm:$0xff] }
 0xa6f   :  { %v10419_v43 = vpack.c.bf16 %v8467_v40, %v8465_v42  ;;  %v3070_v42 = vld [vmem:[%s13890_s6 + $0x98] sm:$0xff] }
 0xa71   :  { %10358 = vmatpush1.bf16.msra.mxu0 %v10357_v45  ;;  %v8436_v45 = vld [vmem:[%s13890_s6 + $0x298] sm:$0xff] }
 0xa72   :  { %10360 = vmatprep.subr.bf16.mxu0 %v10359_v51  ;;  %v10383_v51 = vpack.c.bf16 %v8431_v50, %v8429_v41  ;;  %v10385_v54 = vpack.c.bf16 %v8436_v45, %v8434_v44  ;;  %v8469_v50 = vld [vmem:[%s13890_s6 + $0x3a0] sm:$0xff]  ;;  %v8471_v44 = vld [vmem:[%s13890_s6 + $0x3b0] sm:$0xff] }
 0xa73   :  { %v10423_v45 = vpack.c.bf16 %v8471_v44, %v8469_v50  ;;  %v3074_v50 = vld [vmem:[%s13890_s6 + $0xb8] sm:$0xff] }
 0xa75   :  { %10362 = vmatpush1.bf16.msra.mxu0 %v10361_v58  ;;  %v8435_v58 = vld [vmem:[%s13890_s6 + $0x290] sm:$0xff] }
 0xa76   :  { %v10387_v60 = vpack.c.bf16 %v8435_v58, %v8433_v55  ;;  %v8473_v55 = vld [vmem:[%s13890_s6 + $0x3c0] sm:$0xff] }
 0xa78   :  { %2897 = vmatmul.mubr.f32.vlgmr.msra.gmra.mrb[90].mxu0 %v2797_v48  ;;  %v8438_v48 = vld [vmem:[%s13890_s6 + $0x2a8] sm:$0xff] }
 0xa79   :  { %2902 = vmatprep.mubr.f32.mxu0 %v11494_v1 }
 0xa7c   :  { %2903 = vmatmul.mubr.f32.gmra.mrb[92].mxu0 %v2798_v59  ;;  %v8440_v59 = vld [vmem:[%s13890_s6 + $0x2b8] sm:$0xff] }
 0xa7d   :  { %3631 = vmatprep.mubr.f32.mxu0 %v11494_v1  ;;  %v10389_v49 = vpack.c.bf16 %v8440_v59, %v8438_v48  ;;  %v8475_v48 = vld [vmem:[%s13890_s6 + $0x3d0] sm:$0xff]  ;;  %v8478_v59 = vld [vmem:[%s13890_s6 + $0x3e8] sm:$0xff] }
 0xb4b   :  { %v2898_v56 = vpop.f32.mrb[90].mxu0 }
 0xb4c   :  { %v2926_v57 = vmul.f32 %v2919_v53, %v2898_v56  ;;  %v2900_v4 = vpop.f32.mrb[91].mxu0 }
 0xb4d   :  { %v2927_v5 = vmul.f32 %v2923_v2, %v2900_v4  ;;  %v8443_v4 = vld [vmem:[%s13890_s6 + $0x2d0] sm:$0xff] }
 0xb4e   :  { %v2943_v8 = vadd.f32 %v2936_v3, %v2926_v57 }
 0xb4f   :  { %v2904_v7 = vpop.f32.mrb[92].mxu0  ;;  %v2944_v11 = vadd.f32 %v2940_v6, %v2927_v5  ;;  %v8446_v5 = vld [vmem:[%s13890_s6 + $0x2e8] sm:$0xff] }
 0xb50   :  { %v2928_v9 = vmul.f32 %v2919_v53, %v2904_v7  ;;  %v2906_v10 = vpop.f32.mrb[93].mxu0  ;;  %v2947_v15 = vmax.f32 %v2943_v8, 0.0  ;;  %v8439_v53 = vld [vmem:[%s13890_s6 + $0x2b0] sm:$0xff] }
 0xb51   :  { %v2929_v12 = vmul.f32 %v2923_v2, %v2906_v10  ;;  %v2948_v20 = vmax.f32 %v2944_v11, 0.0  ;;  %v8444_v2 = vld [vmem:[%s13890_s6 + $0x2d8] sm:$0xff]  ;;  %v10391_v56 = vpack.c.bf16 %v8439_v53, %v8437_v61  ;;  %v8447_v10 = vld [vmem:[%s13890_s6 + $0x2f0] sm:$0xff]  ;;  %v8450_v11 = vld [vmem:[%s13890_s6 + $0x308] sm:$0xff] }
 0xb52   :  { %v2945_v13 = vadd.f32 %v2936_v3, %v2928_v9  ;;  %v10393_v57 = vpack.c.bf16 %v8444_v2, %v8442_v63  ;;  %v8441_v3 = vld [vmem:[%s13890_s6 + $0x2c0] sm:$0xff]  ;;  %v8479_v63 = vld [vmem:[%s13890_s6 + $0x3f0] sm:$0xff] }
 0xb53   :  { %v2946_v14 = vadd.f32 %v2940_v6, %v2929_v12  ;;  %v8448_v6 = vld [vmem:[%s13890_s6 + $0x2f8] sm:$0xff]  ;;  %v10395_v7 = vpack.c.bf16 %v8443_v4, %v8441_v3  ;;  %v8445_v9 = vld [vmem:[%s13890_s6 + $0x2e0] sm:$0xff] }
 0xb54   :  { %v2949_v16 = vmax.f32 %v2945_v13, 0.0  ;;  %v10397_v8 = vpack.c.bf16 %v8448_v6, %v8446_v5  ;;  %v8452_v12 = vld [vmem:[%s13890_s6 + $0x318] sm:$0xff]  ;;  %v10399_v13 = vpack.c.bf16 %v8447_v10, %v8445_v9  ;;  %v8477_v53 = vld [vmem:[%s13890_s6 + $0x3e0] sm:$0xff] }
 0xb55   :  { %v2950_v21 = vmax.f32 %v2946_v14, 0.0  ;;  %v10401_v14 = vpack.c.bf16 %v8452_v12, %v8450_v11  ;;  %v10431_v2 = vpack.c.bf16 %v8479_v63, %v8477_v53  ;;  %v3051_v9 = vld [vmem:[%s13890_s6] sm:$0xff]  ;;  %v3053_v12 = vld [vmem:[%s13890_s6 + $0x10] sm:$0xff]  ;;  %v3082_v53 = vld [vmem:[%s13890_s6 + $0xf8] sm:$0xff] }
 0xb56   :  { %v10366_v22 = vpack.c.bf16 %v2949_v16, %v2947_v15  ;;  %v8449_v15 = vld [vmem:[%s13890_s6 + $0x300] sm:$0xff]  ;;  %v8451_v16 = vld [vmem:[%s13890_s6 + $0x310] sm:$0xff] }
 0xb57   :  { %v10363_v24 = vpack.c.bf16 %v2950_v21, %v2948_v20  ;;  %v10403_v20 = vpack.c.bf16 %v8451_v16, %v8449_v15  ;;  %v10405_v21 = vpack.c.bf16 %v8456_v19, %v8454_v17  ;;  %v3056_v15 = vld [vmem:[%s13890_s6 + $0x28] sm:$0xff]  ;;  %v3058_v16 = vld [vmem:[%s13890_s6 + $0x38] sm:$0xff] }
 0xb59   :  { %10365 = vmatprep.subr.msk.bf16.mxu1 %vm12266_vm10, %v10363_v24  ;;  %v8455_v24 = vld [vmem:[%s13890_s6 + $0x330] sm:$0xff] }
 0xb5a   :  { %10368 = vmatpush1.bf16.msk.msra.mxu1 %vm12266_vm10, %v10366_v22  ;;  %v8453_v22 = vld [vmem:[%s13890_s6 + $0x320] sm:$0xff] }
 0xb5b   :  { %10370 = vmatprep.subr.bf16.mxu1 %v10369_v25  ;;  %v8458_v25 = vld [vmem:[%s13890_s6 + $0x348] sm:$0xff]  ;;  %v10407_v27 = vpack.c.bf16 %v8455_v24, %v8453_v22  ;;  %v10437_v24 = vpack.c.bf16 %v3058_v16, %v3056_v15  ;;  %v3089_v15 = vld [vmem:[%s13890_s6 + $0x130] sm:$0xff] }
 0xb5c   :  { %v10409_v18 = vpack.c.bf16 %v8460_v26, %v8458_v25  ;;  %v3055_v25 = vld [vmem:[%s13890_s6 + $0x20] sm:$0xff]  ;;  %v3057_v26 = vld [vmem:[%s13890_s6 + $0x30] sm:$0xff]  ;;  %v3092_v16 = vld [vmem:[%s13890_s6 + $0x148] sm:$0xff] }
 0xb5d   :  { %8415 = vmatmul.mubr.msk.f32.vlgmr.msra.gmra.mrb[90].mxu1 %vm2953_vm11, %v2951_v29  ;;  %v8459_v29 = vld [vmem:[%s13890_s6 + $0x350] sm:$0xff] }
 0xb5e   :  { %3036 = vmatprep.mubr.f32.mxu1 %v11494_v1  ;;  %10372 = vmatpush1.bf16.msra.mxu1 %v10371_v30  ;;  %v8462_v30 = vld [vmem:[%s13890_s6 + $0x368] sm:$0xff]  ;;  %v10411_v32 = vpack.c.bf16 %v8459_v29, %v8457_v28  ;;  %v3062_v28 = vld [vmem:[%s13890_s6 + $0x58] sm:$0xff]  ;;  %v10439_v29 = vpack.c.bf16 %v3057_v26, %v3055_v25 }
 0xb5f   :  { %10374 = vmatprep.subr.bf16.mxu1 %v10373_v31  ;;  %v8464_v31 = vld [vmem:[%s13890_s6 + $0x378] sm:$0xff] }
 0xb60   :  { %v10413_v33 = vpack.c.bf16 %v8464_v31, %v8462_v30  ;;  %v3059_v31 = vld [vmem:[%s13890_s6 + $0x40] sm:$0xff]  ;;  %v3098_v25 = vld [vmem:[%s13890_s6 + $0x178] sm:$0xff] }
 0xb61   :  { %8416 = vmatmul.mubr.msk.f32.gmra.mrb[92].mxu1 %vm2953_vm11, %v2952_v36  ;;  %v10415_v36 = vpack.c.bf16 %v8463_v35, %v8461_v34  ;;  %v3066_v34 = vld [vmem:[%s13890_s6 + $0x78] sm:$0xff] }
 0xb62   :  { %10376 = vmatpush1.bf16.msra.mxu1 %v10375_v37  ;;  %v8466_v37 = vld [vmem:[%s13890_s6 + $0x388] sm:$0xff] }
 0xb63   :  { %10378 = vmatprep.subr.bf16.mxu1 %v10377_v38  ;;  %v8468_v38 = vld [vmem:[%s13890_s6 + $0x398] sm:$0xff] }
 0xb64   :  { %v10417_v39 = vpack.c.bf16 %v8468_v38, %v8466_v37  ;;  %v3063_v37 = vld [vmem:[%s13890_s6 + $0x60] sm:$0xff]  ;;  %v3065_v38 = vld [vmem:[%s13890_s6 + $0x70] sm:$0xff] }
 0xb65   :  { %v10447_v40 = vpack.c.bf16 %v3065_v38, %v3063_v37 }
 0xb66   :  { %10380 = vmatpush1.bf16.msra.mxu1 %v10379_v46  ;;  %v8470_v46 = vld [vmem:[%s13890_s6 + $0x3a8] sm:$0xff] }
 0xb67   :  { %10382 = vmatprep.subr.bf16.mxu1 %v10381_v47  ;;  %v8472_v47 = vld [vmem:[%s13890_s6 + $0x3b8] sm:$0xff] }
 0xb68   :  { %v10421_v41 = vpack.c.bf16 %v8472_v47, %v8470_v46  ;;  %v3067_v46 = vld [vmem:[%s13890_s6 + $0x80] sm:$0xff]  ;;  %v3069_v47 = vld [vmem:[%s13890_s6 + $0x90] sm:$0xff] }
 0xb69   :  { %v10451_v44 = vpack.c.bf16 %v3069_v47, %v3067_v46 }
 0xb6a   :  { %10384 = vmatpush1.bf16.msra.mxu1 %v10383_v51  ;;  %v8474_v51 = vld [vmem:[%s13890_s6 + $0x3c8] sm:$0xff] }
 0xb6b   :  { %10386 = vmatprep.subr.bf16.mxu1 %v10385_v54  ;;  %v8476_v54 = vld [vmem:[%s13890_s6 + $0x3d8] sm:$0xff] }
 0xb6c   :  { %v10425_v58 = vpack.c.bf16 %v8476_v54, %v8474_v51  ;;  %v3071_v51 = vld [vmem:[%s13890_s6 + $0xa0] sm:$0xff]  ;;  %v3073_v54 = vld [vmem:[%s13890_s6 + $0xb0] sm:$0xff] }
 0xb6e   :  { %10388 = vmatpush1.bf16.msra.mxu1 %v10387_v60  ;;  %v8480_v60 = vld [vmem:[%s13890_s6 + $0x3f8] sm:$0xff] }
 0xb6f   :  { %10390 = vmatprep.subr.bf16.mxu1 %v10389_v49  ;;  %v10427_v49 = vpack.c.bf16 %v8475_v48, %v8473_v55  ;;  %v10429_v61 = vpack.c.bf16 %v8480_v60, %v8478_v59  ;;  %v3076_v55 = vld [vmem:[%s13890_s6 + $0xc8] sm:$0xff]  ;;  %v10455_v48 = vpack.c.bf16 %v3073_v54, %v3071_v51  ;;  %v3075_v60 = vld [vmem:[%s13890_s6 + $0xc0] sm:$0xff] }
 0xb72   :  { %10392 = vmatpush1.bf16.msra.mxu1 %v10391_v56  ;;  %v3052_v56 = vld [vmem:[%s13890_s6 + $0x8] sm:$0xff] }
 0xb73   :  { %10394 = vmatprep.subr.bf16.mxu1 %v10393_v57  ;;  %v3054_v57 = vld [vmem:[%s13890_s6 + $0x18] sm:$0xff] }
 0xb74   :  { %v10433_v3 = vpack.c.bf16 %v3054_v57, %v3052_v56  ;;  %v3079_v56 = vld [vmem:[%s13890_s6 + $0xe0] sm:$0xff]  ;;  %v3081_v57 = vld [vmem:[%s13890_s6 + $0xf0] sm:$0xff] }
 0xb76   :  { %10396 = vmatpush1.bf16.msra.mxu1 %v10395_v7 }
 0xb77   :  { %10398 = vmatprep.subr.bf16.mxu1 %v10397_v8 }
 0xb7a   :  { %10400 = vmatpush1.bf16.msra.mxu1 %v10399_v13 }
 0xb7b   :  { %10402 = vmatprep.subr.bf16.mxu1 %v10401_v14 }
 0xb7e   :  { %10404 = vmatpush1.bf16.msra.mxu1 %v10403_v20 }
 0xb7f   :  { %10406 = vmatprep.subr.bf16.mxu1 %v10405_v21  ;;  %v10435_v21 = vpack.c.bf16 %v3053_v12, %v3051_v9  ;;  %v3085_v9 = vld [vmem:[%s13890_s6 + $0x110] sm:$0xff] }
 0xb82   :  { %10408 = vmatpush1.bf16.msra.mxu1 %v10407_v27 }
 0xb83   :  { %10410 = vmatprep.subr.bf16.mxu1 %v10409_v18  ;;  %v3060_v18 = vld [vmem:[%s13890_s6 + $0x48] sm:$0xff] }
 0xb84   :  { %v10441_v30 = vpack.c.bf16 %v3062_v28, %v3060_v18  ;;  %v3095_v18 = vld [vmem:[%s13890_s6 + $0x160] sm:$0xff]  ;;  %v3097_v28 = vld [vmem:[%s13890_s6 + $0x170] sm:$0xff] }
 0xb86   :  { %10412 = vmatpush1.bf16.msra.mxu1 %v10411_v32  ;;  %v3061_v32 = vld [vmem:[%s13890_s6 + $0x50] sm:$0xff] }
 0xb87   :  { %10414 = vmatprep.subr.bf16.mxu1 %v10413_v33  ;;  %v3064_v33 = vld [vmem:[%s13890_s6 + $0x68] sm:$0xff]  ;;  %v10443_v35 = vpack.c.bf16 %v3061_v32, %v3059_v31  ;;  %v10479_v31 = vpack.c.bf16 %v3097_v28, %v3095_v18 }
 0xb8a   :  { %10416 = vmatpush1.bf16.msra.mxu1 %v10415_v36  ;;  %v10445_v36 = vpack.c.bf16 %v3066_v34, %v3064_v33  ;;  %v3099_v33 = vld [vmem:[%s13890_s6 + $0x180] sm:$0xff]  ;;  %v3101_v34 = vld [vmem:[%s13890_s6 + $0x190] sm:$0xff] }
 0xb8b   :  { %10418 = vmatprep.subr.bf16.mxu1 %v10417_v39  ;;  %v3068_v39 = vld [vmem:[%s13890_s6 + $0x88] sm:$0xff]  ;;  %v10483_v37 = vpack.c.bf16 %v3101_v34, %v3099_v33 }
 0xb8e   :  { %10420 = vmatpush1.bf16.msra.mxu1 %v10419_v43  ;;  %v10449_v43 = vpack.c.bf16 %v3070_v42, %v3068_v39  ;;  %v3103_v39 = vld [vmem:[%s13890_s6 + $0x1a0] sm:$0xff]  ;;  %v3105_v42 = vld [vmem:[%s13890_s6 + $0x1b0] sm:$0xff] }
 0xb8f   :  { %10422 = vmatprep.subr.bf16.mxu1 %v10421_v41  ;;  %v3072_v41 = vld [vmem:[%s13890_s6 + $0xa8] sm:$0xff]  ;;  %v10487_v46 = vpack.c.bf16 %v3105_v42, %v3103_v39 }
 0xb92   :  { %10424 = vmatpush1.bf16.msra.mxu1 %v10423_v45  ;;  %v10453_v45 = vpack.c.bf16 %v3074_v50, %v3072_v41  ;;  %v3107_v41 = vld [vmem:[%s13890_s6 + $0x1c0] sm:$0xff]  ;;  %v3109_v50 = vld [vmem:[%s13890_s6 + $0x1d0] sm:$0xff] }
 0xb93   :  { %10426 = vmatprep.subr.bf16.mxu1 %v10425_v58  ;;  %v3078_v58 = vld [vmem:[%s13890_s6 + $0xd8] sm:$0xff]  ;;  %v10491_v51 = vpack.c.bf16 %v3109_v50, %v3107_v41 }
 0xb94   :  { %v10457_v59 = vpack.c.bf16 %v3078_v58, %v3076_v55  ;;  %v3111_v55 = vld [vmem:[%s13890_s6 + $0x1e0] sm:$0xff]  ;;  %v3113_v58 = vld [vmem:[%s13890_s6 + $0x1f0] sm:$0xff] }
 0xb96   :  { %10428 = vmatpush1.bf16.msra.mxu1 %v10427_v49  ;;  %v3077_v49 = vld [vmem:[%s13890_s6 + $0xd0] sm:$0xff] }
 0xb97   :  { %10430 = vmatprep.subr.bf16.mxu1 %v10429_v61  ;;  %v3080_v61 = vld [vmem:[%s13890_s6 + $0xe8] sm:$0xff]  ;;  %v10459_v63 = vpack.c.bf16 %v3077_v49, %v3075_v60  ;;  %v10495_v60 = vpack.c.bf16 %v3113_v58, %v3111_v55 }
 0xb9a   :  { %10432 = vmatpush1.bf16.msra.mxu1 %v10431_v2  ;;  %v10461_v2 = vpack.c.bf16 %v3082_v53, %v3080_v61  ;;  %v8481_v61 = vld [vmem:[%s13890_s6 + $0x400] sm:$0xff]  ;;  %v8483_v53 = vld [vmem:[%s13890_s6 + $0x410] sm:$0xff] }
 0xb9b   :  { %10434 = vmatprep.subr.bf16.mxu1 %v10433_v3  ;;  %v3084_v3 = vld [vmem:[%s13890_s6 + $0x108] sm:$0xff] }
 0xc30   :  { %v12469_v4 = vpop.f32.mrb[90].mxu1 }
 0xc31   :  { %3043 = vst [vmem:[#allocation7] sm:$0xff] %v12469_v4  ;;  %v3034_v5 = vpop.f32.mrb[91].mxu1 }
 0xc32   :  { %3044 = vst [vmem:[#allocation7 + $0x8] sm:$0xff] %v3034_v5 }
 0xc34   :  { %v3038_v6 = vpop.f32.mrb[92].mxu1 }
 0xc35   :  { %3045 = vst [vmem:[#allocation7 + $0x10] sm:$0xf] %v3038_v6  ;;  %v3040_v7 = vpop.f32.mrb[93].mxu1  ;;  %v10463_v6 = vpack.c.bf16 %v3081_v57, %v3079_v56  ;;  %v10499_v56 = vpack.c.bf16 %v8483_v53, %v8481_v61 }
 0xc36   :  { %3046 = vst [vmem:[#allocation7 + $0x18] sm:$0xf] %v3040_v7 }
 0xc38   :  { %v3115_v10 = vld [vmem:[#allocation7] sm:$0xfe] }
 0xc39   :  { %v3116_v8 = vld [vmem:[#allocation7 + $0x8] sm:$0xfe]  ;;  %v3189_v20 = vrot.slane %v3115_v10, 1  ;;  %v3088_v10 = vld [vmem:[%s13890_s6 + $0x128] sm:$0xff] }
 0xc3a   :  { %v3192_v17 = vrot.slane %v3116_v8, 1  ;;  %v3083_v8 = vld [vmem:[%s13890_s6 + $0x100] sm:$0xff] }
 0xc3b   :  { %v10467_v12 = vpack.c.bf16 %v3085_v9, %v3083_v8  ;;  %v8490_v8 = vld [vmem:[%s13890_s6 + $0x448] sm:$0xff]  ;;  %v8492_v9 = vld [vmem:[%s13890_s6 + $0x458] sm:$0xff] }
 0xc3c   :  { %v3117_v11 = vld [vmem:[#allocation7 + $0x10] sm:$0x7] }
 0xc3d   :  { %v3118_v13 = vld [vmem:[#allocation7 + $0x18] sm:$0x7]  ;;  %v3190_v14 = vrot.slane %v3117_v11, 1  ;;  %v3090_v11 = vld [vmem:[%s13890_s6 + $0x138] sm:$0xff] }
 0xc3e   :  { %v3193_v19 = vrot.slane %v3118_v13, 1  ;;  %v10469_v13 = vpack.c.bf16 %v3090_v11, %v3088_v10  ;;  %v12678_v57 = vld [vmem:[#allocation7 + $0x18] sm:$0xf] }
 0xc3f   :  { %v3191_v27 = vsel %vm3188_vm12, %v3189_v20, %v3190_v14  ;;  %v3050_v10 = vld [vmem:[#allocation7 + $0x18] sm:$0x3]  ;;  %v3431_v11 = vrot.slane %v12678_v57, 2 }
 0xc40   :  { %v3194_v22 = vsel %vm3188_vm12, %v3192_v17, %v3193_v19  ;;  %v3094_v17 = vld [vmem:[%s13890_s6 + $0x158] sm:$0xff] }
 0xc41   :  { %3263 = vmatprep.mubr.f32.mxu1 %v3194_v22  ;;  %v10473_v20 = vpack.c.bf16 %v3094_v17, %v3092_v16  ;;  %v3093_v22 = vld [vmem:[%s13890_s6 + $0x150] sm:$0xff]  ;;  %v3049_v17 = vld [vmem:[#allocation7 + $0x10] sm:$0x3] }
 0xc42   :  { %3264 = vmatmul.mubr.f32.vlgmr.msra.gmra.mrb[94].mxu1 %v3191_v27  ;;  %v8491_v16 = vld [vmem:[%s13890_s6 + $0x450] sm:$0xff] }
 0xc43   :  { %10436 = vmatpush1.bf16.msra.mxu1 %v10435_v21  ;;  %3269 = vmatprep.mubr.f32.mxu1 %v3193_v19  ;;  %v3091_v21 = vld [vmem:[%s13890_s6 + $0x140] sm:$0xff] }
 0xc44   :  { %10438 = vmatprep.subr.bf16.mxu1 %v10437_v24  ;;  %v3096_v24 = vld [vmem:[%s13890_s6 + $0x168] sm:$0xff]  ;;  %v10475_v26 = vpack.c.bf16 %v3093_v22, %v3091_v21 }
 0xc45   :  { %v10477_v27 = vpack.c.bf16 %v3098_v25, %v3096_v24  ;;  %v8493_v24 = vld [vmem:[%s13890_s6 + $0x460] sm:$0xff]  ;;  %v8495_v25 = vld [vmem:[%s13890_s6 + $0x470] sm:$0xff] }
 0xc46   :  { %3270 = vmatmul.mubr.f32.gmra.mrb[96].mxu1 %v3190_v14  ;;  %v3087_v14 = vld [vmem:[%s13890_s6 + $0x120] sm:$0xff]  ;;  %v10511_v18 = vpack.c.bf16 %v8495_v25, %v8493_v24  ;;  %v8536_v24 = vld [vmem:[%s13890_s6 + $0x5b8] sm:$0xff] }
 0xc47   :  { %10440 = vmatpush1.bf16.msra.mxu1 %v10439_v29  ;;  %3340 = vmatprep.mubr.f32.mxu1 %v3034_v5  ;;  %v3086_v5 = vld [vmem:[%s13890_s6 + $0x118] sm:$0xff]  ;;  %v10471_v19 = vpack.c.bf16 %v3089_v15, %v3087_v14  ;;  %v3100_v29 = vld [vmem:[%s13890_s6 + $0x188] sm:$0xff]  ;;  %v10505_v14 = vpack.c.bf16 %v8492_v9, %v8490_v8  ;;  %v8489_v15 = vld [vmem:[%s13890_s6 + $0x440] sm:$0xff] }
 0xc48   :  { %10442 = vmatprep.subr.bf16.mxu1 %v10441_v30  ;;  %v10465_v7 = vpack.c.bf16 %v3086_v5, %v3084_v3  ;;  %v3102_v30 = vld [vmem:[%s13890_s6 + $0x198] sm:$0xff]  ;;  %v8485_v5 = vld [vmem:[%s13890_s6 + $0x420] sm:$0xff]  ;;  %v10507_v21 = vpack.c.bf16 %v8491_v16, %v8489_v15  ;;  %v8523_v8 = vld [vmem:[%s13890_s6 + $0x550] sm:$0xff] }
 0xc49   :  { %v10481_v32 = vpack.c.bf16 %v3102_v30, %v3100_v29  ;;  %v8497_v29 = vld [vmem:[%s13890_s6 + $0x480] sm:$0xff]  ;;  %v8499_v30 = vld [vmem:[%s13890_s6 + $0x490] sm:$0xff]  ;;  %v8526_v9 = vld [vmem:[%s13890_s6 + $0x568] sm:$0xff] }
 0xc4a   :  { %v10515_v33 = vpack.c.bf16 %v8499_v30, %v8497_v29  ;;  %v8527_v15 = vld [vmem:[%s13890_s6 + $0x570] sm:$0xff]  ;;  %v8530_v16 = vld [vmem:[%s13890_s6 + $0x588] sm:$0xff]  ;;  %v8540_v29 = vld [vmem:[%s13890_s6 + $0x5d8] sm:$0xff] }
 0xc4b   :  { %10444 = vmatpush1.bf16.msra.mxu1 %v10443_v35  ;;  %v3104_v35 = vld [vmem:[%s13890_s6 + $0x1a8] sm:$0xff] }
 0xc4c   :  { %10446 = vmatprep.subr.bf16.mxu1 %v10445_v36  ;;  %v3106_v36 = vld [vmem:[%s13890_s6 + $0x1b8] sm:$0xff] }
 0xc4d   :  { %v10485_v38 = vpack.c.bf16 %v3106_v36, %v3104_v35  ;;  %v8501_v35 = vld [vmem:[%s13890_s6 + $0x4a0] sm:$0xff]  ;;  %v8503_v36 = vld [vmem:[%s13890_s6 + $0x4b0] sm:$0xff] }
 0xc4e   :  { %v10519_v39 = vpack.c.bf16 %v8503_v36, %v8501_v35  ;;  %v8544_v35 = vld [vmem:[%s13890_s6 + $0x5f8] sm:$0xff] }
 0xc4f   :  { %10448 = vmatpush1.bf16.msra.mxu1 %v10447_v40  ;;  %v3108_v40 = vld [vmem:[%s13890_s6 + $0x1c8] sm:$0xff] }
 0xc50   :  { %10450 = vmatprep.subr.bf16.mxu1 %v10449_v43  ;;  %v3110_v43 = vld [vmem:[%s13890_s6 + $0x1d8] sm:$0xff] }
 0xc51   :  { %v10489_v47 = vpack.c.bf16 %v3110_v43, %v3108_v40  ;;  %v8505_v40 = vld [vmem:[%s13890_s6 + $0x4c0] sm:$0xff]  ;;  %v8507_v43 = vld [vmem:[%s13890_s6 + $0x4d0] sm:$0xff] }
 0xc52   :  { %v10523_v41 = vpack.c.bf16 %v8507_v43, %v8505_v40  ;;  %v3353_v43 = vld [vmem:[#allocation7] sm:$0xfc] }
 0xc53   :  { %10452 = vmatpush1.bf16.msra.mxu1 %v10451_v44  ;;  %v3112_v44 = vld [vmem:[%s13890_s6 + $0x1e8] sm:$0xff] }
 0xc54   :  { %10454 = vmatprep.subr.bf16.mxu1 %v10453_v45  ;;  %v3114_v45 = vld [vmem:[%s13890_s6 + $0x1f8] sm:$0xff] }
 0xc55   :  { %v10493_v54 = vpack.c.bf16 %v3114_v45, %v3112_v44  ;;  %v8509_v44 = vld [vmem:[%s13890_s6 + $0x4e0] sm:$0xff]  ;;  %v8511_v45 = vld [vmem:[%s13890_s6 + $0x4f0] sm:$0xff] }
 0xc56   :  { %v10527_v55 = vpack.c.bf16 %v8511_v45, %v8509_v44  ;;  %v3536_v45 = vld [vmem:[#allocation19 + $0x7] ss:$8 sm:$0x3] }
 0xc57   :  { %10456 = vmatpush1.bf16.msra.mxu1 %v10455_v48  ;;  %v8482_v48 = vld [vmem:[%s13890_s6 + $0x408] sm:$0xff] }
 0xc58   :  { %10458 = vmatprep.subr.bf16.mxu1 %v10457_v59  ;;  %v8484_v59 = vld [vmem:[%s13890_s6 + $0x418] sm:$0xff] }
 0xc59   :  { %v10497_v49 = vpack.c.bf16 %v8484_v59, %v8482_v48  ;;  %v8513_v48 = vld [vmem:[%s13890_s6 + $0x500] sm:$0xff]  ;;  %v8515_v59 = vld [vmem:[%s13890_s6 + $0x510] sm:$0xff] }
 0xc5a   :  { %v10531_v61 = vpack.c.bf16 %v8515_v59, %v8513_v48 }
 0xc5b   :  { %10460 = vmatpush1.bf16.msra.mxu1 %v10459_v63  ;;  %v8486_v63 = vld [vmem:[%s13890_s6 + $0x428] sm:$0xff] }
 0xc5c   :  { %10462 = vmatprep.subr.bf16.mxu1 %v10461_v2  ;;  %v8488_v2 = vld [vmem:[%s13890_s6 + $0x438] sm:$0xff] }
 0xc5d   :  { %v10501_v3 = vpack.c.bf16 %v8488_v2, %v8486_v63  ;;  %v8517_v63 = vld [vmem:[%s13890_s6 + $0x520] sm:$0xff]  ;;  %v8519_v2 = vld [vmem:[%s13890_s6 + $0x530] sm:$0xff] }
 0xc5f   :  { %10464 = vmatpush1.bf16.msra.mxu1 %v10463_v6  ;;  %v8487_v6 = vld [vmem:[%s13890_s6 + $0x430] sm:$0xff] }
 0xc60   :  { %10466 = vmatprep.subr.bf16.mxu1 %v10465_v7  ;;  %v3354_v7 = vld [vmem:[#allocation7 + $0x8] sm:$0xfc] }
 0xc63   :  { %10468 = vmatpush1.bf16.msra.mxu1 %v10467_v12  ;;  %v10503_v12 = vpack.c.bf16 %v8487_v6, %v8485_v5  ;;  %v10535_v5 = vpack.c.bf16 %v8519_v2, %v8517_v63 }
 0xc64   :  { %10470 = vmatprep.subr.bf16.mxu1 %v10469_v13  ;;  %v3430_v13 = vrot.slane %v3354_v7, 2  ;;  %v8521_v7 = vld [vmem:[%s13890_s6 + $0x540] sm:$0xff] }
 0xc67   :  { %10472 = vmatpush1.bf16.msra.mxu1 %v10471_v19  ;;  %v8496_v19 = vld [vmem:[%s13890_s6 + $0x478] sm:$0xff] }
 0xc68   :  { %10474 = vmatprep.subr.bf16.mxu1 %v10473_v20  ;;  %v3432_v20 = vsel %vm3426_vm13, %v3430_v13, %v3431_v11 }
 0xc6b   :  { %10476 = vmatpush1.bf16.msra.mxu1 %v10475_v26  ;;  %v8498_v26 = vld [vmem:[%s13890_s6 + $0x488] sm:$0xff] }
 0xc6c   :  { %10478 = vmatprep.subr.bf16.mxu1 %v10477_v27  ;;  %v8500_v27 = vld [vmem:[%s13890_s6 + $0x498] sm:$0xff] }
 0xc6d   :  { %v10513_v28 = vpack.c.bf16 %v8500_v27, %v8498_v26  ;;  %v8533_v27 = vld [vmem:[%s13890_s6 + $0x5a0] sm:$0xff] }
 0xc6f   :  { %10480 = vmatpush1.bf16.msra.mxu1 %v10479_v31  ;;  %v8502_v31 = vld [vmem:[%s13890_s6 + $0x4a8] sm:$0xff] }
 0xc70   :  { %10482 = vmatprep.subr.bf16.mxu1 %v10481_v32  ;;  %v8504_v32 = vld [vmem:[%s13890_s6 + $0x4b8] sm:$0xff] }
 0xc71   :  { %v10517_v34 = vpack.c.bf16 %v8504_v32, %v8502_v31  ;;  %v8537_v32 = vld [vmem:[%s13890_s6 + $0x5c0] sm:$0xff] }
 0xc73   :  { %10484 = vmatpush1.bf16.msra.mxu1 %v10483_v37  ;;  %v8506_v37 = vld [vmem:[%s13890_s6 + $0x4c8] sm:$0xff] }
 0xc74   :  { %10486 = vmatprep.subr.bf16.mxu1 %v10485_v38  ;;  %v8508_v38 = vld [vmem:[%s13890_s6 + $0x4d8] sm:$0xff] }
 0xc75   :  { %v10521_v42 = vpack.c.bf16 %v8508_v38, %v8506_v37  ;;  %v8541_v38 = vld [vmem:[%s13890_s6 + $0x5e0] sm:$0xff] }
 0xc77   :  { %10488 = vmatpush1.bf16.msra.mxu1 %v10487_v46  ;;  %v8510_v46 = vld [vmem:[%s13890_s6 + $0x4e8] sm:$0xff] }
 0xc78   :  { %10490 = vmatprep.subr.bf16.mxu1 %v10489_v47  ;;  %v8512_v47 = vld [vmem:[%s13890_s6 + $0x4f8] sm:$0xff] }
 0xc79   :  { %v10525_v50 = vpack.c.bf16 %v8512_v47, %v8510_v46  ;;  %v3427_v47 = vrot.slane %v3353_v43, 2  ;;  %v8574_v43 = vld [vmem:[%s13891_s7 + $0x2b8] sm:$0xff] }
 0xc7b   :  { %10492 = vmatpush1.bf16.msra.mxu1 %v10491_v51  ;;  %v8514_v51 = vld [vmem:[%s13890_s6 + $0x508] sm:$0xff] }
 0xc7c   :  { %10494 = vmatprep.subr.bf16.mxu1 %v10493_v54  ;;  %v8516_v54 = vld [vmem:[%s13890_s6 + $0x518] sm:$0xff] }
 0xc7d   :  { %v10529_v58 = vpack.c.bf16 %v8516_v54, %v8514_v51 }
 0xc7f   :  { %10496 = vmatpush1.bf16.msra.mxu1 %v10495_v60  ;;  %v8518_v60 = vld [vmem:[%s13890_s6 + $0x528] sm:$0xff] }
 0xc80   :  { %10498 = vmatprep.subr.bf16.mxu1 %v10497_v49  ;;  %v8520_v49 = vld [vmem:[%s13890_s6 + $0x538] sm:$0xff] }
 0xc81   :  { %v10533_v53 = vpack.c.bf16 %v8520_v49, %v8518_v60  ;;  %v3545_v60 = vrot.slane %v3536_v45, %v12253_v62 }
 0xc82   :  { %3341 = vmatmul.mubr.f32.vlgmr.msra.gmra.mrb[94].mxu1 %v12469_v4  ;;  %v8494_v4 = vld [vmem:[%s13890_s6 + $0x468] sm:$0xff] }
 0xc83   :  { %3346 = vmatprep.mubr.f32.mxu1 %v3050_v10  ;;  %10500 = vmatpush1.bf16.msra.mxu1 %v10499_v56  ;;  %v10509_v22 = vpack.c.bf16 %v8496_v19, %v8494_v4  ;;  %v8522_v56 = vld [vmem:[%s13890_s6 + $0x548] sm:$0xff]  ;;  %v8528_v10 = vld [vmem:[%s13890_s6 + $0x578] sm:$0xff] }
 0xc84   :  { %10502 = vmatprep.subr.bf16.mxu1 %v10501_v3  ;;  %v8524_v3 = vld [vmem:[%s13890_s6 + $0x558] sm:$0xff]  ;;  %v10541_v13 = vpack.c.bf16 %v8528_v10, %v8526_v9  ;;  %v8552_v10 = vld [vmem:[%s13891_s7 + $0x208] sm:$0xff] }
 0xc85   :  { %v10537_v6 = vpack.c.bf16 %v8524_v3, %v8522_v56 }
 0xc86   :  { %3347 = vmatmul.mubr.f32.gmra.mrb[96].mxu1 %v3049_v17  ;;  %v8532_v17 = vld [vmem:[%s13890_s6 + $0x598] sm:$0xff] }
 0xc87   :  { %10504 = vmatpush1.bf16.msra.mxu1 %v10503_v12  ;;  %3501 = vmatprep.mubr.f32.mxu1 %v3432_v20  ;;  %v10539_v12 = vpack.c.bf16 %v8523_v8, %v8521_v7  ;;  %v10545_v19 = vpack.c.bf16 %v8532_v17, %v8530_v16  ;;  %v8529_v20 = vld [vmem:[%s13890_s6 + $0x580] sm:$0xff]  ;;  %v8553_v16 = vld [vmem:[%s13891_s7 + $0x210] sm:$0xff]  ;;  %v8556_v17 = vld [vmem:[%s13891_s7 + $0x228] sm:$0xff] }
 0xc88   :  { %10506 = vmatprep.subr.bf16.mxu1 %v10505_v14  ;;  %v8525_v14 = vld [vmem:[%s13890_s6 + $0x560] sm:$0xff] }
 0xc89   :  { %v10543_v4 = vpack.c.bf16 %v8527_v15, %v8525_v14  ;;  %v8551_v15 = vld [vmem:[%s13891_s7 + $0x200] sm:$0xff] }
 0xc8b   :  { %10508 = vmatpush1.bf16.msra.mxu1 %v10507_v21  ;;  %v8531_v21 = vld [vmem:[%s13890_s6 + $0x590] sm:$0xff] }
 0xc8c   :  { %10510 = vmatprep.subr.bf16.mxu1 %v10509_v22  ;;  %v8534_v22 = vld [vmem:[%s13890_s6 + $0x5a8] sm:$0xff]  ;;  %v10547_v25 = vpack.c.bf16 %v8531_v21, %v8529_v20  ;;  %v10575_v20 = vpack.c.bf16 %v8553_v16, %v8551_v15  ;;  %v8591_v16 = vld [vmem:[%s13891_s7 + $0x340] sm:$0xff] }
 0xc8d   :  { %v10549_v26 = vpack.c.bf16 %v8536_v24, %v8534_v22  ;;  %v8555_v22 = vld [vmem:[%s13891_s7 + $0x220] sm:$0xff]  ;;  %v8557_v24 = vld [vmem:[%s13891_s7 + $0x230] sm:$0xff] }
 0xc8f   :  { %10512 = vmatpush1.bf16.msra.mxu1 %v10511_v18  ;;  %v8535_v18 = vld [vmem:[%s13890_s6 + $0x5b0] sm:$0xff] }
 0xc90   :  { %10514 = vmatprep.subr.bf16.mxu1 %v10513_v28  ;;  %v8538_v28 = vld [vmem:[%s13890_s6 + $0x5c8] sm:$0xff]  ;;  %v10551_v30 = vpack.c.bf16 %v8535_v18, %v8533_v27  ;;  %v8559_v18 = vld [vmem:[%s13891_s7 + $0x240] sm:$0xff] }
 0xc91   :  { %v10553_v31 = vpack.c.bf16 %v8540_v29, %v8538_v28  ;;  %v8561_v28 = vld [vmem:[%s13891_s7 + $0x250] sm:$0xff]  ;;  %v8564_v29 = vld [vmem:[%s13891_s7 + $0x268] sm:$0xff] }
 0xc93   :  { %10516 = vmatpush1.bf16.msra.mxu1 %v10515_v33  ;;  %v8539_v33 = vld [vmem:[%s13890_s6 + $0x5d0] sm:$0xff] }
 0xc94   :  { %10518 = vmatprep.subr.bf16.mxu1 %v10517_v34  ;;  %v8542_v34 = vld [vmem:[%s13890_s6 + $0x5e8] sm:$0xff]  ;;  %v10555_v36 = vpack.c.bf16 %v8539_v33, %v8537_v32  ;;  %v8563_v33 = vld [vmem:[%s13891_s7 + $0x260] sm:$0xff] }
 0xc95   :  { %v10557_v37 = vpack.c.bf16 %v8544_v35, %v8542_v34  ;;  %v8565_v34 = vld [vmem:[%s13891_s7 + $0x270] sm:$0xff]  ;;  %v8568_v35 = vld [vmem:[%s13891_s7 + $0x288] sm:$0xff] }
 0xc97   :  { %10520 = vmatpush1.bf16.msra.mxu1 %v10519_v39  ;;  %v8543_v39 = vld [vmem:[%s13890_s6 + $0x5f0] sm:$0xff] }
 0xc98   :  { %10522 = vmatprep.subr.bf16.mxu1 %v10521_v42  ;;  %v3355_v42 = vld [vmem:[#allocation7 + $0x10] sm:$0xf]  ;;  %v10559_v40 = vpack.c.bf16 %v8543_v39, %v8541_v38 }
 0xc99   :  { %v3428_v46 = vrot.slane %v3355_v42, 2  ;;  %v8567_v39 = vld [vmem:[%s13891_s7 + $0x280] sm:$0xff]  ;;  %v8569_v42 = vld [vmem:[%s13891_s7 + $0x290] sm:$0xff] }
 0xc9b   :  { %10524 = vmatpush1.bf16.msra.mxu1 %v10523_v41  ;;  %v3429_v41 = vsel %vm3426_vm13, %v3427_v47, %v3428_v46 }
 0xc9c   :  { %10526 = vmatprep.subr.bf16.mxu1 %v10525_v50  ;;  %v3519_v50 = vld [vmem:[#allocation19 + $0x6] ss:$8 sm:$0x3] }
 0xc9d   :  { %v3524_v44 = vrot.slane %v3519_v50, %v12251_v52  ;;  %v3528_v51 = vrot.slane %v3519_v50, %v12253_v62  ;;  %v8573_v50 = vld [vmem:[%s13891_s7 + $0x2b0] sm:$0xff] }
 0xc9f   :  { %10528 = vmatpush1.bf16.msra.mxu1 %v10527_v55 }
 0xca0   :  { %10530 = vmatprep.subr.bf16.mxu1 %v10529_v58  ;;  %v3541_v58 = vrot.slane %v3536_v45, %v12251_v52  ;;  %v8578_v45 = vld [vmem:[%s13891_s7 + $0x2d8] sm:$0xff] }
 0xca3   :  { %10532 = vmatpush1.bf16.msra.mxu1 %v10531_v61 }
 0xca4   :  { %10534 = vmatprep.subr.bf16.mxu1 %v10533_v53 }
 0xca7   :  { %10536 = vmatpush1.bf16.msra.mxu1 %v10535_v5 }
 0xca8   :  { %10538 = vmatprep.subr.bf16.mxu1 %v10537_v6 }
 0xcab   :  { %10540 = vmatpush1.bf16.msra.mxu1 %v10539_v12  ;;  %v8554_v12 = vld [vmem:[%s13891_s7 + $0x218] sm:$0xff] }
 0xcac   :  { %10542 = vmatprep.subr.bf16.mxu1 %v10541_v13  ;;  %v3556_v13 = vld [vmem:[#allocation21 + $0xec] sm:$0xf]  ;;  %v10573_v14 = vpack.c.bf16 %v8554_v12, %v8552_v10  ;;  %v8589_v10 = vld [vmem:[%s13891_s7 + $0x330] sm:$0xff]  ;;  %v8592_v12 = vld [vmem:[%s13891_s7 + $0x348] sm:$0xff] }
 0xcaf   :  { %10544 = vmatpush1.bf16.msra.mxu1 %v10543_v4  ;;  %v8558_v4 = vld [vmem:[%s13891_s7 + $0x238] sm:$0xff] }
 0xcb0   :  { %10546 = vmatprep.subr.bf16.mxu1 %v10545_v19  ;;  %v3557_v19 = vld [vmem:[#allocation21 + $0xf0] sm:$0xf]  ;;  %v10577_v21 = vpack.c.bf16 %v8558_v4, %v8556_v17  ;;  %v8593_v17 = vld [vmem:[%s13891_s7 + $0x350] sm:$0xff] }
 0xcb1   :  { %v10615_v4 = vpack.c.bf16 %v8593_v17, %v8591_v16  ;;  %v3728_v17 = vld [vmem:[%s13891_s7 + $0x40] sm:$0xff] }
 0xcb3   :  { %10548 = vmatpush1.bf16.msra.mxu1 %v10547_v25  ;;  %v8560_v25 = vld [vmem:[%s13891_s7 + $0x248] sm:$0xff] }
 0xcb4   :  { %10550 = vmatprep.subr.bf16.mxu1 %v10549_v26  ;;  %v10579_v26 = vpack.c.bf16 %v8557_v24, %v8555_v22  ;;  %v10581_v27 = vpack.c.bf16 %v8562_v23, %v8560_v25  ;;  %v8595_v22 = vld [vmem:[%s13891_s7 + $0x360] sm:$0xff]  ;;  %v8597_v24 = vld [vmem:[%s13891_s7 + $0x370] sm:$0xff]  ;;  %v8600_v23 = vld [vmem:[%s13891_s7 + $0x388] sm:$0xff] }
 0xcb5   :  { %v10619_v25 = vpack.c.bf16 %v8597_v24, %v8595_v22  ;;  %v3732_v24 = vld [vmem:[%s13891_s7 + $0x60] sm:$0xff] }
 0xcb7   :  { %10552 = vmatpush1.bf16.msra.mxu1 %v10551_v30  ;;  %v8566_v30 = vld [vmem:[%s13891_s7 + $0x278] sm:$0xff] }
 0xcb8   :  { %10554 = vmatprep.subr.bf16.mxu1 %v10553_v31  ;;  %v10583_v31 = vpack.c.bf16 %v8561_v28, %v8559_v18  ;;  %v10585_v32 = vpack.c.bf16 %v8566_v30, %v8564_v29  ;;  %v8599_v18 = vld [vmem:[%s13891_s7 + $0x380] sm:$0xff]  ;;  %v8601_v28 = vld [vmem:[%s13891_s7 + $0x390] sm:$0xff]  ;;  %v8604_v30 = vld [vmem:[%s13891_s7 + $0x3a8] sm:$0xff] }
 0xcb9   :  { %v10623_v29 = vpack.c.bf16 %v8601_v28, %v8599_v18  ;;  %v3736_v28 = vld [vmem:[%s13891_s7 + $0x80] sm:$0xff] }
 0xcbb   :  { %10556 = vmatpush1.bf16.msra.mxu1 %v10555_v36  ;;  %v8570_v36 = vld [vmem:[%s13891_s7 + $0x298] sm:$0xff] }
 0xcbc   :  { %10558 = vmatprep.subr.bf16.mxu1 %v10557_v37  ;;  %v10587_v37 = vpack.c.bf16 %v8565_v34, %v8563_v33  ;;  %v10589_v38 = vpack.c.bf16 %v8570_v36, %v8568_v35  ;;  %v8603_v33 = vld [vmem:[%s13891_s7 + $0x3a0] sm:$0xff]  ;;  %v8605_v34 = vld [vmem:[%s13891_s7 + $0x3b0] sm:$0xff]  ;;  %v8608_v36 = vld [vmem:[%s13891_s7 + $0x3c8] sm:$0xff] }
 0xcbd   :  { %v10627_v35 = vpack.c.bf16 %v8605_v34, %v8603_v33  ;;  %v3740_v34 = vld [vmem:[%s13891_s7 + $0xa0] sm:$0xff] }
 0xcbf   :  { %10560 = vmatpush1.bf16.msra.mxu1 %v10559_v40  ;;  %v8572_v40 = vld [vmem:[%s13891_s7 + $0x2a8] sm:$0xff] }
 0xcc0   :  { %v10593_v47 = vpack.c.bf16 %v8574_v43, %v8572_v40  ;;  %v8612_v40 = vld [vmem:[%s13891_s7 + $0x3e8] sm:$0xff]  ;;  %v8614_v43 = vld [vmem:[%s13891_s7 + $0x3f8] sm:$0xff] }
 0xcc2   :  { %3502 = vmatmul.mubr.f32.vlgmr.msra.gmra.mrb[94].mxu1 %v3429_v41  ;;  %v8571_v41 = vld [vmem:[%s13891_s7 + $0x2a0] sm:$0xff] }
 0xcc3   :  { %3507 = vmatprep.mubr.f32.mxu1 %v3431_v11 }
 0xcc6   :  { %3508 = vmatmul.mubr.f32.gmra.mrb[96].mxu1 %v3428_v46  ;;  %v10591_v46 = vpack.c.bf16 %v8569_v42, %v8567_v39  ;;  %v8609_v42 = vld [vmem:[%s13891_s7 + $0x3d0] sm:$0xff] }
 0xcc7   :  { %4094 = vmatprep.mubr.f32.mxu1 %v11494_v1 }
 0xd95   :  { %v3503_v54 = vpop.f32.mrb[94].mxu1 }
 0xd96   :  { %v3531_v55 = vmul.f32 %v3524_v44, %v3503_v54  ;;  %v3505_v48 = vpop.f32.mrb[95].mxu1 }
 0xd97   :  { %v3532_v59 = vmul.f32 %v3528_v51, %v3505_v48  ;;  %v8580_v48 = vld [vmem:[%s13891_s7 + $0x2e8] sm:$0xff] }
 0xd98   :  { %v3548_v57 = vadd.f32 %v3541_v58, %v3531_v55  ;;  %v8575_v55 = vld [vmem:[%s13891_s7 + $0x2c0] sm:$0xff] }
 0xd99   :  { %v3509_v49 = vpop.f32.mrb[96].mxu1  ;;  %v3549_v53 = vadd.f32 %v3545_v60, %v3532_v59  ;;  %v8582_v59 = vld [vmem:[%s13891_s7 + $0x2f8] sm:$0xff] }
 0xd9a   :  { %v3533_v11 = vmul.f32 %v3524_v44, %v3509_v49  ;;  %v3511_v61 = vpop.f32.mrb[97].mxu1  ;;  %v3552_v3 = vmax.f32 %v3548_v57, 0.0  ;;  %v8576_v44 = vld [vmem:[%s13891_s7 + $0x2c8] sm:$0xff]  ;;  %v10601_v49 = vpack.c.bf16 %v8582_v59, %v8580_v48  ;;  %v8579_v57 = vld [vmem:[%s13891_s7 + $0x2e0] sm:$0xff] }
 0xd9b   :  { %v3534_v63 = vmul.f32 %v3528_v51, %v3511_v61  ;;  %v3553_v6 = vmax.f32 %v3549_v53, 0.0  ;;  %v10595_v51 = vpack.c.bf16 %v8573_v50, %v8571_v41  ;;  %v10597_v54 = vpack.c.bf16 %v8578_v45, %v8576_v44  ;;  %v8584_v61 = vld [vmem:[%s13891_s7 + $0x308] sm:$0xff]  ;;  %v8586_v53 = vld [vmem:[%s13891_s7 + $0x318] sm:$0xff]  ;;  %v8611_v41 = vld [vmem:[%s13891_s7 + $0x3e0] sm:$0xff] }
 0xd9c   :  { %v3550_v2 = vadd.f32 %v3541_v58, %v3533_v11  ;;  %v8577_v58 = vld [vmem:[%s13891_s7 + $0x2d0] sm:$0xff]  ;;  %v3721_v45 = vld [vmem:[%s13891_s7 + $0x8] sm:$0xff] }
 0xd9d   :  { %v3551_v56 = vadd.f32 %v3545_v60, %v3534_v63  ;;  %v10599_v60 = vpack.c.bf16 %v8577_v58, %v8575_v55  ;;  %v8581_v11 = vld [vmem:[%s13891_s7 + $0x2f0] sm:$0xff] }
 0xd9e   :  { %v3554_v5 = vmax.f32 %v3550_v2, 0.0  ;;  %v10603_v63 = vpack.c.bf16 %v8581_v11, %v8579_v57  ;;  %v10605_v2 = vpack.c.bf16 %v8586_v53, %v8584_v61  ;;  %v8613_v50 = vld [vmem:[%s13891_s7 + $0x3f0] sm:$0xff]  ;;  %v3720_v61 = vld [vmem:[%s13891_s7] sm:$0xff] }
 0xd9f   :  { %v3555_v7 = vmax.f32 %v3551_v56, 0.0  ;;  %v8583_v56 = vld [vmem:[%s13891_s7 + $0x300] sm:$0xff]  ;;  %v10635_v44 = vpack.c.bf16 %v8613_v50, %v8611_v41  ;;  %v3722_v53 = vld [vmem:[%s13891_s7 + $0x10] sm:$0xff] }
 0xda0   :  { %v10564_v8 = vpack.c.bf16 %v3554_v5, %v3552_v3  ;;  %v8585_v3 = vld [vmem:[%s13891_s7 + $0x310] sm:$0xff]  ;;  %v8588_v5 = vld [vmem:[%s13891_s7 + $0x328] sm:$0xff]  ;;  %v3748_v50 = vld [vmem:[%s13891_s7 + $0xe0] sm:$0xff] }
 0xda1   :  { %v10561_v9 = vpack.c.bf16 %v3555_v7, %v3553_v6  ;;  %v8590_v6 = vld [vmem:[%s13891_s7 + $0x338] sm:$0xff]  ;;  %v10607_v7 = vpack.c.bf16 %v8585_v3, %v8583_v56 }
 0xda2   :  { %v3727_v56 = vld [vmem:[%s13891_s7 + $0x38] sm:$0xff] }
 0xda3   :  { %10563 = vmatprep.subr.msk.bf16.mxu0 %vm12266_vm10, %v10561_v9 }
 0xda4   :  { %10566 = vmatpush1.bf16.msk.msra.mxu0 %vm12266_vm10, %v10564_v8 }
 0xda5   :  { %10569 = vmatprep.subr.msk.bf16.mxu0 %vm12266_vm10, %v10561_v9  ;;  %v8587_v9 = vld [vmem:[%s13891_s7 + $0x320] sm:$0xff] }
 0xda7   :  { %8547 = vmatmul.mubr.msk.f32.vlgmr.msra.gmra.mrb[94].mxu0 %vm2953_vm11, %v3556_v13  ;;  %v8594_v13 = vld [vmem:[%s13891_s7 + $0x358] sm:$0xff] }
 0xda8   :  { %10572 = vmatpush1.bf16.msk.msra.mxu0 %vm12266_vm10, %v10564_v8  ;;  %3705 = vmatprep.mubr.f32.mxu0 %v11494_v1  ;;  %v10609_v8 = vpack.c.bf16 %v8590_v6, %v8588_v5  ;;  %v10613_v15 = vpack.c.bf16 %v8594_v13, %v8592_v12  ;;  %v10639_v6 = vpack.c.bf16 %v3722_v53, %v3720_v61  ;;  %v3729_v13 = vld [vmem:[%s13891_s7 + $0x48] sm:$0xff]  ;;  %v3758_v61 = vld [vmem:[%s13891_s7 + $0x130] sm:$0xff] }
 0xda9   :  { %10574 = vmatprep.subr.bf16.mxu0 %v10573_v14  ;;  %v10611_v14 = vpack.c.bf16 %v8589_v10, %v8587_v9  ;;  %v3724_v9 = vld [vmem:[%s13891_s7 + $0x20] sm:$0xff]  ;;  %v3726_v10 = vld [vmem:[%s13891_s7 + $0x30] sm:$0xff]  ;;  %v3761_v53 = vld [vmem:[%s13891_s7 + $0x148] sm:$0xff] }
 0xdab   :  { %8550 = vmatmul.mubr.msk.f32.vlgmr.msra.gmra.mrb[96].mxu0 %vm2953_vm11, %v3557_v19  ;;  %v8596_v19 = vld [vmem:[%s13891_s7 + $0x368] sm:$0xff] }
 0xdac   :  { %10576 = vmatpush1.bf16.msra.mxu0 %v10575_v20  ;;  %v8598_v20 = vld [vmem:[%s13891_s7 + $0x378] sm:$0xff] }
 0xdad   :  { %10578 = vmatprep.subr.bf16.mxu0 %v10577_v21  ;;  %v10617_v21 = vpack.c.bf16 %v8598_v20, %v8596_v19  ;;  %v3733_v19 = vld [vmem:[%s13891_s7 + $0x68] sm:$0xff]  ;;  %v3735_v20 = vld [vmem:[%s13891_s7 + $0x78] sm:$0xff] }
 0xdae   :  { %v10649_v22 = vpack.c.bf16 %v3735_v20, %v3733_v19  ;;  %v3770_v19 = vld [vmem:[%s13891_s7 + $0x190] sm:$0xff]  ;;  %v3773_v20 = vld [vmem:[%s13891_s7 + $0x1a8] sm:$0xff] }
 0xdb0   :  { %10580 = vmatpush1.bf16.msra.mxu0 %v10579_v26  ;;  %v8602_v26 = vld [vmem:[%s13891_s7 + $0x398] sm:$0xff] }
 0xdb1   :  { %10582 = vmatprep.subr.bf16.mxu0 %v10581_v27  ;;  %v10621_v27 = vpack.c.bf16 %v8602_v26, %v8600_v23  ;;  %v3737_v23 = vld [vmem:[%s13891_s7 + $0x88] sm:$0xff]  ;;  %v3739_v26 = vld [vmem:[%s13891_s7 + $0x98] sm:$0xff] }
 0xdb2   :  { %v10653_v18 = vpack.c.bf16 %v3739_v26, %v3737_v23  ;;  %v3774_v23 = vld [vmem:[%s13891_s7 + $0x1b0] sm:$0xff]  ;;  %v3777_v26 = vld [vmem:[%s13891_s7 + $0x1c8] sm:$0xff] }
 0xdb4   :  { %10584 = vmatpush1.bf16.msra.mxu0 %v10583_v31  ;;  %v8606_v31 = vld [vmem:[%s13891_s7 + $0x3b8] sm:$0xff] }
 0xdb5   :  { %10586 = vmatprep.subr.bf16.mxu0 %v10585_v32  ;;  %v10625_v32 = vpack.c.bf16 %v8606_v31, %v8604_v30  ;;  %v3741_v30 = vld [vmem:[%s13891_s7 + $0xa8] sm:$0xff]  ;;  %v3743_v31 = vld [vmem:[%s13891_s7 + $0xb8] sm:$0xff] }
 0xdb6   :  { %v10657_v33 = vpack.c.bf16 %v3743_v31, %v3741_v30  ;;  %v3778_v30 = vld [vmem:[%s13891_s7 + $0x1d0] sm:$0xff]  ;;  %v3781_v31 = vld [vmem:[%s13891_s7 + $0x1e8] sm:$0xff] }
 0xdb8   :  { %10588 = vmatpush1.bf16.msra.mxu0 %v10587_v37  ;;  %v8610_v37 = vld [vmem:[%s13891_s7 + $0x3d8] sm:$0xff] }
 0xdb9   :  { %10590 = vmatprep.subr.bf16.mxu0 %v10589_v38  ;;  %v8607_v38 = vld [vmem:[%s13891_s7 + $0x3c0] sm:$0xff]  ;;  %v10629_v39 = vpack.c.bf16 %v8610_v37, %v8608_v36  ;;  %v3745_v36 = vld [vmem:[%s13891_s7 + $0xc8] sm:$0xff]  ;;  %v3747_v37 = vld [vmem:[%s13891_s7 + $0xd8] sm:$0xff] }
 0xdbc   :  { %10592 = vmatpush1.bf16.msra.mxu0 %v10591_v46  ;;  %v10631_v46 = vpack.c.bf16 %v8609_v42, %v8607_v38  ;;  %v3744_v42 = vld [vmem:[%s13891_s7 + $0xc0] sm:$0xff] }
 0xdbd   :  { %10594 = vmatprep.subr.bf16.mxu0 %v10593_v47  ;;  %v10633_v47 = vpack.c.bf16 %v8614_v43, %v8612_v40  ;;  %v3746_v40 = vld [vmem:[%s13891_s7 + $0xd0] sm:$0xff]  ;;  %v3749_v43 = vld [vmem:[%s13891_s7 + $0xe8] sm:$0xff] }
 0xdc0   :  { %10596 = vmatpush1.bf16.msra.mxu0 %v10595_v51  ;;  %v3723_v51 = vld [vmem:[%s13891_s7 + $0x18] sm:$0xff] }
 0xdc1   :  { %10598 = vmatprep.subr.bf16.mxu0 %v10597_v54  ;;  %v10637_v54 = vpack.c.bf16 %v3723_v51, %v3721_v45  ;;  %v3753_v45 = vld [vmem:[%s13891_s7 + $0x108] sm:$0xff]  ;;  %v3755_v51 = vld [vmem:[%s13891_s7 + $0x118] sm:$0xff] }
 0xdc4   :  { %10600 = vmatpush1.bf16.msra.mxu0 %v10599_v60 }
 0xdc5   :  { %10602 = vmatprep.subr.bf16.mxu0 %v10601_v49 }
 0xdc8   :  { %10604 = vmatpush1.bf16.msra.mxu0 %v10603_v63 }
 0xdc9   :  { %10606 = vmatprep.subr.bf16.mxu0 %v10605_v2  ;;  %v3725_v2 = vld [vmem:[%s13891_s7 + $0x28] sm:$0xff] }
 0xdcc   :  { %10608 = vmatpush1.bf16.msra.mxu0 %v10607_v7 }
 0xdcd   :  { %10610 = vmatprep.subr.bf16.mxu0 %v10609_v8  ;;  %v10641_v8 = vpack.c.bf16 %v3727_v56, %v3725_v2 }
 0xdd0   :  { %10612 = vmatpush1.bf16.msra.mxu0 %v10611_v14  ;;  %v3731_v14 = vld [vmem:[%s13891_s7 + $0x58] sm:$0xff] }
 0xdd1   :  { %10614 = vmatprep.subr.bf16.mxu0 %v10613_v15  ;;  %v10643_v15 = vpack.c.bf16 %v3726_v10, %v3724_v9  ;;  %v10645_v16 = vpack.c.bf16 %v3731_v14, %v3729_v13  ;;  %v3766_v13 = vld [vmem:[%s13891_s7 + $0x170] sm:$0xff]  ;;  %v3769_v14 = vld [vmem:[%s13891_s7 + $0x188] sm:$0xff] }
 0xdd4   :  { %10616 = vmatpush1.bf16.msra.mxu0 %v10615_v4  ;;  %v3730_v4 = vld [vmem:[%s13891_s7 + $0x50] sm:$0xff] }
 0xdd5   :  { %10618 = vmatprep.subr.bf16.mxu0 %v10617_v21  ;;  %v10647_v21 = vpack.c.bf16 %v3730_v4, %v3728_v17  ;;  %v3768_v4 = vld [vmem:[%s13891_s7 + $0x180] sm:$0xff] }
 0xdd8   :  { %10620 = vmatpush1.bf16.msra.mxu0 %v10619_v25  ;;  %v3734_v25 = vld [vmem:[%s13891_s7 + $0x70] sm:$0xff] }
 0xdd9   :  { %10622 = vmatprep.subr.bf16.mxu0 %v10621_v27  ;;  %v10651_v27 = vpack.c.bf16 %v3734_v25, %v3732_v24  ;;  %v3772_v25 = vld [vmem:[%s13891_s7 + $0x1a0] sm:$0xff] }
 0xddc   :  { %10624 = vmatpush1.bf16.msra.mxu0 %v10623_v29  ;;  %v3738_v29 = vld [vmem:[%s13891_s7 + $0x90] sm:$0xff] }
 0xddd   :  { %10626 = vmatprep.subr.bf16.mxu0 %v10625_v32  ;;  %v10655_v32 = vpack.c.bf16 %v3738_v29, %v3736_v28  ;;  %v3776_v29 = vld [vmem:[%s13891_s7 + $0x1c0] sm:$0xff] }
 0xde0   :  { %10628 = vmatpush1.bf16.msra.mxu0 %v10627_v35  ;;  %v3742_v35 = vld [vmem:[%s13891_s7 + $0xb0] sm:$0xff] }
 0xde1   :  { %10630 = vmatprep.subr.bf16.mxu0 %v10629_v39  ;;  %v10659_v38 = vpack.c.bf16 %v3742_v35, %v3740_v34  ;;  %v10661_v39 = vpack.c.bf16 %v3747_v37, %v3745_v36  ;;  %v3780_v35 = vld [vmem:[%s13891_s7 + $0x1e0] sm:$0xff]  ;;  %v3782_v36 = vld [vmem:[%s13891_s7 + $0x1f0] sm:$0xff] }
 0xde2   :  { %v10699_v37 = vpack.c.bf16 %v3782_v36, %v3780_v35 }
 0xde4   :  { %10632 = vmatpush1.bf16.msra.mxu0 %v10631_v46  ;;  %v3751_v46 = vld [vmem:[%s13891_s7 + $0xf8] sm:$0xff] }
 0xde5   :  { %10634 = vmatprep.subr.bf16.mxu0 %v10633_v47  ;;  %v10663_v47 = vpack.c.bf16 %v3746_v40, %v3744_v42  ;;  %v10665_v41 = vpack.c.bf16 %v3751_v46, %v3749_v43 }
 0xde8   :  { %10636 = vmatpush1.bf16.msra.mxu0 %v10635_v44  ;;  %v3750_v44 = vld [vmem:[%s13891_s7 + $0xf0] sm:$0xff] }
 0xde9   :  { %10638 = vmatprep.subr.bf16.mxu0 %v10637_v54  ;;  %v10667_v54 = vpack.c.bf16 %v3750_v44, %v3748_v50  ;;  %v4018_v44 = vld [vmem:[#allocation21 + $0xf4] sm:$0x3] }
 0xe7a   :  { %v3633_v55 = vpop.f32.mrb[94].mxu0 }
 0xe7b   :  { %v3635_v58 = vpop.f32.mrb[95].mxu0 }
 0xe7e   :  { %v3707_v48 = vpop.f32.mrb[96].mxu0 }
 0xe7f   :  { %v3712_v59 = vmax.f32 %v3633_v55, %v3707_v48  ;;  %v3709_v60 = vpop.f32.mrb[97].mxu0  ;;  %v10669_v55 = vpack.c.bf16 %v3755_v51, %v3753_v45  ;;  %v3754_v48 = vld [vmem:[%s13891_s7 + $0x110] sm:$0xff]  ;;  %v4104_v45 = vld [vmem:[#allocation22 + $0x18] sm:$0xff] }
 0xe80   :  { %v3713_v49 = vmax.f32 %v3635_v58, %v3709_v60  ;;  %v3752_v58 = vld [vmem:[%s13891_s7 + $0x100] sm:$0xff]  ;;  %v3759_v60 = vld [vmem:[%s13891_s7 + $0x138] sm:$0xff] }
 0xe82   :  { %v3716_v57 = vcombine.low %v3712_v59, %v3713_v49  ;;  %v3757_v59 = vld [vmem:[%s13891_s7 + $0x128] sm:$0xff]  ;;  %v10671_v49 = vpack.c.bf16 %v3754_v48, %v3752_v58  ;;  %v4106_v48 = vld [vmem:[#allocation22 + $0x28] sm:$0xff] }
 0xe84   :  { %3718 = vst [vmem:[#allocation8] sm:$0xff] %v3716_v57  ;;  %v10673_v57 = vpack.c.bf16 %v3759_v60, %v3757_v59  ;;  %v4108_v59 = vld [vmem:[#allocation22 + $0x38] sm:$0xff] }
 0xe85   :  { %v13279_v60 = vpack.c.bf16 %v4108_v59, %v4106_v48 }
 0xe8b   :  { %v3784_v11 = vld [vmem:[#allocation8] sm:$0xee] }
 0xe8c   :  { %v3851_v63 = vcombine.high %v3784_v11, %v3784_v11  ;;  %v13088_v3 = vld [vmem:[#allocation8] sm:$0x77]  ;;  %v3852_v7 = vrot.slane %v3784_v11, 1  ;;  %v3756_v11 = vld [vmem:[%s13891_s7 + $0x120] sm:$0xff] }
 0xe8d   :  { %v3928_v12 = vcombine.high %v13088_v3, %v13088_v3  ;;  %v10675_v2 = vpack.c.bf16 %v3758_v61, %v3756_v11 }
 0xe8e   :  { %v3853_v5 = vrot.slane %v3851_v63, 1  ;;  %v3763_v63 = vld [vmem:[%s13891_s7 + $0x158] sm:$0xff] }
 0xe8f   :  { %v10677_v56 = vpack.c.bf16 %v3763_v63, %v3761_v53  ;;  %v4645_v63 = vld [vmem:[#allocation22 + $0x40] sm:$0xfe] }
 0xe90   :  { %3920 = vmatprep.mubr.f32.mxu0 %v3853_v5  ;;  %v3760_v5 = vld [vmem:[%s13891_s7 + $0x140] sm:$0xff] }
 0xe91   :  { %3921 = vmatmul.mubr.f32.vlgmr.msra.gmra.mrb[98].mxu0 %v3852_v7  ;;  %v3765_v7 = vld [vmem:[%s13891_s7 + $0x168] sm:$0xff] }
 0xe92   :  { %10640 = vmatpush1.bf16.msra.mxu0 %v10639_v6  ;;  %3994 = vmatprep.mubr.f32.mxu0 %v3928_v12  ;;  %v3762_v6 = vld [vmem:[%s13891_s7 + $0x150] sm:$0xff]  ;;  %v3764_v12 = vld [vmem:[%s13891_s7 + $0x160] sm:$0xff] }
 0xe93   :  { %10642 = vmatprep.subr.bf16.mxu0 %v10641_v8  ;;  %v3767_v8 = vld [vmem:[%s13891_s7 + $0x178] sm:$0xff]  ;;  %v10679_v9 = vpack.c.bf16 %v3762_v6, %v3760_v5  ;;  %v4655_v5 = vrot.slane %v4645_v63, 1 }
 0xe94   :  { %v10681_v10 = vpack.c.bf16 %v3767_v8, %v3765_v7 }
 0xe96   :  { %10644 = vmatpush1.bf16.msra.mxu0 %v10643_v15  ;;  %v3771_v15 = vld [vmem:[%s13891_s7 + $0x198] sm:$0xff] }
 0xe97   :  { %10646 = vmatprep.subr.bf16.mxu0 %v10645_v16  ;;  %v10683_v16 = vpack.c.bf16 %v3766_v13, %v3764_v12  ;;  %v10685_v17 = vpack.c.bf16 %v3771_v15, %v3769_v14 }
 0xe9a   :  { %10648 = vmatpush1.bf16.msra.mxu0 %v10647_v21  ;;  %v3775_v21 = vld [vmem:[%s13891_s7 + $0x1b8] sm:$0xff] }
 0xe9b   :  { %10650 = vmatprep.subr.bf16.mxu0 %v10649_v22  ;;  %v10687_v22 = vpack.c.bf16 %v3770_v19, %v3768_v4  ;;  %v10689_v24 = vpack.c.bf16 %v3775_v21, %v3773_v20 }
 0xe9e   :  { %10652 = vmatpush1.bf16.msra.mxu0 %v10651_v27  ;;  %v3779_v27 = vld [vmem:[%s13891_s7 + $0x1d8] sm:$0xff] }
 0xe9f   :  { %10654 = vmatprep.subr.bf16.mxu0 %v10653_v18  ;;  %v10691_v18 = vpack.c.bf16 %v3774_v23, %v3772_v25  ;;  %v10693_v28 = vpack.c.bf16 %v3779_v27, %v3777_v26  ;;  %v13338_v23 = vld [vmem:[#allocation22 + $0x40] ss:$8 sm:$0x3] }
 0xea2   :  { %10656 = vmatpush1.bf16.msra.mxu0 %v10655_v32  ;;  %v3783_v32 = vld [vmem:[%s13891_s7 + $0x1f8] sm:$0xff]  ;;  %s11497_s7 = smov 32  }
 0xea3   :  { %10658 = vmatprep.subr.bf16.mxu0 %v10657_v33  ;;  %v10695_v33 = vpack.c.bf16 %v3778_v30, %v3776_v29  ;;  %v10697_v34 = vpack.c.bf16 %v3783_v32, %v3781_v31 }
 0xea6   :  { %10660 = vmatpush1.bf16.msra.mxu0 %v10659_v38  ;;  %v4002_v38 = vld [vmem:[#allocation19 + $0x10] ss:$8 sm:$0x3] }
 0xea7   :  { %10662 = vmatprep.subr.bf16.mxu0 %v10661_v39  ;;  %v4007_v39 = vrot.slane %v4002_v38, %v12251_v52  ;;  %v4011_v42 = vrot.slane %v4002_v38, %v12253_v62 }
 0xeaa   :  { %10664 = vmatpush1.bf16.msra.mxu0 %v10663_v47 }
 0xeab   :  { %10666 = vmatprep.subr.bf16.mxu0 %v10665_v41 }
 0xeae   :  { %10668 = vmatpush1.bf16.msra.mxu0 %v10667_v54  ;;  %v4101_v54 = vld [vmem:[#allocation22] sm:$0xff] }
 0xeaf   :  { %10670 = vmatprep.subr.bf16.mxu0 %v10669_v55  ;;  %v4103_v55 = vld [vmem:[#allocation22 + $0x10] sm:$0xff] }
 0xeb0   :  { %v13273_v58 = vpack.c.bf16 %v4103_v55, %v4101_v54 }
 0xeb2   :  { %10672 = vmatpush1.bf16.msra.mxu0 %v10671_v49  ;;  %v4105_v49 = vld [vmem:[#allocation22 + $0x20] sm:$0xff] }
 0xeb3   :  { %10674 = vmatprep.subr.bf16.mxu0 %v10673_v57  ;;  %v4107_v57 = vld [vmem:[#allocation22 + $0x30] sm:$0xff] }
 0xeb4   :  { %v13281_v11 = vpack.c.bf16 %v4107_v57, %v4105_v49 }
 0xeb6   :  { %10676 = vmatpush1.bf16.msra.mxu0 %v10675_v2  ;;  %v4646_v2 = vld [vmem:[#allocation22 + $0x50] sm:$0xff] }
 0xeb7   :  { %10678 = vmatprep.subr.bf16.mxu0 %v10677_v56  ;;  %v4647_v56 = vld [vmem:[#allocation22 + $0x60] sm:$0xff]  ;;  %v4656_v6 = vrot.slane %v4646_v2, 1 }
 0xeb8   :  { %v4658_v7 = vrot.slane %v4647_v56, 1 }
 0xeb9   :  { %v4657_v12 = vsel %vm3188_vm12, %v4655_v5, %v4656_v6 }
 0xeba   :  { %10680 = vmatpush1.bf16.msra.mxu0 %v10679_v9  ;;  %v4648_v9 = vld [vmem:[#allocation22 + $0x70] sm:$0xff]  ;;  %v4659_v13 = vsel %vm3188_vm12, %v4656_v6, %v4658_v7 }
 0xebb   :  { %10682 = vmatprep.subr.bf16.mxu0 %v10681_v10  ;;  %v4649_v10 = vld [vmem:[#allocation22 + $0x80] sm:$0x1]  ;;  %v4660_v14 = vrot.slane %v4648_v9, 1 }
 0xebc   :  { %v4662_v15 = vrot.slane %v4649_v10, 1 }
 0xebe   :  { %10684 = vmatpush1.bf16.msra.mxu0 %v10683_v16  ;;  %v13311_v16 = vpack.c.bf16 %v4659_v13, %v4657_v12  ;;  %v4663_v4 = vsel %vm3188_vm12, %v4660_v14, %v4662_v15 }
 0xebf   :  { %10686 = vmatprep.subr.bf16.mxu0 %v10685_v17  ;;  %v4661_v17 = vsel %vm3188_vm12, %v4658_v7, %v4660_v14 }
 0xec0   :  { %v13318_v20 = vpack.c.bf16 %v4663_v4, %v4661_v17 }
 0xec2   :  { %10688 = vmatpush1.bf16.msra.mxu0 %v10687_v22 }
 0xec3   :  { %10690 = vmatprep.subr.bf16.mxu0 %v10689_v24 }
 0xec6   :  { %10692 = vmatpush1.bf16.msra.mxu0 %v10691_v18  ;;  %v13346_v18 = vrot.slane %v13338_v23, %v12251_v52 }
 0xec7   :  { %10694 = vmatprep.subr.bf16.mxu0 %v10693_v28 }
 0xeca   :  { %10696 = vmatpush1.bf16.msra.mxu0 %v10695_v33 }
 0xecb   :  { %10698 = vmatprep.subr.bf16.mxu0 %v10697_v34 }
 0xece   :  { %10700 = vmatpush1.bf16.msra.mxu0 %v10699_v37 }
 0xed1   :  { %3995 = vmatmul.mubr.f32.vlgmr.msra.gmra.mrb[98].mxu0 %v13088_v3  ;;  %v4102_v3 = vld [vmem:[#allocation22 + $0x8] sm:$0xff] }
 0xed2   :  { %4414 = vmatprep.mubr.f32.mxu0 %v11494_v1  ;;  %v13271_v51 = vpack.c.bf16 %v4104_v45, %v4102_v3 }
 0xed4   :  { %10726 = vmatprep.subr.bf16.mxu0 %v13271_v51 }
 0xed5   :  { %10728 = vmatpush1.bf16.msra.mxu0 %v13273_v58 }
 0xed6   :  { %10730 = vmatprep.subr.bf16.mxu0 %v13279_v60 }
 0xed9   :  { %10732 = vmatpush1.bf16.msra.mxu0 %v13281_v11 }
 0xeda   :  { %10742 = vmatprep.subr.bf16.mxu0 %v13271_v51 }
 0xfa4   :  { %v3996_v40 = vpop.f32.mrb[98].mxu0 }
 0xfa5   :  { %v4014_v43 = vadd.f32 %v4007_v39, %v3996_v40  ;;  %v3998_v46 = vpop.f32.mrb[99].mxu0 }
 0xfa6   :  { %v4015_v47 = vadd.f32 %v4011_v42, %v3998_v46 }
 0xfa7   :  { %v4016_v50 = vmax.f32 %v4014_v43, 0.0 }
 0xfa8   :  { %v4017_v41 = vmax.f32 %v4015_v47, 0.0 }
 0xfaa   :  { %8615 = vmatprep.subr.msk.mxu1 %vm4023_vm14, %v4017_v41 }
 0xfab   :  { %8616 = vmatpush1.msk.msra.mxu1 %vm4023_vm14, %v4016_v50 }
 0xfac   :  { %8617 = vmatmul.mubr.msk.f32.vlgmr.msra.gmra.mrb[98].mxu1 %vm4019_vm15, %v4018_v44  ;;  %10702 = vmatprep.subr.bf16.mxu1 %v13271_v51 }
 0xfad   :  { %4189 = vmatprep.mubr.f32.mxu1 %v11494_v1  ;;  %10704 = vmatpush1.bf16.msra.mxu1 %v13273_v58 }
 0xfae   :  { %10706 = vmatprep.subr.bf16.mxu1 %v13279_v60 }
 0xfb1   :  { %10708 = vmatpush1.bf16.msra.mxu1 %v13281_v11 }
 0xfb2   :  { %10710 = vmatprep.subr.bf16.mxu1 %v13271_v51 }
0x107f   :  { %v13289_v61 = vpop.f32.mrb[98].mxu1 }
0x1080   :  { %4346 = vrot.lane.b32.xlu0 %v13289_v61, %s11497_s7  ;;  %v13293_v53 = vpop.f32.mrb[99].mxu1  ;;  %8618 = vmatmul.mubr.msk.f32.vlgmr.msra.gmra.mrb[100].mxu1 %vm318_vm2, %v13289_v61 }
0x1081   :  { %4495 = vrot.lane.b32.xlu1 %v13293_v53, %s11498_s15  ;;  %10712 = vmatpush1.bf16.msra.mxu1 %v13273_v58 }
0x1082   :  { %10714 = vmatprep.subr.bf16.mxu1 %v13279_v60  ;;  %4264 = vmatprep.mubr.f32.mxu1 %v11494_v1 }
0x1085   :  { %10716 = vmatpush1.bf16.msra.mxu1 %v13281_v11 }
0x1086   :  { %10718 = vmatprep.subr.bf16.mxu1 %v13271_v51 }
0x10f2   :  { %v4347_v8 = vpop.permute.xlu0 %4346 }
0x10f3   :  { %8621 = vmatmul.mubr.msk.f32.vlgmr.msra.gmra.mrb[100].mxu0 %vm318_vm2, %v4347_v8  ;;  %v4496_v19 = vpop.permute.xlu1 %4495 }
0x10f4   :  { %10744 = vmatpush1.bf16.msra.mxu0 %v13273_v58  ;;  %4563 = vmatprep.mubr.f32.mxu0 %v11494_v1 }
0x10f5   :  { %10746 = vmatprep.subr.bf16.mxu0 %v13279_v60 }
0x10f8   :  { %10748 = vmatpush1.bf16.msra.mxu0 %v13281_v11 }
0x10f9   :  { %10757 = vmatprep.subr.bf16.mxu0 %v11492_v0 }
0x10fb   :  { %8623 = vmatmul.mubr.msk.f32.vlgmr.msra.gmra.mrb[102].mxu0 %vm318_vm2, %v4496_v19 }
0x10fc   :  { %10759 = vmatpush3.bf16.msra.mxu0 %v13311_v16  ;;  %9691 = vmatprep.mubr.msk.f32.mxu0 %vm11493_vm0, %v11494_v1 }
0x10fd   :  { %10760 = vmatprep.subr.bf16.mxu0 %v11492_v0 }
0x1100   :  { %10762 = vmatpush3.bf16.msra.mxu0 %v13318_v20 }
0x1101   :  { %10769 = vmatprep.subr.bf16.mxu0 %v11492_v0 }
0x1103   :  { %9692 = vmatmul.mubr.f32.vlgmr.msra.gmra.mrb[104].mxu0 %v11494_v1 }
0x1104   :  { %10771 = vmatpush3.bf16.msra.mxu0 %v13311_v16  ;;  %9713 = vmatprep.mubr.msk.f32.mxu0 %vm11493_vm0, %v11494_v1 }
0x1105   :  { %10772 = vmatprep.subr.bf16.mxu0 %v11492_v0 }
0x1108   :  { %10774 = vmatpush3.bf16.msra.mxu0 %v13318_v20 }
0x1109   :  { %10781 = vmatprep.subr.bf16.mxu0 %v11492_v0 }
0x1153   :  { %v4191_v21 = vpop.f32.mrb[100].mxu1 }
0x1154   :  { %v13332_v22 = vpop.f32.mrb[101].mxu1  ;;  %v4192_v28 = vadd.f32 %v4191_v21, %v13346_v18 }
0x11c6   :  { %v13334_v24 = vpop.f32.mrb[100].mxu0 }
0x11c7   :  { %v13336_v25 = vpop.f32.mrb[101].mxu0 }
0x11ce   :  { %v13340_v26 = vpop.f32.mrb[102].mxu0 }
0x11cf   :  { %v13342_v27 = vpop.f32.mrb[103].mxu0 }
0x11d6   :  { %v4737_v29 = vpop.f32.mrb[104].mxu0 }
0x11d7   :  { %v4741_v30 = vadd.f32 %v4737_v29, %v4192_v28  ;;  %v9693_v31 = vpop.f32.mrb[105].mxu0 }
0x11d9   :  { %11047 = vtanh.f32 %v4741_v30  ;;  %v8625_v33 = vmul.f32 -1.442695, %v4741_v30 }
0x11db   :  { %11049 = vpow2.f32 %v8625_v33 }
0x11e3   :  { %v11048_v32 = vpop.eup %11047 }
0x11e4   :  { %4751 = vrot.lane.b32.xlu0 %v11048_v32, %s11495_s11 }
0x11e5   :  { %v11050_v34 = vpop.eup %11049 }
0x11e6   :  { %v4745_v35 = vadd.f32 1.0, %v11050_v34 }
0x11e8   :  { %11051 = vrcp.f32 %v4745_v35 }
0x11f2   :  { %v11052_v36 = vpop.eup %11051 }
0x11f3   :  { %v4749_v39 = vmul.f32 0.0, %v11052_v36 }
0x1256   :  { %v4752_v37 = vpop.permute.xlu0 %4751 }
0x1257   :  { %v4754_v38 = vmul.f32 %v11052_v36, %v4752_v37 }
0x1259   :  { %4756 = vrot.lane.b32.xlu1 %v4754_v38, %s11497_s7 }
0x125d   :  { %4196 = vrot.lane.b32.xlu1 %v13289_v61, %s11498_s15 }
0x1261   :  { %4570 = vrot.lane.b32.xlu1 %v13293_v53, %s11495_s11 }
0x12cb   :  { %v4757_v42 = vpop.permute.xlu1 %4756 }
0x12cc   :  { %v13355_v40 = vadd.f32 %v4757_v42, %v4749_v39 }
0x12ce   :  { %11053 = vtanh.f32 %v13355_v40 }
0x12cf   :  { %v4197_v43 = vpop.permute.xlu1 %4196 }
0x12d0   :  { %8619 = vmatmul.mubr.msk.f32.vlgmr.msra.gmra.mrb[102].mxu1 %vm318_vm2, %v4197_v43  ;;  %v4417_v43 = vadd.f32 %v13334_v24, %v13346_v18 }
0x12d1   :  { %10720 = vmatpush1.bf16.msra.mxu1 %v13273_v58  ;;  %4339 = vmatprep.mubr.f32.mxu1 %v11494_v1 }
0x12d2   :  { %10722 = vmatprep.subr.bf16.mxu1 %v13279_v60 }
0x12d3   :  { %v4571_v44 = vpop.permute.xlu1 %4570 }
0x12d5   :  { %10724 = vmatpush1.bf16.msra.mxu1 %v13281_v11 }
0x12d6   :  { %10734 = vmatprep.subr.bf16.mxu1 %v13271_v51 }
0x12d8   :  { %v11054_v46 = vpop.eup %11053 }
0x12d9   :  { %4762 = vrot.lane.b32.xlu0 %v11054_v46, %s11495_s11 }
0x12dd   :  { %4271 = vrot.lane.b32.xlu0 %v13289_v61, %s11495_s11 }
0x134b   :  { %v4763_v47 = vpop.permute.xlu0 %4762 }
0x134c   :  { %v4765_v41 = vmul.f32 %v11052_v36, %v4763_v47 }
0x134e   :  { %4767 = vrot.lane.b32.xlu0 %v4765_v41, %s11497_s7 }
0x134f   :  { %v4272_v50 = vpop.permute.xlu0 %4271 }
0x1350   :  { %8620 = vmatmul.mubr.msk.f32.vlgmr.msra.gmra.mrb[104].mxu1 %vm318_vm2, %v4272_v50 }
0x1351   :  { %10736 = vmatpush1.bf16.msra.mxu1 %v13273_v58  ;;  %4488 = vmatprep.mubr.f32.mxu1 %v11494_v1 }
0x1352   :  { %10738 = vmatprep.subr.bf16.mxu1 %v13279_v60 }
0x1355   :  { %10740 = vmatpush1.bf16.msra.mxu1 %v13281_v11 }
0x1356   :  { %10750 = vmatprep.subr.bf16.mxu1 %v13271_v51 }
0x1358   :  { %8622 = vmatmul.mubr.msk.f32.vlgmr.msra.gmra.mrb[106].mxu1 %vm318_vm2, %v13293_v53 }
0x1359   :  { %10752 = vmatpush1.bf16.msra.mxu1 %v13273_v58  ;;  %4638 = vmatprep.mubr.f32.mxu1 %v11494_v1 }
0x135a   :  { %10754 = vmatprep.subr.bf16.mxu1 %v13279_v60 }
0x135d   :  { %10756 = vmatpush1.bf16.msra.mxu1 %v13281_v11 }
0x135e   :  { %10763 = vmatprep.subr.bf16.mxu1 %v11492_v0 }
0x1360   :  { %8624 = vmatmul.mubr.msk.f32.vlgmr.msra.gmra.mrb[108].mxu1 %vm318_vm2, %v4571_v44 }
0x1361   :  { %10765 = vmatpush3.bf16.msra.mxu1 %v13311_v16  ;;  %9702 = vmatprep.mubr.msk.f32.mxu1 %vm11493_vm0, %v11494_v1 }
0x1362   :  { %10766 = vmatprep.subr.bf16.mxu1 %v11492_v0 }
0x1365   :  { %10768 = vmatpush3.bf16.msra.mxu1 %v13318_v20 }
0x1366   :  { %10775 = vmatprep.subr.bf16.mxu1 %v11492_v0 }
0x13a3   :  { %v4266_v3 = vpop.f32.mrb[102].mxu1 }
0x13a4   :  { %v13388_v45 = vpop.f32.mrb[103].mxu1  ;;  %v4267_v49 = vadd.f32 %v4266_v3, %v13346_v18 }
0x13c0   :  { %v4768_v51 = vpop.permute.xlu0 %4767 }
0x13c1   :  { %4771 = vst.msk [vmem:[#allocation9] sm:$0x3] %vm4770_vm1, %v4768_v51  ;;  %9703 = vmatmul.mubr.msk.f32.vlgmr.msra.gmra.mrb[110].mxu1 %vm318_vm2, %v4768_v51 }
0x13c2   :  { %10777 = vmatpush3.bf16.msra.mxu1 %v13311_v16  ;;  %9724 = vmatprep.mubr.msk.f32.mxu1 %vm11493_vm0, %v11494_v1 }
0x13c3   :  { %10778 = vmatprep.subr.bf16.mxu1 %v11492_v0 }
0x13c6   :  { %10780 = vmatpush3.bf16.msra.mxu1 %v13318_v20 }
0x13c7   :  { %10787 = vmatprep.subr.bf16.mxu1 %v11492_v0 }
0x1423   :  { %v4341_v54 = vpop.f32.mrb[104].mxu1 }
0x1424   :  { %v13398_v55 = vpop.f32.mrb[105].mxu1  ;;  %v4342_v17 = vadd.f32 %v4341_v54, %v13346_v18 }
0x142b   :  { %v13400_v58 = vpop.f32.mrb[106].mxu1 }
0x142c   :  { %v13402_v48 = vpop.f32.mrb[107].mxu1 }
0x1433   :  { %v13404_v59 = vpop.f32.mrb[108].mxu1 }
0x1434   :  { %v13406_v60 = vpop.f32.mrb[109].mxu1 }
0x1494   :  { %v4840_v57 = vpop.f32.mrb[110].mxu1 }
0x1495   :  { %v4844_v11 = vadd.f32 %v4840_v57, %v4267_v49  ;;  %v9704_v61 = vpop.f32.mrb[111].mxu1 }
0x1497   :  { %11055 = vtanh.f32 %v4844_v11  ;;  %v8627_v63 = vmul.f32 -1.442695, %v4844_v11 }
0x1499   :  { %11057 = vpow2.f32 %v8627_v63 }
0x14a1   :  { %v11056_v53 = vpop.eup %11055 }
0x14a2   :  { %4854 = vrot.lane.b32.xlu1 %v11056_v53, %s11495_s11 }
0x14a3   :  { %v11058_v2 = vpop.eup %11057 }
0x14a4   :  { %v4848_v56 = vadd.f32 1.0, %v11058_v2 }
0x14a6   :  { %11059 = vrcp.f32 %v4848_v56 }
0x14b0   :  { %v11060_v5 = vpop.eup %11059 }
0x14b1   :  { %v4852_v8 = vmul.f32 %v11060_v5, %v13355_v40 }
0x1514   :  { %v4855_v6 = vpop.permute.xlu1 %4854 }
0x1515   :  { %v4857_v7 = vmul.f32 %v11060_v5, %v4855_v6 }
0x1517   :  { %4859 = vrot.lane.b32.xlu0 %v4857_v7, %s11497_s7 }
0x1589   :  { %v4860_v9 = vpop.permute.xlu0 %4859 }
0x158a   :  { %v4862_v10 = vadd.f32 %v4860_v9, %v4852_v8 }
0x158c   :  { %11061 = vtanh.f32 %v4862_v10 }
0x1596   :  { %v11062_v12 = vpop.eup %11061 }
0x1597   :  { %4865 = vrot.lane.b32.xlu1 %v11062_v12, %s11495_s11 }
0x1609   :  { %v4866_v13 = vpop.permute.xlu1 %4865 }
0x160a   :  { %v4868_v14 = vmul.f32 %v11060_v5, %v4866_v13  ;;  %v4491_v5 = vadd.f32 %v13400_v58, %v13346_v18 }
0x160c   :  { %4870 = vrot.lane.b32.xlu0 %v4868_v14, %s11497_s7 }
0x167e   :  { %v4871_v15 = vpop.permute.xlu0 %4870 }
0x167f   :  { %4873 = vst.msk [vmem:[#allocation9 + $0x2] sm:$0x3] %vm4770_vm1, %v4871_v15  ;;  %9714 = vmatmul.mubr.msk.f32.vlgmr.msra.gmra.mrb[106].mxu0 %vm318_vm2, %v4871_v15 }
0x1680   :  { %10783 = vmatpush3.bf16.msra.mxu0 %v13311_v16  ;;  %9735 = vmatprep.mubr.msk.f32.mxu0 %vm11493_vm0, %v11494_v1 }
0x1681   :  { %10784 = vmatprep.subr.bf16.mxu0 %v11492_v0 }
0x1684   :  { %10786 = vmatpush3.bf16.msra.mxu0 %v13318_v20 }
0x1685   :  { %10793 = vmatprep.subr.bf16.mxu0 %v11492_v0 }
0x1752   :  { %v4942_v4 = vpop.f32.mrb[106].mxu0 }
0x1753   :  { %v4946_v19 = vadd.f32 %v4942_v4, %v4342_v17  ;;  %v9715_v21 = vpop.f32.mrb[107].mxu0 }
0x1755   :  { %11063 = vtanh.f32 %v4946_v19  ;;  %v8629_v29 = vmul.f32 -1.442695, %v4946_v19 }
0x1757   :  { %11065 = vpow2.f32 %v8629_v29  ;;  %v5385_v29 = vld [vmem:[#allocation22 + $0x58] sm:$0xff] }
0x175f   :  { %v11064_v28 = vpop.eup %11063 }
0x1760   :  { %4956 = vrot.lane.b32.xlu1 %v11064_v28, %s11495_s11  ;;  %v5384_v28 = vld [vmem:[#allocation22 + $0x48] sm:$0xfe] }
0x1761   :  { %v11066_v30 = vpop.eup %11065 }
0x1762   :  { %v4950_v31 = vadd.f32 1.0, %v11066_v30  ;;  %v5386_v30 = vld [vmem:[#allocation22 + $0x68] sm:$0xff] }
0x1764   :  { %11067 = vrcp.f32 %v4950_v31  ;;  %v5394_v31 = vrot.slane %v5384_v28, 1 }
0x176e   :  { %v11068_v32 = vpop.eup %11067 }
0x176f   :  { %v4954_v35 = vmul.f32 %v11068_v32, %v4862_v10 }
0x17d2   :  { %v4957_v33 = vpop.permute.xlu1 %4956 }
0x17d3   :  { %v4959_v34 = vmul.f32 %v11068_v32, %v4957_v33  ;;  %v5397_v33 = vrot.slane %v5386_v30, 1  ;;  %v4641_v30 = vadd.f32 %v13404_v59, %v13346_v18 }
0x17d5   :  { %4961 = vrot.lane.b32.xlu0 %v4959_v34, %s11497_s7  ;;  %v5387_v34 = vld [vmem:[#allocation22 + $0x78] sm:$0xff] }
0x1847   :  { %v4962_v36 = vpop.permute.xlu0 %4961 }
0x1848   :  { %v4964_v37 = vadd.f32 %v4962_v36, %v4954_v35  ;;  %v5388_v35 = vld [vmem:[#allocation22 + $0x88] sm:$0x1] }
0x184a   :  { %11069 = vtanh.f32 %v4964_v37 }
0x1854   :  { %v11070_v38 = vpop.eup %11069 }
0x1855   :  { %4967 = vrot.lane.b32.xlu1 %v11070_v38, %s11495_s11  ;;  %v5399_v38 = vrot.slane %v5387_v34, 1 }
0x18c7   :  { %v4968_v39 = vpop.permute.xlu1 %4967 }
0x18c8   :  { %v4970_v42 = vmul.f32 %v11068_v32, %v4968_v39  ;;  %v5395_v32 = vrot.slane %v5385_v29, 1  ;;  %v5401_v39 = vrot.slane %v5388_v35, 1 }
0x18ca   :  { %4972 = vrot.lane.b32.xlu0 %v4970_v42, %s11497_s7  ;;  %v5396_v36 = vsel %vm3188_vm12, %v5394_v31, %v5395_v32 }
0x193c   :  { %v4973_v40 = vpop.permute.xlu0 %4972 }
0x193d   :  { %4975 = vst.msk [vmem:[#allocation9 + $0x4] sm:$0x3] %vm4770_vm1, %v4973_v40  ;;  %9725 = vmatmul.mubr.msk.f32.vlgmr.msra.gmra.mrb[112].mxu1 %vm318_vm2, %v4973_v40  ;;  %v5400_v40 = vsel %vm3188_vm12, %v5397_v33, %v5399_v38 }
0x193e   :  { %10789 = vmatpush3.bf16.msra.mxu1 %v13311_v16  ;;  %9746 = vmatprep.mubr.msk.f32.mxu1 %vm11493_vm0, %v11494_v1 }
0x193f   :  { %10790 = vmatprep.subr.bf16.mxu1 %v11492_v0 }
0x1942   :  { %10792 = vmatpush3.bf16.msra.mxu1 %v13318_v20 }
0x1943   :  { %10799 = vmatprep.subr.bf16.mxu1 %v11492_v0 }
0x1a10   :  { %v5044_v46 = vpop.f32.mrb[112].mxu1 }
0x1a11   :  { %v5048_v47 = vadd.f32 %v5044_v46, %v4417_v43  ;;  %v9726_v41 = vpop.f32.mrb[113].mxu1  ;;  %v5402_v43 = vsel %vm3188_vm12, %v5399_v38, %v5401_v39 }
0x1a12   :  { %v4566_v41 = vadd.f32 %v13340_v26, %v13346_v18 }
0x1a13   :  { %11071 = vtanh.f32 %v5048_v47  ;;  %v8631_v44 = vmul.f32 -1.442695, %v5048_v47  ;;  %v13467_v47 = vpack.c.bf16 %v5402_v43, %v5400_v40 }
0x1a15   :  { %11073 = vpow2.f32 %v8631_v44 }
0x1a1d   :  { %v11072_v50 = vpop.eup %11071 }
0x1a1e   :  { %5058 = vrot.lane.b32.xlu1 %v11072_v50, %s11495_s11 }
0x1a1f   :  { %v11074_v3 = vpop.eup %11073 }
0x1a20   :  { %v5052_v51 = vadd.f32 1.0, %v11074_v3 }
0x1a22   :  { %11075 = vrcp.f32 %v5052_v51  ;;  %v13485_v51 = vrot.slane %v13338_v23, %v12253_v62 }
0x1a24   :  { %v4568_v34 = vadd.f32 %v13342_v27, %v13485_v51 }
0x1a2c   :  { %v11076_v54 = vpop.eup %11075 }
0x1a2d   :  { %v5056_v11 = vmul.f32 %v11076_v54, %v4964_v37  ;;  %v5398_v37 = vsel %vm3188_vm12, %v5395_v32, %v5397_v33 }
0x1a2e   :  { %v13460_v42 = vpack.c.bf16 %v5398_v37, %v5396_v36 }
0x1a90   :  { %v5059_v49 = vpop.permute.xlu1 %5058 }
0x1a91   :  { %v5061_v57 = vmul.f32 %v11076_v54, %v5059_v49 }
0x1a93   :  { %5063 = vrot.lane.b32.xlu0 %v5061_v57, %s11497_s7 }
0x1b05   :  { %v5064_v61 = vpop.permute.xlu0 %5063 }
0x1b06   :  { %v5066_v24 = vadd.f32 %v5064_v61, %v5056_v11 }
0x1b08   :  { %11077 = vtanh.f32 %v5066_v24 }
0x1b12   :  { %v11078_v53 = vpop.eup %11077 }
0x1b13   :  { %5069 = vrot.lane.b32.xlu1 %v11078_v53, %s11495_s11 }
0x1b85   :  { %v5070_v63 = vpop.permute.xlu1 %5069 }
0x1b86   :  { %v5072_v2 = vmul.f32 %v11076_v54, %v5070_v63  ;;  %v4643_v54 = vadd.f32 %v13406_v60, %v13485_v51 }
0x1b88   :  { %5074 = vrot.lane.b32.xlu0 %v5072_v2, %s11497_s7 }
0x1bfa   :  { %v5075_v56 = vpop.permute.xlu0 %5074 }
0x1bfb   :  { %5077 = vst.msk [vmem:[#allocation9 + $0x6] sm:$0x3] %vm4770_vm1, %v5075_v56  ;;  %9736 = vmatmul.mubr.msk.f32.vlgmr.msra.gmra.mrb[108].mxu0 %vm318_vm2, %v5075_v56 }
0x1bfc   :  { %10795 = vmatpush3.bf16.msra.mxu0 %v13311_v16  ;;  %9757 = vmatprep.mubr.msk.f32.mxu0 %vm11493_vm0, %v11494_v1 }
0x1bfd   :  { %10796 = vmatprep.subr.bf16.mxu0 %v11492_v0 }
0x1c00   :  { %10798 = vmatpush3.bf16.msra.mxu0 %v13318_v20 }
0x1c01   :  { %10805 = vmatprep.subr.bf16.mxu0 %v11492_v0 }
0x1cce   :  { %v5146_v6 = vpop.f32.mrb[108].mxu0 }
0x1ccf   :  { %v5150_v7 = vadd.f32 %v5146_v6, %v4491_v5  ;;  %v9737_v8 = vpop.f32.mrb[109].mxu0 }
0x1cd1   :  { %11079 = vtanh.f32 %v5150_v7  ;;  %v8633_v16 = vmul.f32 -1.442695, %v5150_v7 }
0x1cd3   :  { %11081 = vpow2.f32 %v8633_v16 }
0x1cdb   :  { %v11080_v9 = vpop.eup %11079 }
0x1cdc   :  { %5160 = vrot.lane.b32.xlu1 %v11080_v9, %s11495_s11 }
0x1cdd   :  { %v11082_v10 = vpop.eup %11081 }
0x1cde   :  { %v5154_v12 = vadd.f32 1.0, %v11082_v10 }
0x1ce0   :  { %11083 = vrcp.f32 %v5154_v12 }
0x1cea   :  { %v11084_v13 = vpop.eup %11083 }
0x1ceb   :  { %v5158_v15 = vmul.f32 %v11084_v13, %v5066_v24 }
0x1d4e   :  { %v5161_v14 = vpop.permute.xlu1 %5160 }
0x1d4f   :  { %v5163_v20 = vmul.f32 %v11084_v13, %v5161_v14 }
0x1d51   :  { %5165 = vrot.lane.b32.xlu0 %v5163_v20, %s11497_s7 }
0x1dc3   :  { %v5166_v17 = vpop.permute.xlu0 %5165 }
0x1dc4   :  { %v13453_v58 = vadd.f32 %v5166_v17, %v5158_v15 }
0x1dc6   :  { %11085 = vtanh.f32 %v13453_v58 }
0x1dd0   :  { %v11086_v4 = vpop.eup %11085 }
0x1dd1   :  { %5171 = vrot.lane.b32.xlu1 %v11086_v4, %s11495_s11 }
0x1e43   :  { %v5172_v19 = vpop.permute.xlu1 %5171 }
0x1e44   :  { %v5174_v21 = vmul.f32 %v11084_v13, %v5172_v19 }
0x1e46   :  { %5176 = vrot.lane.b32.xlu0 %v5174_v21, %s11497_s7 }
0x1eb8   :  { %v5177_v46 = vpop.permute.xlu0 %5176 }
0x1eb9   :  { %5179 = vst.msk [vmem:[#allocation9 + $0x8] sm:$0x3] %vm4770_vm1, %v5177_v46  ;;  %9747 = vmatmul.mubr.msk.f32.vlgmr.msra.gmra.mrb[114].mxu1 %vm318_vm2, %v5177_v46 }
0x1eba   :  { %10801 = vmatpush3.bf16.msra.mxu1 %v13460_v42  ;;  %9768 = vmatprep.mubr.msk.f32.mxu1 %vm11493_vm0, %v11494_v1 }
0x1ebb   :  { %10802 = vmatprep.subr.bf16.mxu1 %v11492_v0 }
0x1ebe   :  { %10804 = vmatpush3.bf16.msra.mxu1 %v13467_v47 }
0x1ebf   :  { %10811 = vmatprep.subr.bf16.mxu1 %v11492_v0 }
0x1ec1   :  { %9769 = vmatmul.mubr.f32.vlgmr.msra.gmra.mrb[116].mxu1 %v11494_v1 }
0x1ec2   :  { %10813 = vmatpush3.bf16.msra.mxu1 %v13460_v42  ;;  %9790 = vmatprep.mubr.msk.f32.mxu1 %vm11493_vm0, %v11494_v1 }
0x1ec3   :  { %10814 = vmatprep.subr.bf16.mxu1 %v11492_v0 }
0x1ec6   :  { %10816 = vmatpush3.bf16.msra.mxu1 %v13467_v47 }
0x1ec7   :  { %10823 = vmatprep.subr.bf16.mxu1 %v11492_v0 }
0x1f8c   :  { %v5248_v50 = vpop.f32.mrb[114].mxu1 }
0x1f8d   :  { %v5252_v44 = vadd.f32 %v5248_v50, %v4566_v41  ;;  %v9748_v3 = vpop.f32.mrb[115].mxu1 }
0x1f8f   :  { %11087 = vtanh.f32 %v5252_v44  ;;  %v8635_v26 = vmul.f32 -1.442695, %v5252_v44 }
0x1f94   :  { %v5473_v49 = vpop.f32.mrb[116].mxu1 }
0x1f95   :  { %v5477_v57 = vadd.f32 %v5473_v49, %v4643_v54  ;;  %v9770_v11 = vpop.f32.mrb[117].mxu1 }
0x1f97   :  { %11089 = vtanh.f32 %v5477_v57  ;;  %v8638_v53 = vmul.f32 -1.442695, %v5477_v57  ;;  %v4493_v57 = vadd.f32 %v13402_v48, %v13485_v51 }
0x1f98   :  { %11091 = vpow2.f32 %v8635_v26 }
0x1f99   :  { %v11088_v61 = vpop.eup %11087  ;;  %11093 = vpow2.f32 %v8638_v53 }
0x1f9a   :  { %5262 = vrot.lane.b32.xlu1 %v11088_v61, %s11495_s11 }
0x1fa1   :  { %v11090_v24 = vpop.eup %11089 }
0x1fa2   :  { %5487 = vrot.lane.b32.xlu0 %v11090_v24, %s11495_s11  ;;  %v11092_v63 = vpop.eup %11091 }
0x1fa3   :  { %v5256_v23 = vadd.f32 1.0, %v11092_v63  ;;  %v11094_v2 = vpop.eup %11093 }
0x1fa4   :  { %v5481_v56 = vadd.f32 1.0, %v11094_v2 }
0x1fa5   :  { %11095 = vrcp.f32 %v5256_v23 }
0x1fa6   :  { %11097 = vrcp.f32 %v5481_v56 }
0x1faf   :  { %v11096_v60 = vpop.eup %11095 }
0x1fb0   :  { %v11098_v7 = vpop.eup %11097  ;;  %v5260_v16 = vmul.f32 %v11096_v60, %v13453_v58 }
0x1fb1   :  { %v5485_v13 = vmul.f32 0.0, %v11098_v7 }
0x200c   :  { %v5263_v5 = vpop.permute.xlu1 %5262 }
0x200d   :  { %v5265_v6 = vmul.f32 %v11096_v60, %v5263_v5 }
0x200f   :  { %5267 = vrot.lane.b32.xlu1 %v5265_v6, %s11497_s7 }
0x2014   :  { %v5488_v8 = vpop.permute.xlu0 %5487 }
0x2015   :  { %v5490_v9 = vmul.f32 %v11098_v7, %v5488_v8 }
0x2017   :  { %5492 = vrot.lane.b32.xlu0 %v5490_v9, %s11497_s7 }
0x2081   :  { %v5268_v10 = vpop.permute.xlu1 %5267 }
0x2082   :  { %v13494_v12 = vadd.f32 %v5268_v10, %v5260_v16  ;;  %v4419_v10 = vadd.f32 %v13336_v25, %v13485_v51 }
0x2084   :  { %11099 = vtanh.f32 %v13494_v12 }
0x2089   :  { %v5493_v14 = vpop.permute.xlu0 %5492 }
0x208a   :  { %v5495_v20 = vadd.f32 %v5493_v14, %v5485_v13 }
0x208c   :  { %11101 = vtanh.f32 %v5495_v20 }
0x208e   :  { %v11100_v15 = vpop.eup %11099 }
0x208f   :  { %5273 = vrot.lane.b32.xlu1 %v11100_v15, %s11495_s11 }
0x2096   :  { %v11102_v17 = vpop.eup %11101 }
0x2097   :  { %5498 = vrot.lane.b32.xlu0 %v11102_v17, %s11495_s11 }
0x2101   :  { %v5274_v4 = vpop.permute.xlu1 %5273 }
0x2102   :  { %v5276_v19 = vmul.f32 %v11096_v60, %v5274_v4 }
0x2104   :  { %5278 = vrot.lane.b32.xlu1 %v5276_v19, %s11497_s7 }
0x2109   :  { %v5499_v58 = vpop.permute.xlu0 %5498 }
0x210a   :  { %v5501_v21 = vmul.f32 %v11098_v7, %v5499_v58 }
0x210c   :  { %5503 = vrot.lane.b32.xlu0 %v5501_v21, %s11497_s7 }
0x2176   :  { %v5279_v28 = vpop.permute.xlu1 %5278 }
0x2177   :  { %5281 = vst.msk [vmem:[#allocation9 + $0xa] sm:$0x3] %vm4770_vm1, %v5279_v28  ;;  %9758 = vmatmul.mubr.msk.f32.vlgmr.msra.gmra.mrb[110].mxu0 %vm318_vm2, %v5279_v28 }
0x2178   :  { %10807 = vmatpush3.bf16.msra.mxu0 %v13460_v42  ;;  %9779 = vmatprep.mubr.msk.f32.mxu0 %vm11493_vm0, %v11494_v1 }
0x2179   :  { %10808 = vmatprep.subr.bf16.mxu0 %v11492_v0 }
0x217c   :  { %10810 = vmatpush3.bf16.msra.mxu0 %v13467_v47 }
0x217d   :  { %10817 = vmatprep.subr.bf16.mxu0 %v11492_v0 }
0x217e   :  { %v5504_v29 = vpop.permute.xlu0 %5503 }
0x217f   :  { %5506 = vst.msk [vmem:[#allocation10 + $0xc] sm:$0x3] %vm4770_vm1, %v5504_v29  ;;  %9780 = vmatmul.mubr.msk.f32.vlgmr.msra.gmra.mrb[112].mxu0 %vm318_vm2, %v5504_v29 }
0x2180   :  { %10819 = vmatpush3.bf16.msra.mxu0 %v13460_v42  ;;  %9801 = vmatprep.mubr.msk.f32.mxu0 %vm11493_vm0, %v11494_v1 }
0x2181   :  { %10820 = vmatprep.subr.bf16.mxu0 %v11492_v0 }
0x2184   :  { %10822 = vmatpush3.bf16.msra.mxu0 %v13467_v47 }
0x2185   :  { %10829 = vmatprep.subr.bf16.mxu0 %v11492_v0 }
0x224a   :  { %v5350_v31 = vpop.f32.mrb[110].mxu0 }
0x224b   :  { %v13519_v32 = vadd.f32 %v5350_v31, %v4641_v30  ;;  %v9759_v33 = vpop.f32.mrb[111].mxu0 }
0x2252   :  { %v5575_v35 = vpop.f32.mrb[112].mxu0 }
0x2253   :  { %v5579_v36 = vadd.f32 %v5575_v35, %v4568_v34  ;;  %v9781_v37 = vpop.f32.mrb[113].mxu0 }
0x2255   :  { %11103 = vtanh.f32 %v5579_v36  ;;  %v8640_v39 = vmul.f32 -1.442695, %v5579_v36  ;;  %v4344_v36 = vadd.f32 %v13398_v55, %v13485_v51 }
0x2257   :  { %11105 = vpow2.f32 %v8640_v39 }
0x225f   :  { %v11104_v38 = vpop.eup %11103 }
0x2260   :  { %5589 = vrot.lane.b32.xlu1 %v11104_v38, %s11495_s11 }
0x2261   :  { %v11106_v40 = vpop.eup %11105 }
0x2262   :  { %v5583_v43 = vadd.f32 1.0, %v11106_v40 }
0x2264   :  { %11107 = vrcp.f32 %v5583_v43 }
0x226e   :  { %v11108_v18 = vpop.eup %11107 }
0x226f   :  { %v5587_v41 = vmul.f32 %v11108_v18, %v5495_v20 }
0x22d2   :  { %v5590_v59 = vpop.permute.xlu1 %5589 }
0x22d3   :  { %v5592_v46 = vmul.f32 %v11108_v18, %v5590_v59 }
0x22d5   :  { %5594 = vrot.lane.b32.xlu0 %v5592_v46, %s11497_s7 }
0x2347   :  { %v5595_v50 = vpop.permute.xlu0 %5594 }
0x2348   :  { %v5597_v27 = vadd.f32 %v5595_v50, %v5587_v41 }
0x234a   :  { %11109 = vtanh.f32 %v5597_v27 }
0x2354   :  { %v11110_v44 = vpop.eup %11109 }
0x2355   :  { %5600 = vrot.lane.b32.xlu1 %v11110_v44, %s11495_s11 }
0x23c7   :  { %v5601_v3 = vpop.permute.xlu1 %5600 }
0x23c8   :  { %v5603_v54 = vmul.f32 %v11108_v18, %v5601_v3 }
0x23ca   :  { %5605 = vrot.lane.b32.xlu0 %v5603_v54, %s11497_s7 }
0x243c   :  { %v5606_v49 = vpop.permute.xlu0 %5605 }
0x243d   :  { %5608 = vst.msk [vmem:[#allocation10 + $0xa] sm:$0x3] %vm4770_vm1, %v5606_v49  ;;  %9791 = vmatmul.mubr.msk.f32.vlgmr.msra.gmra.mrb[118].mxu1 %vm318_vm2, %v5606_v49  ;;  %v4269_v49 = vadd.f32 %v13388_v45, %v13485_v51 }
0x243e   :  { %10825 = vmatpush3.bf16.msra.mxu1 %v13460_v42  ;;  %9812 = vmatprep.mubr.msk.f32.mxu1 %vm11493_vm0, %v11494_v1 }
0x243f   :  { %10826 = vmatprep.subr.bf16.mxu1 %v11492_v0 }
0x2442   :  { %10828 = vmatpush3.bf16.msra.mxu1 %v13467_v47 }
0x2443   :  { %10835 = vmatprep.subr.bf16.mxu1 %v11492_v0 }
0x2510   :  { %v5677_v11 = vpop.f32.mrb[118].mxu1 }
0x2511   :  { %v5681_v61 = vadd.f32 %v5677_v11, %v4493_v57  ;;  %v9792_v24 = vpop.f32.mrb[119].mxu1 }
0x2513   :  { %11111 = vtanh.f32 %v5681_v61  ;;  %v8642_v53 = vmul.f32 -1.442695, %v5681_v61 }
0x2515   :  { %11113 = vpow2.f32 %v8642_v53 }
0x251d   :  { %v11112_v26 = vpop.eup %11111 }
0x251e   :  { %5691 = vrot.lane.b32.xlu1 %v11112_v26, %s11495_s11 }
0x251f   :  { %v11114_v63 = vpop.eup %11113 }
0x2520   :  { %v5685_v23 = vadd.f32 1.0, %v11114_v63 }
0x2522   :  { %11115 = vrcp.f32 %v5685_v23 }
0x252c   :  { %v11116_v2 = vpop.eup %11115 }
0x252d   :  { %v5689_v5 = vmul.f32 %v11116_v2, %v5597_v27 }
0x2590   :  { %v5692_v56 = vpop.permute.xlu1 %5691 }
0x2591   :  { %v5694_v60 = vmul.f32 %v11116_v2, %v5692_v56 }
0x2593   :  { %5696 = vrot.lane.b32.xlu0 %v5694_v60, %s11497_s7 }
0x2605   :  { %v5697_v6 = vpop.permute.xlu0 %5696 }
0x2606   :  { %v5699_v48 = vadd.f32 %v5697_v6, %v5689_v5 }
0x2608   :  { %11117 = vtanh.f32 %v5699_v48 }
0x2612   :  { %v11118_v7 = vpop.eup %11117 }
0x2613   :  { %5702 = vrot.lane.b32.xlu1 %v11118_v7, %s11495_s11 }
0x2685   :  { %v5703_v8 = vpop.permute.xlu1 %5702 }
0x2686   :  { %v5705_v9 = vmul.f32 %v11116_v2, %v5703_v8 }
0x2688   :  { %5707 = vrot.lane.b32.xlu0 %v5705_v9, %s11497_s7  ;;  %v8637_v9 = vmul.f32 -1.442695, %v13519_v32 }
0x26fa   :  { %v5708_v16 = vpop.permute.xlu0 %5707 }
0x26fb   :  { %5710 = vst.msk [vmem:[#allocation10 + $0x8] sm:$0x3] %vm4770_vm1, %v5708_v16  ;;  %9802 = vmatmul.mubr.msk.f32.vlgmr.msra.gmra.mrb[114].mxu0 %vm318_vm2, %v5708_v16 }
0x26fc   :  { %10831 = vmatpush3.bf16.msra.mxu0 %v13460_v42  ;;  %9823 = vmatprep.mubr.msk.f32.mxu0 %vm11493_vm0, %v11494_v1 }
0x26fd   :  { %10832 = vmatprep.subr.bf16.mxu0 %v11492_v0 }
0x2700   :  { %10834 = vmatpush3.bf16.msra.mxu0 %v13467_v47 }
0x27ce   :  { %v5779_v13 = vpop.f32.mrb[114].mxu0 }
0x27cf   :  { %v5783_v14 = vadd.f32 %v5779_v13, %v4419_v10  ;;  %v9803_v20 = vpop.f32.mrb[115].mxu0 }
0x27d1   :  { %11119 = vtanh.f32 %v5783_v14  ;;  %v8644_v17 = vmul.f32 -1.442695, %v5783_v14 }
0x27d3   :  { %11121 = vpow2.f32 %v8644_v17 }
0x27db   :  { %v11120_v15 = vpop.eup %11119 }
0x27dc   :  { %5793 = vrot.lane.b32.xlu1 %v11120_v15, %s11495_s11 }
0x27dd   :  { %v11122_v4 = vpop.eup %11121 }
0x27de   :  { %v5787_v19 = vadd.f32 1.0, %v11122_v4 }
0x27e0   :  { %11123 = vrcp.f32 %v5787_v19 }
0x27ea   :  { %v11124_v58 = vpop.eup %11123 }
0x27eb   :  { %v5791_v29 = vmul.f32 %v11124_v58, %v5699_v48 }
0x284e   :  { %v5794_v21 = vpop.permute.xlu1 %5793 }
0x284f   :  { %v5796_v28 = vmul.f32 %v11124_v58, %v5794_v21 }
0x2851   :  { %5798 = vrot.lane.b32.xlu0 %v5796_v28, %s11497_s7 }
0x28c3   :  { %v5799_v30 = vpop.permute.xlu0 %5798 }
0x28c4   :  { %v5801_v25 = vadd.f32 %v5799_v30, %v5791_v29 }
0x28c6   :  { %11125 = vtanh.f32 %v5801_v25 }
0x28d0   :  { %v11126_v31 = vpop.eup %11125 }
0x28d1   :  { %5804 = vrot.lane.b32.xlu1 %v11126_v31, %s11495_s11 }
0x2943   :  { %v5805_v33 = vpop.permute.xlu1 %5804 }
0x2944   :  { %v5807_v34 = vmul.f32 %v11124_v58, %v5805_v33  ;;  %v4194_v58 = vadd.f32 %v13332_v22, %v13485_v51 }
0x2946   :  { %5809 = vrot.lane.b32.xlu0 %v5807_v34, %s11497_s7 }
0x29b8   :  { %v5810_v35 = vpop.permute.xlu0 %5809 }
0x29b9   :  { %5812 = vst.msk [vmem:[#allocation10 + $0x6] sm:$0x3] %vm4770_vm1, %v5810_v35  ;;  %9813 = vmatmul.mubr.msk.f32.vlgmr.msra.gmra.mrb[120].mxu1 %vm318_vm2, %v5810_v35 }
0x29ba   :  { %10837 = vmatpush3.bf16.msra.mxu1 %v13460_v42  ;;  %9834 = vmatprep.mubr.msk.f32.mxu1 %vm11493_vm0, %v11494_v1 }
0x29bb   :  { %10838 = vmatprep.subr.bf16.mxu1 %v11492_v0 }
0x29be   :  { %10840 = vmatpush3.bf16.msra.mxu1 %v13467_v47 }
0x2a8c   :  { %v5881_v37 = vpop.f32.mrb[120].mxu1 }
0x2a8d   :  { %v5885_v38 = vadd.f32 %v5881_v37, %v4344_v36  ;;  %v9814_v39 = vpop.f32.mrb[121].mxu1 }
0x2a8f   :  { %11127 = vtanh.f32 %v5885_v38  ;;  %v8646_v43 = vmul.f32 -1.442695, %v5885_v38 }
0x2a91   :  { %11129 = vpow2.f32 %v8646_v43  ;;  %v6127_v43 = vld [vmem:[#allocation24 + $0x20] sm:$0xff] }
0x2a99   :  { %v11128_v40 = vpop.eup %11127 }
0x2a9a   :  { %5895 = vrot.lane.b32.xlu1 %v11128_v40, %s11495_s11 }
0x2a9b   :  { %v11130_v42 = vpop.eup %11129 }
0x2a9c   :  { %v5889_v18 = vadd.f32 1.0, %v11130_v42  ;;  %v6128_v42 = vld [vmem:[#allocation24 + $0x28] sm:$0xff] }
0x2a9e   :  { %11131 = vrcp.f32 %v5889_v18  ;;  %v10841_v18 = vpack.c.bf16 %v6128_v42, %v6127_v43  ;;  %v6445_v43 = vld [vmem:[#allocation22 + $0xf0] sm:$0xff]  ;;  %v6446_v42 = vld [vmem:[#allocation22 + $0x100] sm:$0x3] }
0x2aa0   :  { %10842 = vmatprep.subr.bf16.mxu0 %v10841_v18 }
0x2aa8   :  { %v11132_v59 = vpop.eup %11131 }
0x2aa9   :  { %v5893_v47 = vmul.f32 %v11132_v59, %v5801_v25 }
0x2b0c   :  { %v5896_v46 = vpop.permute.xlu1 %5895 }
0x2b0d   :  { %v5898_v41 = vmul.f32 %v11132_v59, %v5896_v46  ;;  %v6130_v46 = vld [vmem:[#allocation24 + $0x38] sm:$0xff] }
0x2b0f   :  { %5900 = vrot.lane.b32.xlu0 %v5898_v41, %s11497_s7 }
0x2b81   :  { %v5901_v50 = vpop.permute.xlu0 %5900 }
0x2b82   :  { %v5903_v55 = vadd.f32 %v5901_v50, %v5893_v47  ;;  %v6121_v47 = vld [vmem:[#allocation24] sm:$0xff]  ;;  %v6122_v50 = vld [vmem:[#allocation24 + $0x8] sm:$0xff] }
0x2b84   :  { %11133 = vtanh.f32 %v5903_v55 }
0x2b8e   :  { %v11134_v27 = vpop.eup %11133 }
0x2b8f   :  { %5906 = vrot.lane.b32.xlu1 %v11134_v27, %s11495_s11 }
0x2c01   :  { %v5907_v44 = vpop.permute.xlu1 %5906 }
0x2c02   :  { %v5909_v3 = vmul.f32 %v11132_v59, %v5907_v44  ;;  %v6129_v59 = vld [vmem:[#allocation24 + $0x30] sm:$0xff] }
0x2c03   :  { %v10845_v41 = vpack.c.bf16 %v6130_v46, %v6129_v59  ;;  %v6459_v59 = vrot.slane %v6446_v42, 2 }
0x2c04   :  { %5911 = vrot.lane.b32.xlu0 %v5909_v3, %s11497_s7  ;;  %v6301_v3 = vld [vmem:[#allocation22 + $0x88] sm:$0xfe] }
0x2c76   :  { %v5912_v54 = vpop.permute.xlu0 %5911 }
0x2c77   :  { %5914 = vst.msk [vmem:[#allocation10 + $0x4] sm:$0x3] %vm4770_vm1, %v5912_v54  ;;  %9824 = vmatmul.mubr.msk.f32.vlgmr.msra.gmra.mrb[116].mxu0 %vm318_vm2, %v5912_v54  ;;  %v6303_v54 = vld [vmem:[#allocation22 + $0x98] sm:$0xff] }
0x2c78   :  { %10844 = vmatpush3.bf16.msra.mxu0 %v10841_v18  ;;  %v6457_v18 = vrot.slane %v6445_v43, 2 }
0x2c79   :  { %10846 = vmatprep.subr.bf16.mxu0 %v10845_v41 }
0x2c7c   :  { %10848 = vmatpush3.bf16.msra.mxu0 %v10845_v41  ;;  %v6460_v41 = vsel %vm3426_vm13, %v6457_v18, %v6459_v59 }
0x2d4a   :  { %v5983_v57 = vpop.f32.mrb[116].mxu0 }
0x2d4b   :  { %v5987_v11 = vadd.f32 %v5983_v57, %v4269_v49  ;;  %v9825_v61 = vpop.f32.mrb[117].mxu0  ;;  %v6305_v49 = vld [vmem:[#allocation22 + $0xa8] sm:$0xff]  ;;  %v6336_v57 = vrot.slane %v6301_v3, 1 }
0x2d4c   :  { %v6341_v61 = vrot.slane %v6305_v49, 1 }
0x2d4d   :  { %11135 = vtanh.f32 %v5987_v11  ;;  %v8648_v26 = vmul.f32 -1.442695, %v5987_v11  ;;  %v6337_v11 = vrot.slane %v6303_v54, 1  ;;  %v6311_v54 = vld [vmem:[#allocation22 + $0xc1] ss:$8 sm:$0x3] }
0x2d4e   :  { %v13638_v49 = vrot.slane %v6311_v54, %v12253_v62 }
0x2d4f   :  { %11137 = vpow2.f32 %v8648_v26  ;;  %v6302_v26 = vld [vmem:[#allocation22 + $0x90] sm:$0xff] }
0x2d57   :  { %v11136_v24 = vpop.eup %11135 }
0x2d58   :  { %5997 = vrot.lane.b32.xlu1 %v11136_v24, %s11495_s11  ;;  %v6300_v24 = vld [vmem:[#allocation22 + $0x80] sm:$0xfe] }
0x2d59   :  { %v11138_v53 = vpop.eup %11137 }
0x2d5a   :  { %v5991_v63 = vadd.f32 1.0, %v11138_v53  ;;  %v6304_v53 = vld [vmem:[#allocation22 + $0xa0] sm:$0xff] }
0x2d5c   :  { %11139 = vrcp.f32 %v5991_v63  ;;  %v6333_v63 = vrot.slane %v6300_v24, 1  ;;  %v6316_v24 = vrot.slane %v6311_v54, %v12251_v52 }
0x2d66   :  { %v11140_v23 = vpop.eup %11139 }
0x2d67   :  { %v5995_v60 = vmul.f32 %v11140_v23, %v5903_v55  ;;  %v10849_v55 = vpack.c.bf16 %v6122_v50, %v6121_v47  ;;  %v8655_v50 = vld [vmem:[#allocation24 + $0x40] ss:$0 sm:$0xff] }
0x2d69   :  { %10850 = vmatprep.subr.bf16.mxu0 %v10849_v55 }
0x2dca   :  { %v5998_v2 = vpop.permute.xlu1 %5997 }
0x2dcb   :  { %v6000_v56 = vmul.f32 %v11140_v23, %v5998_v2  ;;  %v6338_v2 = vsel %vm3188_vm12, %v6336_v57, %v6337_v11 }
0x2dcd   :  { %6002 = vrot.lane.b32.xlu0 %v6000_v56, %s11497_s7  ;;  %v6342_v56 = vsel %vm3188_vm12, %v6337_v11, %v6341_v61 }
0x2e3f   :  { %v6003_v5 = vpop.permute.xlu0 %6002 }
0x2e40   :  { %v6005_v45 = vadd.f32 %v6003_v5, %v5995_v60  ;;  %v6339_v60 = vrot.slane %v6304_v53, 1  ;;  %v10857_v5 = vpack.c.bf16 %v6342_v56, %v6338_v2 }
0x2e42   :  { %11141 = vtanh.f32 %v6005_v45  ;;  %10858 = vmatprep.subr.bf16.mxu1 %v10857_v5 }
0x2e43   :  { %11143 = vtanh.f32 %v13519_v32 }
0x2e44   :  { %11145 = vpow2.f32 %v8637_v9  ;;  %v6124_v9 = vld [vmem:[#allocation24 + $0x18] sm:$0xff] }
0x2e4c   :  { %v11142_v6 = vpop.eup %11141 }
0x2e4d   :  { %6008 = vrot.lane.b32.xlu1 %v11142_v6, %s11495_s11  ;;  %v11144_v8 = vpop.eup %11143 }
0x2e4e   :  { %v11146_v16 = vpop.eup %11145 }
0x2e4f   :  { %v5358_v10 = vadd.f32 1.0, %v11146_v16 }
0x2e51   :  { %11147 = vrcp.f32 %v5358_v10 }
0x2e5b   :  { %v11148_v14 = vpop.eup %11147 }
0x2e5c   :  { %v5362_v17 = vmul.f32 %v11148_v14, %v13494_v12 }
0x2ebf   :  { %v6009_v48 = vpop.permute.xlu1 %6008 }
0x2ec0   :  { %v6011_v7 = vmul.f32 %v11140_v23, %v6009_v48  ;;  %v6334_v23 = vrot.slane %v6302_v26, 1 }
0x2ec2   :  { %6013 = vrot.lane.b32.xlu0 %v6011_v7, %s11497_s7  ;;  %v6340_v6 = vsel %vm3188_vm12, %v6334_v23, %v6339_v60 }
0x2ec6   :  { %5364 = vrot.lane.b32.xlu0 %v11144_v8, %s11495_s11  ;;  %v6123_v8 = vld [vmem:[#allocation24 + $0x10] sm:$0xff] }
0x2ec7   :  { %v10853_v10 = vpack.c.bf16 %v6124_v9, %v6123_v8 }
0x2f34   :  { %v6014_v13 = vpop.permute.xlu0 %6013 }
0x2f35   :  { %6016 = vst.msk [vmem:[#allocation10 + $0x2] sm:$0x3] %vm4770_vm1, %v6014_v13  ;;  %9835 = vmatmul.mubr.msk.f32.vlgmr.msra.gmra.mrb[122].mxu1 %vm318_vm2, %v6014_v13  ;;  %v6126_v13 = vld [vmem:[#allocation10 + $0x8] sm:$0x3f] }
0x2f36   :  { %6429 = vmatprep.mubr.f32.mxu1 %v11494_v1 }
0x2f38   :  { %v5365_v20 = vpop.permute.xlu0 %5364 }
0x2f39   :  { %v5367_v15 = vmul.f32 %v11148_v14, %v5365_v20 }
0x2f3b   :  { %5369 = vrot.lane.b32.xlu0 %v5367_v15, %s11497_s7  ;;  %v6307_v15 = vld [vmem:[#allocation22 + $0xb8] sm:$0xff] }
0x2fad   :  { %v5370_v4 = vpop.permute.xlu0 %5369 }
0x2fae   :  { %v5372_v32 = vadd.f32 %v5370_v4, %v5362_v17  ;;  %v6309_v17 = vld [vmem:[#allocation22 + $0xc8] sm:$0x1]  ;;  %v6345_v4 = vrot.slane %v6307_v15, 1 }
0x2fb0   :  { %11149 = vtanh.f32 %v5372_v32  ;;  %v6349_v32 = vrot.slane %v6309_v17, 1 }
0x2fba   :  { %v11150_v19 = vpop.eup %11149 }
0x2fbb   :  { %5375 = vrot.lane.b32.xlu0 %v11150_v19, %s11495_s11  ;;  %v6306_v19 = vld [vmem:[#allocation22 + $0xb0] sm:$0xff] }
0x3008   :  { %v6085_v21 = vpop.f32.mrb[122].mxu1 }
0x3009   :  { %v6089_v28 = vadd.f32 %v6085_v21, %v4194_v58  ;;  %v9836_v29 = vpop.f32.mrb[123].mxu1  ;;  %v6308_v58 = vld [vmem:[#allocation22 + $0xc0] sm:$0x1]  ;;  %v6343_v21 = vrot.slane %v6306_v19, 1 }
0x300a   :  { %v6346_v29 = vsel %vm3188_vm12, %v6341_v61, %v6345_v4 }
0x300b   :  { %11151 = vtanh.f32 %v6089_v28  ;;  %v8650_v12 = vmul.f32 -1.442695, %v6089_v28  ;;  %v6347_v28 = vrot.slane %v6308_v58, 1 }
0x300d   :  { %11153 = vpow2.f32 %v8650_v12  ;;  %v6348_v12 = vsel %vm3188_vm12, %v6343_v21, %v6347_v28 }
0x3015   :  { %v11152_v30 = vpop.eup %11151 }
0x3016   :  { %6099 = vrot.lane.b32.xlu1 %v11152_v30, %s11495_s11  ;;  %v6350_v30 = vsel %vm3188_vm12, %v6345_v4, %v6349_v32 }
0x3017   :  { %v11154_v33 = vpop.eup %11153 }
0x3018   :  { %v6093_v34 = vadd.f32 1.0, %v11154_v33 }
0x301a   :  { %11155 = vrcp.f32 %v6093_v34  ;;  %v6442_v34 = vld [vmem:[#allocation22 + $0xc0] sm:$0xfc] }
0x3024   :  { %v11156_v35 = vpop.eup %11155 }
0x3025   :  { %v6097_v51 = vmul.f32 %v11156_v35, %v6005_v45  ;;  %v6335_v45 = vsel %vm3188_vm12, %v6333_v63, %v6334_v23 }
0x3026   :  { %v10859_v48 = vpack.c.bf16 %v6340_v6, %v6335_v45 }
0x3028   :  { %10860 = vmatpush1.bf16.msra.mxu1 %v10859_v48 }
0x302d   :  { %v5376_v25 = vpop.permute.xlu0 %5375 }
0x302e   :  { %v5378_v31 = vmul.f32 %v11148_v14, %v5376_v25  ;;  %v6119_v14 = vld [vmem:[#allocation9] sm:$0xff]  ;;  %v10861_v25 = vpack.c.bf16 %v6350_v30, %v6346_v29 }
0x3030   :  { %5380 = vrot.lane.b32.xlu0 %v5378_v31, %s11497_s7  ;;  %v6344_v31 = vsel %vm3188_vm12, %v6339_v60, %v6343_v21  ;;  %10862 = vmatprep.subr.bf16.mxu1 %v10861_v25 }
0x3031   :  { %v10863_v33 = vpack.c.bf16 %v6348_v12, %v6344_v31 }
0x3033   :  { %10864 = vmatpush1.bf16.msra.mxu1 %v10863_v33 }
0x3034   :  { %10865 = vmatprep.subr.bf16.mxu1 %v11492_v0 }
0x3088   :  { %v6100_v36 = vpop.permute.xlu1 %6099 }
0x3089   :  { %v6102_v37 = vmul.f32 %v11156_v35, %v6100_v36  ;;  %v6444_v36 = vld [vmem:[#allocation22 + $0xe0] sm:$0xff] }
0x308b   :  { %6104 = vrot.lane.b32.xlu1 %v6102_v37, %s11497_s7  ;;  %v6452_v37 = vrot.slane %v6442_v34, 2 }
0x30a2   :  { %v5381_v22 = vpop.permute.xlu0 %5380 }
0x30a3   :  { %5383 = vst.msk [vmem:[#allocation9 + $0xc] sm:$0x3] %vm4770_vm1, %v5381_v22 }
0x30aa   :  { %v6120_v20 = vld [vmem:[#allocation9 + $0x8] sm:$0x3f] }
0x30fd   :  { %v6105_v38 = vpop.permute.xlu1 %6104 }
0x30fe   :  { %v6107_v39 = vadd.f32 %v6105_v38, %v6097_v51  ;;  %v6455_v51 = vrot.slane %v6444_v36, 2 }
0x3100   :  { %11157 = vtanh.f32 %v6107_v39  ;;  %v6458_v46 = vsel %vm3426_vm13, %v6455_v51, %v6457_v18 }
0x3101   :  { %v13617_v47 = vpack.c.bf16 %v6460_v41, %v6458_v46 }
0x310a   :  { %v11158_v40 = vpop.eup %11157 }
0x310b   :  { %6110 = vrot.lane.b32.xlu1 %v11158_v40, %s11495_s11 }
0x317d   :  { %v6111_v27 = vpop.permute.xlu1 %6110 }
0x317e   :  { %v6113_v44 = vmul.f32 %v11156_v35, %v6111_v27  ;;  %v6443_v35 = vld [vmem:[#allocation22 + $0xd0] sm:$0xff] }
0x317f   :  { %v6453_v22 = vrot.slane %v6443_v35, 2 }
0x3180   :  { %6115 = vrot.lane.b32.xlu1 %v6113_v44, %s11497_s7 }
0x3181   :  { %v6454_v38 = vsel %vm3426_vm13, %v6452_v37, %v6453_v22  ;;  %v6456_v39 = vsel %vm3426_vm13, %v6453_v22, %v6455_v51 }
0x3182   :  { %v13611_v40 = vpack.c.bf16 %v6456_v39, %v6454_v38 }
0x31f2   :  { %v6116_v7 = vpop.permute.xlu1 %6115 }
0x31f3   :  { %6118 = vst.msk [vmem:[#allocation10] sm:$0x3] %vm4770_vm1, %v6116_v7 }
0x31fa   :  { %v6125_v16 = vld [vmem:[#allocation10] sm:$0xff] }
0x31fb   :  { %9845 = vmatprep.mubr.msk.f32.mxu0 %vm318_vm2, %v6125_v16 }
0x31fc   :  { %9846 = vmatmul.mubr.msk.f32.vlgmr.msra.gmra.mrb[118].mxu0 %vm318_vm2, %v6126_v13 }
0x31fd   :  { %10852 = vmatpush3.bf16.msra.mxu0 %v10849_v55  ;;  %9856 = vmatprep.mubr.msk.f32.mxu0 %vm318_vm2, %v6119_v14 }
0x31fe   :  { %10854 = vmatprep.subr.bf16.mxu0 %v10853_v10 }
0x3201   :  { %10856 = vmatpush3.bf16.msra.mxu0 %v10853_v10 }
0x3202   :  { %10871 = vmatprep.subr.bf16.mxu0 %v11492_v0 }
0x3204   :  { %9857 = vmatmul.mubr.msk.f32.vlgmr.msra.gmra.mrb[118].mxu0 %vm318_vm2, %v6120_v20 }
0x3205   :  { %9878 = vmatprep.mubr.msk.f32.mxu0 %vm11493_vm0, %v11494_v1  ;;  %10873 = vmatpush3.bf16.msra.mxu0 %v13611_v40 }
0x3206   :  { %10874 = vmatprep.subr.bf16.mxu0 %v11492_v0 }
0x3209   :  { %10876 = vmatpush3.bf16.msra.mxu0 %v13617_v47 }
0x320a   :  { %10883 = vmatprep.subr.bf16.mxu0 %v11492_v0 }
0x32d7   :  { %v9858_v55 = vpop.f32.mrb[118].mxu0 }
0x32d8   :  { %v6284_v27 = vpop.f32.mrb[119].mxu0  ;;  %v6299_v3 = vadd.f32 %v9858_v55, %v8655_v50 }
0x32d9   :  { %v6298_v44 = vadd.f32 %v8655_v50, %v6284_v27 }
0x32db   :  { %8656 = vmatmul.mubr.msk.f32.vlgmr.msra.gmra.mrb[124].mxu1 %vm318_vm2, %v6298_v44 }
0x32dc   :  { %10867 = vmatpush3.bf16.msra.mxu1 %v13611_v40  ;;  %6435 = vmatprep.mubr.f32.mxu1 %v11494_v1 }
0x32dd   :  { %10868 = vmatprep.subr.bf16.mxu1 %v11492_v0 }
0x32df   :  { %8657 = vmatmul.mubr.msk.f32.gmra.mrb[126].mxu1 %vm318_vm2, %v6299_v3 }
0x32e0   :  { %10870 = vmatpush3.bf16.msra.mxu1 %v13617_v47  ;;  %9867 = vmatprep.mubr.msk.f32.mxu1 %vm11493_vm0, %v11494_v1 }
0x32e1   :  { %10877 = vmatprep.subr.bf16.mxu1 %v11492_v0 }
0x32e3   :  { %9868 = vmatmul.mubr.f32.vlgmr.msra.gmra.mrb[128].mxu1 %v11494_v1 }
0x32e4   :  { %10879 = vmatpush3.bf16.msra.mxu1 %v13611_v40  ;;  %9889 = vmatprep.mubr.msk.f32.mxu1 %vm11493_vm0, %v11494_v1 }
0x32e5   :  { %10880 = vmatprep.subr.bf16.mxu1 %v11492_v0 }
0x32e8   :  { %10882 = vmatpush3.bf16.msra.mxu1 %v13617_v47 }
0x32e9   :  { %10889 = vmatprep.subr.bf16.mxu1 %v11492_v0 }
0x33ae   :  { %v6431_v57 = vpop.f32.mrb[124].mxu1 }
0x33af   :  { %v6433_v11 = vpop.f32.mrb[125].mxu1  ;;  %v13648_v23 = vadd.f32 %v6431_v57, %v6316_v24 }
0x33b0   :  { %v13641_v61 = vadd.f32 %v6433_v11, %v13638_v49 }
0x33b2   :  { %v6437_v26 = vpop.f32.mrb[126].mxu1 }
0x33b3   :  { %v13644_v53 = vadd.f32 %v6437_v26, %v6316_v24  ;;  %v13646_v63 = vpop.f32.mrb[127].mxu1 }
0x33b6   :  { %v6531_v2 = vpop.f32.mrb[128].mxu1 }
0x33b7   :  { %v6535_v56 = vadd.f32 %v6531_v2, %v13648_v23  ;;  %v9869_v60 = vpop.f32.mrb[129].mxu1 }
0x33b9   :  { %11159 = vtanh.f32 %v6535_v56  ;;  %v8658_v5 = vmul.f32 -1.442695, %v6535_v56 }
0x33bb   :  { %11161 = vpow2.f32 %v8658_v5 }
0x33c3   :  { %v11160_v62 = vpop.eup %11159 }
0x33c4   :  { %6545 = vrot.lane.b32.xlu1 %v11160_v62, %s11495_s11 }
0x33c5   :  { %v11162_v45 = vpop.eup %11161 }
0x33c6   :  { %v6539_v6 = vadd.f32 1.0, %v11162_v45 }
0x33c8   :  { %11163 = vrcp.f32 %v6539_v6 }
0x33d2   :  { %v11164_v52 = vpop.eup %11163 }
0x33d3   :  { %v6543_v8 = vmul.f32 0.0, %v11164_v52 }
0x3436   :  { %v6546_v48 = vpop.permute.xlu1 %6545 }
0x3437   :  { %v6548_v7 = vmul.f32 %v11164_v52, %v6546_v48 }
0x3439   :  { %6550 = vrot.lane.b32.xlu0 %v6548_v7, %s11497_s7 }
0x34ab   :  { %v6551_v9 = vpop.permute.xlu0 %6550 }
0x34ac   :  { %v6553_v16 = vadd.f32 %v6551_v9, %v6543_v8 }
0x34ae   :  { %11165 = vtanh.f32 %v6553_v16  ;;  %v6649_v31 = vrot.slane %v6553_v16, 6 }
0x34b8   :  { %v11166_v10 = vpop.eup %11165 }
0x34b9   :  { %6556 = vrot.lane.b32.xlu1 %v11166_v10, %s11495_s11 }
0x352b   :  { %v6557_v13 = vpop.permute.xlu1 %6556 }
0x352c   :  { %v6559_v14 = vmul.f32 %v11164_v52, %v6557_v13 }
0x352e   :  { %6561 = vrot.lane.b32.xlu0 %v6559_v14, %s11497_s7 }
0x35a0   :  { %v6562_v20 = vpop.permute.xlu0 %6561 }
0x35a1   :  { %6564 = vst.msk [vmem:[#allocation9] sm:$0x3] %vm4770_vm1, %v6562_v20  ;;  %9879 = vmatmul.mubr.msk.f32.vlgmr.msra.gmra.mrb[120].mxu0 %vm318_vm2, %v6562_v20 }
0x35a2   :  { %10885 = vmatpush3.bf16.msra.mxu0 %v13611_v40  ;;  %9900 = vmatprep.mubr.msk.f32.mxu0 %vm11493_vm0, %v11494_v1 }
0x35a3   :  { %10886 = vmatprep.subr.bf16.mxu0 %v11492_v0 }
0x35a6   :  { %10888 = vmatpush3.bf16.msra.mxu0 %v13617_v47 }
0x35a7   :  { %10895 = vmatprep.subr.bf16.mxu0 %v11492_v0 }
0x3674   :  { %v6633_v15 = vpop.f32.mrb[120].mxu0 }
0x3675   :  { %v6638_v17 = vrot.slane %v6633_v15, 6  ;;  %v9880_v4 = vpop.f32.mrb[121].mxu0 }
0x3677   :  { %v6640_v32 = vadd.f32 %v6638_v17, %v13648_v23 }
0x3679   :  { %11167 = vtanh.f32 %v6640_v32  ;;  %v8660_v58 = vmul.f32 -1.442695, %v6640_v32 }
0x367b   :  { %11169 = vpow2.f32 %v8660_v58 }
0x3683   :  { %v11168_v19 = vpop.eup %11167 }
0x3684   :  { %6653 = vrot.lane.b32.xlu1 %v11168_v19, %s11495_s11 }
0x3685   :  { %v11170_v21 = vpop.eup %11169 }
0x3686   :  { %v6644_v28 = vadd.f32 1.0, %v11170_v21 }
0x3688   :  { %11171 = vrcp.f32 %v6644_v28 }
0x3692   :  { %v11172_v29 = vpop.eup %11171 }
0x3693   :  { %v6651_v12 = vmul.f32 %v11172_v29, %v6649_v31 }
0x36f6   :  { %v6654_v30 = vpop.permute.xlu1 %6653 }
0x36f7   :  { %v6656_v25 = vmul.f32 %v11172_v29, %v6654_v30 }
0x36f9   :  { %6658 = vrot.lane.b32.xlu0 %v6656_v25, %s11497_s7 }
0x376b   :  { %v6659_v33 = vpop.permute.xlu0 %6658 }
0x376c   :  { %v6661_v34 = vadd.f32 %v6659_v33, %v6651_v12 }
0x376e   :  { %11173 = vtanh.f32 %v6661_v34  ;;  %v6761_v44 = vrot.slane %v6661_v34, 6 }
0x3778   :  { %v11174_v35 = vpop.eup %11173 }
0x3779   :  { %6664 = vrot.lane.b32.xlu1 %v11174_v35, %s11495_s11 }
0x37eb   :  { %v6665_v36 = vpop.permute.xlu1 %6664 }
0x37ec   :  { %v13667_v37 = vmul.f32 %v11172_v29, %v6665_v36 }
0x37ee   :  { %v6674_v22 = vrot.slane %v13667_v37, 2 }
0x37f0   :  { %6675 = vrot.lane.b32.xlu0 %v6674_v22, %s11497_s7 }
0x3862   :  { %v6676_v51 = vpop.permute.xlu0 %6675 }
0x3863   :  { %9890 = vmatmul.mubr.msk.f32.vlgmr.msra.gmra.mrb[130].mxu1 %vm318_vm2, %v6676_v51 }
0x3864   :  { %10891 = vmatpush3.bf16.msra.mxu1 %v13611_v40  ;;  %9911 = vmatprep.mubr.msk.f32.mxu1 %vm11493_vm0, %v11494_v1 }
0x3865   :  { %10892 = vmatprep.subr.bf16.mxu1 %v11492_v0 }
0x3868   :  { %10894 = vmatpush3.bf16.msra.mxu1 %v13617_v47 }
0x3869   :  { %10901 = vmatprep.subr.bf16.mxu1 %v11492_v0 }
0x3936   :  { %v6745_v38 = vpop.f32.mrb[130].mxu1 }
0x3937   :  { %v6750_v39 = vrot.slane %v6745_v38, 4  ;;  %v9891_v43 = vpop.f32.mrb[131].mxu1  ;;  %v7225_v38 = vld [vmem:[#allocation22 + $0xc8] sm:$0xfc] }
0x3938   :  { %v7227_v43 = vld [vmem:[#allocation22 + $0xe8] sm:$0xff] }
0x3939   :  { %v6752_v42 = vadd.f32 %v6750_v39, %v13648_v23  ;;  %v7226_v39 = vld [vmem:[#allocation22 + $0xd8] sm:$0xff] }
0x393b   :  { %11175 = vtanh.f32 %v6752_v42  ;;  %v8662_v59 = vmul.f32 -1.442695, %v6752_v42  ;;  %v7235_v42 = vrot.slane %v7225_v38, 2 }
0x393d   :  { %11177 = vpow2.f32 %v8662_v59  ;;  %v7238_v59 = vrot.slane %v7227_v43, 2 }
0x3945   :  { %v11176_v18 = vpop.eup %11175 }
0x3946   :  { %6765 = vrot.lane.b32.xlu1 %v11176_v18, %s11495_s11  ;;  %v7236_v18 = vrot.slane %v7226_v39, 2 }
0x3947   :  { %v11178_v46 = vpop.eup %11177 }
0x3948   :  { %v6756_v41 = vadd.f32 1.0, %v11178_v46  ;;  %v7228_v46 = vld [vmem:[#allocation22 + $0xf8] sm:$0xff] }
0x394a   :  { %11179 = vrcp.f32 %v6756_v41  ;;  %v7229_v41 = vld [vmem:[#allocation22 + $0x108] sm:$0x3] }
0x3954   :  { %v11180_v50 = vpop.eup %11179 }
0x3955   :  { %v6763_v3 = vmul.f32 %v11180_v50, %v6761_v44  ;;  %v7242_v44 = vrot.slane %v7229_v41, 2 }
0x39b8   :  { %v6766_v55 = vpop.permute.xlu1 %6765 }
0x39b9   :  { %v6768_v27 = vmul.f32 %v11180_v50, %v6766_v55  ;;  %v7239_v55 = vsel %vm3426_vm13, %v7236_v18, %v7238_v59 }
0x39bb   :  { %6770 = vrot.lane.b32.xlu0 %v6768_v27, %s11497_s7  ;;  %v7240_v27 = vrot.slane %v7228_v46, 2 }
0x3a2d   :  { %v6771_v54 = vpop.permute.xlu0 %6770 }
0x3a2e   :  { %v6773_v57 = vadd.f32 %v6771_v54, %v6763_v3  ;;  %v7241_v54 = vsel %vm3426_vm13, %v7238_v59, %v7240_v27 }
0x3a30   :  { %11181 = vtanh.f32 %v6773_v57  ;;  %v6873_v10 = vrot.slane %v6773_v57, 6  ;;  %v7243_v57 = vsel %vm3426_vm13, %v7240_v27, %v7242_v44 }
0x3a3a   :  { %v11182_v11 = vpop.eup %11181 }
0x3a3b   :  { %6776 = vrot.lane.b32.xlu1 %v11182_v11, %s11495_s11 }
0x3aad   :  { %v6777_v24 = vpop.permute.xlu1 %6776 }
0x3aae   :  { %v13682_v26 = vmul.f32 %v11180_v50, %v6777_v24  ;;  %v7237_v50 = vsel %vm3426_vm13, %v7235_v42, %v7236_v18  ;;  %v13725_v24 = vpack.c.bf16 %v7243_v57, %v7241_v54 }
0x3aaf   :  { %v13718_v3 = vpack.c.bf16 %v7239_v55, %v7237_v50 }
0x3ab0   :  { %v6786_v2 = vrot.slane %v13682_v26, 4 }
0x3ab2   :  { %6787 = vrot.lane.b32.xlu0 %v6786_v2, %s11497_s7 }
0x3b24   :  { %v6788_v56 = vpop.permute.xlu0 %6787 }
0x3b25   :  { %9901 = vmatmul.mubr.msk.f32.vlgmr.msra.gmra.mrb[122].mxu0 %vm318_vm2, %v6788_v56 }
0x3b26   :  { %10897 = vmatpush3.bf16.msra.mxu0 %v13611_v40  ;;  %9922 = vmatprep.mubr.msk.f32.mxu0 %vm11493_vm0, %v11494_v1 }
0x3b27   :  { %10898 = vmatprep.subr.bf16.mxu0 %v11492_v0 }
0x3b2a   :  { %10900 = vmatpush3.bf16.msra.mxu0 %v13617_v47 }
0x3b2b   :  { %10907 = vmatprep.subr.bf16.mxu0 %v11492_v0 }
0x3bf8   :  { %v6857_v60 = vpop.f32.mrb[122].mxu0 }
0x3bf9   :  { %v6862_v62 = vrot.slane %v6857_v60, 2  ;;  %v9902_v5 = vpop.f32.mrb[123].mxu0 }
0x3bfb   :  { %v6864_v45 = vadd.f32 %v6862_v62, %v13648_v23 }
0x3bfd   :  { %11183 = vtanh.f32 %v6864_v45  ;;  %v8664_v52 = vmul.f32 -1.442695, %v6864_v45  ;;  %v13742_v45 = vadd.f32 %v13646_v63, %v13638_v49 }
0x3bff   :  { %11185 = vpow2.f32 %v8664_v52 }
0x3c07   :  { %v11184_v6 = vpop.eup %11183 }
0x3c08   :  { %6877 = vrot.lane.b32.xlu1 %v11184_v6, %s11495_s11 }
0x3c09   :  { %v11186_v48 = vpop.eup %11185 }
0x3c0a   :  { %v6868_v7 = vadd.f32 1.0, %v11186_v48 }
0x3c0c   :  { %11187 = vrcp.f32 %v6868_v7 }
0x3c16   :  { %v11188_v8 = vpop.eup %11187 }
0x3c17   :  { %v6875_v13 = vmul.f32 %v11188_v8, %v6873_v10 }
0x3c7a   :  { %v6878_v9 = vpop.permute.xlu1 %6877 }
0x3c7b   :  { %v6880_v16 = vmul.f32 %v11188_v8, %v6878_v9 }
0x3c7d   :  { %6882 = vrot.lane.b32.xlu0 %v6880_v16, %s11497_s7 }
0x3cef   :  { %v6883_v14 = vpop.permute.xlu0 %6882 }
0x3cf0   :  { %v6885_v20 = vadd.f32 %v6883_v14, %v6875_v13 }
0x3cf2   :  { %11189 = vtanh.f32 %v6885_v20 }
0x3cfc   :  { %v11190_v23 = vpop.eup %11189 }
0x3cfd   :  { %6888 = vrot.lane.b32.xlu1 %v11190_v23, %s11495_s11 }
0x3d6f   :  { %v6889_v15 = vpop.permute.xlu1 %6888 }
0x3d70   :  { %v13697_v17 = vmul.f32 %v11188_v8, %v6889_v15 }
0x3d72   :  { %v6898_v4 = vrot.slane %v13697_v17, 6 }
0x3d74   :  { %6899 = vrot.lane.b32.xlu0 %v6898_v4, %s11497_s7 }
0x3de6   :  { %v6900_v32 = vpop.permute.xlu0 %6899 }
0x3de7   :  { %9912 = vmatmul.mubr.msk.f32.vlgmr.msra.gmra.mrb[132].mxu1 %vm318_vm2, %v6900_v32 }
0x3de8   :  { %10903 = vmatpush3.bf16.msra.mxu1 %v13611_v40  ;;  %9933 = vmatprep.mubr.msk.f32.mxu1 %vm11493_vm0, %v11494_v1 }
0x3de9   :  { %10904 = vmatprep.subr.bf16.mxu1 %v11492_v0 }
0x3dec   :  { %10906 = vmatpush3.bf16.msra.mxu1 %v13617_v47  ;;  %v6982_v47 = vrot.slane %v6885_v20, 6 }
0x3ded   :  { %10913 = vmatprep.subr.bf16.mxu1 %v11492_v0 }
0x3eba   :  { %v6969_v19 = vpop.f32.mrb[132].mxu1 }
0x3ebb   :  { %v6973_v58 = vadd.f32 %v6969_v19, %v13644_v53  ;;  %v9913_v21 = vpop.f32.mrb[133].mxu1 }
0x3ebd   :  { %11191 = vtanh.f32 %v6973_v58  ;;  %v8666_v29 = vmul.f32 -1.442695, %v6973_v58 }
0x3ebf   :  { %11193 = vpow2.f32 %v8666_v29 }
0x3ec7   :  { %v11192_v28 = vpop.eup %11191 }
0x3ec8   :  { %6986 = vrot.lane.b32.xlu1 %v11192_v28, %s11495_s11 }
0x3ec9   :  { %v11194_v40 = vpop.eup %11193 }
0x3eca   :  { %v6977_v30 = vadd.f32 1.0, %v11194_v40 }
0x3ecc   :  { %11195 = vrcp.f32 %v6977_v30 }
0x3ed6   :  { %v11196_v25 = vpop.eup %11195 }
0x3ed7   :  { %v6984_v33 = vmul.f32 %v11196_v25, %v6982_v47 }
0x3f3a   :  { %v6987_v31 = vpop.permute.xlu1 %6986 }
0x3f3b   :  { %v6989_v12 = vmul.f32 %v11196_v25, %v6987_v31 }
0x3f3d   :  { %6991 = vrot.lane.b32.xlu0 %v6989_v12, %s11497_s7 }
0x3faf   :  { %v6992_v34 = vpop.permute.xlu0 %6991 }
0x3fb0   :  { %v13711_v35 = vadd.f32 %v6992_v34, %v6984_v33 }
0x3fb2   :  { %11197 = vtanh.f32 %v13711_v35  ;;  %v7090_v19 = vrot.slane %v13711_v35, 6 }
0x3fbc   :  { %v11198_v36 = vpop.eup %11197 }
0x3fbd   :  { %6997 = vrot.lane.b32.xlu1 %v11198_v36, %s11495_s11 }
0x402f   :  { %v6998_v22 = vpop.permute.xlu1 %6997 }
0x4030   :  { %v7000_v51 = vmul.f32 %v11196_v25, %v6998_v22 }
0x4032   :  { %7002 = vrot.lane.b32.xlu0 %v7000_v51, %s11497_s7 }
0x40a4   :  { %v7003_v11 = vpop.permute.xlu0 %7002 }
0x40a5   :  { %7005 = vst.msk [vmem:[#allocation9 + $0x8] sm:$0x3] %vm4770_vm1, %v7003_v11  ;;  %9923 = vmatmul.mubr.msk.f32.vlgmr.msra.gmra.mrb[124].mxu0 %vm318_vm2, %v7003_v11 }
0x40a6   :  { %10909 = vmatpush3.bf16.msra.mxu0 %v13718_v3  ;;  %9944 = vmatprep.mubr.msk.f32.mxu0 %vm11493_vm0, %v11494_v1 }
0x40a7   :  { %10910 = vmatprep.subr.bf16.mxu0 %v11492_v0 }
0x40aa   :  { %10912 = vmatpush3.bf16.msra.mxu0 %v13725_v24 }
0x40ab   :  { %10919 = vmatprep.subr.bf16.mxu0 %v11492_v0 }
0x40ad   :  { %9945 = vmatmul.mubr.f32.vlgmr.msra.gmra.mrb[126].mxu0 %v11494_v1 }
0x40ae   :  { %10921 = vmatpush3.bf16.msra.mxu0 %v13718_v3  ;;  %9966 = vmatprep.mubr.msk.f32.mxu0 %vm11493_vm0, %v11494_v1 }
0x40af   :  { %10922 = vmatprep.subr.bf16.mxu0 %v11492_v0 }
0x40b2   :  { %10924 = vmatpush3.bf16.msra.mxu0 %v13725_v24 }
0x40b3   :  { %10931 = vmatprep.subr.bf16.mxu0 %v11492_v0 }
0x4178   :  { %v7074_v2 = vpop.f32.mrb[124].mxu0 }
0x4179   :  { %v7079_v56 = vrot.slane %v7074_v2, 6  ;;  %v9924_v60 = vpop.f32.mrb[125].mxu0 }
0x417b   :  { %v7081_v62 = vadd.f32 %v7079_v56, %v13644_v53 }
0x417d   :  { %11199 = vtanh.f32 %v7081_v62  ;;  %v8668_v9 = vmul.f32 -1.442695, %v7081_v62 }
0x4180   :  { %v7314_v5 = vpop.f32.mrb[126].mxu0 }
0x4181   :  { %v7319_v6 = vrot.slane %v7314_v5, 4  ;;  %v9946_v52 = vpop.f32.mrb[127].mxu0 }
0x4183   :  { %v7321_v48 = vadd.f32 %v7319_v6, %v13742_v45 }
0x4185   :  { %11201 = vtanh.f32 %v7321_v48  ;;  %v8671_v16 = vmul.f32 -1.442695, %v7321_v48 }
0x4186   :  { %11203 = vpow2.f32 %v8668_v9 }
0x4187   :  { %v11200_v7 = vpop.eup %11199  ;;  %11205 = vpow2.f32 %v8671_v16 }
0x4188   :  { %7094 = vrot.lane.b32.xlu1 %v11200_v7, %s11495_s11 }
0x418f   :  { %v11202_v8 = vpop.eup %11201 }
0x4190   :  { %7331 = vrot.lane.b32.xlu0 %v11202_v8, %s11495_s11  ;;  %v11204_v10 = vpop.eup %11203 }
0x4191   :  { %v7085_v13 = vadd.f32 1.0, %v11204_v10  ;;  %v11206_v49 = vpop.eup %11205 }
0x4192   :  { %v7325_v63 = vadd.f32 1.0, %v11206_v49 }
0x4193   :  { %11207 = vrcp.f32 %v7085_v13 }
0x4194   :  { %11209 = vrcp.f32 %v7325_v63 }
0x419d   :  { %v11208_v14 = vpop.eup %11207 }
0x419e   :  { %v11210_v15 = vpop.eup %11209  ;;  %v7092_v58 = vmul.f32 %v11208_v14, %v7090_v19 }
0x419f   :  { %v7329_v29 = vmul.f32 0.0, %v11210_v15 }
0x41fa   :  { %v7095_v20 = vpop.permute.xlu1 %7094 }
0x41fb   :  { %v7097_v23 = vmul.f32 %v11208_v14, %v7095_v20 }
0x41fd   :  { %7099 = vrot.lane.b32.xlu1 %v7097_v23, %s11497_s7 }
0x4202   :  { %v7332_v4 = vpop.permute.xlu0 %7331 }
0x4203   :  { %v7334_v32 = vmul.f32 %v11210_v15, %v7332_v4 }
0x4205   :  { %7336 = vrot.lane.b32.xlu0 %v7334_v32, %s11497_s7 }
0x426f   :  { %v7100_v21 = vpop.permute.xlu1 %7099 }
0x4270   :  { %v13750_v28 = vadd.f32 %v7100_v21, %v7092_v58 }
0x4272   :  { %11211 = vtanh.f32 %v13750_v28 }
0x4277   :  { %v7337_v40 = vpop.permute.xlu0 %7336 }
0x4278   :  { %v7339_v30 = vadd.f32 %v7337_v40, %v7329_v29 }
0x427a   :  { %11213 = vtanh.f32 %v7339_v30  ;;  %v7438_v57 = vrot.slane %v7339_v30, 2 }
0x427c   :  { %v11212_v25 = vpop.eup %11211 }
0x427d   :  { %7105 = vrot.lane.b32.xlu1 %v11212_v25, %s11495_s11 }
0x4284   :  { %v11214_v31 = vpop.eup %11213 }
0x4285   :  { %7342 = vrot.lane.b32.xlu0 %v11214_v31, %s11495_s11 }
0x42ef   :  { %v7106_v12 = vpop.permute.xlu1 %7105 }
0x42f0   :  { %v13755_v47 = vmul.f32 %v11208_v14, %v7106_v12 }
0x42f2   :  { %v7114_v33 = vrot.slane %v13755_v47, 2 }
0x42f4   :  { %7115 = vrot.lane.b32.xlu1 %v7114_v33, %s11497_s7 }
0x42f7   :  { %v7343_v34 = vpop.permute.xlu0 %7342 }
0x42f8   :  { %v13759_v35 = vmul.f32 %v11210_v15, %v7343_v34 }
0x42fa   :  { %v7351_v36 = vrot.slane %v13759_v35, 4 }
0x42fc   :  { %7352 = vrot.lane.b32.xlu0 %v7351_v36, %s11497_s7 }
0x4366   :  { %v7116_v22 = vpop.permute.xlu1 %7115 }
0x4367   :  { %9934 = vmatmul.mubr.msk.f32.vlgmr.msra.gmra.mrb[134].mxu1 %vm318_vm2, %v7116_v22 }
0x4368   :  { %10915 = vmatpush3.bf16.msra.mxu1 %v13718_v3  ;;  %9955 = vmatprep.mubr.msk.f32.mxu1 %vm11493_vm0, %v11494_v1 }
0x4369   :  { %10916 = vmatprep.subr.bf16.mxu1 %v11492_v0 }
0x436c   :  { %10918 = vmatpush3.bf16.msra.mxu1 %v13725_v24 }
0x436d   :  { %10925 = vmatprep.subr.bf16.mxu1 %v11492_v0 }
0x436e   :  { %v7353_v51 = vpop.permute.xlu0 %7352 }
0x436f   :  { %9956 = vmatmul.mubr.msk.f32.vlgmr.msra.gmra.mrb[136].mxu1 %vm318_vm2, %v7353_v51 }
0x4370   :  { %10927 = vmatpush3.bf16.msra.mxu1 %v13718_v3  ;;  %9977 = vmatprep.mubr.msk.f32.mxu1 %vm11493_vm0, %v11494_v1 }
0x4371   :  { %10928 = vmatprep.subr.bf16.mxu1 %v11492_v0 }
0x4374   :  { %10930 = vmatpush3.bf16.msra.mxu1 %v13725_v24 }
0x4375   :  { %10937 = vmatprep.subr.bf16.mxu1 %v11492_v0 }
0x443a   :  { %v13777_v38 = vpop.f32.mrb[134].mxu1 }
0x443b   :  { %v9935_v39 = vpop.f32.mrb[135].mxu1 }
0x4442   :  { %v7422_v43 = vpop.f32.mrb[136].mxu1 }
0x4443   :  { %v7427_v42 = vrot.slane %v7422_v43, 6  ;;  %v9957_v18 = vpop.f32.mrb[137].mxu1 }
0x4445   :  { %v7429_v59 = vadd.f32 %v7427_v42, %v13742_v45 }
0x4447   :  { %11215 = vtanh.f32 %v7429_v59  ;;  %v8673_v41 = vmul.f32 -1.442695, %v7429_v59 }
0x4449   :  { %11217 = vpow2.f32 %v8673_v41 }
0x4451   :  { %v11216_v46 = vpop.eup %11215 }
0x4452   :  { %7442 = vrot.lane.b32.xlu1 %v11216_v46, %s11495_s11 }
0x4453   :  { %v11218_v50 = vpop.eup %11217 }
0x4454   :  { %v7433_v55 = vadd.f32 1.0, %v11218_v50 }
0x4456   :  { %11219 = vrcp.f32 %v7433_v55 }
0x4460   :  { %v11220_v27 = vpop.eup %11219 }
0x4461   :  { %v7440_v11 = vmul.f32 %v11220_v27, %v7438_v57 }
0x44c4   :  { %v7443_v44 = vpop.permute.xlu1 %7442 }
0x44c5   :  { %v7445_v54 = vmul.f32 %v11220_v27, %v7443_v44 }
0x44c7   :  { %7447 = vrot.lane.b32.xlu0 %v7445_v54, %s11497_s7 }
0x4539   :  { %v7448_v2 = vpop.permute.xlu0 %7447 }
0x453a   :  { %v7450_v56 = vadd.f32 %v7448_v2, %v7440_v11 }
0x453c   :  { %11221 = vtanh.f32 %v7450_v56  ;;  %v7546_v20 = vrot.slane %v7450_v56, 2 }
0x4546   :  { %v11222_v60 = vpop.eup %11221 }
0x4547   :  { %7453 = vrot.lane.b32.xlu1 %v11222_v60, %s11495_s11 }
0x45b9   :  { %v7454_v62 = vpop.permute.xlu1 %7453 }
0x45ba   :  { %v13783_v5 = vmul.f32 %v11220_v27, %v7454_v62 }
0x45bc   :  { %v7462_v6 = vrot.slane %v13783_v5, 2 }
0x45be   :  { %7463 = vrot.lane.b32.xlu0 %v7462_v6, %s11497_s7 }
0x4630   :  { %v7464_v52 = vpop.permute.xlu0 %7463 }
0x4631   :  { %9967 = vmatmul.mubr.msk.f32.vlgmr.msra.gmra.mrb[128].mxu0 %vm318_vm2, %v7464_v52 }
0x4632   :  { %10933 = vmatpush3.bf16.msra.mxu0 %v13718_v3  ;;  %9988 = vmatprep.mubr.msk.f32.mxu0 %vm11493_vm0, %v11494_v1 }
0x4633   :  { %10934 = vmatprep.subr.bf16.mxu0 %v11492_v0 }
0x4636   :  { %10936 = vmatpush3.bf16.msra.mxu0 %v13725_v24 }
0x4637   :  { %10943 = vmatprep.subr.bf16.mxu0 %v11492_v0 }
0x4704   :  { %v7533_v48 = vpop.f32.mrb[128].mxu0 }
0x4705   :  { %v7537_v7 = vadd.f32 %v7533_v48, %v13742_v45  ;;  %v9968_v8 = vpop.f32.mrb[129].mxu0 }
0x4707   :  { %11223 = vtanh.f32 %v7537_v7  ;;  %v8675_v16 = vmul.f32 -1.442695, %v7537_v7 }
0x4709   :  { %11225 = vpow2.f32 %v8675_v16 }
0x4711   :  { %v11224_v9 = vpop.eup %11223 }
0x4712   :  { %7550 = vrot.lane.b32.xlu1 %v11224_v9, %s11495_s11 }
0x4713   :  { %v11226_v10 = vpop.eup %11225 }
0x4714   :  { %v7541_v13 = vadd.f32 1.0, %v11226_v10 }
0x4716   :  { %11227 = vrcp.f32 %v7541_v13 }
0x4720   :  { %v11228_v49 = vpop.eup %11227 }
0x4721   :  { %v7548_v23 = vmul.f32 %v11228_v49, %v7546_v20 }
0x4784   :  { %v7551_v63 = vpop.permute.xlu1 %7550 }
0x4785   :  { %v7553_v14 = vmul.f32 %v11228_v49, %v7551_v63 }
0x4787   :  { %7555 = vrot.lane.b32.xlu0 %v7553_v14, %s11497_s7 }
0x47f9   :  { %v7556_v15 = vpop.permute.xlu0 %7555 }
0x47fa   :  { %v7558_v4 = vadd.f32 %v7556_v15, %v7548_v23 }
0x47fc   :  { %11229 = vtanh.f32 %v7558_v4  ;;  %v7654_v51 = vrot.slane %v7558_v4, 2 }
0x4806   :  { %v11230_v45 = vpop.eup %11229 }
0x4807   :  { %7561 = vrot.lane.b32.xlu1 %v11230_v45, %s11495_s11 }
0x4879   :  { %v7562_v32 = vpop.permute.xlu1 %7561 }
0x487a   :  { %v7564_v19 = vmul.f32 %v11228_v49, %v7562_v32 }
0x487c   :  { %7566 = vrot.lane.b32.xlu0 %v7564_v19, %s11497_s7 }
0x48ee   :  { %v7567_v58 = vpop.permute.xlu0 %7566 }
0x48ef   :  { %7569 = vst.msk [vmem:[#allocation10 + $0x8] sm:$0x3] %vm4770_vm1, %v7567_v58  ;;  %9978 = vmatmul.mubr.msk.f32.vlgmr.msra.gmra.mrb[138].mxu1 %vm318_vm2, %v7567_v58 }
0x48f0   :  { %10939 = vmatpush3.bf16.msra.mxu1 %v13718_v3  ;;  %9999 = vmatprep.mubr.msk.f32.mxu1 %vm11493_vm0, %v11494_v1 }
0x48f1   :  { %10940 = vmatprep.subr.bf16.mxu1 %v11492_v0 }
0x48f4   :  { %10942 = vmatpush3.bf16.msra.mxu1 %v13725_v24 }
0x49c2   :  { %v7638_v21 = vpop.f32.mrb[138].mxu1 }
0x49c3   :  { %v7643_v29 = vrot.slane %v7638_v21, 2  ;;  %v9979_v40 = vpop.f32.mrb[139].mxu1 }
0x49c4   :  { %v7190_v40 = vrot.slane %v13777_v38, 4 }
0x49c5   :  { %v7645_v30 = vadd.f32 %v7643_v29, %v13641_v61 }
0x49c7   :  { %11231 = vtanh.f32 %v7645_v30  ;;  %v8677_v31 = vmul.f32 -1.442695, %v7645_v30  ;;  %v7192_v30 = vadd.f32 %v7190_v40, %v13644_v53 }
0x49c9   :  { %11233 = vpow2.f32 %v8677_v31 }
0x49d1   :  { %v11232_v25 = vpop.eup %11231 }
0x49d2   :  { %7658 = vrot.lane.b32.xlu1 %v11232_v25, %s11495_s11 }
0x49d3   :  { %v11234_v12 = vpop.eup %11233 }
0x49d4   :  { %v7649_v33 = vadd.f32 1.0, %v11234_v12 }
0x49d6   :  { %11235 = vrcp.f32 %v7649_v33 }
0x49e0   :  { %v11236_v34 = vpop.eup %11235 }
0x49e1   :  { %v7656_v39 = vmul.f32 %v11236_v34, %v7654_v51 }
0x4a44   :  { %v7659_v36 = vpop.permute.xlu1 %7658 }
0x4a45   :  { %v7661_v22 = vmul.f32 %v11236_v34, %v7659_v36 }
0x4a47   :  { %7663 = vrot.lane.b32.xlu0 %v7661_v22, %s11497_s7 }
0x4ab9   :  { %v7664_v43 = vpop.permute.xlu0 %7663 }
0x4aba   :  { %v7666_v42 = vadd.f32 %v7664_v43, %v7656_v39  ;;  %v7201_v43 = vrot.slane %v13750_v28, 6 }
0x4abc   :  { %11237 = vtanh.f32 %v7666_v42 }
0x4ac6   :  { %v11238_v18 = vpop.eup %11237 }
0x4ac7   :  { %7669 = vrot.lane.b32.xlu1 %v11238_v18, %s11495_s11 }
0x4b39   :  { %v7670_v59 = vpop.permute.xlu1 %7669 }
0x4b3a   :  { %v13810_v46 = vmul.f32 %v11236_v34, %v7670_v59  ;;  %v8670_v34 = vmul.f32 -1.442695, %v7192_v30 }
0x4b3c   :  { %v7678_v41 = vrot.slane %v13810_v46, 6 }
0x4b3e   :  { %7679 = vrot.lane.b32.xlu0 %v7678_v41, %s11497_s7 }
0x4bb0   :  { %v7680_v50 = vpop.permute.xlu0 %7679 }
0x4bb1   :  { %9989 = vmatmul.mubr.msk.f32.vlgmr.msra.gmra.mrb[130].mxu0 %vm318_vm2, %v7680_v50 }
0x4bb2   :  { %10945 = vmatpush3.bf16.msra.mxu0 %v13718_v3  ;;  %10010 = vmatprep.mubr.msk.f32.mxu0 %vm11493_vm0, %v11494_v1  ;;  %vm6784_vm0 = vcmask 259076  }
0x4bb3   :  { %10946 = vmatprep.subr.bf16.mxu0 %v11492_v0  ;;  %v7765_v0 = vrot.slane %v7666_v42, 2 }
0x4bb6   :  { %10948 = vmatpush3.bf16.msra.mxu0 %v13725_v24 }
0x4c84   :  { %v7749_v55 = vpop.f32.mrb[130].mxu0 }
0x4c85   :  { %v7754_v27 = vrot.slane %v7749_v55, 4  ;;  %v9990_v44 = vpop.f32.mrb[131].mxu0 }
0x4c87   :  { %v7756_v54 = vadd.f32 %v7754_v27, %v13641_v61 }
0x4c89   :  { %11239 = vtanh.f32 %v7756_v54  ;;  %v8679_v11 = vmul.f32 -1.442695, %v7756_v54 }
0x4c8b   :  { %11241 = vpow2.f32 %v8679_v11 }
0x4c93   :  { %v11240_v57 = vpop.eup %11239 }
0x4c94   :  { %7769 = vrot.lane.b32.xlu1 %v11240_v57, %s11495_s11 }
0x4c95   :  { %v11242_v2 = vpop.eup %11241 }
0x4c96   :  { %v7760_v3 = vadd.f32 1.0, %v11242_v2 }
0x4c98   :  { %11243 = vrcp.f32 %v7760_v3 }
0x4ca2   :  { %v11244_v56 = vpop.eup %11243 }
0x4ca3   :  { %v7767_v24 = vmul.f32 %v11244_v56, %v7765_v0 }
0x4d06   :  { %v7770_v1 = vpop.permute.xlu1 %7769 }
0x4d07   :  { %v7772_v60 = vmul.f32 %v11244_v56, %v7770_v1 }
0x4d09   :  { %7774 = vrot.lane.b32.xlu0 %v7772_v60, %s11497_s7 }
0x4d7b   :  { %v7775_v62 = vpop.permute.xlu0 %7774 }
0x4d7c   :  { %v7777_v6 = vadd.f32 %v7775_v62, %v7767_v24 }
0x4d7e   :  { %11245 = vtanh.f32 %v7777_v6  ;;  %v7876_v32 = vrot.slane %v7777_v6, 2 }
0x4d88   :  { %v11246_v52 = vpop.eup %11245 }
0x4d89   :  { %7780 = vrot.lane.b32.xlu1 %v11246_v52, %s11495_s11  ;;  %v8016_v52 = vld [vmem:[#allocation24 + $0x61] sm:$0xff] }
0x4dfb   :  { %v7781_v48 = vpop.permute.xlu1 %7780 }
0x4dfc   :  { %v7783_v7 = vmul.f32 %v11244_v56, %v7781_v48  ;;  %v8017_v48 = vld [vmem:[#allocation24 + $0x69] sm:$0xff] }
0x4dfe   :  { %v7789_v8 = vrot.slane %v7783_v7, 4 }
0x4e00   :  { %7790 = vrot.lane.b32.xlu0 %v7789_v8, %s11497_s7  ;;  %v8019_v8 = vld [vmem:[#allocation24 + $0x79] sm:$0xff] }
0x4e72   :  { %v7791_v9 = vpop.permute.xlu0 %7790 }
0x4e73   :  { %10000 = vmatmul.mubr.msk.f32.vlgmr.msra.gmra.mrb[140].mxu1 %vm318_vm2, %v7791_v9 }
0x4f46   :  { %v7860_v16 = vpop.f32.mrb[140].mxu1 }
0x4f47   :  { %v7865_v10 = vrot.slane %v7860_v16, 6  ;;  %v10001_v13 = vpop.f32.mrb[141].mxu1  ;;  %v8011_v16 = vld [vmem:[#allocation24 + $0x49] sm:$0xff] }
0x4f49   :  { %v7867_v49 = vadd.f32 %v7865_v10, %v13641_v61 }
0x4f4b   :  { %11247 = vtanh.f32 %v7867_v49  ;;  %v8681_v14 = vmul.f32 -1.442695, %v7867_v49 }
0x4f4d   :  { %11249 = vpow2.f32 %v8681_v14  ;;  %v8190_v14 = vld [vmem:[#allocation24 + $0x8a] sm:$0xff] }
0x4f55   :  { %v11248_v63 = vpop.eup %11247 }
0x4f56   :  { %7880 = vrot.lane.b32.xlu1 %v11248_v63, %s11495_s11  ;;  %v8189_v63 = vld [vmem:[#allocation24 + $0x82] sm:$0xff] }
0x4f57   :  { %v11250_v20 = vpop.eup %11249 }
0x4f58   :  { %v7871_v23 = vadd.f32 1.0, %v11250_v20  ;;  %v10965_v20 = vpack.c.bf16 %v8190_v14, %v8189_v63 }
0x4f5a   :  { %11251 = vrcp.f32 %v7871_v23  ;;  %10966 = vmatprep.subr.bf16.mxu0 %v10965_v20 }
0x4f64   :  { %v11252_v15 = vpop.eup %11251 }
0x4f65   :  { %v7878_v19 = vmul.f32 %v11252_v15, %v7876_v32 }
0x4fc8   :  { %v7881_v4 = vpop.permute.xlu1 %7880 }
0x4fc9   :  { %v7883_v45 = vmul.f32 %v11252_v15, %v7881_v4 }
0x4fcb   :  { %7885 = vrot.lane.b32.xlu0 %v7883_v45, %s11497_s7 }
0x503d   :  { %v7886_v58 = vpop.permute.xlu0 %7885 }
0x503e   :  { %v7888_v21 = vadd.f32 %v7886_v58, %v7878_v19  ;;  %v8012_v58 = vld [vmem:[#allocation24 + $0x51] sm:$0xff] }
0x5040   :  { %11253 = vtanh.f32 %v7888_v21 }
0x5041   :  { %11255 = vtanh.f32 %v7192_v30 }
0x5042   :  { %11257 = vpow2.f32 %v8670_v34  ;;  %v8688_v34 = vld [vmem:[#allocation24 + $0x81] ss:$0 sm:$0xff] }
0x504a   :  { %v11254_v29 = vpop.eup %11253 }
0x504b   :  { %7891 = vrot.lane.b32.xlu1 %v11254_v29, %s11495_s11  ;;  %v11256_v33 = vpop.eup %11255 }
0x504c   :  { %v11258_v36 = vpop.eup %11257 }
0x504d   :  { %v7196_v22 = vadd.f32 1.0, %v11258_v36 }
0x504f   :  { %11259 = vrcp.f32 %v7196_v22 }
0x5059   :  { %v11260_v38 = vpop.eup %11259 }
0x505a   :  { %v7203_v42 = vmul.f32 %v11260_v38, %v7201_v43 }
0x50bd   :  { %v7892_v25 = vpop.permute.xlu1 %7891 }
0x50be   :  { %v7894_v31 = vmul.f32 %v11252_v15, %v7892_v25 }
0x50c0   :  { %v7900_v12 = vrot.slane %v7894_v31, 2 }
0x50c2   :  { %7901 = vrot.lane.b32.xlu0 %v7900_v12, %s11497_s7  ;;  %v8192_v12 = vld [vmem:[#allocation24 + $0x9a] sm:$0xff] }
0x50c6   :  { %7205 = vrot.lane.b32.xlu0 %v11256_v33, %s11495_s11 }
0x5134   :  { %v7902_v51 = vpop.permute.xlu0 %7901 }
0x5135   :  { %10011 = vmatmul.mubr.msk.f32.vlgmr.msra.gmra.mrb[132].mxu0 %vm318_vm2, %v7902_v51 }
0x5136   :  { %10968 = vmatpush3.bf16.msra.mxu0 %v10965_v20 }
0x5138   :  { %v7206_v39 = vpop.permute.xlu0 %7205 }
0x5139   :  { %v7208_v53 = vmul.f32 %v11260_v38, %v7206_v39  ;;  %v8689_v39 = vld [vmem:[#allocation24 + $0xa2] ss:$0 sm:$0xff] }
0x513b   :  { %7210 = vrot.lane.b32.xlu0 %v7208_v53, %s11497_s7 }
0x51ad   :  { %v7211_v18 = vpop.permute.xlu0 %7210 }
0x51ae   :  { %v7213_v59 = vadd.f32 %v7211_v18, %v7203_v42 }
0x51b0   :  { %11261 = vtanh.f32 %v7213_v59 }
0x51ba   :  { %v11262_v41 = vpop.eup %11261 }
0x51bb   :  { %7216 = vrot.lane.b32.xlu0 %v11262_v41, %s11495_s11 }
0x51bf   :  { %7785 = vrot.lane.b32.xlu0 %v7783_v7, %s11497_s7  ;;  %v10949_v7 = vpack.c.bf16 %v8017_v48, %v8016_v52 }
0x51c1   :  { %10950 = vmatprep.subr.bf16.mxu1 %v10949_v7 }
0x51c2   :  { %10952 = vmatpush3.bf16.msra.mxu1 %v10949_v7 }
0x5208   :  { %v7971_v50 = vpop.f32.mrb[132].mxu0 }
0x5209   :  { %v7975_v55 = vadd.f32 %v7971_v50, %v13641_v61  ;;  %v10012_v27 = vpop.f32.mrb[133].mxu0  ;;  %v7984_v61 = vrot.slane %v7888_v21, 2  ;;  %v8013_v21 = vld [vmem:[#allocation24 + $0x59] sm:$0xff] }
0x520b   :  { %11263 = vtanh.f32 %v7975_v55  ;;  %v8683_v57 = vmul.f32 -1.442695, %v7975_v55 }
0x520d   :  { %11265 = vpow2.f32 %v8683_v57 }
0x5215   :  { %v11264_v44 = vpop.eup %11263 }
0x5216   :  { %7988 = vrot.lane.b32.xlu1 %v11264_v44, %s11495_s11 }
0x5217   :  { %v11266_v11 = vpop.eup %11265 }
0x5218   :  { %v7979_v2 = vadd.f32 1.0, %v11266_v11 }
0x521a   :  { %11267 = vrcp.f32 %v7979_v2 }
0x5224   :  { %v11268_v3 = vpop.eup %11267 }
0x5225   :  { %v7986_v60 = vmul.f32 %v11268_v3, %v7984_v61 }
0x522d   :  { %v7217_v54 = vpop.permute.xlu0 %7216 }
0x522e   :  { %v7219_v6 = vmul.f32 %v11260_v38, %v7217_v54 }
0x5231   :  { %v7786_v28 = vpop.permute.xlu0 %7785 }
0x5232   :  { %7788 = vst.msk [vmem:[#allocation10] sm:$0x30] %vm6784_vm0, %v7786_v28 }
0x5288   :  { %v7989_v56 = vpop.permute.xlu1 %7988 }
0x5289   :  { %v7991_v1 = vmul.f32 %v11268_v3, %v7989_v56 }
0x528b   :  { %7993 = vrot.lane.b32.xlu1 %v7991_v1, %s11497_s7 }
0x52fd   :  { %v7994_v0 = vpop.permute.xlu1 %7993 }
0x52fe   :  { %v7996_v24 = vadd.f32 %v7994_v0, %v7986_v60 }
0x5300   :  { %11269 = vtanh.f32 %v7996_v24 }
0x530a   :  { %v11270_v62 = vpop.eup %11269 }
0x530b   :  { %7999 = vrot.lane.b32.xlu1 %v11270_v62, %s11495_s11 }
0x530f   :  { %7674 = vrot.lane.b32.xlu1 %v13810_v46, %s11497_s7  ;;  %v8018_v46 = vld [vmem:[#allocation24 + $0x71] sm:$0xff] }
0x5310   :  { %v10953_v9 = vpack.c.bf16 %v8019_v8, %v8018_v46 }
0x5312   :  { %10954 = vmatprep.subr.bf16.mxu1 %v10953_v9 }
0x5313   :  { %7896 = vrot.lane.b32.xlu1 %v7894_v31, %s11497_s7  ;;  %10956 = vmatpush3.bf16.msra.mxu1 %v10953_v9  ;;  %v8191_v31 = vld [vmem:[#allocation24 + $0x92] sm:$0xff] }
0x5314   :  { %v10969_v33 = vpack.c.bf16 %v8192_v12, %v8191_v31 }
0x5316   :  { %10970 = vmatprep.subr.bf16.mxu0 %v10969_v33 }
0x5317   :  { %7347 = vrot.lane.b32.xlu1 %v13759_v35, %s11497_s7  ;;  %v8010_v35 = vld [vmem:[#allocation24 + $0x41] sm:$0xff]  ;;  %10972 = vmatpush3.bf16.msra.mxu0 %v10969_v33 }
0x531b   :  { %6669 = vrot.lane.b32.xlu1 %v13667_v37, %s11497_s7  ;;  %v10957_v37 = vpack.c.bf16 %v8011_v16, %v8010_v35 }
0x531d   :  { %10958 = vmatprep.subr.bf16.mxu1 %v10957_v37 }
0x531f   :  { %6893 = vrot.lane.b32.xlu1 %v13697_v17, %s11497_s7 }
0x5323   :  { %7221 = vrot.lane.b32.xlu1 %v7219_v6, %s11497_s7 }
0x537d   :  { %v8000_v10 = vpop.permute.xlu1 %7999 }
0x537e   :  { %v8002_v13 = vmul.f32 %v11268_v3, %v8000_v10 }
0x5380   :  { %8004 = vrot.lane.b32.xlu0 %v8002_v13, %s11497_s7 }
0x5381   :  { %v7675_v17 = vpop.permute.xlu1 %7674 }
0x5382   :  { %7677 = vst.msk [vmem:[#allocation10] sm:$0xc0] %vm6896_vm3, %v7675_v17 }
0x5384   :  { %7458 = vrot.lane.b32.xlu0 %v13783_v5, %s11497_s7 }
0x5385   :  { %v7897_v49 = vpop.permute.xlu1 %7896 }
0x5386   :  { %7899 = vst.msk [vmem:[#allocation10] sm:$0xc] %vm6672_vm4, %v7897_v49 }
0x5388   :  { %6781 = vrot.lane.b32.xlu0 %v13682_v26, %s11497_s7 }
0x5389   :  { %v7348_v23 = vpop.permute.xlu1 %7347 }
0x538a   :  { %7350 = vst.msk [vmem:[#allocation10 + $0x8] sm:$0x30] %vm6784_vm0, %v7348_v23 }
0x538c   :  { %7110 = vrot.lane.b32.xlu0 %v13755_v47, %s11497_s7  ;;  %v10961_v47 = vpack.c.bf16 %v8013_v21, %v8012_v58 }
0x538d   :  { %v6670_v15 = vpop.permute.xlu1 %6669 }
0x538e   :  { %6673 = vst.msk [vmem:[#allocation9] sm:$0xc] %vm6672_vm4, %v6670_v15 }
0x5391   :  { %v6894_v5 = vpop.permute.xlu1 %6893 }
0x5392   :  { %6897 = vst.msk [vmem:[#allocation9] sm:$0xc0] %vm6896_vm3, %v6894_v5 }
0x5395   :  { %v7222_v4 = vpop.permute.xlu1 %7221 }
0x5396   :  { %7224 = vst.msk [vmem:[#allocation9 + $0x8] sm:$0x30] %vm6784_vm0, %v7222_v4 }
0x53f2   :  { %v8005_v45 = vpop.permute.xlu0 %8004 }
0x53f3   :  { %8007 = vst.msk [vmem:[#allocation10] sm:$0x3] %vm4770_vm1, %v8005_v45 }
0x53f6   :  { %v7459_v26 = vpop.permute.xlu0 %7458 }
0x53f7   :  { %7461 = vst.msk [vmem:[#allocation10 + $0x8] sm:$0xc] %vm6672_vm4, %v7459_v26 }
0x53fa   :  { %v6782_v32 = vpop.permute.xlu0 %6781  ;;  %v8014_v19 = vld [vmem:[#allocation10] sm:$0xff] }
0x53fb   :  { %6785 = vst.msk [vmem:[#allocation9] sm:$0x30] %vm6784_vm0, %v6782_v32  ;;  %10021 = vmatprep.mubr.msk.f32.mxu1 %vm318_vm2, %v8014_v19 }
0x53fe   :  { %v7111_v29 = vpop.permute.xlu0 %7110  ;;  %v8015_v40 = vld [vmem:[#allocation10 + $0x8] sm:$0x3f] }
0x53ff   :  { %7113 = vst.msk [vmem:[#allocation9 + $0x8] sm:$0xc] %vm6672_vm4, %v7111_v29  ;;  %10022 = vmatmul.mubr.msk.f32.vlgmr.msra.gmra.mrb[142].mxu1 %vm318_vm2, %v8015_v40 }
0x5400   :  { %10960 = vmatpush3.bf16.msra.mxu1 %v10957_v37 }
0x5401   :  { %10962 = vmatprep.subr.bf16.mxu1 %v10961_v47 }
0x5402   :  { %v8008_v30 = vld [vmem:[#allocation9] sm:$0xff] }
0x5403   :  { %10032 = vmatprep.mubr.msk.f32.mxu1 %vm318_vm2, %v8008_v30 }
0x5404   :  { %10964 = vmatpush3.bf16.msra.mxu1 %v10961_v47 }
0x5406   :  { %v8009_v25 = vld [vmem:[#allocation9 + $0x8] sm:$0x3f] }
0x5407   :  { %10033 = vmatmul.mubr.msk.f32.vlgmr.msra.gmra.mrb[142].mxu1 %vm318_vm2, %v8009_v25 }
0x54da   :  { %v10034_v36 = vpop.f32.mrb[142].mxu1 }
0x54db   :  { %v8173_v22 = vpop.f32.mrb[143].mxu1  ;;  %v8188_v38 = vadd.f32 %v10034_v36, %v8688_v34 }
0x54dc   :  { %v8187_v51 = vadd.f32 %v8688_v34, %v8173_v22 }
0x54de   :  { %10043 = vmatprep.mubr.msk.f32.mxu0 %vm318_vm2, %v8187_v51 }
0x54df   :  { %10044 = vmatmul.mubr.msk.f32.vlgmr.msra.gmra.mrb[134].mxu0 %vm318_vm2, %v8188_v38 }
0x55b2   :  { %v10045_v53 = vpop.f32.mrb[134].mxu0 }
0x55b3   :  { %v8276_v43 = vadd.f32 %v10045_v53, %v8689_v39  ;;  %v8270_v42 = vpop.f32.mrb[135].mxu0 }
0x55b4   :  { %v8271_v18 = vadd.f32 %v8689_v39, %v8270_v42 }
0x55b5   :  { %8281 = vst.msk [vmem:[%s13896_s12 + $0x8] sm:$0x3f] %vm8280_vm5, %v8276_v43 }
0x55b6   :  { %8279 = vst.msk [vmem:[%s13896_s12] sm:$0xff] %vm2953_vm11, %v8271_v18 }
0x55b7   :  { %8286 = vsyncpa [#allocation12], 1 }
0x55b8   :  { %8287 = vsyncpa [#allocation14], 1 }
0x55b9   :  { %8288 = vsyncpa [#allocation17], 1 }
0x55ba   :  { %8289 = vsyncpa [#allocation20], 1 }
0x55bb   :  { %8290 = vsyncpa [#allocation23], 1 }

</bundles_post_ra>
